<compile_context>
chip_gen: v6e
topology: v6e:2x2x1
jax: 0.10.0
libtpu: 0.0.40
codegen_flags: <defaults>
</compile_context>

<pallas_src>
import jax
import jax.numpy as jnp
from jax.experimental import pallas as pl
from jax.experimental.pallas import tpu as pltpu


D_IN, D_H1, D_H2, D_OUT = 4096, 1024, 512, 1
TK = 2048  # K-tile for layer 1 (4096 / 2048 = 2 grid steps)


def value_head_kernel(h_ref, w1_ref, b1_ref, w2_ref, b2_ref, w3_ref, b3_ref,
                      o_ref, acc_ref):
    # h_ref:  (B, 4096) bf16, VMEM-resident (constant index_map)
    # w1_ref: (TK, 1024) bf16 K-slice of layer-1 weight (streamed / double-buffered)
    # b1_ref: (1, 1024), w2_ref: (1024, 512), b2_ref: (1, 512), w3_ref: (1, 512)
    # b3_ref: (1, 1) fp32 in SMEM
    # acc_ref: (B, 1024) fp32 scratch accumulator (persists across grid steps)
    k = pl.program_id(0)

    @pl.when(k == 0)
    def _():
        acc_ref[...] = jnp.zeros_like(acc_ref)

    # Layer-1 partial product for this K tile (fp32 accumulation on the MXU).
    start = pl.multiple_of(k * TK, TK)
    x_k = h_ref[:, pl.ds(start, TK)]
    acc_ref[...] += jnp.dot(x_k, w1_ref[...], preferred_element_type=jnp.float32)

    @pl.when(k == pl.num_programs(0) - 1)
    def _():
        # Finish layer 1: bias + ReLU, cast to bf16 like the PyTorch bf16 Linear.
        x1 = acc_ref[...] + b1_ref[...].astype(jnp.float32)
        x1 = jnp.maximum(x1, 0.0).astype(jnp.bfloat16)

        # Layer 2: 1024 -> 512 (+ bias), ReLU, bf16.
        x2 = jnp.dot(x1, w2_ref[...], preferred_element_type=jnp.float32)
        x2 = x2 + b2_ref[...].astype(jnp.float32)
        x2 = jnp.maximum(x2, 0.0).astype(jnp.bfloat16)

        # Layer 3: 512 -> 1 as a VPU multiply + lane reduction (no N=1 matmul).
        w3_row = w3_ref[...].astype(jnp.float32)                  # (1, 512)
        x3 = jnp.sum(x2.astype(jnp.float32) * w3_row, axis=-1, keepdims=True)
        x3 = x3 + b3_ref[0, 0]                                    # SMEM scalar bias

        o_ref[...] = x3.astype(jnp.bfloat16)


def vlm_value_head(h, w1, b1, w2, b2, w3, b3):
    """Apply the bf16 value head to last-token hidden states h: (B, 4096) -> (B, 1)."""
    B = h.shape[0]
    assert h.shape[1] == D_IN, "hidden size must be 4096"
    assert D_IN % TK == 0, "layer-1 K dim must be divisible by TK"
    n_k = D_IN // TK
    return pl.pallas_call(
        value_head_kernel,
        out_shape=jax.ShapeDtypeStruct((B, D_OUT), jnp.bfloat16),
        grid=(n_k,),
        in_specs=[
            pl.BlockSpec((B, D_IN), lambda k: (0, 0)),        # h: resident (16 KiB)
            pl.BlockSpec((TK, D_H1), lambda k: (k, 0)),       # w1: stream K tiles
            pl.BlockSpec((1, D_H1), lambda k: (0, 0)),        # b1: resident
            pl.BlockSpec((D_H1, D_H2), lambda k: (0, 0)),     # w2: resident
            pl.BlockSpec((1, D_H2), lambda k: (0, 0)),        # b2: resident
            pl.BlockSpec((1, D_H2), lambda k: (0, 0)),        # w3 row: resident
            pl.BlockSpec(memory_space=pltpu.MemorySpace.SMEM),  # b3: fp32 scalar
        ],
        out_specs=pl.BlockSpec((B, D_OUT), lambda k: (0, 0)),
        scratch_shapes=[pltpu.VMEM((B, D_H1), jnp.float32)],
        compiler_params=pltpu.CompilerParams(
            # K is a reduction axis; a future batch/M axis (for large B) would go
            # in front marked "parallel" to use v7x's 2 TensorCores.
            dimension_semantics=("arbitrary",),
        ),
    )(h, w1, b1, w2, b2, w3, b3.astype(jnp.float32))


def init_value_head_params(key):
    """Deterministic synthetic init (uniform, scaled like PyTorch Linear default)."""
    ks = jax.random.split(key, 6)

    def lin(kw, kb, fan_in, fan_out):
        bound = 1.0 / jnp.sqrt(fan_in)
        w = jax.random.uniform(kw, (fan_in, fan_out), jnp.float32, -bound, bound)
        b = jax.random.uniform(kb, (1, fan_out), jnp.float32, -bound, bound)
        return w.astype(jnp.bfloat16), b.astype(jnp.bfloat16)

    w1, b1 = lin(ks[0], ks[1], D_IN, D_H1)
    w2, b2 = lin(ks[2], ks[3], D_H1, D_H2)
    w3_col, b3 = lin(ks[4], ks[5], D_H2, D_OUT)   # (512, 1), (1, 1)
    w3 = w3_col.reshape(1, D_H2)                  # store as (1, 512) row
    return w1, b1, w2, b2, w3, b3


def reference_value_head(h, w1, b1, w2, b2, w3, b3):
    """Pure-JAX reference matching the module's bf16 layer-by-layer semantics."""
    x = h
    x = jnp.maximum(
        jnp.dot(x, w1, preferred_element_type=jnp.float32) + b1.astype(jnp.float32), 0.0
    ).astype(jnp.bfloat16)
    x = jnp.maximum(
        jnp.dot(x, w2, preferred_element_type=jnp.float32) + b2.astype(jnp.float32), 0.0
    ).astype(jnp.bfloat16)
    x = (jnp.dot(x, w3.T, preferred_element_type=jnp.float32)
         + b3.astype(jnp.float32)).astype(jnp.bfloat16)
    return x


if __name__ == "__main__":
    key = jax.random.PRNGKey(0)
    k_h, k_p = jax.random.split(key)

    B = 2  # small batch
    # Stand-in for base(**inputs).hidden_states[-1][:, -1]  -> (B, 4096) bf16
    hidden_last_token = jax.random.normal(k_h, (B, D_IN), jnp.float32).astype(jnp.bfloat16)

    params = init_value_head_params(k_p)

    values = vlm_value_head(hidden_last_token, *params)
    values = jax.block_until_ready(values)

    assert values.shape == (B, D_OUT) and values.dtype == jnp.bfloat16

    ref = reference_value_head(hidden_last_token, *params)
    err = jnp.max(jnp.abs(values.astype(jnp.float32) - ref.astype(jnp.float32)))
    assert float(err) < 3e-2, f"mismatch vs reference: {float(err)}"

    print("KERNEL_OK")
</pallas_src>

<mosaic_0001>
module attributes {stable_mosaic.version = 11 : i64} {
  func.func @value_head_kernel(%arg0: i32, %arg1: memref<2x4096xbf16, #tpu.memory_space<vmem>>, %arg2: memref<2048x1024xbf16, #tpu.memory_space<vmem>>, %arg3: memref<1x1024xbf16, #tpu.memory_space<vmem>>, %arg4: memref<1024x512xbf16, #tpu.memory_space<vmem>>, %arg5: memref<1x512xbf16, #tpu.memory_space<vmem>>, %arg6: memref<1x512xbf16, #tpu.memory_space<vmem>>, %arg7: memref<1x1xf32, #tpu.memory_space<smem>>, %arg8: memref<2x1xbf16, #tpu.memory_space<vmem>>, %arg9: memref<2x1024xf32, #tpu.memory_space<vmem>>) attributes {dimension_semantics = [#tpu.dimension_semantics<arbitrary>], iteration_bounds = array<i64: 2>, scalar_prefetch = 0 : i64, scratch_operands = 1 : i64, tpu.core_type = #tpu.core_type<tc>, window_params = [{pipeline_mode = #tpu.pipeline_mode<synchronous>, transform_indices = @transform_0, window_bounds = array<i64: 2, 4096>}, {transform_indices = @transform_1, window_bounds = array<i64: 2048, 1024>}, {pipeline_mode = #tpu.pipeline_mode<synchronous>, transform_indices = @transform_2, window_bounds = array<i64: 1, 1024>}, {pipeline_mode = #tpu.pipeline_mode<synchronous>, transform_indices = @transform_3, window_bounds = array<i64: 1024, 512>}, {pipeline_mode = #tpu.pipeline_mode<synchronous>, transform_indices = @transform_4, window_bounds = array<i64: 1, 512>}, {pipeline_mode = #tpu.pipeline_mode<synchronous>, transform_indices = @transform_5, window_bounds = array<i64: 1, 512>}, {transform_indices = @transform_6, window_bounds = array<i64: 1, 1>}, {pipeline_mode = #tpu.pipeline_mode<synchronous>, transform_indices = @transform_7, window_bounds = array<i64: 2, 1>}]} {
    %c0_i32 = arith.constant 0 : i32
    %0 = arith.cmpi eq, %arg0, %c0_i32 : i32
    %1 = arith.extui %0 : i1 to i32
    %c0_i32_0 = arith.constant 0 : i32
    %2 = arith.cmpi ne, %1, %c0_i32_0 : i32
    scf.if %2 {
      %cst_8 = arith.constant 0.000000e+00 : f32
      %15 = vector.broadcast %cst_8 : f32 to vector<2x1024xf32>
      %c0_9 = arith.constant 0 : index
      %c0_10 = arith.constant 0 : index
      %16 = vector.load %arg9[%c0_9, %c0_10] : memref<2x1024xf32, #tpu.memory_space<vmem>>, vector<2x1024xf32>
      tpu.vector_store %arg9[%c0_9, %c0_10], %15 {strides = array<i32>} : memref<2x1024xf32, #tpu.memory_space<vmem>>, vector<2x1024xf32>,
    } else {
    }
    %c2048_i32 = arith.constant 2048 : i32
    %3 = arith.muli %arg0, %c2048_i32 : i32
    %4 = tpu.assume_multiple %3, 2048 : i32
    %c0 = arith.constant 0 : index
    %5 = arith.index_cast %4 : i32 to index
    %6 = vector.load %arg1[%c0, %5] : memref<2x4096xbf16, #tpu.memory_space<vmem>>, vector<2x2048xbf16>
    %c0_1 = arith.constant 0 : index
    %c0_2 = arith.constant 0 : index
    %7 = vector.load %arg9[%c0_1, %c0_2] : memref<2x1024xf32, #tpu.memory_space<vmem>>, vector<2x1024xf32>
    %c0_3 = arith.constant 0 : index
    %c0_4 = arith.constant 0 : index
    %8 = vector.load %arg2[%c0_3, %c0_4] : memref<2048x1024xbf16, #tpu.memory_space<vmem>>, vector<2048x1024xbf16>
    %cst = arith.constant dense<0.000000e+00> : vector<2x1024xf32>
    %9 = tpu.matmul %6, %8, %cst {dimension_numbers = #tpu.dot_dimension_numbers<[1], [0], [0], [1], [0, 0, 1, 1], [], []>} : vector<2x2048xbf16>, vector<2048x1024xbf16>, vector<2x1024xf32> -> vector<2x1024xf32>
    %10 = arith.addf %7, %9 : vector<2x1024xf32>
    %c0_5 = arith.constant 0 : index
    %c0_6 = arith.constant 0 : index
    %11 = vector.load %arg9[%c0_5, %c0_6] : memref<2x1024xf32, #tpu.memory_space<vmem>>, vector<2x1024xf32>
    tpu.vector_store %arg9[%c0_5, %c0_6], %10 {strides = array<i32>} : memref<2x1024xf32, #tpu.memory_space<vmem>>, vector<2x1024xf32>,
    %c1_i32 = arith.constant 1 : i32
    %12 = arith.cmpi eq, %arg0, %c1_i32 : i32
    %13 = arith.extui %12 : i1 to i32
    %c0_i32_7 = arith.constant 0 : i32
    %14 = arith.cmpi ne, %13, %c0_i32_7 : i32
    scf.if %14 {
      %c0_8 = arith.constant 0 : index
      %c0_9 = arith.constant 0 : index
      %15 = vector.load %arg9[%c0_8, %c0_9] : memref<2x1024xf32, #tpu.memory_space<vmem>>, vector<2x1024xf32>
      %c0_10 = arith.constant 0 : index
      %c0_11 = arith.constant 0 : index
      %16 = vector.load %arg3[%c0_10, %c0_11] : memref<1x1024xbf16, #tpu.memory_space<vmem>>, vector<1x1024xbf16>
      %17 = arith.extf %16 : vector<1x1024xbf16> to vector<1x1024xf32>
      %18 = vector.broadcast %17 : vector<1x1024xf32> to vector<2x1024xf32>
      %19 = arith.addf %15, %18 : vector<2x1024xf32>
      %cst_12 = arith.constant 0.000000e+00 : f32
      %20 = vector.broadcast %cst_12 : f32 to vector<2x1024xf32>
      %21 = arith.maximumf %19, %20 : vector<2x1024xf32>
      %22 = arith.truncf %21 : vector<2x1024xf32> to vector<2x1024xbf16>
      %c0_13 = arith.constant 0 : index
      %c0_14 = arith.constant 0 : index
      %23 = vector.load %arg4[%c0_13, %c0_14] : memref<1024x512xbf16, #tpu.memory_space<vmem>>, vector<1024x512xbf16>
      %cst_15 = arith.constant dense<0.000000e+00> : vector<2x512xf32>
      %24 = tpu.matmul %22, %23, %cst_15 {dimension_numbers = #tpu.dot_dimension_numbers<[1], [0], [0], [1], [0, 0, 1, 1], [], []>} : vector<2x1024xbf16>, vector<1024x512xbf16>, vector<2x512xf32> -> vector<2x512xf32>
      %c0_16 = arith.constant 0 : index
      %c0_17 = arith.constant 0 : index
      %25 = vector.load %arg5[%c0_16, %c0_17] : memref<1x512xbf16, #tpu.memory_space<vmem>>, vector<1x512xbf16>
      %26 = arith.extf %25 : vector<1x512xbf16> to vector<1x512xf32>
      %27 = vector.broadcast %26 : vector<1x512xf32> to vector<2x512xf32>
      %28 = arith.addf %24, %27 : vector<2x512xf32>
      %cst_18 = arith.constant 0.000000e+00 : f32
      %29 = vector.broadcast %cst_18 : f32 to vector<2x512xf32>
      %30 = arith.maximumf %28, %29 : vector<2x512xf32>
      %31 = arith.truncf %30 : vector<2x512xf32> to vector<2x512xbf16>
      %c0_19 = arith.constant 0 : index
      %c0_20 = arith.constant 0 : index
      %32 = vector.load %arg6[%c0_19, %c0_20] : memref<1x512xbf16, #tpu.memory_space<vmem>>, vector<1x512xbf16>
      %33 = arith.extf %32 : vector<1x512xbf16> to vector<1x512xf32>
      %34 = arith.extf %31 : vector<2x512xbf16> to vector<2x512xf32>
      %35 = vector.broadcast %33 : vector<1x512xf32> to vector<2x512xf32>
      %36 = arith.mulf %34, %35 : vector<2x512xf32>
      %cst_21 = arith.constant dense<0.000000e+00> : vector<2xf32>
      %37 = vector.multi_reduction <add>, %36, %cst_21 [1] : vector<2x512xf32> to vector<2xf32>
      %38 = vector.shape_cast %37 : vector<2xf32> to vector<2x1xf32>
      %c0_22 = arith.constant 0 : index
      %c0_23 = arith.constant 0 : index
      %39 = memref.load %arg7[%c0_22, %c0_23] : memref<1x1xf32, #tpu.memory_space<smem>>
      %40 = vector.broadcast %39 : f32 to vector<2x1xf32>
      %41 = arith.addf %38, %40 : vector<2x1xf32>
      %42 = arith.truncf %41 : vector<2x1xf32> to vector<2x1xbf16>
      %c0_24 = arith.constant 0 : index
      %c0_25 = arith.constant 0 : index
      %43 = vector.load %arg8[%c0_24, %c0_25] : memref<2x1xbf16, #tpu.memory_space<vmem>>, vector<2x1xbf16>
      tpu.vector_store %arg8[%c0_24, %c0_25], %42 {strides = array<i32>} : memref<2x1xbf16, #tpu.memory_space<vmem>>, vector<2x1xbf16>,
    } else {
    }
    return
  }
  func.func @transform_0(%arg0: i32) -> (i32, i32) {
    %c0_i32 = arith.constant 0 : i32
    %c0_i32_0 = arith.constant 0 : i32
    %c0_i32_1 = arith.constant 0 : i32
    return %c0_i32, %c0_i32_0 : i32, i32
  }
  func.func @transform_1(%arg0: i32) -> (i32, i32) {
    %c0_i32 = arith.constant 0 : i32
    %c0_i32_0 = arith.constant 0 : i32
    return %arg0, %c0_i32 : i32, i32
  }
  func.func @transform_2(%arg0: i32) -> (i32, i32) {
    %c0_i32 = arith.constant 0 : i32
    %c0_i32_0 = arith.constant 0 : i32
    %c0_i32_1 = arith.constant 0 : i32
    return %c0_i32, %c0_i32_0 : i32, i32
  }
  func.func @transform_3(%arg0: i32) -> (i32, i32) {
    %c0_i32 = arith.constant 0 : i32
    %c0_i32_0 = arith.constant 0 : i32
    %c0_i32_1 = arith.constant 0 : i32
    return %c0_i32, %c0_i32_0 : i32, i32
  }
  func.func @transform_4(%arg0: i32) -> (i32, i32) {
    %c0_i32 = arith.constant 0 : i32
    %c0_i32_0 = arith.constant 0 : i32
    %c0_i32_1 = arith.constant 0 : i32
    return %c0_i32, %c0_i32_0 : i32, i32
  }
  func.func @transform_5(%arg0: i32) -> (i32, i32) {
    %c0_i32 = arith.constant 0 : i32
    %c0_i32_0 = arith.constant 0 : i32
    %c0_i32_1 = arith.constant 0 : i32
    return %c0_i32, %c0_i32_0 : i32, i32
  }
  func.func @transform_6(%arg0: i32) -> (i32, i32) {
    %c0_i32 = arith.constant 0 : i32
    %c0_i32_0 = arith.constant 0 : i32
    %c0_i32_1 = arith.constant 0 : i32
    return %c0_i32, %c0_i32_0 : i32, i32
  }
  func.func @transform_7(%arg0: i32) -> (i32, i32) {
    %c0_i32 = arith.constant 0 : i32
    %c0_i32_0 = arith.constant 0 : i32
    %c0_i32_1 = arith.constant 0 : i32
    return %c0_i32, %c0_i32_0 : i32, i32
  }
}

</mosaic_0001>

<bundles_post_ra>
// kernel: tpu_custom_call.1
= control target key start
LH: loop header
LB: loop body
LE: loop exit
PB: predicated region body
PF: predicated region fallthrough
CT: control target
= control target key end

     0   :  { %s13920_s0 = inlined_call_operand.hbm [shape: bf16[2,4096], index: 0, kind: input, shape index: {}]   ;;  %s13921_s1 = inlined_call_operand.hbm [shape: bf16[4096,1024], index: 1, kind: input, shape index: {}]   ;;  %s13922_s2 = inlined_call_operand.hbm [shape: bf16[1,1024], index: 2, kind: input, shape index: {}]   ;;  %s13923_s3 = inlined_call_operand.hbm [shape: bf16[1024,512], index: 3, kind: input, shape index: {}]   ;;  %s13924_s4 = inlined_call_operand.hbm [shape: bf16[1,512], index: 4, kind: input, shape index: {}]   ;;  %s13925_s5 = inlined_call_operand.hbm [shape: bf16[1,512], index: 5, kind: input, shape index: {}]   ;;  %s13926_s6 = inlined_call_operand.<no memory space> [shape: f32[1,1], index: 6, kind: input, shape index: {}]   ;;  %s13927_s7 = inlined_call_operand.hbm [shape: bf16[2,1], index: 7, kind: output, shape index: {}]  }
   0x1   :  { %12 = sst [smem:[#allocation3]] %s13926_s6 }
   0x2   :  { %13 = vsyncpa [#allocation5], 0 }
   0x3   :  { %14 = vsyncpa [#allocation8], 0 }
   0x4   :  { %16 = vsyncpa [#allocation8 + $0x1], 0 }
   0x5   :  { %17 = vsyncpa [#allocation11], 0 }
   0x6   :  { %18 = vsyncpa [#allocation14], 0 }
   0x7   :  { %19 = vsyncpa [#allocation6], 0  ;;  %s12345_s26 = smov 0   ;;  %s12347_s27 = smov 0  }
   0x8   :  { %s12349_s28 = smov 0   ;;  %s12351_s29 = smov 0  }
   0x9 LB: > { %s12364_s6 = sadd.s32 4294967295, %s12286_s29   ;;  %p66_p0 = scmp.ne.s32.totalorder %s12278_s27, %s12274_s26  ;;  %s12286_s29 = sphi %s12351_s29, %s13950_s29   ;;  %s12282_s28 = sphi %s12349_s28, %s13949_s28   ;;  %s12278_s27 = sphi %s12347_s27, %s13948_s27   ;;  %s12274_s26 = sphi %s12345_s26, %s13947_s26  }
   0xa   : > { %p13928_p1 = scmp.eq.s32.totalorder %s12364_s6, 0  ;;  %p10253_p2 = scmp.ge.s32.totalorder %s12286_s29, 1 }
   0xb   : > { %p203_p3 = scmp.lt.s32.totalorder %s12286_s29, 3  ;;  %s12288_s9 = smov [#allocation9]  }
   0xc   : > { %p12373_p5 = por %p13928_p1, %p66_p0  ;;  %s227_s10 = sshll.u32 %s12288_s9, 4  ;;  %s228_s10 = int_to_ptr.vmem [resolvable:$true] %s227_s10 }
   0xd   : > { %p12377_p6 = pnand %p10253_p2, %p203_p3  ;;  %s12289_s11 = smov [#allocation10]  }
   0xe   : > { %s13931_s30 = scalar_select %p12373_p5, 1, 0 }
   0xf   : > { %s13932_s8 = scalar_select %p12377_p6, 1, 0 }
  0x10   : > { %p11586_p7 = pneg %p12377_p6  ;;  %s237_s12 = sshll.u32 %s12289_s11, 4  ;;  %s238_s12 = int_to_ptr.vmem [resolvable:$true] %s237_s12 }
  0x11   : > { %s12290_s14 = smov [#allocation4]   ;;  %s12061_s17 = scalar_lea.vmem %s228_s10, 128 }
  0x12   : > { %p12385_p8 = pnand %p11586_p7, %p13928_p1  ;;  %s216_s15 = sshll.u32 %s12290_s14, 4  ;;  %s217_s15 = int_to_ptr.vmem [resolvable:$true] %s216_s15 }
  0x13   : > { %p12062_p10 = scmp.ne.s32.totalorder %s228_s10, %s12061_s17  ;;  %p12069_p13 = scmp.lt.s32.totalorder %s228_s10, %s228_s10 }
  0x14   : > { %p12391_p9 = pneg %p12385_p8  ;;  %p12070_p0 = scmp.lt.s32.totalorder %s12061_s17, %s12061_s17 }
  0x16   : > { %p12064_p11 = pnand %p12062_p10, %p12391_p9  ;;  %p12071_p2 = por %p12070_p0, %p12069_p13 }
  0x18   : > { %p12065_p12 = pneg %p12064_p11 }
  0x1a   : > { %p12072_p3 = pnand %p12071_p2, %p12065_p12 }
  0x1c   : > { %12075 = shalt.err (!%p12072_p3)
}
  0x1d   : > { %11592 = dma.hbm_to_vmem [thread:$0]  (!%p12385_p8), %s13922_s2, 128, %s228_s10, [#allocation8]  }
  0x1e   : > { %s12087_s20 = scalar_lea.vmem %s238_s12, 32768  ;;  %p12095_p5 = scmp.lt.s32.totalorder %s238_s12, %s238_s12 }
  0x1f   : > { %p12088_p7 = scmp.ne.s32.totalorder %s238_s12, %s12087_s20  ;;  %p12096_p10 = scmp.lt.s32.totalorder %s12087_s20, %s12087_s20 }
  0x21   : > { %p12090_p4 = pnand %p12088_p7, %p12391_p9  ;;  %p12097_p11 = por %p12096_p10, %p12095_p5 }
  0x23   : > { %p12091_p1 = pneg %p12090_p4 }
  0x25   : > { %p12098_p6 = pnand %p12097_p11, %p12091_p1 }
  0x27   : > { %12101 = shalt.err (!%p12098_p6)
}
  0x28   : > { %s12291_s21 = smov 256   ;;  %s12292_s22 = smov 16  }
  0x29   : > { %11595 = dma.hbm_to_vmem [thread:$0]  (!%p12385_p8), %s13923_s3, 32768, %s238_s12, [#allocation11], %s12291_s21, %s12291_s21, %s12292_s22  }
  0x2a   : > { %s12113_s25 = scalar_lea.vmem %s217_s15, 512  ;;  %p12121_p0 = scmp.lt.s32.totalorder %s217_s15, %s217_s15 }
  0x2b   : > { %p12114_p12 = scmp.ne.s32.totalorder %s217_s15, %s12113_s25  ;;  %p12122_p2 = scmp.lt.s32.totalorder %s12113_s25, %s12113_s25 }
  0x2d   : > { %p12116_p13 = pnand %p12114_p12, %p12391_p9  ;;  %p12123_p5 = por %p12122_p2, %p12121_p0 }
  0x2f   : > { %p12117_p4 = pneg %p12116_p13 }
  0x31   : > { %p12124_p1 = pnand %p12123_p5, %p12117_p4 }
  0x33   : > { %12127 = shalt.err (!%p12124_p1)
}
  0x34   : > { %11589 = dma.hbm_to_vmem [thread:$0]  (!%p12385_p8), %s13920_s0, 512, %s217_s15, [#allocation5]  }
  0x35   : > { %s12293_s10 = smov [#allocation12]   ;;  %s12294_s12 = smov [#allocation13]  }
  0x36   : > { %s251_s11 = sshll.u32 %s12293_s10, 4  ;;  %s262_s14 = sshll.u32 %s12294_s12, 4  ;;  %s252_s11 = int_to_ptr.vmem [resolvable:$true] %s251_s11  ;;  %s263_s14 = int_to_ptr.vmem [resolvable:$true] %s262_s14 }
  0x37   : > { %s12139_s17 = scalar_lea.vmem %s252_s11, 64  ;;  %p12147_p10 = scmp.lt.s32.totalorder %s252_s11, %s252_s11 }
  0x38   : > { %p12140_p6 = scmp.ne.s32.totalorder %s252_s11, %s12139_s17  ;;  %p12148_p11 = scmp.lt.s32.totalorder %s12139_s17, %s12139_s17 }
  0x3a   : > { %p12142_p3 = pnand %p12140_p6, %p12391_p9  ;;  %p12149_p12 = por %p12148_p11, %p12147_p10 }
  0x3c   : > { %p12143_p7 = pneg %p12142_p3 }
  0x3e   : > { %p12150_p13 = pnand %p12149_p12, %p12143_p7 }
  0x40   : > { %12153 = shalt.err (!%p12150_p13)
}
  0x41   : > { %11598 = dma.hbm_to_vmem [thread:$0]  (!%p12385_p8), %s13924_s4, 64, %s252_s11, [#allocation11]  }
  0x42   : > { %s12165_s15 = scalar_lea.vmem %s263_s14, 64  ;;  %p12173_p5 = scmp.lt.s32.totalorder %s263_s14, %s263_s14 }
  0x43   : > { %p12166_p4 = scmp.ne.s32.totalorder %s263_s14, %s12165_s15  ;;  %p12174_p1 = scmp.lt.s32.totalorder %s12165_s15, %s12165_s15 }
  0x45   : > { %p12168_p0 = pnand %p12166_p4, %p12391_p9  ;;  %p12175_p6 = por %p12174_p1, %p12173_p5 }
  0x47   : > { %p12169_p2 = pneg %p12168_p0 }
  0x49   : > { %p12176_p3 = pnand %p12175_p6, %p12169_p2 }
  0x4b   : > { %12179 = shalt.err (!%p12176_p3)
}
  0x4c   : > { %11601 = dma.hbm_to_vmem [thread:$0]  (!%p12385_p8), %s13925_s5, 64, %s263_s14, [#allocation14]  }
  0x4d   : > { %s12431_s16 = sadd.s32 1, %s12286_s29   ;;  %s53_s13 = sadd.s32 1, %s12282_s28 }
  0x4e   : > { %s50_s22 = ssub.s32 %s12286_s29, %s12431_s16  ;;  %p60_p7 = scmp.ne.s32.totalorder %s12282_s28, %s12278_s27 }
  0x4f   : > { %p51_p9 = scmp.eq.s32.totalorder %s50_s22, 0  ;;  %p61_p10 = scmp.eq.s32.totalorder %s12286_s29, 0 }
  0x50   : > { %p11611_p11 = scmp.lt.s32.totalorder %s12286_s29, 2  ;;  %s276_s24 = sand.u32 1, %s12286_s29  }
  0x51   : > { %s12441_s23 = scalar_select %p51_p9, %s12282_s28, %s53_s13  }
  0x52   : > { %p62_p12 = por %p61_p10, %p60_p7  ;;  %s278_s25 = sand.u32 1, %s12282_s28  }
  0x53   : > { %s10260_s26 = sshll.u32 %s278_s25, 13  ;;  %s11559_s9 = sshll.u32 %s12286_s29, 17 }
  0x54   : > { %s12449_s12 = scalar_lea.hbm %s13921_s1, %s11559_s9  ;;  %s280_s14 = scalar_lea.vmem [#allocation7], %s10260_s26 }
  0x55   : > { %s288_s17 = sshll.u32 %s280_s14, 4  ;;  %p12451_p8 = pnand %p11611_p11, %p62_p12  ;;  %s12455_s17 = int_to_ptr.vmem [resolvable:$true] %s288_s17 }
  0x56   : > { %s12457_s19 = scalar_lea.sflag [#allocation8], %s276_s24  ;;  %s12180_s29 = scalar_lea.hbm %s12449_s12, 131072 }
  0x57   : > { %p12181_p13 = scmp.ne.s32.totalorder %s12449_s12, %s12180_s29  ;;  %p12182_p4 = pneg %p12451_p8 }
  0x58   : > { %s12185_s21 = scalar_lea.hbm %s13921_s1, 262144  ;;  %p12186_p5 = scmp.lt.s32.totalorder %s12449_s12, %s13921_s1 }
  0x59   : > { %p12183_p0 = pnand %p12182_p4, %p12181_p13  ;;  %p12187_p1 = scmp.lt.s32.totalorder %s12185_s21, %s12180_s29 }
  0x5b   : > { %p12184_p2 = pneg %p12183_p0  ;;  %p12188_p6 = por %p12187_p1, %p12186_p5 }
  0x5d   : > { %p12189_p3 = pnand %p12188_p6, %p12184_p2 }
  0x5f   : > { %12192 = shalt.err (!%p12189_p3)
}
  0x60   : > { %s12193_s24 = scalar_lea.vmem %s12455_s17, 131072  ;;  %s12295_s25 = smov [#allocation7]  }
  0x61   : > { %p12194_p9 = scmp.ne.s32.totalorder %s12455_s17, %s12193_s24  ;;  %s12198_s26 = sshll.u32 %s12295_s25, 4  ;;  %s12199_s26 = int_to_ptr.vmem [resolvable:$false] %s12198_s26 }
  0x62   : > { %s12200_s9 = scalar_lea.vmem %s12199_s26, 262144  ;;  %p12201_p11 = scmp.lt.s32.totalorder %s12455_s17, %s12199_s26 }
  0x63   : > { %p12196_p7 = pnand %p12194_p9, %p12182_p4  ;;  %p12202_p12 = scmp.lt.s32.totalorder %s12200_s9, %s12193_s24 }
  0x65   : > { %p12197_p10 = pneg %p12196_p7  ;;  %p12203_p13 = por %p12202_p12, %p12201_p11 }
  0x67   : > { %p12204_p0 = pnand %p12203_p13, %p12197_p10 }
  0x69   : > { %12207 = shalt.err (!%p12204_p0)
}
  0x6a   : > { %s12296_s10 = smov 512   ;;  %s12297_s11 = smov 32  }
  0x6b   : > { %11605 = dma.hbm_to_vmem [thread:$0]  (!%p12451_p8), %s12449_s12, 131072, %s12455_s17, %s12457_s19, %s12296_s10, %s12296_s10, %s12297_s11  }
  0x6c   : > { %p13936_p4 = scmp.ne.s32.totalorder %s13932_s8, 0 }
  0x6d   : > { %p13937_p2 = scmp.eq.s32.totalorder (!%p13936_p4), %s12364_s6, 0 }
  0x6e   : > { %300 = sbr.rel (%p13936_p4) target bundleno = 2000 (0x7d0), region = 48 }
  0x73   : > { %12249 = dma.done.wait (%p13937_p2), [#allocation5], 512   ;;  %p13938_p5 = pmov %p13937_p2 }
  0x74   : > { %s306_s14 = sand.u32 1, %s12364_s6   ;;  %s308_s29 = sand.u32 1, %s12278_s27  }
  0x75   : > { %12251 = vsyncadd (%p13938_p5), [#allocation5], 4294966784  ;;  %s10266_s15 = sshll.u32 %s308_s29, 13  ;;  %s307_s20 = scalar_lea.sflag [#allocation8], %s306_s14 }
  0x76   : > { %s12486_s21 = scalar_lea.vmem [#allocation7], %s10266_s15  ;;  %p13939_p1 = scmp.ne.s32.totalorder %s13931_s30, 0 }
  0x78   : > { %12253 = dma.done.wait (%p13939_p1), %s307_s20, 131072  }
  0x79   : > { %12255 = vsyncadd (%p13939_p1), %s307_s20, 4294836224  ;;  %p13940_p8 = pmov %p13937_p2 }
  0x7a   : > { %p13941_p6 = pmov %p13937_p2 }
  0x7b   : > { %12257 = dma.done.wait (%p13940_p8), [#allocation8], 128  }
  0x7c   : > { %12259 = vsyncadd (%p13941_p6), [#allocation8], 4294967168  ;;  %p13942_p3 = pmov %p13937_p2 }
  0x7d   : > { %p13943_p9 = pmov %p13937_p2 }
  0x7e   : > { %12261 = dma.done.wait (%p13942_p3), [#allocation11], 32832  }
  0x7f   : > { %12263 = vsyncadd (%p13943_p9), [#allocation11], 4294934464  ;;  %p13944_p7 = pmov %p13937_p2 }
  0x80   : > { %p13945_p10 = pmov %p13937_p2 }
  0x81   : > { %12265 = dma.done.wait (%p13944_p7), [#allocation14], 64  }
  0x82   : > { %12267 = vsyncadd (%p13945_p10), [#allocation14], 4294967232  ;;  %p13946_p11 = scmp.ne.s32.totalorder %s12364_s6, 0 }
  0x84   : > { %356 = sbr.rel (%p13946_p11) target bundleno = 139 (0x8b), region = 76 }
  0x89   : > { %v12298_v0 = vmov 0.0  }
  0x8a   : > { %357 = vst [vmem:[#allocation2] sm:$0xff] %v12298_v0  ;;  %358 = vst [vmem:[#allocation2 + $0x8] sm:$0xff] %v12298_v0 }
  0x8b PF: > { %v423_v1 = vld [vmem:[%s12486_s21 + $0x1c0] sm:$0xff]  ;;  %v12299_v33 = vmov 1966171168   ;;  %v1397_v35 = vlaneseq  ;;  %s10272_s30 = sshll.u32 %s12364_s6, 11  ;;  %p11297_p12 = scmp.ne.s32.totalorder %s12364_s6, 1 }
  0x8c   : > { %v427_v2 = vld [vmem:[%s12486_s21 + $0x1e0] sm:$0xff]  ;;  %v1395_v34 = vunpack.c.l.s4 %v12299_v33  ;;  %s12533_s8 = sshra.s32 %s10272_s30, 7  ;;  %s10138_s17 = sld [smem:[#allocation3]] (!%p11297_p12) }
  0x8d   : > { %v551_v3 = vld [vmem:[%s12486_s21 + $0x5c0] sm:$0xff]  ;;  %v10330_v4 = vcombine.high %v423_v1, %v427_v2  ;;  %v10329_v6 = vcombine.low %v423_v1, %v427_v2  ;;  %v12529_v45 = vshrl.u32 %v1397_v35, 7  ;;  %s362_s12 = scalar_lea.vmem [#allocation4], %s12533_s8 }
  0x8e   : > { %v555_v5 = vld [vmem:[%s12486_s21 + $0x5e0] sm:$0xff]  ;;  %v1396_v44 = vunpack.c.0.s8 %v1395_v34  ;;  %v12545_v60 = vld [vmem:[%s362_s12] sm:$0xff] }
  0x8f   : > { %v415_v7 = vld [vmem:[%s12486_s21 + $0x180] sm:$0xff]  ;;  %v10458_v9 = vcombine.high %v551_v3, %v555_v5  ;;  %v10457_v10 = vcombine.low %v551_v3, %v555_v5  ;;  %6627 = vmatprep.subr.bf16.mxu0 %v10330_v4 }
  0x90   : > { %v419_v8 = vld [vmem:[%s12486_s21 + $0x1a0] sm:$0xff]  ;;  %6628 = vmatpush1.bf16.msra.mxu0 %v10329_v6  ;;  %v12538_v54 = vsub.s32 %v1396_v44, %v12529_v45 }
  0x91   : > { %v10322_v11 = vcombine.high %v415_v7, %v419_v8  ;;  %v543_v12 = vld [vmem:[%s12486_s21 + $0x580] sm:$0xff]  ;;  %6668 = vmatprep.subr.bf16.mxu1 %v10458_v9  ;;  %v10321_v19 = vcombine.low %v415_v7, %v419_v8 }
  0x92   : > { %v547_v13 = vld [vmem:[%s12486_s21 + $0x5a0] sm:$0xff]  ;;  %6669 = vmatpush1.bf16.msra.mxu1 %v10457_v10  ;;  %v12551_v0 = vrot.slane %v12545_v60, %v12538_v54 }
  0x93   : > { %v407_v14 = vld [vmem:[%s12486_s21 + $0x140] sm:$0xff]  ;;  %v10450_v15 = vcombine.high %v543_v12, %v547_v13  ;;  %6629 = vmatprep.subr.bf16.mxu0 %v10322_v11  ;;  %v10449_v20 = vcombine.low %v543_v12, %v547_v13 }
  0x94   : > { %v411_v16 = vld [vmem:[%s12486_s21 + $0x160] sm:$0xff]  ;;  %6630 = vmatpush1.bf16.msra.mxu0 %v10321_v19  ;;  %v1408_v4 = vcombine.high %v12551_v0, %v12551_v0 }
  0x95   : > { %v535_v17 = vld [vmem:[%s12486_s21 + $0x540] sm:$0xff]  ;;  %v10314_v21 = vcombine.high %v407_v14, %v411_v16  ;;  %6670 = vmatprep.subr.bf16.mxu1 %v10450_v15  ;;  %v10313_v27 = vcombine.low %v407_v14, %v411_v16 }
  0x96   : > { %v539_v18 = vld [vmem:[%s12486_s21 + $0x560] sm:$0xff]  ;;  %6671 = vmatpush1.bf16.msra.mxu1 %v10449_v20  ;;  %v12560_v10 = vrot.slane %v1408_v4, %v12538_v54 }
  0x97   : > { %v10442_v22 = vcombine.high %v535_v17, %v539_v18  ;;  %v399_v23 = vld [vmem:[%s12486_s21 + $0x100] sm:$0xff]  ;;  %6631 = vmatprep.subr.bf16.mxu0 %v10314_v21  ;;  %v10441_v28 = vcombine.low %v535_v17, %v539_v18 }
  0x98   : > { %v403_v24 = vld [vmem:[%s12486_s21 + $0x120] sm:$0xff]  ;;  %6632 = vmatpush1.bf16.msra.mxu0 %v10313_v27  ;;  %6659 = vmatprep.mubr.bf16.mxu0 %v12560_v10  ;;  %v12567_v14 = vcombine.high %v12560_v10, %v12560_v10 }
  0x99   : > { %v527_v25 = vld [vmem:[%s12486_s21 + $0x500] sm:$0xff]  ;;  %v10306_v29 = vcombine.high %v399_v23, %v403_v24  ;;  %6672 = vmatprep.subr.bf16.mxu1 %v10442_v22  ;;  %v10305_v38 = vcombine.low %v399_v23, %v403_v24 }
  0x9a   : > { %v531_v26 = vld [vmem:[%s12486_s21 + $0x520] sm:$0xff]  ;;  %6673 = vmatpush1.bf16.msra.mxu1 %v10441_v28  ;;  %6700 = vmatprep.mubr.bf16.mxu1 %v12567_v14 }
  0x9b   : > { %v10434_v30 = vcombine.high %v527_v25, %v531_v26  ;;  %v391_v31 = vld [vmem:[%s12486_s21 + $0xc0] sm:$0xff]  ;;  %6633 = vmatprep.subr.bf16.mxu0 %v10306_v29  ;;  %v10433_v39 = vcombine.low %v527_v25, %v531_v26 }
  0x9c   : > { %v395_v32 = vld [vmem:[%s12486_s21 + $0xe0] sm:$0xff]  ;;  %6634 = vmatpush1.bf16.msra.mxu0 %v10305_v38 }
  0x9d   : > { %v519_v36 = vld [vmem:[%s12486_s21 + $0x4c0] sm:$0xff]  ;;  %v10298_v40 = vcombine.high %v391_v31, %v395_v32  ;;  %6674 = vmatprep.subr.bf16.mxu1 %v10434_v30  ;;  %v10297_v48 = vcombine.low %v391_v31, %v395_v32 }
  0x9e   : > { %v523_v37 = vld [vmem:[%s12486_s21 + $0x4e0] sm:$0xff]  ;;  %6675 = vmatpush1.bf16.msra.mxu1 %v10433_v39 }
  0x9f   : > { %v10426_v41 = vcombine.high %v519_v36, %v523_v37  ;;  %v383_v42 = vld [vmem:[%s12486_s21 + $0x80] sm:$0xff]  ;;  %6635 = vmatprep.subr.bf16.mxu0 %v10298_v40  ;;  %v10425_v49 = vcombine.low %v519_v36, %v523_v37 }
  0xa0   : > { %v387_v43 = vld [vmem:[%s12486_s21 + $0xa0] sm:$0xff]  ;;  %6636 = vmatpush1.bf16.msra.mxu0 %v10297_v48 }
  0xa1   : > { %v511_v46 = vld [vmem:[%s12486_s21 + $0x480] sm:$0xff]  ;;  %v10290_v50 = vcombine.high %v383_v42, %v387_v43  ;;  %6676 = vmatprep.subr.bf16.mxu1 %v10426_v41  ;;  %v10289_v57 = vcombine.low %v383_v42, %v387_v43 }
  0xa2   : > { %v515_v47 = vld [vmem:[%s12486_s21 + $0x4a0] sm:$0xff]  ;;  %6677 = vmatpush1.bf16.msra.mxu1 %v10425_v49 }
  0xa3   : > { %v10418_v51 = vcombine.high %v511_v46, %v515_v47  ;;  %v375_v52 = vld [vmem:[%s12486_s21 + $0x40] sm:$0xff]  ;;  %6637 = vmatprep.subr.bf16.mxu0 %v10290_v50  ;;  %v10417_v58 = vcombine.low %v511_v46, %v515_v47 }
  0xa4   : > { %v379_v53 = vld [vmem:[%s12486_s21 + $0x60] sm:$0xff]  ;;  %6638 = vmatpush1.bf16.msra.mxu0 %v10289_v57 }
  0xa5   : > { %v503_v55 = vld [vmem:[%s12486_s21 + $0x440] sm:$0xff]  ;;  %v10282_v59 = vcombine.high %v375_v52, %v379_v53  ;;  %6678 = vmatprep.subr.bf16.mxu1 %v10418_v51  ;;  %v10281_v3 = vcombine.low %v375_v52, %v379_v53 }
  0xa6   : > { %v507_v56 = vld [vmem:[%s12486_s21 + $0x460] sm:$0xff]  ;;  %6679 = vmatpush1.bf16.msra.mxu1 %v10417_v58 }
  0xa7   : > { %v10410_v61 = vcombine.high %v503_v55, %v507_v56  ;;  %v367_v62 = vld [vmem:[%s12486_s21] sm:$0xff]  ;;  %6639 = vmatprep.subr.bf16.mxu0 %v10282_v59  ;;  %v10409_v5 = vcombine.low %v503_v55, %v507_v56 }
  0xa8   : > { %v371_v63 = vld [vmem:[%s12486_s21 + $0x20] sm:$0xff]  ;;  %6640 = vmatpush1.bf16.msra.mxu0 %v10281_v3 }
  0xa9   : > { %v495_v1 = vld [vmem:[%s12486_s21 + $0x400] sm:$0xff]  ;;  %v10274_v6 = vcombine.high %v367_v62, %v371_v63  ;;  %6680 = vmatprep.subr.bf16.mxu1 %v10410_v61  ;;  %v10273_v13 = vcombine.low %v367_v62, %v371_v63 }
  0xaa   : > { %v499_v2 = vld [vmem:[%s12486_s21 + $0x420] sm:$0xff]  ;;  %6681 = vmatpush1.bf16.msra.mxu1 %v10409_v5 }
  0xab   : > { %v10402_v7 = vcombine.high %v495_v1, %v499_v2  ;;  %v487_v8 = vld [vmem:[%s12486_s21 + $0x3c0] sm:$0xff]  ;;  %6641 = vmatprep.subr.bf16.mxu0 %v10274_v6  ;;  %v10401_v15 = vcombine.low %v495_v1, %v499_v2  ;;  %v1393_v2 = vcombine.high %v12545_v60, %v12545_v60 }
  0xac   : > { %v491_v9 = vld [vmem:[%s12486_s21 + $0x3e0] sm:$0xff]  ;;  %6642 = vmatpush1.bf16.msra.mxu0 %v10273_v13 }
  0xad   : > { %v615_v11 = vld [vmem:[%s12486_s21 + $0x7c0] sm:$0xff]  ;;  %v10394_v16 = vcombine.high %v487_v8, %v491_v9  ;;  %6682 = vmatprep.subr.bf16.mxu1 %v10402_v7  ;;  %v10393_v22 = vcombine.low %v487_v8, %v491_v9 }
  0xae   : > { %v619_v12 = vld [vmem:[%s12486_s21 + $0x7e0] sm:$0xff]  ;;  %6683 = vmatpush1.bf16.msra.mxu1 %v10401_v15 }
  0xaf   : > { %v10522_v17 = vcombine.high %v615_v11, %v619_v12  ;;  %v479_v18 = vld [vmem:[%s12486_s21 + $0x380] sm:$0xff]  ;;  %6643 = vmatprep.subr.bf16.mxu0 %v10394_v16  ;;  %v10521_v23 = vcombine.low %v615_v11, %v619_v12  ;;  %v12601_v12 = vrot.slane %v1393_v2, %v12538_v54 }
  0xb0   : > { %v483_v19 = vld [vmem:[%s12486_s21 + $0x3a0] sm:$0xff]  ;;  %6644 = vmatpush2.bf16.msra.mxu0 %v10393_v22 }
  0xb1   : > { %v607_v20 = vld [vmem:[%s12486_s21 + $0x780] sm:$0xff]  ;;  %v10386_v24 = vcombine.high %v479_v18, %v483_v19  ;;  %6684 = vmatprep.subr.bf16.mxu1 %v10522_v17  ;;  %v10385_v30 = vcombine.low %v479_v18, %v483_v19 }
  0xb2   : > { %v611_v21 = vld [vmem:[%s12486_s21 + $0x7a0] sm:$0xff]  ;;  %6685 = vmatpush2.bf16.msra.mxu1 %v10521_v23  ;;  %v12611_v23 = vrot.slane %v12551_v0, %v12538_v54 }
  0xb3   : > { %v10514_v25 = vcombine.high %v607_v20, %v611_v21  ;;  %v471_v26 = vld [vmem:[%s12486_s21 + $0x340] sm:$0xff]  ;;  %6645 = vmatprep.subr.bf16.mxu0 %v10386_v24  ;;  %v10513_v31 = vcombine.low %v607_v20, %v611_v21  ;;  %v1409_v21 = vcombine.high %v12601_v12, %v12601_v12 }
  0xb4   : > { %v475_v27 = vld [vmem:[%s12486_s21 + $0x360] sm:$0xff]  ;;  %6646 = vmatpush2.bf16.msra.mxu0 %v10385_v30  ;;  %v12622_v0 = vcombine.high %v12611_v23, %v12611_v23 }
  0xb5   : > { %v599_v28 = vld [vmem:[%s12486_s21 + $0x740] sm:$0xff]  ;;  %v10378_v32 = vcombine.high %v471_v26, %v475_v27  ;;  %6686 = vmatprep.subr.bf16.mxu1 %v10514_v25  ;;  %v10377_v38 = vcombine.low %v471_v26, %v475_v27 }
  0xb6   : > { %v603_v29 = vld [vmem:[%s12486_s21 + $0x760] sm:$0xff]  ;;  %6687 = vmatpush2.bf16.msra.mxu1 %v10513_v31  ;;  %v12618_v31 = vrot.slane %v1409_v21, %v12538_v54 }
  0xb7   : > { %v10506_v33 = vcombine.high %v599_v28, %v603_v29  ;;  %v463_v34 = vld [vmem:[%s12486_s21 + $0x300] sm:$0xff]  ;;  %6647 = vmatprep.subr.bf16.mxu0 %v10378_v32  ;;  %v10505_v39 = vcombine.low %v599_v28, %v603_v29 }
  0xb8   : > { %v467_v35 = vld [vmem:[%s12486_s21 + $0x320] sm:$0xff]  ;;  %6648 = vmatpush2.bf16.msra.mxu0 %v10377_v38 }
  0xb9   : > { %v591_v36 = vld [vmem:[%s12486_s21 + $0x700] sm:$0xff]  ;;  %v10370_v40 = vcombine.high %v463_v34, %v467_v35  ;;  %6688 = vmatprep.subr.bf16.mxu1 %v10506_v33  ;;  %v10369_v47 = vcombine.low %v463_v34, %v467_v35 }
  0xba   : > { %v595_v37 = vld [vmem:[%s12486_s21 + $0x720] sm:$0xff]  ;;  %6689 = vmatpush2.bf16.msra.mxu1 %v10505_v39 }
  0xbb   : > { %v10498_v41 = vcombine.high %v591_v36, %v595_v37  ;;  %v455_v42 = vld [vmem:[%s12486_s21 + $0x2c0] sm:$0xff]  ;;  %6649 = vmatprep.subr.bf16.mxu0 %v10370_v40  ;;  %v10497_v48 = vcombine.low %v591_v36, %v595_v37  ;;  %v12631_v40 = vcombine.high %v12618_v31, %v12618_v31 }
  0xbc   : > { %v459_v43 = vld [vmem:[%s12486_s21 + $0x2e0] sm:$0xff]  ;;  %6650 = vmatpush2.bf16.msra.mxu0 %v10369_v47 }
  0xbd   : > { %v583_v44 = vld [vmem:[%s12486_s21 + $0x6c0] sm:$0xff]  ;;  %v10362_v49 = vcombine.high %v455_v42, %v459_v43  ;;  %6690 = vmatprep.subr.bf16.mxu1 %v10498_v41  ;;  %v10361_v56 = vcombine.low %v455_v42, %v459_v43 }
  0xbe   : > { %v587_v46 = vld [vmem:[%s12486_s21 + $0x6e0] sm:$0xff]  ;;  %6691 = vmatpush2.bf16.msra.mxu1 %v10497_v48 }
  0xbf   : > { %v10490_v50 = vcombine.high %v583_v44, %v587_v46  ;;  %v447_v51 = vld [vmem:[%s12486_s21 + $0x280] sm:$0xff]  ;;  %6651 = vmatprep.subr.bf16.mxu0 %v10362_v49  ;;  %v10489_v57 = vcombine.low %v583_v44, %v587_v46 }
  0xc0   : > { %v451_v52 = vld [vmem:[%s12486_s21 + $0x2a0] sm:$0xff]  ;;  %6652 = vmatpush2.bf16.msra.mxu0 %v10361_v56 }
  0xc1   : > { %v575_v53 = vld [vmem:[%s12486_s21 + $0x680] sm:$0xff]  ;;  %v10354_v58 = vcombine.high %v447_v51, %v451_v52  ;;  %6692 = vmatprep.subr.bf16.mxu1 %v10490_v50  ;;  %v10353_v3 = vcombine.low %v447_v51, %v451_v52 }
  0xc2   : > { %v579_v55 = vld [vmem:[%s12486_s21 + $0x6a0] sm:$0xff]  ;;  %6693 = vmatpush2.bf16.msra.mxu1 %v10489_v57 }
  0xc3   : > { %v10482_v59 = vcombine.high %v575_v53, %v579_v55  ;;  %v439_v61 = vld [vmem:[%s12486_s21 + $0x240] sm:$0xff]  ;;  %6653 = vmatprep.subr.bf16.mxu0 %v10354_v58  ;;  %v10481_v4 = vcombine.low %v575_v53, %v579_v55 }
  0xc4   : > { %v443_v62 = vld [vmem:[%s12486_s21 + $0x260] sm:$0xff]  ;;  %6654 = vmatpush2.bf16.msra.mxu0 %v10353_v3 }
  0xc5   : > { %v567_v63 = vld [vmem:[%s12486_s21 + $0x640] sm:$0xff]  ;;  %v10346_v5 = vcombine.high %v439_v61, %v443_v62  ;;  %6694 = vmatprep.subr.bf16.mxu1 %v10482_v59  ;;  %v10345_v60 = vcombine.low %v439_v61, %v443_v62 }
  0xc6   : > { %v571_v1 = vld [vmem:[%s12486_s21 + $0x660] sm:$0xff]  ;;  %6695 = vmatpush2.bf16.msra.mxu1 %v10481_v4 }
  0xc7   : > { %v10474_v6 = vcombine.high %v567_v63, %v571_v1  ;;  %v431_v7 = vld [vmem:[%s12486_s21 + $0x200] sm:$0xff]  ;;  %6655 = vmatprep.subr.bf16.mxu0 %v10346_v5  ;;  %v10473_v13 = vcombine.low %v567_v63, %v571_v1 }
  0xc8   : > { %v435_v8 = vld [vmem:[%s12486_s21 + $0x220] sm:$0xff]  ;;  %6656 = vmatpush2.bf16.msra.mxu0 %v10345_v60 }
  0xc9   : > { %v559_v9 = vld [vmem:[%s12486_s21 + $0x600] sm:$0xff]  ;;  %v10338_v15 = vcombine.high %v431_v7, %v435_v8  ;;  %6696 = vmatprep.subr.bf16.mxu1 %v10474_v6  ;;  %v10337_v22 = vcombine.low %v431_v7, %v435_v8 }
  0xca   : > { %v563_v11 = vld [vmem:[%s12486_s21 + $0x620] sm:$0xff]  ;;  %6697 = vmatpush2.bf16.msra.mxu1 %v10473_v13 }
  0xcb   : > { %v10466_v16 = vcombine.high %v559_v9, %v563_v11  ;;  %v679_v17 = vld [vmem:[%s12486_s21 + $0x9c0] sm:$0xff]  ;;  %6657 = vmatprep.subr.bf16.mxu0 %v10338_v15  ;;  %v10465_v24 = vcombine.low %v559_v9, %v563_v11 }
  0xcc   : > { %v683_v18 = vld [vmem:[%s12486_s21 + $0x9e0] sm:$0xff]  ;;  %6658 = vmatpush2.bf16.msra.mxu0 %v10337_v22 }
  0xcd   : > { %v807_v19 = vld [vmem:[%s12486_s21 + $0xdc0] sm:$0xff]  ;;  %v10586_v25 = vcombine.high %v679_v17, %v683_v18  ;;  %6698 = vmatprep.subr.bf16.mxu1 %v10466_v16  ;;  %v10585_v32 = vcombine.low %v679_v17, %v683_v18 }
  0xce   : > { %v811_v20 = vld [vmem:[%s12486_s21 + $0xde0] sm:$0xff]  ;;  %6699 = vmatpush2.bf16.msra.mxu1 %v10465_v24 }
  0xcf   : > { %v10714_v26 = vcombine.high %v807_v19, %v811_v20  ;;  %v671_v27 = vld [vmem:[%s12486_s21 + $0x980] sm:$0xff]  ;;  %6709 = vmatprep.subr.bf16.mxu0 %v10586_v25  ;;  %v10713_v33 = vcombine.low %v807_v19, %v811_v20  ;;  %6660 = vmatmul.mubr.bf16.vlgmr.msra.gmra.mxu0 %v12611_v23 }
  0xd0   : > { %v675_v28 = vld [vmem:[%s12486_s21 + $0x9a0] sm:$0xff]  ;;  %6710 = vmatpush1.bf16.msra.mxu0 %v10585_v32  ;;  %6741 = vmatprep.mubr.bf16.mxu0 %v12618_v31 }
  0xd1   : > { %v799_v29 = vld [vmem:[%s12486_s21 + $0xd80] sm:$0xff]  ;;  %v10578_v34 = vcombine.high %v671_v27, %v675_v28  ;;  %6750 = vmatprep.subr.bf16.mxu1 %v10714_v26  ;;  %6701 = vmatmul.mubr.bf16.vlgmr.msra.gmra.mxu1 %v12622_v0  ;;  %v10577_v41 = vcombine.low %v671_v27, %v675_v28 }
  0xd2   : > { %v803_v30 = vld [vmem:[%s12486_s21 + $0xda0] sm:$0xff]  ;;  %6751 = vmatpush1.bf16.msra.mxu1 %v10713_v33  ;;  %6782 = vmatprep.mubr.bf16.mxu1 %v12631_v40 }
  0xd3   : > { %v10706_v35 = vcombine.high %v799_v29, %v803_v30  ;;  %v663_v36 = vld [vmem:[%s12486_s21 + $0x940] sm:$0xff]  ;;  %6711 = vmatprep.subr.bf16.mxu0 %v10578_v34  ;;  %v10705_v42 = vcombine.low %v799_v29, %v803_v30 }
  0xd4   : > { %v667_v37 = vld [vmem:[%s12486_s21 + $0x960] sm:$0xff]  ;;  %6712 = vmatpush1.bf16.msra.mxu0 %v10577_v41 }
  0xd5   : > { %v791_v38 = vld [vmem:[%s12486_s21 + $0xd40] sm:$0xff]  ;;  %v10570_v43 = vcombine.high %v663_v36, %v667_v37  ;;  %6752 = vmatprep.subr.bf16.mxu1 %v10706_v35  ;;  %v10569_v50 = vcombine.low %v663_v36, %v667_v37 }
  0xd6   : > { %v795_v39 = vld [vmem:[%s12486_s21 + $0xd60] sm:$0xff]  ;;  %6753 = vmatpush1.bf16.msra.mxu1 %v10705_v42 }
  0xd7   : > { %v10698_v44 = vcombine.high %v791_v38, %v795_v39  ;;  %v655_v46 = vld [vmem:[%s12486_s21 + $0x900] sm:$0xff]  ;;  %6713 = vmatprep.subr.bf16.mxu0 %v10570_v43  ;;  %v10697_v51 = vcombine.low %v791_v38, %v795_v39 }
  0xd8   : > { %v659_v47 = vld [vmem:[%s12486_s21 + $0x920] sm:$0xff]  ;;  %6714 = vmatpush1.bf16.msra.mxu0 %v10569_v50 }
  0xd9   : > { %v783_v48 = vld [vmem:[%s12486_s21 + $0xd00] sm:$0xff]  ;;  %v10562_v52 = vcombine.high %v655_v46, %v659_v47  ;;  %6754 = vmatprep.subr.bf16.mxu1 %v10698_v44  ;;  %v10561_v59 = vcombine.low %v655_v46, %v659_v47 }
  0xda   : > { %v787_v49 = vld [vmem:[%s12486_s21 + $0xd20] sm:$0xff]  ;;  %6755 = vmatpush1.bf16.msra.mxu1 %v10697_v51 }
  0xdb   : > { %v10690_v53 = vcombine.high %v783_v48, %v787_v49  ;;  %v647_v55 = vld [vmem:[%s12486_s21 + $0x8c0] sm:$0xff]  ;;  %6715 = vmatprep.subr.bf16.mxu0 %v10562_v52  ;;  %v10689_v61 = vcombine.low %v783_v48, %v787_v49 }
  0xdc   : > { %v651_v56 = vld [vmem:[%s12486_s21 + $0x8e0] sm:$0xff]  ;;  %6716 = vmatpush1.bf16.msra.mxu0 %v10561_v59 }
  0xdd   : > { %v775_v57 = vld [vmem:[%s12486_s21 + $0xcc0] sm:$0xff]  ;;  %v10554_v62 = vcombine.high %v647_v55, %v651_v56  ;;  %6756 = vmatprep.subr.bf16.mxu1 %v10690_v53  ;;  %v10553_v5 = vcombine.low %v647_v55, %v651_v56 }
  0xde   : > { %v779_v58 = vld [vmem:[%s12486_s21 + $0xce0] sm:$0xff]  ;;  %6757 = vmatpush1.bf16.msra.mxu1 %v10689_v61 }
  0xdf   : > { %v10682_v63 = vcombine.high %v775_v57, %v779_v58  ;;  %v639_v1 = vld [vmem:[%s12486_s21 + $0x880] sm:$0xff]  ;;  %6717 = vmatprep.subr.bf16.mxu0 %v10554_v62  ;;  %v10681_v6 = vcombine.low %v775_v57, %v779_v58 }
  0xe0   : > { %v643_v2 = vld [vmem:[%s12486_s21 + $0x8a0] sm:$0xff]  ;;  %6718 = vmatpush1.bf16.msra.mxu0 %v10553_v5 }
  0xe1   : > { %v767_v3 = vld [vmem:[%s12486_s21 + $0xc80] sm:$0xff]  ;;  %v10546_v7 = vcombine.high %v639_v1, %v643_v2  ;;  %6758 = vmatprep.subr.bf16.mxu1 %v10682_v63  ;;  %v10545_v15 = vcombine.low %v639_v1, %v643_v2 }
  0xe2   : > { %v771_v4 = vld [vmem:[%s12486_s21 + $0xca0] sm:$0xff]  ;;  %6759 = vmatpush1.bf16.msra.mxu1 %v10681_v6 }
  0xe3   : > { %v10674_v8 = vcombine.high %v767_v3, %v771_v4  ;;  %v631_v9 = vld [vmem:[%s12486_s21 + $0x840] sm:$0xff]  ;;  %6719 = vmatprep.subr.bf16.mxu0 %v10546_v7  ;;  %v10673_v16 = vcombine.low %v767_v3, %v771_v4 }
  0xe4   : > { %v635_v11 = vld [vmem:[%s12486_s21 + $0x860] sm:$0xff]  ;;  %6720 = vmatpush1.bf16.msra.mxu0 %v10545_v15 }
  0xe5   : > { %v759_v60 = vld [vmem:[%s12486_s21 + $0xc40] sm:$0xff]  ;;  %v10538_v17 = vcombine.high %v631_v9, %v635_v11  ;;  %6760 = vmatprep.subr.bf16.mxu1 %v10674_v8  ;;  %v10537_v24 = vcombine.low %v631_v9, %v635_v11 }
  0xe6   : > { %v763_v13 = vld [vmem:[%s12486_s21 + $0xc60] sm:$0xff]  ;;  %6761 = vmatpush1.bf16.msra.mxu1 %v10673_v16 }
  0xe7   : > { %v10666_v18 = vcombine.high %v759_v60, %v763_v13  ;;  %v623_v19 = vld [vmem:[%s12486_s21 + $0x800] sm:$0xff]  ;;  %6721 = vmatprep.subr.bf16.mxu0 %v10538_v17  ;;  %v10665_v25 = vcombine.low %v759_v60, %v763_v13 }
  0xe8   : > { %v627_v20 = vld [vmem:[%s12486_s21 + $0x820] sm:$0xff]  ;;  %6722 = vmatpush1.bf16.msra.mxu0 %v10537_v24 }
  0xe9   : > { %v751_v21 = vld [vmem:[%s12486_s21 + $0xc00] sm:$0xff]  ;;  %v10530_v26 = vcombine.high %v623_v19, %v627_v20  ;;  %6762 = vmatprep.subr.bf16.mxu1 %v10666_v18  ;;  %v10529_v33 = vcombine.low %v623_v19, %v627_v20 }
  0xea   : > { %v755_v22 = vld [vmem:[%s12486_s21 + $0xc20] sm:$0xff]  ;;  %6763 = vmatpush1.bf16.msra.mxu1 %v10665_v25 }
  0xeb   : > { %v10658_v27 = vcombine.high %v751_v21, %v755_v22  ;;  %v743_v28 = vld [vmem:[%s12486_s21 + $0xbc0] sm:$0xff]  ;;  %6723 = vmatprep.subr.bf16.mxu0 %v10530_v26  ;;  %v10657_v34 = vcombine.low %v751_v21, %v755_v22  ;;  %v12686_v26 = vld [vmem:[%s362_s12 + $0x8] sm:$0xff] }
  0xec   : > { %v747_v29 = vld [vmem:[%s12486_s21 + $0xbe0] sm:$0xff]  ;;  %6724 = vmatpush1.bf16.msra.mxu0 %v10529_v33 }
  0xed   : > { %v871_v30 = vld [vmem:[%s12486_s21 + $0xfc0] sm:$0xff]  ;;  %v10650_v35 = vcombine.high %v743_v28, %v747_v29  ;;  %6764 = vmatprep.subr.bf16.mxu1 %v10658_v27  ;;  %v10649_v42 = vcombine.low %v743_v28, %v747_v29 }
  0xee   : > { %v875_v32 = vld [vmem:[%s12486_s21 + $0xfe0] sm:$0xff]  ;;  %6765 = vmatpush1.bf16.msra.mxu1 %v10657_v34 }
  0xef   : > { %v10778_v36 = vcombine.high %v871_v30, %v875_v32  ;;  %v735_v37 = vld [vmem:[%s12486_s21 + $0xb80] sm:$0xff]  ;;  %6725 = vmatprep.subr.bf16.mxu0 %v10650_v35  ;;  %v10777_v43 = vcombine.low %v871_v30, %v875_v32  ;;  %v12694_v35 = vrot.slane %v12686_v26, %v12538_v54 }
  0xf0   : > { %v739_v38 = vld [vmem:[%s12486_s21 + $0xba0] sm:$0xff]  ;;  %6726 = vmatpush2.bf16.msra.mxu0 %v10649_v42 }
  0xf1   : > { %v863_v39 = vld [vmem:[%s12486_s21 + $0xf80] sm:$0xff]  ;;  %v10642_v44 = vcombine.high %v735_v37, %v739_v38  ;;  %6766 = vmatprep.subr.bf16.mxu1 %v10778_v36  ;;  %v10641_v51 = vcombine.low %v735_v37, %v739_v38 }
  0xf2   : > { %v867_v41 = vld [vmem:[%s12486_s21 + $0xfa0] sm:$0xff]  ;;  %6767 = vmatpush2.bf16.msra.mxu1 %v10777_v43 }
  0xf3   : > { %v10770_v46 = vcombine.high %v863_v39, %v867_v41  ;;  %v727_v47 = vld [vmem:[%s12486_s21 + $0xb40] sm:$0xff]  ;;  %6727 = vmatprep.subr.bf16.mxu0 %v10642_v44  ;;  %v10769_v52 = vcombine.low %v863_v39, %v867_v41 }
  0xf4   : > { %v731_v48 = vld [vmem:[%s12486_s21 + $0xb60] sm:$0xff]  ;;  %6728 = vmatpush2.bf16.msra.mxu0 %v10641_v51 }
  0xf5   : > { %v855_v49 = vld [vmem:[%s12486_s21 + $0xf40] sm:$0xff]  ;;  %v10634_v53 = vcombine.high %v727_v47, %v731_v48  ;;  %6768 = vmatprep.subr.bf16.mxu1 %v10770_v46  ;;  %v10633_v61 = vcombine.low %v727_v47, %v731_v48  ;;  %v1457_v46 = vcombine.high %v12694_v35, %v12694_v35  ;;  %v12704_v48 = vrot.slane %v12601_v12, %v12538_v54 }
  0xf6   : > { %v859_v50 = vld [vmem:[%s12486_s21 + $0xf60] sm:$0xff]  ;;  %6769 = vmatpush2.bf16.msra.mxu1 %v10769_v52 }
  0xf7   : > { %v10762_v55 = vcombine.high %v855_v49, %v859_v50  ;;  %v719_v56 = vld [vmem:[%s12486_s21 + $0xb00] sm:$0xff]  ;;  %6729 = vmatprep.subr.bf16.mxu0 %v10634_v53  ;;  %v10761_v62 = vcombine.low %v855_v49, %v859_v50  ;;  %v12715_v12 = vcombine.high %v12704_v48, %v12704_v48 }
  0xf8   : > { %v723_v57 = vld [vmem:[%s12486_s21 + $0xb20] sm:$0xff]  ;;  %6730 = vmatpush2.bf16.msra.mxu0 %v10633_v61 }
  0xf9   : > { %v847_v58 = vld [vmem:[%s12486_s21 + $0xf00] sm:$0xff]  ;;  %v10626_v63 = vcombine.high %v719_v56, %v723_v57  ;;  %6770 = vmatprep.subr.bf16.mxu1 %v10762_v55  ;;  %v10625_v6 = vcombine.low %v719_v56, %v723_v57  ;;  %v12711_v57 = vrot.slane %v1457_v46, %v12538_v54 }
  0xfa   : > { %v851_v59 = vld [vmem:[%s12486_s21 + $0xf20] sm:$0xff]  ;;  %6771 = vmatpush2.bf16.msra.mxu1 %v10761_v62 }
  0xfb   : > { %v10754_v1 = vcombine.high %v847_v58, %v851_v59  ;;  %v711_v2 = vld [vmem:[%s12486_s21 + $0xac0] sm:$0xff]  ;;  %6731 = vmatprep.subr.bf16.mxu0 %v10626_v63  ;;  %v10753_v7 = vcombine.low %v847_v58, %v851_v59 }
  0xfc   : > { %v715_v3 = vld [vmem:[%s12486_s21 + $0xae0] sm:$0xff]  ;;  %6732 = vmatpush2.bf16.msra.mxu0 %v10625_v6 }
  0xfd   : > { %v839_v4 = vld [vmem:[%s12486_s21 + $0xec0] sm:$0xff]  ;;  %v10618_v8 = vcombine.high %v711_v2, %v715_v3  ;;  %6772 = vmatprep.subr.bf16.mxu1 %v10754_v1  ;;  %v10617_v16 = vcombine.low %v711_v2, %v715_v3 }
  0xfe   : > { %v843_v5 = vld [vmem:[%s12486_s21 + $0xee0] sm:$0xff]  ;;  %6773 = vmatpush2.bf16.msra.mxu1 %v10753_v7 }
  0xff   : > { %v10746_v9 = vcombine.high %v839_v4, %v843_v5  ;;  %v703_v11 = vld [vmem:[%s12486_s21 + $0xa80] sm:$0xff]  ;;  %6733 = vmatprep.subr.bf16.mxu0 %v10618_v8  ;;  %v10745_v17 = vcombine.low %v839_v4, %v843_v5  ;;  %v12724_v4 = vcombine.high %v12711_v57, %v12711_v57 }
 0x100   : > { %v707_v60 = vld [vmem:[%s12486_s21 + $0xaa0] sm:$0xff]  ;;  %6734 = vmatpush2.bf16.msra.mxu0 %v10617_v16 }
 0x101   : > { %v831_v13 = vld [vmem:[%s12486_s21 + $0xe80] sm:$0xff]  ;;  %v10610_v18 = vcombine.high %v703_v11, %v707_v60  ;;  %6774 = vmatprep.subr.bf16.mxu1 %v10746_v9  ;;  %v10609_v25 = vcombine.low %v703_v11, %v707_v60 }
 0x102   : > { %v835_v15 = vld [vmem:[%s12486_s21 + $0xea0] sm:$0xff]  ;;  %6775 = vmatpush2.bf16.msra.mxu1 %v10745_v17 }
 0x103   : > { %v10738_v19 = vcombine.high %v831_v13, %v835_v15  ;;  %v695_v20 = vld [vmem:[%s12486_s21 + $0xa40] sm:$0xff]  ;;  %6735 = vmatprep.subr.bf16.mxu0 %v10610_v18  ;;  %v10737_v27 = vcombine.low %v831_v13, %v835_v15 }
 0x104   : > { %v699_v21 = vld [vmem:[%s12486_s21 + $0xa60] sm:$0xff]  ;;  %6736 = vmatpush2.bf16.msra.mxu0 %v10609_v25 }
 0x105   : > { %v823_v22 = vld [vmem:[%s12486_s21 + $0xe40] sm:$0xff]  ;;  %v10602_v28 = vcombine.high %v695_v20, %v699_v21  ;;  %6776 = vmatprep.subr.bf16.mxu1 %v10738_v19  ;;  %v10601_v36 = vcombine.low %v695_v20, %v699_v21 }
 0x106   : > { %v827_v24 = vld [vmem:[%s12486_s21 + $0xe60] sm:$0xff]  ;;  %6777 = vmatpush2.bf16.msra.mxu1 %v10737_v27 }
 0x107   : > { %v10730_v29 = vcombine.high %v823_v22, %v827_v24  ;;  %v687_v30 = vld [vmem:[%s12486_s21 + $0xa00] sm:$0xff]  ;;  %6737 = vmatprep.subr.bf16.mxu0 %v10602_v28  ;;  %v10729_v37 = vcombine.low %v823_v22, %v827_v24 }
 0x108   : > { %v691_v32 = vld [vmem:[%s12486_s21 + $0xa20] sm:$0xff]  ;;  %6738 = vmatpush2.bf16.msra.mxu0 %v10601_v36 }
 0x109   : > { %v815_v33 = vld [vmem:[%s12486_s21 + $0xe00] sm:$0xff]  ;;  %v10594_v38 = vcombine.high %v687_v30, %v691_v32  ;;  %6778 = vmatprep.subr.bf16.mxu1 %v10730_v29  ;;  %v10593_v47 = vcombine.low %v687_v30, %v691_v32 }
 0x10a   : > { %v819_v34 = vld [vmem:[%s12486_s21 + $0xe20] sm:$0xff]  ;;  %6779 = vmatpush2.bf16.msra.mxu1 %v10729_v37 }
 0x10b   : > { %v10722_v39 = vcombine.high %v815_v33, %v819_v34  ;;  %v935_v41 = vld [vmem:[%s12486_s21 + $0x11c0] sm:$0xff]  ;;  %6739 = vmatprep.subr.bf16.mxu0 %v10594_v38  ;;  %v10721_v49 = vcombine.low %v815_v33, %v819_v34 }
 0x10c   : > { %v939_v42 = vld [vmem:[%s12486_s21 + $0x11e0] sm:$0xff]  ;;  %6740 = vmatpush2.bf16.msra.mxu0 %v10593_v47 }
 0x10d   : > { %v1063_v43 = vld [vmem:[%s12486_s21 + $0x15c0] sm:$0xff]  ;;  %v10842_v50 = vcombine.high %v935_v41, %v939_v42  ;;  %6780 = vmatprep.subr.bf16.mxu1 %v10722_v39  ;;  %v10841_v58 = vcombine.low %v935_v41, %v939_v42 }
 0x10e   : > { %v1067_v44 = vld [vmem:[%s12486_s21 + $0x15e0] sm:$0xff]  ;;  %6781 = vmatpush2.bf16.msra.mxu1 %v10721_v49 }
 0x10f   : > { %v10970_v51 = vcombine.high %v1063_v43, %v1067_v44  ;;  %v927_v52 = vld [vmem:[%s12486_s21 + $0x1180] sm:$0xff]  ;;  %6791 = vmatprep.subr.bf16.mxu0 %v10842_v50  ;;  %v10969_v59 = vcombine.low %v1063_v43, %v1067_v44  ;;  %6742 = vmatmul.mubr.bf16.vlgmr.msra.gmra.mxu0 %v12704_v48 }
 0x110   : > { %v931_v53 = vld [vmem:[%s12486_s21 + $0x11a0] sm:$0xff]  ;;  %6792 = vmatpush1.bf16.msra.mxu0 %v10841_v58  ;;  %6823 = vmatprep.mubr.bf16.mxu0 %v12711_v57 }
 0x111   : > { %v1055_v55 = vld [vmem:[%s12486_s21 + $0x1580] sm:$0xff]  ;;  %v10834_v61 = vcombine.high %v927_v52, %v931_v53  ;;  %6832 = vmatprep.subr.bf16.mxu1 %v10970_v51  ;;  %6783 = vmatmul.mubr.bf16.vlgmr.msra.gmra.mxu1 %v12715_v12  ;;  %v10833_v5 = vcombine.low %v927_v52, %v931_v53 }
 0x112   : > { %v1059_v56 = vld [vmem:[%s12486_s21 + $0x15a0] sm:$0xff]  ;;  %6833 = vmatpush1.bf16.msra.mxu1 %v10969_v59  ;;  %6864 = vmatprep.mubr.bf16.mxu1 %v12724_v4 }
 0x113   : > { %v10962_v62 = vcombine.high %v1055_v55, %v1059_v56  ;;  %v919_v63 = vld [vmem:[%s12486_s21 + $0x1140] sm:$0xff]  ;;  %6793 = vmatprep.subr.bf16.mxu0 %v10834_v61  ;;  %v10961_v6 = vcombine.low %v1055_v55, %v1059_v56 }
 0x114   : > { %v923_v1 = vld [vmem:[%s12486_s21 + $0x1160] sm:$0xff]  ;;  %6794 = vmatpush1.bf16.msra.mxu0 %v10833_v5 }
 0x115   : > { %v1047_v2 = vld [vmem:[%s12486_s21 + $0x1540] sm:$0xff]  ;;  %v10826_v7 = vcombine.high %v919_v63, %v923_v1  ;;  %6834 = vmatprep.subr.bf16.mxu1 %v10962_v62  ;;  %v10825_v15 = vcombine.low %v919_v63, %v923_v1 }
 0x116   : > { %v1051_v3 = vld [vmem:[%s12486_s21 + $0x1560] sm:$0xff]  ;;  %6835 = vmatpush1.bf16.msra.mxu1 %v10961_v6 }
 0x117   : > { %v10954_v8 = vcombine.high %v1047_v2, %v1051_v3  ;;  %v911_v9 = vld [vmem:[%s12486_s21 + $0x1100] sm:$0xff]  ;;  %6795 = vmatprep.subr.bf16.mxu0 %v10826_v7  ;;  %v10953_v16 = vcombine.low %v1047_v2, %v1051_v3 }
 0x118   : > { %v915_v11 = vld [vmem:[%s12486_s21 + $0x1120] sm:$0xff]  ;;  %6796 = vmatpush1.bf16.msra.mxu0 %v10825_v15 }
 0x119   : > { %v1039_v60 = vld [vmem:[%s12486_s21 + $0x1500] sm:$0xff]  ;;  %v10818_v17 = vcombine.high %v911_v9, %v915_v11  ;;  %6836 = vmatprep.subr.bf16.mxu1 %v10954_v8  ;;  %v10817_v24 = vcombine.low %v911_v9, %v915_v11 }
 0x11a   : > { %v1043_v13 = vld [vmem:[%s12486_s21 + $0x1520] sm:$0xff]  ;;  %6837 = vmatpush1.bf16.msra.mxu1 %v10953_v16 }
 0x11b   : > { %v10946_v18 = vcombine.high %v1039_v60, %v1043_v13  ;;  %v903_v19 = vld [vmem:[%s12486_s21 + $0x10c0] sm:$0xff]  ;;  %6797 = vmatprep.subr.bf16.mxu0 %v10818_v17  ;;  %v10945_v25 = vcombine.low %v1039_v60, %v1043_v13 }
 0x11c   : > { %v907_v20 = vld [vmem:[%s12486_s21 + $0x10e0] sm:$0xff]  ;;  %6798 = vmatpush1.bf16.msra.mxu0 %v10817_v24 }
 0x11d   : > { %v1031_v21 = vld [vmem:[%s12486_s21 + $0x14c0] sm:$0xff]  ;;  %v10810_v27 = vcombine.high %v903_v19, %v907_v20  ;;  %6838 = vmatprep.subr.bf16.mxu1 %v10946_v18  ;;  %v10809_v34 = vcombine.low %v903_v19, %v907_v20 }
 0x11e   : > { %v1035_v22 = vld [vmem:[%s12486_s21 + $0x14e0] sm:$0xff]  ;;  %6839 = vmatpush1.bf16.msra.mxu1 %v10945_v25 }
 0x11f   : > { %v10938_v28 = vcombine.high %v1031_v21, %v1035_v22  ;;  %v895_v29 = vld [vmem:[%s12486_s21 + $0x1080] sm:$0xff]  ;;  %6799 = vmatprep.subr.bf16.mxu0 %v10810_v27  ;;  %v10937_v36 = vcombine.low %v1031_v21, %v1035_v22 }
 0x120   : > { %v899_v30 = vld [vmem:[%s12486_s21 + $0x10a0] sm:$0xff]  ;;  %6800 = vmatpush1.bf16.msra.mxu0 %v10809_v34 }
 0x121   : > { %v1023_v32 = vld [vmem:[%s12486_s21 + $0x1480] sm:$0xff]  ;;  %v10802_v37 = vcombine.high %v895_v29, %v899_v30  ;;  %6840 = vmatprep.subr.bf16.mxu1 %v10938_v28  ;;  %v10801_v44 = vcombine.low %v895_v29, %v899_v30 }
 0x122   : > { %v1027_v33 = vld [vmem:[%s12486_s21 + $0x14a0] sm:$0xff]  ;;  %6841 = vmatpush1.bf16.msra.mxu1 %v10937_v36 }
 0x123   : > { %v10930_v38 = vcombine.high %v1023_v32, %v1027_v33  ;;  %v887_v39 = vld [vmem:[%s12486_s21 + $0x1040] sm:$0xff]  ;;  %6801 = vmatprep.subr.bf16.mxu0 %v10802_v37  ;;  %v10929_v46 = vcombine.low %v1023_v32, %v1027_v33 }
 0x124   : > { %v891_v41 = vld [vmem:[%s12486_s21 + $0x1060] sm:$0xff]  ;;  %6802 = vmatpush1.bf16.msra.mxu0 %v10801_v44 }
 0x125   : > { %v1015_v42 = vld [vmem:[%s12486_s21 + $0x1440] sm:$0xff]  ;;  %v10794_v47 = vcombine.high %v887_v39, %v891_v41  ;;  %6842 = vmatprep.subr.bf16.mxu1 %v10930_v38  ;;  %v10793_v55 = vcombine.low %v887_v39, %v891_v41 }
 0x126   : > { %v1019_v43 = vld [vmem:[%s12486_s21 + $0x1460] sm:$0xff]  ;;  %6843 = vmatpush1.bf16.msra.mxu1 %v10929_v46 }
 0x127   : > { %v10922_v49 = vcombine.high %v1015_v42, %v1019_v43  ;;  %v879_v50 = vld [vmem:[%s12486_s21 + $0x1000] sm:$0xff]  ;;  %6803 = vmatprep.subr.bf16.mxu0 %v10794_v47  ;;  %v10921_v56 = vcombine.low %v1015_v42, %v1019_v43 }
 0x128   : > { %v883_v51 = vld [vmem:[%s12486_s21 + $0x1020] sm:$0xff]  ;;  %6804 = vmatpush1.bf16.msra.mxu0 %v10793_v55 }
 0x129   : > { %v1007_v52 = vld [vmem:[%s12486_s21 + $0x1400] sm:$0xff]  ;;  %v10786_v58 = vcombine.high %v879_v50, %v883_v51  ;;  %6844 = vmatprep.subr.bf16.mxu1 %v10922_v49  ;;  %v10785_v2 = vcombine.low %v879_v50, %v883_v51 }
 0x12a   : > { %v1011_v53 = vld [vmem:[%s12486_s21 + $0x1420] sm:$0xff]  ;;  %6845 = vmatpush1.bf16.msra.mxu1 %v10921_v56 }
 0x12b   : > { %v10914_v59 = vcombine.high %v1007_v52, %v1011_v53  ;;  %v999_v61 = vld [vmem:[%s12486_s21 + $0x13c0] sm:$0xff]  ;;  %6805 = vmatprep.subr.bf16.mxu0 %v10786_v58  ;;  %v10913_v3 = vcombine.low %v1007_v52, %v1011_v53 }
 0x12c   : > { %v1003_v62 = vld [vmem:[%s12486_s21 + $0x13e0] sm:$0xff]  ;;  %6806 = vmatpush1.bf16.msra.mxu0 %v10785_v2 }
 0x12d   : > { %v1127_v63 = vld [vmem:[%s12486_s21 + $0x17c0] sm:$0xff]  ;;  %v10906_v5 = vcombine.high %v999_v61, %v1003_v62  ;;  %6846 = vmatprep.subr.bf16.mxu1 %v10914_v59  ;;  %v10905_v60 = vcombine.low %v999_v61, %v1003_v62 }
 0x12e   : > { %v1131_v1 = vld [vmem:[%s12486_s21 + $0x17e0] sm:$0xff]  ;;  %6847 = vmatpush1.bf16.msra.mxu1 %v10913_v3 }
 0x12f   : > { %v11034_v6 = vcombine.high %v1127_v63, %v1131_v1  ;;  %v991_v7 = vld [vmem:[%s12486_s21 + $0x1380] sm:$0xff]  ;;  %6807 = vmatprep.subr.bf16.mxu0 %v10906_v5  ;;  %v11033_v13 = vcombine.low %v1127_v63, %v1131_v1  ;;  %v1442_v63 = vcombine.high %v12686_v26, %v12686_v26 }
 0x130   : > { %v995_v8 = vld [vmem:[%s12486_s21 + $0x13a0] sm:$0xff]  ;;  %6808 = vmatpush2.bf16.msra.mxu0 %v10905_v60 }
 0x131   : > { %v1119_v9 = vld [vmem:[%s12486_s21 + $0x1780] sm:$0xff]  ;;  %v10898_v15 = vcombine.high %v991_v7, %v995_v8  ;;  %6848 = vmatprep.subr.bf16.mxu1 %v11034_v6  ;;  %v10897_v21 = vcombine.low %v991_v7, %v995_v8 }
 0x132   : > { %v1123_v11 = vld [vmem:[%s12486_s21 + $0x17a0] sm:$0xff]  ;;  %6849 = vmatpush2.bf16.msra.mxu1 %v11033_v13 }
 0x133   : > { %v11026_v16 = vcombine.high %v1119_v9, %v1123_v11  ;;  %v983_v17 = vld [vmem:[%s12486_s21 + $0x1340] sm:$0xff]  ;;  %6809 = vmatprep.subr.bf16.mxu0 %v10898_v15  ;;  %v11025_v22 = vcombine.low %v1119_v9, %v1123_v11  ;;  %v12784_v11 = vrot.slane %v1442_v63, %v12538_v54 }
 0x134   : > { %v987_v18 = vld [vmem:[%s12486_s21 + $0x1360] sm:$0xff]  ;;  %6810 = vmatpush2.bf16.msra.mxu0 %v10897_v21 }
 0x135   : > { %v1111_v19 = vld [vmem:[%s12486_s21 + $0x1740] sm:$0xff]  ;;  %v10890_v24 = vcombine.high %v983_v17, %v987_v18  ;;  %6850 = vmatprep.subr.bf16.mxu1 %v11026_v16  ;;  %v10889_v32 = vcombine.low %v983_v17, %v987_v18 }
 0x136   : > { %v1115_v20 = vld [vmem:[%s12486_s21 + $0x1760] sm:$0xff]  ;;  %6851 = vmatpush2.bf16.msra.mxu1 %v11025_v22  ;;  %v12794_v22 = vrot.slane %v12694_v35, %v12538_v54 }
 0x137   : > { %v11018_v25 = vcombine.high %v1111_v19, %v1115_v20  ;;  %v975_v27 = vld [vmem:[%s12486_s21 + $0x1300] sm:$0xff]  ;;  %6811 = vmatprep.subr.bf16.mxu0 %v10890_v24  ;;  %v11017_v33 = vcombine.low %v1111_v19, %v1115_v20  ;;  %v1458_v20 = vcombine.high %v12784_v11, %v12784_v11 }
 0x138   : > { %v979_v28 = vld [vmem:[%s12486_s21 + $0x1320] sm:$0xff]  ;;  %6812 = vmatpush2.bf16.msra.mxu0 %v10889_v32  ;;  %v12805_v35 = vcombine.high %v12794_v22, %v12794_v22 }
 0x139   : > { %v1103_v29 = vld [vmem:[%s12486_s21 + $0x1700] sm:$0xff]  ;;  %v10882_v34 = vcombine.high %v975_v27, %v979_v28  ;;  %6852 = vmatprep.subr.bf16.mxu1 %v11018_v25  ;;  %v10881_v42 = vcombine.low %v975_v27, %v979_v28 }
 0x13a   : > { %v1107_v30 = vld [vmem:[%s12486_s21 + $0x1720] sm:$0xff]  ;;  %6853 = vmatpush2.bf16.msra.mxu1 %v11017_v33  ;;  %v12801_v33 = vrot.slane %v1458_v20, %v12538_v54 }
 0x13b   : > { %v11010_v36 = vcombine.high %v1103_v29, %v1107_v30  ;;  %v967_v37 = vld [vmem:[%s12486_s21 + $0x12c0] sm:$0xff]  ;;  %6813 = vmatprep.subr.bf16.mxu0 %v10882_v34  ;;  %v11009_v43 = vcombine.low %v1103_v29, %v1107_v30 }
 0x13c   : > { %v971_v38 = vld [vmem:[%s12486_s21 + $0x12e0] sm:$0xff]  ;;  %6814 = vmatpush2.bf16.msra.mxu0 %v10881_v42 }
 0x13d   : > { %v1095_v39 = vld [vmem:[%s12486_s21 + $0x16c0] sm:$0xff]  ;;  %v10874_v44 = vcombine.high %v967_v37, %v971_v38  ;;  %6854 = vmatprep.subr.bf16.mxu1 %v11010_v36  ;;  %v10873_v52 = vcombine.low %v967_v37, %v971_v38 }
 0x13e   : > { %v1099_v41 = vld [vmem:[%s12486_s21 + $0x16e0] sm:$0xff]  ;;  %6855 = vmatpush2.bf16.msra.mxu1 %v11009_v43 }
 0x13f   : > { %v11002_v46 = vcombine.high %v1095_v39, %v1099_v41  ;;  %v959_v47 = vld [vmem:[%s12486_s21 + $0x1280] sm:$0xff]  ;;  %6815 = vmatprep.subr.bf16.mxu0 %v10874_v44  ;;  %v11001_v53 = vcombine.low %v1095_v39, %v1099_v41  ;;  %v12814_v44 = vcombine.high %v12801_v33, %v12801_v33 }
 0x140   : > { %v963_v49 = vld [vmem:[%s12486_s21 + $0x12a0] sm:$0xff]  ;;  %6816 = vmatpush2.bf16.msra.mxu0 %v10873_v52 }
 0x141   : > { %v1087_v50 = vld [vmem:[%s12486_s21 + $0x1680] sm:$0xff]  ;;  %v10866_v55 = vcombine.high %v959_v47, %v963_v49  ;;  %6856 = vmatprep.subr.bf16.mxu1 %v11002_v46  ;;  %v10865_v1 = vcombine.low %v959_v47, %v963_v49 }
 0x142   : > { %v1091_v51 = vld [vmem:[%s12486_s21 + $0x16a0] sm:$0xff]  ;;  %6857 = vmatpush2.bf16.msra.mxu1 %v11001_v53 }
 0x143   : > { %v10994_v56 = vcombine.high %v1087_v50, %v1091_v51  ;;  %v951_v58 = vld [vmem:[%s12486_s21 + $0x1240] sm:$0xff]  ;;  %6817 = vmatprep.subr.bf16.mxu0 %v10866_v55  ;;  %v10993_v2 = vcombine.low %v1087_v50, %v1091_v51 }
 0x144   : > { %v955_v59 = vld [vmem:[%s12486_s21 + $0x1260] sm:$0xff]  ;;  %6818 = vmatpush2.bf16.msra.mxu0 %v10865_v1 }
 0x145   : > { %v1079_v61 = vld [vmem:[%s12486_s21 + $0x1640] sm:$0xff]  ;;  %v10858_v3 = vcombine.high %v951_v58, %v955_v59  ;;  %6858 = vmatprep.subr.bf16.mxu1 %v10994_v56  ;;  %v10857_v26 = vcombine.low %v951_v58, %v955_v59 }
 0x146   : > { %v1083_v62 = vld [vmem:[%s12486_s21 + $0x1660] sm:$0xff]  ;;  %6859 = vmatpush2.bf16.msra.mxu1 %v10993_v2 }
 0x147   : > { %v10986_v5 = vcombine.high %v1079_v61, %v1083_v62  ;;  %v943_v6 = vld [vmem:[%s12486_s21 + $0x1200] sm:$0xff]  ;;  %6819 = vmatprep.subr.bf16.mxu0 %v10858_v3  ;;  %v10985_v60 = vcombine.low %v1079_v61, %v1083_v62 }
 0x148   : > { %v947_v7 = vld [vmem:[%s12486_s21 + $0x1220] sm:$0xff]  ;;  %6820 = vmatpush2.bf16.msra.mxu0 %v10857_v26 }
 0x149   : > { %v1071_v8 = vld [vmem:[%s12486_s21 + $0x1600] sm:$0xff]  ;;  %v10850_v13 = vcombine.high %v943_v6, %v947_v7  ;;  %6860 = vmatprep.subr.bf16.mxu1 %v10986_v5  ;;  %v10849_v21 = vcombine.low %v943_v6, %v947_v7 }
 0x14a   : > { %v1075_v9 = vld [vmem:[%s12486_s21 + $0x1620] sm:$0xff]  ;;  %6861 = vmatpush2.bf16.msra.mxu1 %v10985_v60 }
 0x14b   : > { %v10978_v15 = vcombine.high %v1071_v8, %v1075_v9  ;;  %v1191_v16 = vld [vmem:[%s12486_s21 + $0x19c0] sm:$0xff]  ;;  %6821 = vmatprep.subr.bf16.mxu0 %v10850_v13  ;;  %v10977_v24 = vcombine.low %v1071_v8, %v1075_v9 }
 0x14c   : > { %v1195_v17 = vld [vmem:[%s12486_s21 + $0x19e0] sm:$0xff]  ;;  %6822 = vmatpush2.bf16.msra.mxu0 %v10849_v21 }
 0x14d   : > { %v1319_v18 = vld [vmem:[%s12486_s21 + $0x1dc0] sm:$0xff]  ;;  %v11098_v25 = vcombine.high %v1191_v16, %v1195_v17  ;;  %6862 = vmatprep.subr.bf16.mxu1 %v10978_v15  ;;  %v11097_v34 = vcombine.low %v1191_v16, %v1195_v17 }
 0x14e   : > { %v1323_v19 = vld [vmem:[%s12486_s21 + $0x1de0] sm:$0xff]  ;;  %6863 = vmatpush2.bf16.msra.mxu1 %v10977_v24 }
 0x14f   : > { %v11226_v27 = vcombine.high %v1319_v18, %v1323_v19  ;;  %v1183_v28 = vld [vmem:[%s12486_s21 + $0x1980] sm:$0xff]  ;;  %6873 = vmatprep.subr.bf16.mxu0 %v11098_v25  ;;  %v11225_v36 = vcombine.low %v1319_v18, %v1323_v19  ;;  %6824 = vmatmul.mubr.bf16.vlgmr.msra.gmra.mxu0 %v12794_v22 }
 0x150   : > { %v1187_v29 = vld [vmem:[%s12486_s21 + $0x19a0] sm:$0xff]  ;;  %6874 = vmatpush1.bf16.msra.mxu0 %v11097_v34  ;;  %6905 = vmatprep.mubr.bf16.mxu0 %v12801_v33 }
 0x151   : > { %v1311_v30 = vld [vmem:[%s12486_s21 + $0x1d80] sm:$0xff]  ;;  %v11090_v37 = vcombine.high %v1183_v28, %v1187_v29  ;;  %6914 = vmatprep.subr.bf16.mxu1 %v11226_v27  ;;  %6865 = vmatmul.mubr.bf16.vlgmr.msra.gmra.mxu1 %v12805_v35  ;;  %v11089_v46 = vcombine.low %v1183_v28, %v1187_v29 }
 0x152   : > { %v1315_v32 = vld [vmem:[%s12486_s21 + $0x1da0] sm:$0xff]  ;;  %6915 = vmatpush1.bf16.msra.mxu1 %v11225_v36  ;;  %6946 = vmatprep.mubr.bf16.mxu1 %v12814_v44 }
 0x153   : > { %v11218_v38 = vcombine.high %v1311_v30, %v1315_v32  ;;  %v1175_v39 = vld [vmem:[%s12486_s21 + $0x1940] sm:$0xff]  ;;  %6875 = vmatprep.subr.bf16.mxu0 %v11090_v37  ;;  %v11217_v47 = vcombine.low %v1311_v30, %v1315_v32 }
 0x154   : > { %v1179_v41 = vld [vmem:[%s12486_s21 + $0x1960] sm:$0xff]  ;;  %6876 = vmatpush1.bf16.msra.mxu0 %v11089_v46 }
 0x155   : > { %v1303_v42 = vld [vmem:[%s12486_s21 + $0x1d40] sm:$0xff]  ;;  %v11082_v49 = vcombine.high %v1175_v39, %v1179_v41  ;;  %6916 = vmatprep.subr.bf16.mxu1 %v11218_v38  ;;  %v11081_v56 = vcombine.low %v1175_v39, %v1179_v41 }
 0x156   : > { %v1307_v43 = vld [vmem:[%s12486_s21 + $0x1d60] sm:$0xff]  ;;  %6917 = vmatpush1.bf16.msra.mxu1 %v11217_v47 }
 0x157   : > { %v11210_v50 = vcombine.high %v1303_v42, %v1307_v43  ;;  %v1167_v51 = vld [vmem:[%s12486_s21 + $0x1900] sm:$0xff]  ;;  %6877 = vmatprep.subr.bf16.mxu0 %v11082_v49  ;;  %v11209_v58 = vcombine.low %v1303_v42, %v1307_v43 }
 0x158   : > { %v1171_v52 = vld [vmem:[%s12486_s21 + $0x1920] sm:$0xff]  ;;  %6878 = vmatpush1.bf16.msra.mxu0 %v11081_v56 }
 0x159   : > { %v1295_v53 = vld [vmem:[%s12486_s21 + $0x1d00] sm:$0xff]  ;;  %v11074_v59 = vcombine.high %v1167_v51, %v1171_v52  ;;  %6918 = vmatprep.subr.bf16.mxu1 %v11210_v50  ;;  %v11073_v3 = vcombine.low %v1167_v51, %v1171_v52 }
 0x15a   : > { %v1299_v55 = vld [vmem:[%s12486_s21 + $0x1d20] sm:$0xff]  ;;  %6919 = vmatpush1.bf16.msra.mxu1 %v11209_v58 }
 0x15b   : > { %v11202_v61 = vcombine.high %v1295_v53, %v1299_v55  ;;  %v1159_v62 = vld [vmem:[%s12486_s21 + $0x18c0] sm:$0xff]  ;;  %6879 = vmatprep.subr.bf16.mxu0 %v11074_v59  ;;  %v11201_v5 = vcombine.low %v1295_v53, %v1299_v55 }
 0x15c   : > { %v1163_v63 = vld [vmem:[%s12486_s21 + $0x18e0] sm:$0xff]  ;;  %6880 = vmatpush1.bf16.msra.mxu0 %v11073_v3 }
 0x15d   : > { %v1287_v1 = vld [vmem:[%s12486_s21 + $0x1cc0] sm:$0xff]  ;;  %v11066_v6 = vcombine.high %v1159_v62, %v1163_v63  ;;  %6920 = vmatprep.subr.bf16.mxu1 %v11202_v61  ;;  %v11065_v13 = vcombine.low %v1159_v62, %v1163_v63 }
 0x15e   : > { %v1291_v2 = vld [vmem:[%s12486_s21 + $0x1ce0] sm:$0xff]  ;;  %6921 = vmatpush1.bf16.msra.mxu1 %v11201_v5 }
 0x15f   : > { %v11194_v7 = vcombine.high %v1287_v1, %v1291_v2  ;;  %v1151_v8 = vld [vmem:[%s12486_s21 + $0x1880] sm:$0xff]  ;;  %6881 = vmatprep.subr.bf16.mxu0 %v11066_v6  ;;  %v11193_v15 = vcombine.low %v1287_v1, %v1291_v2 }
 0x160   : > { %v1155_v9 = vld [vmem:[%s12486_s21 + $0x18a0] sm:$0xff]  ;;  %6882 = vmatpush1.bf16.msra.mxu0 %v11065_v13 }
 0x161   : > { %v1279_v26 = vld [vmem:[%s12486_s21 + $0x1c80] sm:$0xff]  ;;  %v11058_v16 = vcombine.high %v1151_v8, %v1155_v9  ;;  %6922 = vmatprep.subr.bf16.mxu1 %v11194_v7  ;;  %v11057_v24 = vcombine.low %v1151_v8, %v1155_v9 }
 0x162   : > { %v1283_v60 = vld [vmem:[%s12486_s21 + $0x1ca0] sm:$0xff]  ;;  %6923 = vmatpush1.bf16.msra.mxu1 %v11193_v15 }
 0x163   : > { %v11186_v17 = vcombine.high %v1279_v26, %v1283_v60  ;;  %v1143_v18 = vld [vmem:[%s12486_s21 + $0x1840] sm:$0xff]  ;;  %6883 = vmatprep.subr.bf16.mxu0 %v11058_v16  ;;  %v11185_v25 = vcombine.low %v1279_v26, %v1283_v60 }
 0x164   : > { %v1147_v19 = vld [vmem:[%s12486_s21 + $0x1860] sm:$0xff]  ;;  %6884 = vmatpush1.bf16.msra.mxu0 %v11057_v24 }
 0x165   : > { %v1271_v20 = vld [vmem:[%s12486_s21 + $0x1c40] sm:$0xff]  ;;  %v11050_v27 = vcombine.high %v1143_v18, %v1147_v19  ;;  %6924 = vmatprep.subr.bf16.mxu1 %v11186_v17  ;;  %v11049_v36 = vcombine.low %v1143_v18, %v1147_v19 }
 0x166   : > { %v1275_v21 = vld [vmem:[%s12486_s21 + $0x1c60] sm:$0xff]  ;;  %6925 = vmatpush1.bf16.msra.mxu1 %v11185_v25 }
 0x167   : > { %v11178_v28 = vcombine.high %v1271_v20, %v1275_v21  ;;  %v1135_v29 = vld [vmem:[%s12486_s21 + $0x1800] sm:$0xff]  ;;  %6885 = vmatprep.subr.bf16.mxu0 %v11050_v27  ;;  %v11177_v37 = vcombine.low %v1271_v20, %v1275_v21 }
 0x168   : > { %v1139_v30 = vld [vmem:[%s12486_s21 + $0x1820] sm:$0xff]  ;;  %6886 = vmatpush1.bf16.msra.mxu0 %v11049_v36 }
 0x169   : > { %v1263_v32 = vld [vmem:[%s12486_s21 + $0x1c00] sm:$0xff]  ;;  %v11042_v38 = vcombine.high %v1135_v29, %v1139_v30  ;;  %6926 = vmatprep.subr.bf16.mxu1 %v11178_v28  ;;  %v11041_v47 = vcombine.low %v1135_v29, %v1139_v30 }
 0x16a   : > { %v1267_v34 = vld [vmem:[%s12486_s21 + $0x1c20] sm:$0xff]  ;;  %6927 = vmatpush1.bf16.msra.mxu1 %v11177_v37 }
 0x16b   : > { %v11170_v39 = vcombine.high %v1263_v32, %v1267_v34  ;;  %v1255_v41 = vld [vmem:[%s12486_s21 + $0x1bc0] sm:$0xff]  ;;  %6887 = vmatprep.subr.bf16.mxu0 %v11042_v38  ;;  %v11169_v49 = vcombine.low %v1263_v32, %v1267_v34 }
 0x16c   : > { %v1259_v42 = vld [vmem:[%s12486_s21 + $0x1be0] sm:$0xff]  ;;  %6888 = vmatpush1.bf16.msra.mxu0 %v11041_v47 }
 0x16d   : > { %v1383_v43 = vld [vmem:[%s12486_s21 + $0x1fc0] sm:$0xff]  ;;  %v11162_v50 = vcombine.high %v1255_v41, %v1259_v42  ;;  %6928 = vmatprep.subr.bf16.mxu1 %v11170_v39  ;;  %v11161_v58 = vcombine.low %v1255_v41, %v1259_v42 }
 0x16e   : > { %v1387_v46 = vld [vmem:[%s12486_s21 + $0x1fe0] sm:$0xff]  ;;  %6929 = vmatpush1.bf16.msra.mxu1 %v11169_v49 }
 0x16f   : > { %v11290_v51 = vcombine.high %v1383_v43, %v1387_v46  ;;  %v1247_v52 = vld [vmem:[%s12486_s21 + $0x1b80] sm:$0xff]  ;;  %6889 = vmatprep.subr.bf16.mxu0 %v11162_v50  ;;  %v11289_v59 = vcombine.low %v1383_v43, %v1387_v46 }
 0x170   : > { %v1251_v53 = vld [vmem:[%s12486_s21 + $0x1ba0] sm:$0xff]  ;;  %6890 = vmatpush2.bf16.msra.mxu0 %v11161_v58 }
 0x171   : > { %v1375_v55 = vld [vmem:[%s12486_s21 + $0x1f80] sm:$0xff]  ;;  %v11154_v61 = vcombine.high %v1247_v52, %v1251_v53  ;;  %6930 = vmatprep.subr.bf16.mxu1 %v11290_v51  ;;  %v11153_v5 = vcombine.low %v1247_v52, %v1251_v53 }
 0x172   : > { %v1379_v56 = vld [vmem:[%s12486_s21 + $0x1fa0] sm:$0xff]  ;;  %6931 = vmatpush2.bf16.msra.mxu1 %v11289_v59 }
 0x173   : > { %v11282_v62 = vcombine.high %v1375_v55, %v1379_v56  ;;  %v1239_v63 = vld [vmem:[%s12486_s21 + $0x1b40] sm:$0xff]  ;;  %6891 = vmatprep.subr.bf16.mxu0 %v11154_v61  ;;  %v11281_v6 = vcombine.low %v1375_v55, %v1379_v56 }
 0x174   : > { %v1243_v1 = vld [vmem:[%s12486_s21 + $0x1b60] sm:$0xff]  ;;  %6892 = vmatpush2.bf16.msra.mxu0 %v11153_v5  ;;  %v556_v5 = vld [vmem:[%s12486_s21 + $0x5e8] sm:$0xff] }
 0x175   : > { %v1367_v2 = vld [vmem:[%s12486_s21 + $0x1f40] sm:$0xff]  ;;  %v11146_v7 = vcombine.high %v1239_v63, %v1243_v1  ;;  %6932 = vmatprep.subr.bf16.mxu1 %v11282_v62  ;;  %v11145_v15 = vcombine.low %v1239_v63, %v1243_v1  ;;  %v424_v1 = vld [vmem:[%s12486_s21 + $0x1c8] sm:$0xff] }
 0x176   : > { %v1371_v3 = vld [vmem:[%s12486_s21 + $0x1f60] sm:$0xff]  ;;  %6933 = vmatpush2.bf16.msra.mxu1 %v11281_v6 }
 0x177   : > { %v11274_v8 = vcombine.high %v1367_v2, %v1371_v3  ;;  %v1231_v9 = vld [vmem:[%s12486_s21 + $0x1b00] sm:$0xff]  ;;  %6893 = vmatprep.subr.bf16.mxu0 %v11146_v7  ;;  %v11273_v16 = vcombine.low %v1367_v2, %v1371_v3  ;;  %v428_v2 = vld [vmem:[%s12486_s21 + $0x1e8] sm:$0xff]  ;;  %v12877_v7 = vrot.slane %v12784_v11, %v12538_v54 }
 0x178   : > { %v1235_v26 = vld [vmem:[%s12486_s21 + $0x1b20] sm:$0xff]  ;;  %6894 = vmatpush2.bf16.msra.mxu0 %v11145_v15  ;;  %v552_v3 = vld [vmem:[%s12486_s21 + $0x5c8] sm:$0xff]  ;;  %v10331_v54 = vcombine.low %v424_v1, %v428_v2 }
 0x179   : > { %v1359_v60 = vld [vmem:[%s12486_s21 + $0x1f00] sm:$0xff]  ;;  %v11138_v17 = vcombine.high %v1231_v9, %v1235_v26  ;;  %6934 = vmatprep.subr.bf16.mxu1 %v11274_v8  ;;  %v11137_v25 = vcombine.low %v1231_v9, %v1235_v26  ;;  %v10332_v9 = vcombine.high %v424_v1, %v428_v2  ;;  %v10460_v26 = vcombine.high %v552_v3, %v556_v5  ;;  %v544_v15 = vld [vmem:[%s12486_s21 + $0x588] sm:$0xff] }
 0x17a   : > { %v1363_v13 = vld [vmem:[%s12486_s21 + $0x1f20] sm:$0xff]  ;;  %6935 = vmatpush2.bf16.msra.mxu1 %v11273_v16  ;;  %v548_v16 = vld [vmem:[%s12486_s21 + $0x5a8] sm:$0xff]  ;;  %v10459_v11 = vcombine.low %v552_v3, %v556_v5 }
 0x17b   : > { %v11266_v18 = vcombine.high %v1359_v60, %v1363_v13  ;;  %v1223_v19 = vld [vmem:[%s12486_s21 + $0x1ac0] sm:$0xff]  ;;  %6895 = vmatprep.subr.bf16.mxu0 %v11138_v17  ;;  %v11265_v27 = vcombine.low %v1359_v60, %v1363_v13  ;;  %v416_v60 = vld [vmem:[%s12486_s21 + $0x188] sm:$0xff]  ;;  %v12885_v17 = vcombine.high %v12877_v7, %v12877_v7 }
 0x17c   : > { %v1227_v20 = vld [vmem:[%s12486_s21 + $0x1ae0] sm:$0xff]  ;;  %6896 = vmatpush2.bf16.msra.mxu0 %v11137_v25  ;;  %v420_v13 = vld [vmem:[%s12486_s21 + $0x1a8] sm:$0xff] }
 0x17d   : > { %v1351_v21 = vld [vmem:[%s12486_s21 + $0x1ec0] sm:$0xff]  ;;  %v11130_v28 = vcombine.high %v1223_v19, %v1227_v20  ;;  %6936 = vmatprep.subr.bf16.mxu1 %v11266_v18  ;;  %v11129_v37 = vcombine.low %v1223_v19, %v1227_v20  ;;  %v10324_v18 = vcombine.high %v416_v60, %v420_v13  ;;  %v10452_v19 = vcombine.high %v544_v15, %v548_v16  ;;  %v408_v20 = vld [vmem:[%s12486_s21 + $0x148] sm:$0xff] }
 0x17e   : > { %v1355_v24 = vld [vmem:[%s12486_s21 + $0x1ee0] sm:$0xff]  ;;  %6937 = vmatpush2.bf16.msra.mxu1 %v11265_v27  ;;  %v536_v25 = vld [vmem:[%s12486_s21 + $0x548] sm:$0xff] }
 0x17f   : > { %v11258_v29 = vcombine.high %v1351_v21, %v1355_v24  ;;  %v1215_v30 = vld [vmem:[%s12486_s21 + $0x1a80] sm:$0xff]  ;;  %6897 = vmatprep.subr.bf16.mxu0 %v11130_v28  ;;  %v11257_v38 = vcombine.low %v1351_v21, %v1355_v24  ;;  %v412_v21 = vld [vmem:[%s12486_s21 + $0x168] sm:$0xff] }
 0x180   : > { %v1219_v32 = vld [vmem:[%s12486_s21 + $0x1aa0] sm:$0xff]  ;;  %6898 = vmatpush2.bf16.msra.mxu0 %v11129_v37  ;;  %v540_v27 = vld [vmem:[%s12486_s21 + $0x568] sm:$0xff] }
 0x181   : > { %v1343_v34 = vld [vmem:[%s12486_s21 + $0x1e80] sm:$0xff]  ;;  %v11122_v39 = vcombine.high %v1215_v30, %v1219_v32  ;;  %6938 = vmatprep.subr.bf16.mxu1 %v11258_v29  ;;  %v11121_v49 = vcombine.low %v1215_v30, %v1219_v32  ;;  %v10323_v29 = vcombine.low %v416_v60, %v420_v13  ;;  %v384_v5 = vld [vmem:[%s12486_s21 + $0x88] sm:$0xff] }
 0x182   : > { %v1347_v36 = vld [vmem:[%s12486_s21 + $0x1ea0] sm:$0xff]  ;;  %6939 = vmatpush2.bf16.msra.mxu1 %v11257_v38  ;;  %v10444_v38 = vcombine.high %v536_v25, %v540_v27 }
 0x183   : > { %v11250_v41 = vcombine.high %v1343_v34, %v1347_v36  ;;  %v1207_v42 = vld [vmem:[%s12486_s21 + $0x1a40] sm:$0xff]  ;;  %6899 = vmatprep.subr.bf16.mxu0 %v11122_v39  ;;  %v11249_v50 = vcombine.low %v1343_v34, %v1347_v36  ;;  %v10451_v34 = vcombine.low %v544_v15, %v548_v16  ;;  %v10316_v36 = vcombine.high %v408_v20, %v412_v21  ;;  %v400_v39 = vld [vmem:[%s12486_s21 + $0x108] sm:$0xff] }
 0x184   : > { %v1211_v43 = vld [vmem:[%s12486_s21 + $0x1a60] sm:$0xff]  ;;  %6900 = vmatpush2.bf16.msra.mxu0 %v11121_v49  ;;  %v376_v16 = vld [vmem:[%s12486_s21 + $0x48] sm:$0xff] }
 0x185   : > { %v1335_v46 = vld [vmem:[%s12486_s21 + $0x1e40] sm:$0xff]  ;;  %v11114_v51 = vcombine.high %v1207_v42, %v1211_v43  ;;  %6940 = vmatprep.subr.bf16.mxu1 %v11250_v41  ;;  %v11113_v59 = vcombine.low %v1207_v42, %v1211_v43  ;;  %v404_v41 = vld [vmem:[%s12486_s21 + $0x128] sm:$0xff] }
 0x186   : > { %v1339_v47 = vld [vmem:[%s12486_s21 + $0x1e60] sm:$0xff]  ;;  %6941 = vmatpush2.bf16.msra.mxu1 %v11249_v50  ;;  %v10315_v50 = vcombine.low %v408_v20, %v412_v21 }
 0x187   : > { %v11242_v52 = vcombine.high %v1335_v46, %v1339_v47  ;;  %v1199_v53 = vld [vmem:[%s12486_s21 + $0x1a00] sm:$0xff]  ;;  %6901 = vmatprep.subr.bf16.mxu0 %v11114_v51  ;;  %v11241_v61 = vcombine.low %v1335_v46, %v1339_v47  ;;  %v528_v46 = vld [vmem:[%s12486_s21 + $0x508] sm:$0xff] }
 0x188   : > { %v1203_v55 = vld [vmem:[%s12486_s21 + $0x1a20] sm:$0xff]  ;;  %6902 = vmatpush2.bf16.msra.mxu0 %v11113_v59  ;;  %v532_v47 = vld [vmem:[%s12486_s21 + $0x528] sm:$0xff] }
 0x189   : > { %v1327_v56 = vld [vmem:[%s12486_s21 + $0x1e00] sm:$0xff]  ;;  %v11106_v62 = vcombine.high %v1199_v53, %v1203_v55  ;;  %6942 = vmatprep.subr.bf16.mxu1 %v11242_v52  ;;  %v11105_v6 = vcombine.low %v1199_v53, %v1203_v55  ;;  %v10443_v52 = vcombine.low %v536_v25, %v540_v27  ;;  %v10308_v53 = vcombine.high %v400_v39, %v404_v41  ;;  %v396_v59 = vld [vmem:[%s12486_s21 + $0xe8] sm:$0xff] }
 0x18a   : > { %v1331_v58 = vld [vmem:[%s12486_s21 + $0x1e20] sm:$0xff]  ;;  %6943 = vmatpush2.bf16.msra.mxu1 %v11241_v61  ;;  %v520_v61 = vld [vmem:[%s12486_s21 + $0x4c8] sm:$0xff]  ;;  %v10435_v1 = vcombine.low %v528_v46, %v532_v47 }
 0x18b   : > { %v11234_v63 = vcombine.high %v1327_v56, %v1331_v58  ;;  %6903 = vmatprep.subr.bf16.mxu0 %v11106_v62  ;;  %v11233_v8 = vcombine.low %v1327_v56, %v1331_v58  ;;  %v10436_v56 = vcombine.high %v528_v46, %v532_v47  ;;  %v392_v58 = vld [vmem:[%s12486_s21 + $0xc8] sm:$0xff] }
 0x18c   : > { %6904 = vmatpush2.bf16.msra.mxu0 %v11105_v6  ;;  %v524_v62 = vld [vmem:[%s12486_s21 + $0x4e8] sm:$0xff]  ;;  %v10300_v2 = vcombine.high %v392_v58, %v396_v59 }
 0x18d   : > { %6944 = vmatprep.subr.bf16.mxu1 %v11234_v63  ;;  %6955 = vmatprep.subr.bf16.mxu0 %v10332_v9  ;;  %v10307_v63 = vcombine.low %v400_v39, %v404_v41  ;;  %v10428_v3 = vcombine.high %v520_v61, %v524_v62  ;;  %v388_v6 = vld [vmem:[%s12486_s21 + $0xa8] sm:$0xff]  ;;  %v10427_v60 = vcombine.low %v520_v61, %v524_v62 }
 0x18e   : > { %6945 = vmatpush2.bf16.msra.mxu1 %v11233_v8  ;;  %v512_v8 = vld [vmem:[%s12486_s21 + $0x488] sm:$0xff]  ;;  %v10292_v13 = vcombine.high %v384_v5, %v388_v6 }
 0x18f   : > { %6996 = vmatprep.subr.bf16.mxu1 %v10460_v26  ;;  %v6661_v24 = vpop.f32.mrf.mxu0  ;;  %6906 = vmatmul.mubr.bf16.vlgmr.msra.gmra.mxu0 %v12877_v7  ;;  %v516_v9 = vld [vmem:[%s12486_s21 + $0x4a8] sm:$0xff]  ;;  %v10299_v26 = vcombine.low %v392_v58, %v396_v59 }
 0x190   : > { %6956 = vmatpush1.bf16.msra.mxu0 %v10331_v54  ;;  %6987 = vmatprep.mubr.bf16.mxu0 %v12560_v10  ;;  %v10420_v15 = vcombine.high %v512_v8, %v516_v9  ;;  %v380_v54 = vld [vmem:[%s12486_s21 + $0x68] sm:$0xff]  ;;  %v10419_v20 = vcombine.low %v512_v8, %v516_v9 }
 0x191   : > { %v6702_v28 = vpop.f32.mrf.mxu1  ;;  %6947 = vmatmul.mubr.bf16.vlgmr.msra.gmra.mxu1 %v12885_v17  ;;  %v6663_v32 = vpop.f32.mrf.mxu0  ;;  %6957 = vmatprep.subr.bf16.mxu0 %v10324_v18  ;;  %v508_v18 = vld [vmem:[%s12486_s21 + $0x468] sm:$0xff]  ;;  %v10284_v21 = vcombine.high %v376_v16, %v380_v54 }
 0x192   : > { %v12893_v30 = vadd.f32 %v6702_v28, %v6661_v24  ;;  %6997 = vmatpush1.bf16.msra.mxu1 %v10459_v11  ;;  %7028 = vmatprep.mubr.bf16.mxu1 %v12567_v14  ;;  %v504_v11 = vld [vmem:[%s12486_s21 + $0x448] sm:$0xff] }
 0x193   : > { %v6704_v37 = vpop.f32.mrf.mxu1  ;;  %6998 = vmatprep.subr.bf16.mxu1 %v10452_v19  ;;  %v6665_v43 = vpop.f32.mrf.mxu0  ;;  %v10291_v19 = vcombine.low %v384_v5, %v388_v6  ;;  %v10412_v24 = vcombine.high %v504_v11, %v508_v18  ;;  %v368_v25 = vld [vmem:[%s12486_s21 + $0x8] sm:$0xff] }
 0x194   : > { %v12898_v42 = vadd.f32 %v6704_v37, %v6663_v32  ;;  %6958 = vmatpush1.bf16.msra.mxu0 %v10323_v29  ;;  %v372_v27 = vld [vmem:[%s12486_s21 + $0x28] sm:$0xff]  ;;  %v10283_v32 = vcombine.low %v376_v16, %v380_v54 }
 0x195   : > { %v6706_v49 = vpop.f32.mrf.mxu1  ;;  %v6666_v51 = vpop.f32.mrf.mxu0  ;;  %6959 = vmatprep.subr.bf16.mxu0 %v10316_v36  ;;  %v496_v28 = vld [vmem:[%s12486_s21 + $0x408] sm:$0xff]  ;;  %v10276_v36 = vcombine.high %v368_v25, %v372_v27  ;;  %v10275_v46 = vcombine.low %v368_v25, %v372_v27 }
 0x196   : > { %6999 = vmatpush1.bf16.msra.mxu1 %v10451_v34  ;;  %v500_v29 = vld [vmem:[%s12486_s21 + $0x428] sm:$0xff]  ;;  %v10411_v34 = vcombine.low %v504_v11, %v508_v18 }
 0x197   : > { %v6707_v55 = vpop.f32.mrf.mxu1  ;;  %7000 = vmatprep.subr.bf16.mxu1 %v10444_v38  ;;  %v10404_v37 = vcombine.high %v496_v28, %v500_v29  ;;  %v488_v38 = vld [vmem:[%s12486_s21 + $0x3c8] sm:$0xff]  ;;  %v10403_v47 = vcombine.low %v496_v28, %v500_v29 }
 0x198   : > { %6960 = vmatpush1.bf16.msra.mxu0 %v10315_v50  ;;  %v492_v39 = vld [vmem:[%s12486_s21 + $0x3e8] sm:$0xff] }
 0x199   : > { %6961 = vmatprep.subr.bf16.mxu0 %v10308_v53  ;;  %v616_v41 = vld [vmem:[%s12486_s21 + $0x7c8] sm:$0xff]  ;;  %v10396_v49 = vcombine.high %v488_v38, %v492_v39 }
 0x19a   : > { %7001 = vmatpush1.bf16.msra.mxu1 %v10443_v52  ;;  %v620_v43 = vld [vmem:[%s12486_s21 + $0x7e8] sm:$0xff] }
 0x19b   : > { %7002 = vmatprep.subr.bf16.mxu1 %v10436_v56  ;;  %v10524_v50 = vcombine.high %v616_v41, %v620_v43  ;;  %v480_v51 = vld [vmem:[%s12486_s21 + $0x388] sm:$0xff]  ;;  %v10395_v56 = vcombine.low %v488_v38, %v492_v39  ;;  %v10523_v58 = vcombine.low %v616_v41, %v620_v43 }
 0x19c   : > { %6962 = vmatpush1.bf16.msra.mxu0 %v10307_v63  ;;  %v484_v52 = vld [vmem:[%s12486_s21 + $0x3a8] sm:$0xff] }
 0x19d   : > { %6963 = vmatprep.subr.bf16.mxu0 %v10300_v2  ;;  %v608_v53 = vld [vmem:[%s12486_s21 + $0x788] sm:$0xff]  ;;  %v10388_v59 = vcombine.high %v480_v51, %v484_v52 }
 0x19e   : > { %7003 = vmatpush1.bf16.msra.mxu1 %v10435_v1  ;;  %v612_v55 = vld [vmem:[%s12486_s21 + $0x7a8] sm:$0xff] }
 0x19f   : > { %7004 = vmatprep.subr.bf16.mxu1 %v10428_v3  ;;  %v10516_v61 = vcombine.high %v608_v53, %v612_v55  ;;  %v472_v62 = vld [vmem:[%s12486_s21 + $0x348] sm:$0xff]  ;;  %v10387_v3 = vcombine.low %v480_v51, %v484_v52  ;;  %v10515_v5 = vcombine.low %v608_v53, %v612_v55 }
 0x1a0   : > { %6964 = vmatpush1.bf16.msra.mxu0 %v10299_v26  ;;  %v476_v63 = vld [vmem:[%s12486_s21 + $0x368] sm:$0xff] }
 0x1a1   : > { %6965 = vmatprep.subr.bf16.mxu0 %v10292_v13  ;;  %v600_v1 = vld [vmem:[%s12486_s21 + $0x748] sm:$0xff]  ;;  %v10380_v6 = vcombine.high %v472_v62, %v476_v63 }
 0x1a2   : > { %7005 = vmatpush1.bf16.msra.mxu1 %v10427_v60  ;;  %v604_v2 = vld [vmem:[%s12486_s21 + $0x768] sm:$0xff] }
 0x1a3   : > { %7006 = vmatprep.subr.bf16.mxu1 %v10420_v15  ;;  %v10508_v8 = vcombine.high %v600_v1, %v604_v2  ;;  %v464_v9 = vld [vmem:[%s12486_s21 + $0x308] sm:$0xff]  ;;  %v10379_v15 = vcombine.low %v472_v62, %v476_v63  ;;  %v10507_v16 = vcombine.low %v600_v1, %v604_v2 }
 0x1a4   : > { %6966 = vmatpush1.bf16.msra.mxu0 %v10291_v19  ;;  %v468_v26 = vld [vmem:[%s12486_s21 + $0x328] sm:$0xff] }
 0x1a5   : > { %6967 = vmatprep.subr.bf16.mxu0 %v10284_v21  ;;  %v592_v60 = vld [vmem:[%s12486_s21 + $0x708] sm:$0xff]  ;;  %v10372_v54 = vcombine.high %v464_v9, %v468_v26 }
 0x1a6   : > { %7007 = vmatpush1.bf16.msra.mxu1 %v10419_v20  ;;  %v596_v13 = vld [vmem:[%s12486_s21 + $0x728] sm:$0xff] }
 0x1a7   : > { %7008 = vmatprep.subr.bf16.mxu1 %v10412_v24  ;;  %v10500_v11 = vcombine.high %v592_v60, %v596_v13  ;;  %v456_v18 = vld [vmem:[%s12486_s21 + $0x2c8] sm:$0xff]  ;;  %v10371_v24 = vcombine.low %v464_v9, %v468_v26  ;;  %v10499_v25 = vcombine.low %v592_v60, %v596_v13 }
 0x1a8   : > { %6968 = vmatpush1.bf16.msra.mxu0 %v10283_v32  ;;  %v460_v19 = vld [vmem:[%s12486_s21 + $0x2e8] sm:$0xff] }
 0x1a9   : > { %6969 = vmatprep.subr.bf16.mxu0 %v10276_v36  ;;  %v584_v20 = vld [vmem:[%s12486_s21 + $0x6c8] sm:$0xff]  ;;  %v10364_v27 = vcombine.high %v456_v18, %v460_v19 }
 0x1aa   : > { %7009 = vmatpush1.bf16.msra.mxu1 %v10411_v34  ;;  %v588_v21 = vld [vmem:[%s12486_s21 + $0x6e8] sm:$0xff] }
 0x1ab   : > { %7010 = vmatprep.subr.bf16.mxu1 %v10404_v37  ;;  %v10492_v28 = vcombine.high %v584_v20, %v588_v21  ;;  %v448_v29 = vld [vmem:[%s12486_s21 + $0x288] sm:$0xff]  ;;  %v10363_v37 = vcombine.low %v456_v18, %v460_v19  ;;  %v10491_v38 = vcombine.low %v584_v20, %v588_v21 }
 0x1ac   : > { %6970 = vmatpush1.bf16.msra.mxu0 %v10275_v46  ;;  %v452_v32 = vld [vmem:[%s12486_s21 + $0x2a8] sm:$0xff] }
 0x1ad   : > { %6971 = vmatprep.subr.bf16.mxu0 %v10396_v49  ;;  %v576_v34 = vld [vmem:[%s12486_s21 + $0x688] sm:$0xff]  ;;  %v10356_v39 = vcombine.high %v448_v29, %v452_v32 }
 0x1ae   : > { %7011 = vmatpush1.bf16.msra.mxu1 %v10403_v47  ;;  %v580_v36 = vld [vmem:[%s12486_s21 + $0x6a8] sm:$0xff] }
 0x1af   : > { %7012 = vmatprep.subr.bf16.mxu1 %v10524_v50  ;;  %v10484_v41 = vcombine.high %v576_v34, %v580_v36  ;;  %v440_v43 = vld [vmem:[%s12486_s21 + $0x248] sm:$0xff]  ;;  %v10355_v50 = vcombine.low %v448_v29, %v452_v32  ;;  %v10483_v51 = vcombine.low %v576_v34, %v580_v36 }
 0x1b0   : > { %6972 = vmatpush2.bf16.msra.mxu0 %v10395_v56  ;;  %v444_v46 = vld [vmem:[%s12486_s21 + $0x268] sm:$0xff] }
 0x1b1   : > { %6973 = vmatprep.subr.bf16.mxu0 %v10388_v59  ;;  %v568_v47 = vld [vmem:[%s12486_s21 + $0x648] sm:$0xff]  ;;  %v10348_v52 = vcombine.high %v440_v43, %v444_v46 }
 0x1b2   : > { %7013 = vmatpush2.bf16.msra.mxu1 %v10523_v58  ;;  %v572_v49 = vld [vmem:[%s12486_s21 + $0x668] sm:$0xff] }
 0x1b3   : > { %7014 = vmatprep.subr.bf16.mxu1 %v10516_v61  ;;  %v10476_v53 = vcombine.high %v568_v47, %v572_v49  ;;  %v432_v55 = vld [vmem:[%s12486_s21 + $0x208] sm:$0xff]  ;;  %v10347_v61 = vcombine.low %v440_v43, %v444_v46  ;;  %v10475_v62 = vcombine.low %v568_v47, %v572_v49 }
 0x1b4   : > { %6974 = vmatpush2.bf16.msra.mxu0 %v10387_v3  ;;  %v436_v56 = vld [vmem:[%s12486_s21 + $0x228] sm:$0xff] }
 0x1b5   : > { %6975 = vmatprep.subr.bf16.mxu0 %v10380_v6  ;;  %v560_v58 = vld [vmem:[%s12486_s21 + $0x608] sm:$0xff]  ;;  %v10340_v63 = vcombine.high %v432_v55, %v436_v56 }
 0x1b6   : > { %7015 = vmatpush2.bf16.msra.mxu1 %v10515_v5  ;;  %v564_v59 = vld [vmem:[%s12486_s21 + $0x628] sm:$0xff] }
 0x1b7   : > { %7016 = vmatprep.subr.bf16.mxu1 %v10508_v8  ;;  %v10468_v1 = vcombine.high %v560_v58, %v564_v59  ;;  %v680_v2 = vld [vmem:[%s12486_s21 + $0x9c8] sm:$0xff]  ;;  %v10339_v8 = vcombine.low %v432_v55, %v436_v56  ;;  %v10467_v9 = vcombine.low %v560_v58, %v564_v59 }
 0x1b8   : > { %6976 = vmatpush2.bf16.msra.mxu0 %v10379_v15  ;;  %v684_v3 = vld [vmem:[%s12486_s21 + $0x9e8] sm:$0xff] }
 0x1b9   : > { %6977 = vmatprep.subr.bf16.mxu0 %v10372_v54  ;;  %v808_v5 = vld [vmem:[%s12486_s21 + $0xdc8] sm:$0xff]  ;;  %v10588_v26 = vcombine.high %v680_v2, %v684_v3 }
 0x1ba   : > { %7017 = vmatpush2.bf16.msra.mxu1 %v10507_v16  ;;  %v812_v6 = vld [vmem:[%s12486_s21 + $0xde8] sm:$0xff] }
 0x1bb   : > { %7018 = vmatprep.subr.bf16.mxu1 %v10500_v11  ;;  %v10716_v60 = vcombine.high %v808_v5, %v812_v6  ;;  %v672_v13 = vld [vmem:[%s12486_s21 + $0x988] sm:$0xff]  ;;  %v10587_v11 = vcombine.low %v680_v2, %v684_v3  ;;  %v10715_v18 = vcombine.low %v808_v5, %v812_v6 }
 0x1bc   : > { %6978 = vmatpush2.bf16.msra.mxu0 %v10371_v24  ;;  %v676_v15 = vld [vmem:[%s12486_s21 + $0x9a8] sm:$0xff] }
 0x1bd   : > { %6979 = vmatprep.subr.bf16.mxu0 %v10364_v27  ;;  %v800_v16 = vld [vmem:[%s12486_s21 + $0xd88] sm:$0xff]  ;;  %v10580_v19 = vcombine.high %v672_v13, %v676_v15  ;;  %v10579_v34 = vcombine.low %v672_v13, %v676_v15 }
 0x1be   : > { %7019 = vmatpush2.bf16.msra.mxu1 %v10499_v25  ;;  %v804_v54 = vld [vmem:[%s12486_s21 + $0xda8] sm:$0xff] }
 0x1bf   : > { %7020 = vmatprep.subr.bf16.mxu1 %v10492_v28  ;;  %v10708_v20 = vcombine.high %v800_v16, %v804_v54  ;;  %v664_v21 = vld [vmem:[%s12486_s21 + $0x948] sm:$0xff] }
 0x1c0   : > { %6980 = vmatpush2.bf16.msra.mxu0 %v10363_v37  ;;  %v668_v24 = vld [vmem:[%s12486_s21 + $0x968] sm:$0xff]  ;;  %v10707_v37 = vcombine.low %v800_v16, %v804_v54 }
 0x1c1   : > { %6981 = vmatprep.subr.bf16.mxu0 %v10356_v39  ;;  %v792_v27 = vld [vmem:[%s12486_s21 + $0xd48] sm:$0xff] }
 0x1c2   : > { %7021 = vmatpush2.bf16.msra.mxu1 %v10491_v38  ;;  %v796_v28 = vld [vmem:[%s12486_s21 + $0xd68] sm:$0xff]  ;;  %v10572_v38 = vcombine.high %v664_v21, %v668_v24 }
 0x1c3   : > { %7022 = vmatprep.subr.bf16.mxu1 %v10484_v41  ;;  %v656_v46 = vld [vmem:[%s12486_s21 + $0x908] sm:$0xff]  ;;  %v10699_v56 = vcombine.low %v792_v27, %v796_v28 }
 0x1c4   : > { %6982 = vmatpush2.bf16.msra.mxu0 %v10355_v50  ;;  %v660_v47 = vld [vmem:[%s12486_s21 + $0x928] sm:$0xff] }
 0x1c5   : > { %6983 = vmatprep.subr.bf16.mxu0 %v10348_v52  ;;  %v784_v50 = vld [vmem:[%s12486_s21 + $0xd08] sm:$0xff]  ;;  %v10564_v58 = vcombine.high %v656_v46, %v660_v47  ;;  %v10563_v3 = vcombine.low %v656_v46, %v660_v47 }
 0x1c6   : > { %7023 = vmatpush2.bf16.msra.mxu1 %v10483_v51  ;;  %v788_v51 = vld [vmem:[%s12486_s21 + $0xd28] sm:$0xff] }
 0x1c7   : > { %7024 = vmatprep.subr.bf16.mxu1 %v10476_v53  ;;  %v780_v2 = vld [vmem:[%s12486_s21 + $0xce8] sm:$0xff]  ;;  %v10691_v5 = vcombine.low %v784_v50, %v788_v51 }
 0x1c8   : > { %6984 = vmatpush2.bf16.msra.mxu0 %v10347_v61  ;;  %v10692_v61 = vcombine.high %v784_v50, %v788_v51  ;;  %v772_v13 = vld [vmem:[%s12486_s21 + $0xca8] sm:$0xff] }
 0x1c9   : > { %6985 = vmatprep.subr.bf16.mxu0 %v10340_v63  ;;  %v652_v63 = vld [vmem:[%s12486_s21 + $0x8e8] sm:$0xff] }
 0x1ca   : > { %7025 = vmatpush2.bf16.msra.mxu1 %v10475_v62  ;;  %v648_v62 = vld [vmem:[%s12486_s21 + $0x8c8] sm:$0xff] }
 0x1cb   : > { %7026 = vmatprep.subr.bf16.mxu1 %v10468_v1  ;;  %v776_v1 = vld [vmem:[%s12486_s21 + $0xcc8] sm:$0xff]  ;;  %v10556_v6 = vcombine.high %v648_v62, %v652_v63  ;;  %v10555_v15 = vcombine.low %v648_v62, %v652_v63 }
 0x1cc   : > { %6986 = vmatpush2.bf16.msra.mxu0 %v10339_v8  ;;  %v10684_v8 = vcombine.high %v776_v1, %v780_v2  ;;  %v10683_v16 = vcombine.low %v776_v1, %v780_v2  ;;  %v748_v46 = vld [vmem:[%s12486_s21 + $0xbe8] sm:$0xff] }
 0x1cd   : > { %7037 = vmatprep.subr.bf16.mxu0 %v10588_v26  ;;  %v644_v26 = vld [vmem:[%s12486_s21 + $0x8a8] sm:$0xff] }
 0x1ce   : > { %7027 = vmatpush2.bf16.msra.mxu1 %v10467_v9  ;;  %v640_v9 = vld [vmem:[%s12486_s21 + $0x888] sm:$0xff] }
 0x1cf   : > { %7078 = vmatprep.subr.bf16.mxu1 %v10716_v60  ;;  %v6743_v25 = vpop.f32.mrf.mxu0  ;;  %6988 = vmatmul.mubr.bf16.vlgmr.msra.gmra.mxu0 %v12611_v23  ;;  %v768_v60 = vld [vmem:[%s12486_s21 + $0xc88] sm:$0xff]  ;;  %v10548_v54 = vcombine.high %v640_v9, %v644_v26 }
 0x1d0   : > { %v6744_v29 = vadd.f32 %v6743_v25, %v12893_v30  ;;  %7038 = vmatpush1.bf16.msra.mxu0 %v10587_v11  ;;  %v10700_v30 = vcombine.high %v792_v27, %v796_v28  ;;  %7069 = vmatprep.mubr.bf16.mxu0 %v12618_v31  ;;  %v10676_v11 = vcombine.high %v768_v60, %v772_v13  ;;  %v872_v47 = vld [vmem:[%s12486_s21 + $0xfc8] sm:$0xff] }
 0x1d1   : > { %v6784_v32 = vpop.f32.mrf.mxu1  ;;  %7029 = vmatmul.mubr.bf16.vlgmr.msra.gmra.mxu1 %v12622_v0  ;;  %v6745_v36 = vpop.f32.mrf.mxu0  ;;  %7039 = vmatprep.subr.bf16.mxu0 %v10580_v19  ;;  %v636_v19 = vld [vmem:[%s12486_s21 + $0x868] sm:$0xff]  ;;  %v10675_v25 = vcombine.low %v768_v60, %v772_v13 }
 0x1d2   : > { %7079 = vmatpush1.bf16.msra.mxu1 %v10715_v18  ;;  %v12966_v39 = vadd.f32 %v6784_v32, %v6744_v29  ;;  %v6746_v41 = vadd.f32 %v6745_v36, %v12898_v42  ;;  %7110 = vmatprep.mubr.bf16.mxu1 %v12631_v40  ;;  %v10571_v42 = vcombine.low %v664_v21, %v668_v24  ;;  %v632_v18 = vld [vmem:[%s12486_s21 + $0x848] sm:$0xff] }
 0x1d3   : > { %v6786_v43 = vpop.f32.mrf.mxu1  ;;  %7080 = vmatprep.subr.bf16.mxu1 %v10708_v20  ;;  %v6747_v49 = vpop.f32.mrf.mxu0  ;;  %v760_v20 = vld [vmem:[%s12486_s21 + $0xc48] sm:$0xff]  ;;  %v10547_v24 = vcombine.low %v640_v9, %v644_v26  ;;  %v10540_v27 = vcombine.high %v632_v18, %v636_v19 }
 0x1d4   : > { %v12975_v52 = vadd.f32 %v6786_v43, %v6746_v41  ;;  %7040 = vmatpush1.bf16.msra.mxu0 %v10579_v34  ;;  %v764_v21 = vld [vmem:[%s12486_s21 + $0xc68] sm:$0xff] }
 0x1d5   : > { %v6788_v53 = vpop.f32.mrf.mxu1  ;;  %v6748_v55 = vpop.f32.mrf.mxu0  ;;  %7041 = vmatprep.subr.bf16.mxu0 %v10572_v38  ;;  %v10668_v28 = vcombine.high %v760_v20, %v764_v21  ;;  %v624_v29 = vld [vmem:[%s12486_s21 + $0x808] sm:$0xff]  ;;  %v10667_v38 = vcombine.low %v760_v20, %v764_v21 }
 0x1d6   : > { %7081 = vmatpush1.bf16.msra.mxu1 %v10707_v37  ;;  %v628_v32 = vld [vmem:[%s12486_s21 + $0x828] sm:$0xff]  ;;  %v10539_v37 = vcombine.low %v632_v18, %v636_v19 }
 0x1d7   : > { %v6789_v59 = vpop.f32.mrf.mxu1  ;;  %7082 = vmatprep.subr.bf16.mxu1 %v10700_v30  ;;  %v752_v34 = vld [vmem:[%s12486_s21 + $0xc08] sm:$0xff]  ;;  %v10532_v41 = vcombine.high %v624_v29, %v628_v32  ;;  %v10531_v50 = vcombine.low %v624_v29, %v628_v32 }
 0x1d8   : > { %7042 = vmatpush1.bf16.msra.mxu0 %v10571_v42  ;;  %v756_v36 = vld [vmem:[%s12486_s21 + $0xc28] sm:$0xff] }
 0x1d9   : > { %7043 = vmatprep.subr.bf16.mxu0 %v10564_v58  ;;  %v10660_v43 = vcombine.high %v752_v34, %v756_v36  ;;  %v744_v30 = vld [vmem:[%s12486_s21 + $0xbc8] sm:$0xff]  ;;  %v10659_v51 = vcombine.low %v752_v34, %v756_v36 }
 0x1da   : > { %7083 = vmatpush1.bf16.msra.mxu1 %v10699_v56  ;;  %v876_v49 = vld [vmem:[%s12486_s21 + $0xfe8] sm:$0xff]  ;;  %v10652_v53 = vcombine.high %v744_v30, %v748_v46 }
 0x1db   : > { %7084 = vmatprep.subr.bf16.mxu1 %v10692_v61  ;;  %v10780_v42 = vcombine.high %v872_v47, %v876_v49  ;;  %v736_v55 = vld [vmem:[%s12486_s21 + $0xb88] sm:$0xff]  ;;  %v10651_v61 = vcombine.low %v744_v30, %v748_v46  ;;  %v10779_v62 = vcombine.low %v872_v47, %v876_v49 }
 0x1dc   : > { %7044 = vmatpush1.bf16.msra.mxu0 %v10563_v3  ;;  %v740_v56 = vld [vmem:[%s12486_s21 + $0xba8] sm:$0xff] }
 0x1dd   : > { %7045 = vmatprep.subr.bf16.mxu0 %v10556_v6  ;;  %v864_v58 = vld [vmem:[%s12486_s21 + $0xf88] sm:$0xff]  ;;  %v10644_v63 = vcombine.high %v736_v55, %v740_v56 }
 0x1de   : > { %7085 = vmatpush1.bf16.msra.mxu1 %v10691_v5  ;;  %v868_v59 = vld [vmem:[%s12486_s21 + $0xfa8] sm:$0xff] }
 0x1df   : > { %7086 = vmatprep.subr.bf16.mxu1 %v10684_v8  ;;  %v10772_v1 = vcombine.high %v864_v58, %v868_v59  ;;  %v728_v2 = vld [vmem:[%s12486_s21 + $0xb48] sm:$0xff]  ;;  %v10643_v8 = vcombine.low %v736_v55, %v740_v56  ;;  %v10771_v9 = vcombine.low %v864_v58, %v868_v59 }
 0x1e0   : > { %7046 = vmatpush1.bf16.msra.mxu0 %v10555_v15  ;;  %v732_v3 = vld [vmem:[%s12486_s21 + $0xb68] sm:$0xff] }
 0x1e1   : > { %7047 = vmatprep.subr.bf16.mxu0 %v10548_v54  ;;  %v856_v5 = vld [vmem:[%s12486_s21 + $0xf48] sm:$0xff]  ;;  %v10636_v26 = vcombine.high %v728_v2, %v732_v3 }
 0x1e2   : > { %7087 = vmatpush1.bf16.msra.mxu1 %v10683_v16  ;;  %v860_v6 = vld [vmem:[%s12486_s21 + $0xf68] sm:$0xff] }
 0x1e3   : > { %7088 = vmatprep.subr.bf16.mxu1 %v10676_v11  ;;  %v10764_v60 = vcombine.high %v856_v5, %v860_v6  ;;  %v720_v13 = vld [vmem:[%s12486_s21 + $0xb08] sm:$0xff]  ;;  %v10635_v11 = vcombine.low %v728_v2, %v732_v3  ;;  %v10763_v18 = vcombine.low %v856_v5, %v860_v6 }
 0x1e4   : > { %7048 = vmatpush1.bf16.msra.mxu0 %v10547_v24  ;;  %v724_v15 = vld [vmem:[%s12486_s21 + $0xb28] sm:$0xff] }
 0x1e5   : > { %7049 = vmatprep.subr.bf16.mxu0 %v10540_v27  ;;  %v848_v16 = vld [vmem:[%s12486_s21 + $0xf08] sm:$0xff]  ;;  %v10628_v19 = vcombine.high %v720_v13, %v724_v15 }
 0x1e6   : > { %7089 = vmatpush1.bf16.msra.mxu1 %v10675_v25  ;;  %v852_v54 = vld [vmem:[%s12486_s21 + $0xf28] sm:$0xff] }
 0x1e7   : > { %7090 = vmatprep.subr.bf16.mxu1 %v10668_v28  ;;  %v10756_v20 = vcombine.high %v848_v16, %v852_v54  ;;  %v712_v21 = vld [vmem:[%s12486_s21 + $0xac8] sm:$0xff]  ;;  %v10627_v28 = vcombine.low %v720_v13, %v724_v15  ;;  %v10755_v29 = vcombine.low %v848_v16, %v852_v54 }
 0x1e8   : > { %7050 = vmatpush1.bf16.msra.mxu0 %v10539_v37  ;;  %v716_v24 = vld [vmem:[%s12486_s21 + $0xae8] sm:$0xff] }
 0x1e9   : > { %7051 = vmatprep.subr.bf16.mxu0 %v10532_v41  ;;  %v840_v25 = vld [vmem:[%s12486_s21 + $0xec8] sm:$0xff]  ;;  %v10620_v32 = vcombine.high %v712_v21, %v716_v24 }
 0x1ea   : > { %7091 = vmatpush1.bf16.msra.mxu1 %v10667_v38  ;;  %v844_v27 = vld [vmem:[%s12486_s21 + $0xee8] sm:$0xff] }
 0x1eb   : > { %7092 = vmatprep.subr.bf16.mxu1 %v10660_v43  ;;  %v10748_v34 = vcombine.high %v840_v25, %v844_v27  ;;  %v704_v36 = vld [vmem:[%s12486_s21 + $0xa88] sm:$0xff]  ;;  %v10619_v43 = vcombine.low %v712_v21, %v716_v24  ;;  %v10747_v30 = vcombine.low %v840_v25, %v844_v27 }
 0x1ec   : > { %7052 = vmatpush1.bf16.msra.mxu0 %v10531_v50  ;;  %v708_v37 = vld [vmem:[%s12486_s21 + $0xaa8] sm:$0xff] }
 0x1ed   : > { %7053 = vmatprep.subr.bf16.mxu0 %v10652_v53  ;;  %v832_v38 = vld [vmem:[%s12486_s21 + $0xe88] sm:$0xff]  ;;  %v10612_v46 = vcombine.high %v704_v36, %v708_v37 }
 0x1ee   : > { %7093 = vmatpush1.bf16.msra.mxu1 %v10659_v51  ;;  %v836_v41 = vld [vmem:[%s12486_s21 + $0xea8] sm:$0xff] }
 0x1ef   : > { %7094 = vmatprep.subr.bf16.mxu1 %v10780_v42  ;;  %v10740_v47 = vcombine.high %v832_v38, %v836_v41  ;;  %v696_v49 = vld [vmem:[%s12486_s21 + $0xa48] sm:$0xff]  ;;  %v10611_v42 = vcombine.low %v704_v36, %v708_v37  ;;  %v10739_v55 = vcombine.low %v832_v38, %v836_v41 }
 0x1f0   : > { %7054 = vmatpush2.bf16.msra.mxu0 %v10651_v61  ;;  %v700_v50 = vld [vmem:[%s12486_s21 + $0xa68] sm:$0xff] }
 0x1f1   : > { %7055 = vmatprep.subr.bf16.mxu0 %v10644_v63  ;;  %v824_v51 = vld [vmem:[%s12486_s21 + $0xe48] sm:$0xff]  ;;  %v10604_v56 = vcombine.high %v696_v49, %v700_v50 }
 0x1f2   : > { %7095 = vmatpush2.bf16.msra.mxu1 %v10779_v62  ;;  %v828_v53 = vld [vmem:[%s12486_s21 + $0xe68] sm:$0xff] }
 0x1f3   : > { %7096 = vmatprep.subr.bf16.mxu1 %v10772_v1  ;;  %v10732_v58 = vcombine.high %v824_v51, %v828_v53  ;;  %v688_v59 = vld [vmem:[%s12486_s21 + $0xa08] sm:$0xff]  ;;  %v10603_v1 = vcombine.low %v696_v49, %v700_v50  ;;  %v10731_v2 = vcombine.low %v824_v51, %v828_v53 }
 0x1f4   : > { %7056 = vmatpush2.bf16.msra.mxu0 %v10643_v8  ;;  %v692_v61 = vld [vmem:[%s12486_s21 + $0xa28] sm:$0xff] }
 0x1f5   : > { %7057 = vmatprep.subr.bf16.mxu0 %v10636_v26  ;;  %v816_v62 = vld [vmem:[%s12486_s21 + $0xe08] sm:$0xff]  ;;  %v10596_v3 = vcombine.high %v688_v59, %v692_v61 }
 0x1f6   : > { %7097 = vmatpush2.bf16.msra.mxu1 %v10771_v9  ;;  %v820_v63 = vld [vmem:[%s12486_s21 + $0xe28] sm:$0xff] }
 0x1f7   : > { %7098 = vmatprep.subr.bf16.mxu1 %v10764_v60  ;;  %v10724_v5 = vcombine.high %v816_v62, %v820_v63  ;;  %v936_v6 = vld [vmem:[%s12486_s21 + $0x11c8] sm:$0xff]  ;;  %v10595_v60 = vcombine.low %v688_v59, %v692_v61  ;;  %v10723_v13 = vcombine.low %v816_v62, %v820_v63 }
 0x1f8   : > { %7058 = vmatpush2.bf16.msra.mxu0 %v10635_v11  ;;  %v940_v8 = vld [vmem:[%s12486_s21 + $0x11e8] sm:$0xff] }
 0x1f9   : > { %7059 = vmatprep.subr.bf16.mxu0 %v10628_v19  ;;  %v1064_v9 = vld [vmem:[%s12486_s21 + $0x15c8] sm:$0xff]  ;;  %v10844_v15 = vcombine.high %v936_v6, %v940_v8 }
 0x1fa   : > { %7099 = vmatpush2.bf16.msra.mxu1 %v10763_v18  ;;  %v1068_v26 = vld [vmem:[%s12486_s21 + $0x15e8] sm:$0xff] }
 0x1fb   : > { %7100 = vmatprep.subr.bf16.mxu1 %v10756_v20  ;;  %v10972_v16 = vcombine.high %v1064_v9, %v1068_v26  ;;  %v928_v54 = vld [vmem:[%s12486_s21 + $0x1188] sm:$0xff]  ;;  %v10843_v20 = vcombine.low %v936_v6, %v940_v8  ;;  %v10971_v21 = vcombine.low %v1064_v9, %v1068_v26 }
 0x1fc   : > { %7060 = vmatpush2.bf16.msra.mxu0 %v10627_v28  ;;  %v932_v11 = vld [vmem:[%s12486_s21 + $0x11a8] sm:$0xff] }
 0x1fd   : > { %7061 = vmatprep.subr.bf16.mxu0 %v10620_v32  ;;  %v1056_v18 = vld [vmem:[%s12486_s21 + $0x1588] sm:$0xff]  ;;  %v10836_v24 = vcombine.high %v928_v54, %v932_v11  ;;  %v10835_v38 = vcombine.low %v928_v54, %v932_v11 }
 0x1fe   : > { %7101 = vmatpush2.bf16.msra.mxu1 %v10755_v29  ;;  %v1060_v19 = vld [vmem:[%s12486_s21 + $0x15a8] sm:$0xff] }
 0x1ff   : > { %7102 = vmatprep.subr.bf16.mxu1 %v10748_v34  ;;  %v10964_v25 = vcombine.high %v1056_v18, %v1060_v19  ;;  %v920_v27 = vld [vmem:[%s12486_s21 + $0x1148] sm:$0xff] }
 0x200   : > { %7062 = vmatpush2.bf16.msra.mxu0 %v10619_v43  ;;  %v924_v28 = vld [vmem:[%s12486_s21 + $0x1168] sm:$0xff]  ;;  %v10963_v43 = vcombine.low %v1056_v18, %v1060_v19 }
 0x201   : > { %7063 = vmatprep.subr.bf16.mxu0 %v10612_v46  ;;  %v1048_v32 = vld [vmem:[%s12486_s21 + $0x1548] sm:$0xff] }
 0x202   : > { %7103 = vmatpush2.bf16.msra.mxu1 %v10747_v30  ;;  %v1052_v34 = vld [vmem:[%s12486_s21 + $0x1568] sm:$0xff]  ;;  %v10828_v30 = vcombine.high %v920_v27, %v924_v28 }
 0x203   : > { %7104 = vmatprep.subr.bf16.mxu1 %v10740_v47  ;;  %v912_v50 = vld [vmem:[%s12486_s21 + $0x1108] sm:$0xff]  ;;  %v10955_v61 = vcombine.low %v1048_v32, %v1052_v34 }
 0x204   : > { %7064 = vmatpush2.bf16.msra.mxu0 %v10611_v42  ;;  %v916_v51 = vld [vmem:[%s12486_s21 + $0x1128] sm:$0xff] }
 0x205   : > { %7065 = vmatprep.subr.bf16.mxu0 %v10604_v56  ;;  %v1040_v42 = vld [vmem:[%s12486_s21 + $0x1508] sm:$0xff]  ;;  %v10820_v62 = vcombine.high %v912_v50, %v916_v51  ;;  %v10819_v8 = vcombine.low %v912_v50, %v916_v51 }
 0x206   : > { %7105 = vmatpush2.bf16.msra.mxu1 %v10739_v55  ;;  %v1044_v55 = vld [vmem:[%s12486_s21 + $0x1528] sm:$0xff] }
 0x207   : > { %7106 = vmatprep.subr.bf16.mxu1 %v10732_v58  ;;  %v1036_v6 = vld [vmem:[%s12486_s21 + $0x14e8] sm:$0xff]  ;;  %v10947_v9 = vcombine.low %v1040_v42, %v1044_v55 }
 0x208   : > { %7066 = vmatpush2.bf16.msra.mxu0 %v10603_v1  ;;  %v10948_v1 = vcombine.high %v1040_v42, %v1044_v55  ;;  %v1028_v54 = vld [vmem:[%s12486_s21 + $0x14a8] sm:$0xff] }
 0x209   : > { %7067 = vmatprep.subr.bf16.mxu0 %v10596_v3  ;;  %v908_v3 = vld [vmem:[%s12486_s21 + $0x10e8] sm:$0xff] }
 0x20a   : > { %7107 = vmatpush2.bf16.msra.mxu1 %v10731_v2  ;;  %v904_v2 = vld [vmem:[%s12486_s21 + $0x10c8] sm:$0xff] }
 0x20b   : > { %7108 = vmatprep.subr.bf16.mxu1 %v10724_v5  ;;  %v1032_v5 = vld [vmem:[%s12486_s21 + $0x14c8] sm:$0xff]  ;;  %v10812_v26 = vcombine.high %v904_v2, %v908_v3  ;;  %v10811_v11 = vcombine.low %v904_v2, %v908_v3 }
 0x20c   : > { %7068 = vmatpush2.bf16.msra.mxu0 %v10595_v60  ;;  %v10940_v60 = vcombine.high %v1032_v5, %v1036_v6  ;;  %v10939_v18 = vcombine.low %v1032_v5, %v1036_v6  ;;  %v1004_v50 = vld [vmem:[%s12486_s21 + $0x13e8] sm:$0xff] }
 0x20d   : > { %7119 = vmatprep.subr.bf16.mxu0 %v10844_v15  ;;  %v900_v15 = vld [vmem:[%s12486_s21 + $0x10a8] sm:$0xff] }
 0x20e   : > { %7109 = vmatpush2.bf16.msra.mxu1 %v10723_v13  ;;  %v896_v13 = vld [vmem:[%s12486_s21 + $0x1088] sm:$0xff] }
 0x20f   : > { %7160 = vmatprep.subr.bf16.mxu1 %v10972_v16  ;;  %v6825_v29 = vpop.f32.mrf.mxu0  ;;  %7070 = vmatmul.mubr.bf16.vlgmr.msra.gmra.mxu0 %v12704_v48  ;;  %v1024_v16 = vld [vmem:[%s12486_s21 + $0x1488] sm:$0xff]  ;;  %v10804_v19 = vcombine.high %v896_v13, %v900_v15 }
 0x210   : > { %v6826_v36 = vadd.f32 %v6825_v29, %v12966_v39  ;;  %7120 = vmatpush1.bf16.msra.mxu0 %v10843_v20  ;;  %v10956_v39 = vcombine.high %v1048_v32, %v1052_v34  ;;  %7151 = vmatprep.mubr.bf16.mxu0 %v12711_v57  ;;  %v10932_v20 = vcombine.high %v1024_v16, %v1028_v54  ;;  %v1128_v51 = vld [vmem:[%s12486_s21 + $0x17c8] sm:$0xff] }
 0x211   : > { %v6866_v37 = vpop.f32.mrf.mxu1  ;;  %7111 = vmatmul.mubr.bf16.vlgmr.msra.gmra.mxu1 %v12715_v12  ;;  %v6827_v41 = vpop.f32.mrf.mxu0  ;;  %7121 = vmatprep.subr.bf16.mxu0 %v10836_v24  ;;  %v892_v24 = vld [vmem:[%s12486_s21 + $0x1068] sm:$0xff]  ;;  %v10931_v29 = vcombine.low %v1024_v16, %v1028_v54 }
 0x212   : > { %7161 = vmatpush1.bf16.msra.mxu1 %v10971_v21  ;;  %v13040_v46 = vadd.f32 %v6866_v37, %v6826_v36  ;;  %v6828_v47 = vadd.f32 %v6827_v41, %v12975_v52  ;;  %7192 = vmatprep.mubr.bf16.mxu1 %v12724_v4  ;;  %v10827_v52 = vcombine.low %v920_v27, %v924_v28  ;;  %v888_v21 = vld [vmem:[%s12486_s21 + $0x1048] sm:$0xff] }
 0x213   : > { %v6868_v49 = vpop.f32.mrf.mxu1  ;;  %7162 = vmatprep.subr.bf16.mxu1 %v10964_v25  ;;  %v6829_v53 = vpop.f32.mrf.mxu0  ;;  %v1016_v25 = vld [vmem:[%s12486_s21 + $0x1448] sm:$0xff]  ;;  %v10803_v28 = vcombine.low %v896_v13, %v900_v15  ;;  %v10796_v32 = vcombine.high %v888_v21, %v892_v24 }
 0x214   : > { %v13049_v56 = vadd.f32 %v6868_v49, %v6828_v47  ;;  %7122 = vmatpush1.bf16.msra.mxu0 %v10835_v38  ;;  %v1020_v27 = vld [vmem:[%s12486_s21 + $0x1468] sm:$0xff] }
 0x215   : > { %v6870_v58 = vpop.f32.mrf.mxu1  ;;  %v6830_v59 = vpop.f32.mrf.mxu0  ;;  %7123 = vmatprep.subr.bf16.mxu0 %v10828_v30  ;;  %v10924_v34 = vcombine.high %v1016_v25, %v1020_v27  ;;  %v880_v36 = vld [vmem:[%s12486_s21 + $0x1008] sm:$0xff]  ;;  %v10923_v30 = vcombine.low %v1016_v25, %v1020_v27 }
 0x216   : > { %7163 = vmatpush1.bf16.msra.mxu1 %v10963_v43  ;;  %v884_v37 = vld [vmem:[%s12486_s21 + $0x1028] sm:$0xff]  ;;  %v10795_v43 = vcombine.low %v888_v21, %v892_v24 }
 0x217   : > { %v6871_v63 = vpop.f32.mrf.mxu1  ;;  %7164 = vmatprep.subr.bf16.mxu1 %v10956_v39  ;;  %v1008_v38 = vld [vmem:[%s12486_s21 + $0x1408] sm:$0xff]  ;;  %v10788_v47 = vcombine.high %v880_v36, %v884_v37  ;;  %v10787_v42 = vcombine.low %v880_v36, %v884_v37 }
 0x218   : > { %7124 = vmatpush1.bf16.msra.mxu0 %v10827_v52  ;;  %v1012_v41 = vld [vmem:[%s12486_s21 + $0x1428] sm:$0xff] }
 0x219   : > { %7125 = vmatprep.subr.bf16.mxu0 %v10820_v62  ;;  %v10916_v49 = vcombine.high %v1008_v38, %v1012_v41  ;;  %v1000_v39 = vld [vmem:[%s12486_s21 + $0x13c8] sm:$0xff]  ;;  %v10915_v55 = vcombine.low %v1008_v38, %v1012_v41 }
 0x21a   : > { %7165 = vmatpush1.bf16.msra.mxu1 %v10955_v61  ;;  %v1132_v53 = vld [vmem:[%s12486_s21 + $0x17e8] sm:$0xff]  ;;  %v10908_v58 = vcombine.high %v1000_v39, %v1004_v50 }
 0x21b   : > { %7166 = vmatprep.subr.bf16.mxu1 %v10948_v1  ;;  %v11036_v52 = vcombine.high %v1128_v51, %v1132_v53  ;;  %v992_v59 = vld [vmem:[%s12486_s21 + $0x1388] sm:$0xff]  ;;  %v10907_v1 = vcombine.low %v1000_v39, %v1004_v50  ;;  %v11035_v2 = vcombine.low %v1128_v51, %v1132_v53 }
 0x21c   : > { %7126 = vmatpush1.bf16.msra.mxu0 %v10819_v8  ;;  %v996_v61 = vld [vmem:[%s12486_s21 + $0x13a8] sm:$0xff] }
 0x21d   : > { %7127 = vmatprep.subr.bf16.mxu0 %v10812_v26  ;;  %v1120_v62 = vld [vmem:[%s12486_s21 + $0x1788] sm:$0xff]  ;;  %v10900_v3 = vcombine.high %v992_v59, %v996_v61 }
 0x21e   : > { %7167 = vmatpush1.bf16.msra.mxu1 %v10947_v9  ;;  %v1124_v63 = vld [vmem:[%s12486_s21 + $0x17a8] sm:$0xff] }
 0x21f   : > { %7168 = vmatprep.subr.bf16.mxu1 %v10940_v60  ;;  %v11028_v5 = vcombine.high %v1120_v62, %v1124_v63  ;;  %v984_v6 = vld [vmem:[%s12486_s21 + $0x1348] sm:$0xff]  ;;  %v10899_v60 = vcombine.low %v992_v59, %v996_v61  ;;  %v11027_v13 = vcombine.low %v1120_v62, %v1124_v63 }
 0x220   : > { %7128 = vmatpush1.bf16.msra.mxu0 %v10811_v11  ;;  %v988_v8 = vld [vmem:[%s12486_s21 + $0x1368] sm:$0xff] }
 0x221   : > { %7129 = vmatprep.subr.bf16.mxu0 %v10804_v19  ;;  %v1112_v9 = vld [vmem:[%s12486_s21 + $0x1748] sm:$0xff]  ;;  %v10892_v15 = vcombine.high %v984_v6, %v988_v8 }
 0x222   : > { %7169 = vmatpush1.bf16.msra.mxu1 %v10939_v18  ;;  %v1116_v26 = vld [vmem:[%s12486_s21 + $0x1768] sm:$0xff] }
 0x223   : > { %7170 = vmatprep.subr.bf16.mxu1 %v10932_v20  ;;  %v11020_v16 = vcombine.high %v1112_v9, %v1116_v26  ;;  %v976_v54 = vld [vmem:[%s12486_s21 + $0x1308] sm:$0xff]  ;;  %v10891_v20 = vcombine.low %v984_v6, %v988_v8  ;;  %v11019_v21 = vcombine.low %v1112_v9, %v1116_v26 }
 0x224   : > { %7130 = vmatpush1.bf16.msra.mxu0 %v10803_v28  ;;  %v980_v11 = vld [vmem:[%s12486_s21 + $0x1328] sm:$0xff] }
 0x225   : > { %7131 = vmatprep.subr.bf16.mxu0 %v10796_v32  ;;  %v1104_v18 = vld [vmem:[%s12486_s21 + $0x1708] sm:$0xff]  ;;  %v10884_v24 = vcombine.high %v976_v54, %v980_v11 }
 0x226   : > { %7171 = vmatpush1.bf16.msra.mxu1 %v10931_v29  ;;  %v1108_v19 = vld [vmem:[%s12486_s21 + $0x1728] sm:$0xff] }
 0x227   : > { %7172 = vmatprep.subr.bf16.mxu1 %v10924_v34  ;;  %v11012_v25 = vcombine.high %v1104_v18, %v1108_v19  ;;  %v968_v27 = vld [vmem:[%s12486_s21 + $0x12c8] sm:$0xff]  ;;  %v10883_v34 = vcombine.low %v976_v54, %v980_v11  ;;  %v11011_v36 = vcombine.low %v1104_v18, %v1108_v19 }
 0x228   : > { %7132 = vmatpush1.bf16.msra.mxu0 %v10795_v43  ;;  %v972_v28 = vld [vmem:[%s12486_s21 + $0x12e8] sm:$0xff] }
 0x229   : > { %7133 = vmatprep.subr.bf16.mxu0 %v10788_v47  ;;  %v1096_v29 = vld [vmem:[%s12486_s21 + $0x16c8] sm:$0xff]  ;;  %v10876_v37 = vcombine.high %v968_v27, %v972_v28 }
 0x22a   : > { %7173 = vmatpush1.bf16.msra.mxu1 %v10923_v30  ;;  %v1100_v32 = vld [vmem:[%s12486_s21 + $0x16e8] sm:$0xff] }
 0x22b   : > { %7174 = vmatprep.subr.bf16.mxu1 %v10916_v49  ;;  %v11004_v38 = vcombine.high %v1096_v29, %v1100_v32  ;;  %v960_v41 = vld [vmem:[%s12486_s21 + $0x1288] sm:$0xff]  ;;  %v10875_v49 = vcombine.low %v968_v27, %v972_v28  ;;  %v11003_v39 = vcombine.low %v1096_v29, %v1100_v32 }
 0x22c   : > { %7134 = vmatpush1.bf16.msra.mxu0 %v10787_v42  ;;  %v964_v43 = vld [vmem:[%s12486_s21 + $0x12a8] sm:$0xff] }
 0x22d   : > { %7135 = vmatprep.subr.bf16.mxu0 %v10908_v58  ;;  %v1088_v30 = vld [vmem:[%s12486_s21 + $0x1688] sm:$0xff]  ;;  %v10868_v50 = vcombine.high %v960_v41, %v964_v43 }
 0x22e   : > { %7175 = vmatpush1.bf16.msra.mxu1 %v10915_v55  ;;  %v1092_v47 = vld [vmem:[%s12486_s21 + $0x16a8] sm:$0xff] }
 0x22f   : > { %7176 = vmatprep.subr.bf16.mxu1 %v11036_v52  ;;  %v10996_v51 = vcombine.high %v1088_v30, %v1092_v47  ;;  %v952_v53 = vld [vmem:[%s12486_s21 + $0x1248] sm:$0xff]  ;;  %v10867_v52 = vcombine.low %v960_v41, %v964_v43  ;;  %v10995_v59 = vcombine.low %v1088_v30, %v1092_v47 }
 0x230   : > { %7136 = vmatpush2.bf16.msra.mxu0 %v10907_v1  ;;  %v956_v42 = vld [vmem:[%s12486_s21 + $0x1268] sm:$0xff] }
 0x231   : > { %7137 = vmatprep.subr.bf16.mxu0 %v10900_v3  ;;  %v1080_v55 = vld [vmem:[%s12486_s21 + $0x1648] sm:$0xff]  ;;  %v10860_v61 = vcombine.high %v952_v53, %v956_v42 }
 0x232   : > { %7177 = vmatpush2.bf16.msra.mxu1 %v11035_v2  ;;  %v1084_v58 = vld [vmem:[%s12486_s21 + $0x1668] sm:$0xff] }
 0x233   : > { %7178 = vmatprep.subr.bf16.mxu1 %v11028_v5  ;;  %v10988_v62 = vcombine.high %v1080_v55, %v1084_v58  ;;  %v944_v63 = vld [vmem:[%s12486_s21 + $0x1208] sm:$0xff]  ;;  %v10859_v5 = vcombine.low %v952_v53, %v956_v42  ;;  %v10987_v6 = vcombine.low %v1080_v55, %v1084_v58 }
 0x234   : > { %7138 = vmatpush2.bf16.msra.mxu0 %v10899_v60  ;;  %v948_v1 = vld [vmem:[%s12486_s21 + $0x1228] sm:$0xff] }
 0x235   : > { %7139 = vmatprep.subr.bf16.mxu0 %v10892_v15  ;;  %v1072_v2 = vld [vmem:[%s12486_s21 + $0x1608] sm:$0xff]  ;;  %v10852_v8 = vcombine.high %v944_v63, %v948_v1 }
 0x236   : > { %7179 = vmatpush2.bf16.msra.mxu1 %v11027_v13  ;;  %v1076_v3 = vld [vmem:[%s12486_s21 + $0x1628] sm:$0xff] }
 0x237   : > { %7180 = vmatprep.subr.bf16.mxu1 %v11020_v16  ;;  %v10980_v9 = vcombine.high %v1072_v2, %v1076_v3  ;;  %v1192_v26 = vld [vmem:[%s12486_s21 + $0x19c8] sm:$0xff]  ;;  %v10851_v16 = vcombine.low %v944_v63, %v948_v1  ;;  %v10979_v54 = vcombine.low %v1072_v2, %v1076_v3 }
 0x238   : > { %7140 = vmatpush2.bf16.msra.mxu0 %v10891_v20  ;;  %v1196_v60 = vld [vmem:[%s12486_s21 + $0x19e8] sm:$0xff] }
 0x239   : > { %7141 = vmatprep.subr.bf16.mxu0 %v10884_v24  ;;  %v1320_v13 = vld [vmem:[%s12486_s21 + $0x1dc8] sm:$0xff]  ;;  %v11100_v11 = vcombine.high %v1192_v26, %v1196_v60 }
 0x23a   : > { %7181 = vmatpush2.bf16.msra.mxu1 %v11019_v21  ;;  %v1324_v15 = vld [vmem:[%s12486_s21 + $0x1de8] sm:$0xff] }
 0x23b   : > { %7182 = vmatprep.subr.bf16.mxu1 %v11012_v25  ;;  %v11228_v18 = vcombine.high %v1320_v13, %v1324_v15  ;;  %v1184_v19 = vld [vmem:[%s12486_s21 + $0x1988] sm:$0xff]  ;;  %v11099_v25 = vcombine.low %v1192_v26, %v1196_v60  ;;  %v11227_v27 = vcombine.low %v1320_v13, %v1324_v15 }
 0x23c   : > { %7142 = vmatpush2.bf16.msra.mxu0 %v10883_v34  ;;  %v1188_v20 = vld [vmem:[%s12486_s21 + $0x19a8] sm:$0xff] }
 0x23d   : > { %7143 = vmatprep.subr.bf16.mxu0 %v10876_v37  ;;  %v1312_v21 = vld [vmem:[%s12486_s21 + $0x1d88] sm:$0xff]  ;;  %v11092_v28 = vcombine.high %v1184_v19, %v1188_v20  ;;  %v11091_v30 = vcombine.low %v1184_v19, %v1188_v20 }
 0x23e   : > { %7183 = vmatpush2.bf16.msra.mxu1 %v11011_v36  ;;  %v1316_v24 = vld [vmem:[%s12486_s21 + $0x1da8] sm:$0xff] }
 0x23f   : > { %7184 = vmatprep.subr.bf16.mxu1 %v11004_v38  ;;  %v11220_v29 = vcombine.high %v1312_v21, %v1316_v24  ;;  %v1176_v32 = vld [vmem:[%s12486_s21 + $0x1948] sm:$0xff] }
 0x240   : > { %7144 = vmatpush2.bf16.msra.mxu0 %v10875_v49  ;;  %v1180_v34 = vld [vmem:[%s12486_s21 + $0x1968] sm:$0xff]  ;;  %v11219_v49 = vcombine.low %v1312_v21, %v1316_v24 }
 0x241   : > { %7145 = vmatprep.subr.bf16.mxu0 %v10868_v50  ;;  %v1304_v37 = vld [vmem:[%s12486_s21 + $0x1d48] sm:$0xff] }
 0x242   : > { %7185 = vmatpush2.bf16.msra.mxu1 %v11003_v39  ;;  %v1308_v38 = vld [vmem:[%s12486_s21 + $0x1d68] sm:$0xff]  ;;  %v11084_v39 = vcombine.high %v1176_v32, %v1180_v34 }
 0x243   : > { %7186 = vmatprep.subr.bf16.mxu1 %v10996_v51  ;;  %v1168_v42 = vld [vmem:[%s12486_s21 + $0x1908] sm:$0xff]  ;;  %v11211_v1 = vcombine.low %v1304_v37, %v1308_v38 }
 0x244   : > { %7146 = vmatpush2.bf16.msra.mxu0 %v10867_v52  ;;  %v1172_v55 = vld [vmem:[%s12486_s21 + $0x1928] sm:$0xff] }
 0x245   : > { %7147 = vmatprep.subr.bf16.mxu0 %v10860_v61  ;;  %v1296_v52 = vld [vmem:[%s12486_s21 + $0x1d08] sm:$0xff]  ;;  %v11076_v2 = vcombine.high %v1168_v42, %v1172_v55  ;;  %v11075_v13 = vcombine.low %v1168_v42, %v1172_v55 }
 0x246   : > { %7187 = vmatpush2.bf16.msra.mxu1 %v10995_v59  ;;  %v1300_v59 = vld [vmem:[%s12486_s21 + $0x1d28] sm:$0xff] }
 0x247   : > { %7188 = vmatprep.subr.bf16.mxu1 %v10988_v62  ;;  %v1288_v26 = vld [vmem:[%s12486_s21 + $0x1cc8] sm:$0xff]  ;;  %v11203_v15 = vcombine.low %v1296_v52, %v1300_v59 }
 0x248   : > { %7148 = vmatpush2.bf16.msra.mxu0 %v10859_v5  ;;  %v1292_v60 = vld [vmem:[%s12486_s21 + $0x1ce8] sm:$0xff] }
 0x249   : > { %7149 = vmatprep.subr.bf16.mxu0 %v10852_v8  ;;  %v1160_v8 = vld [vmem:[%s12486_s21 + $0x18c8] sm:$0xff]  ;;  %v11195_v24 = vcombine.low %v1288_v26, %v1292_v60 }
 0x24a   : > { %7189 = vmatpush2.bf16.msra.mxu1 %v10987_v6  ;;  %v11204_v6 = vcombine.high %v1296_v52, %v1300_v59  ;;  %v1280_v19 = vld [vmem:[%s12486_s21 + $0x1c88] sm:$0xff] }
 0x24b   : > { %7190 = vmatprep.subr.bf16.mxu1 %v10980_v9  ;;  %v1164_v9 = vld [vmem:[%s12486_s21 + $0x18e8] sm:$0xff] }
 0x24c   : > { %7150 = vmatpush2.bf16.msra.mxu0 %v10851_v16  ;;  %v11068_v16 = vcombine.high %v1160_v8, %v1164_v9  ;;  %v1284_v20 = vld [vmem:[%s12486_s21 + $0x1ca8] sm:$0xff]  ;;  %v11067_v21 = vcombine.low %v1160_v8, %v1164_v9 }
 0x24d   : > { %7201 = vmatprep.subr.bf16.mxu0 %v11100_v11  ;;  %v1152_v11 = vld [vmem:[%s12486_s21 + $0x1888] sm:$0xff] }
 0x24e   : > { %7191 = vmatpush2.bf16.msra.mxu1 %v10979_v54  ;;  %v11196_v54 = vcombine.high %v1288_v26, %v1292_v60  ;;  %v1256_v42 = vld [vmem:[%s12486_s21 + $0x1bc8] sm:$0xff] }
 0x24f   : > { %7242 = vmatprep.subr.bf16.mxu1 %v11228_v18  ;;  %v6907_v36 = vpop.f32.mrf.mxu0  ;;  %7152 = vmatmul.mubr.bf16.vlgmr.msra.gmra.mxu0 %v12794_v22  ;;  %v1156_v18 = vld [vmem:[%s12486_s21 + $0x18a8] sm:$0xff] }
 0x250   : > { %v6908_v41 = vadd.f32 %v6907_v36, %v13040_v46  ;;  %7202 = vmatpush1.bf16.msra.mxu0 %v11099_v25  ;;  %v11212_v46 = vcombine.high %v1304_v37, %v1308_v38  ;;  %7233 = vmatprep.mubr.bf16.mxu0 %v12801_v33  ;;  %v11060_v25 = vcombine.high %v1152_v11, %v1156_v18  ;;  %v1260_v55 = vld [vmem:[%s12486_s21 + $0x1be8] sm:$0xff] }
 0x251   : > { %v6948_v43 = vpop.f32.mrf.mxu1  ;;  %7193 = vmatmul.mubr.bf16.vlgmr.msra.gmra.mxu1 %v12805_v35  ;;  %v6909_v47 = vpop.f32.mrf.mxu0  ;;  %7203 = vmatprep.subr.bf16.mxu0 %v11092_v28  ;;  %v1144_v28 = vld [vmem:[%s12486_s21 + $0x1848] sm:$0xff]  ;;  %v11059_v36 = vcombine.low %v1152_v11, %v1156_v18  ;;  %v11187_v37 = vcombine.low %v1280_v19, %v1284_v20  ;;  %v11163_v8 = vcombine.low %v1256_v42, %v1260_v55 }
 0x252   : > { %7243 = vmatpush1.bf16.msra.mxu1 %v11227_v27  ;;  %v13114_v50 = vadd.f32 %v6948_v43, %v6908_v41  ;;  %v6910_v51 = vadd.f32 %v6909_v47, %v13049_v56  ;;  %7274 = vmatprep.mubr.bf16.mxu1 %v12814_v44  ;;  %v11083_v56 = vcombine.low %v1176_v32, %v1180_v34  ;;  %v1272_v32 = vld [vmem:[%s12486_s21 + $0x1c48] sm:$0xff] }
 0x253   : > { %v6950_v53 = vpop.f32.mrf.mxu1  ;;  %7244 = vmatprep.subr.bf16.mxu1 %v11220_v29  ;;  %v6911_v58 = vpop.f32.mrf.mxu0  ;;  %v11188_v27 = vcombine.high %v1280_v19, %v1284_v20  ;;  %v1148_v29 = vld [vmem:[%s12486_s21 + $0x1868] sm:$0xff] }
 0x254   : > { %v13123_v61 = vadd.f32 %v6950_v53, %v6910_v51  ;;  %7204 = vmatpush1.bf16.msra.mxu0 %v11091_v30  ;;  %v1276_v34 = vld [vmem:[%s12486_s21 + $0x1c68] sm:$0xff]  ;;  %v11052_v38 = vcombine.high %v1144_v28, %v1148_v29 }
 0x255   : > { %v6952_v62 = vpop.f32.mrf.mxu1  ;;  %v6912_v63 = vpop.f32.mrf.mxu0  ;;  %7205 = vmatprep.subr.bf16.mxu0 %v11084_v39  ;;  %v11180_v41 = vcombine.high %v1272_v32, %v1276_v34  ;;  %v1136_v43 = vld [vmem:[%s12486_s21 + $0x1808] sm:$0xff]  ;;  %v11051_v39 = vcombine.low %v1144_v28, %v1148_v29  ;;  %v11179_v51 = vcombine.low %v1272_v32, %v1276_v34 }
 0x256   : > { %7245 = vmatpush1.bf16.msra.mxu1 %v11219_v49  ;;  %v7947_v3 = vcombine.low %v13114_v50, %v13123_v61  ;;  %v1140_v30 = vld [vmem:[%s12486_s21 + $0x1828] sm:$0xff]  ;;  %v1281_v50 = vld [vmem:[%s12486_s21 + $0x1c90] sm:$0xff] }
 0x257   : > { %v6953_v5 = vpop.f32.mrf.mxu1  ;;  %7246 = vmatprep.subr.bf16.mxu1 %v11212_v46  ;;  %v1264_v47 = vld [vmem:[%s12486_s21 + $0x1c08] sm:$0xff]  ;;  %v11044_v53 = vcombine.high %v1136_v43, %v1140_v30  ;;  %v11043_v59 = vcombine.low %v1136_v43, %v1140_v30  ;;  %v1285_v61 = vld [vmem:[%s12486_s21 + $0x1cb0] sm:$0xff] }
 0x258   : > { %7206 = vmatpush1.bf16.msra.mxu0 %v11083_v56  ;;  %v1268_v49 = vld [vmem:[%s12486_s21 + $0x1c28] sm:$0xff]  ;;  %v11164_v56 = vcombine.high %v1256_v42, %v1260_v55 }
 0x259   : > { %7207 = vmatprep.subr.bf16.mxu0 %v11076_v2  ;;  %v11172_v46 = vcombine.high %v1264_v47, %v1268_v49  ;;  %v1384_v58 = vld [vmem:[%s12486_s21 + $0x1fc8] sm:$0xff]  ;;  %v11171_v62 = vcombine.low %v1264_v47, %v1268_v49 }
 0x25a   : > { %7247 = vmatpush1.bf16.msra.mxu1 %v11211_v1  ;;  %v1388_v52 = vld [vmem:[%s12486_s21 + $0x1fe8] sm:$0xff] }
 0x25b   : > { %7248 = vmatprep.subr.bf16.mxu1 %v11204_v6  ;;  %v11292_v63 = vcombine.high %v1384_v58, %v1388_v52  ;;  %v1248_v1 = vld [vmem:[%s12486_s21 + $0x1b88] sm:$0xff]  ;;  %v11291_v9 = vcombine.low %v1384_v58, %v1388_v52 }
 0x25c   : > { %7208 = vmatpush1.bf16.msra.mxu0 %v11075_v13  ;;  %v1252_v2 = vld [vmem:[%s12486_s21 + $0x1ba8] sm:$0xff] }
 0x25d   : > { %7209 = vmatprep.subr.bf16.mxu0 %v11068_v16  ;;  %v1376_v5 = vld [vmem:[%s12486_s21 + $0x1f88] sm:$0xff]  ;;  %v11156_v26 = vcombine.high %v1248_v1, %v1252_v2  ;;  %v11155_v11 = vcombine.low %v1248_v1, %v1252_v2 }
 0x25e   : > { %7249 = vmatpush1.bf16.msra.mxu1 %v11203_v15  ;;  %v1380_v6 = vld [vmem:[%s12486_s21 + $0x1fa8] sm:$0xff] }
 0x25f   : > { %7250 = vmatprep.subr.bf16.mxu1 %v11196_v54  ;;  %v11284_v60 = vcombine.high %v1376_v5, %v1380_v6  ;;  %v1240_v13 = vld [vmem:[%s12486_s21 + $0x1b48] sm:$0xff]  ;;  %v11283_v18 = vcombine.low %v1376_v5, %v1380_v6 }
 0x260   : > { %7210 = vmatpush1.bf16.msra.mxu0 %v11067_v21  ;;  %v1244_v15 = vld [vmem:[%s12486_s21 + $0x1b68] sm:$0xff] }
 0x261   : > { %7211 = vmatprep.subr.bf16.mxu0 %v11060_v25  ;;  %v1368_v16 = vld [vmem:[%s12486_s21 + $0x1f48] sm:$0xff]  ;;  %v11148_v19 = vcombine.high %v1240_v13, %v1244_v15  ;;  %v11147_v28 = vcombine.low %v1240_v13, %v1244_v15 }
 0x262   : > { %7251 = vmatpush1.bf16.msra.mxu1 %v11195_v24  ;;  %v1372_v54 = vld [vmem:[%s12486_s21 + $0x1f68] sm:$0xff] }
 0x263   : > { %7252 = vmatprep.subr.bf16.mxu1 %v11188_v27  ;;  %v11276_v20 = vcombine.high %v1368_v16, %v1372_v54  ;;  %v1232_v21 = vld [vmem:[%s12486_s21 + $0x1b08] sm:$0xff]  ;;  %v11275_v29 = vcombine.low %v1368_v16, %v1372_v54 }
 0x264   : > { %7212 = vmatpush1.bf16.msra.mxu0 %v11059_v36  ;;  %v1236_v24 = vld [vmem:[%s12486_s21 + $0x1b28] sm:$0xff] }
 0x265   : > { %7213 = vmatprep.subr.bf16.mxu0 %v11052_v38  ;;  %v1360_v25 = vld [vmem:[%s12486_s21 + $0x1f08] sm:$0xff]  ;;  %v11140_v32 = vcombine.high %v1232_v21, %v1236_v24  ;;  %v11139_v43 = vcombine.low %v1232_v21, %v1236_v24 }
 0x266   : > { %7253 = vmatpush1.bf16.msra.mxu1 %v11187_v37  ;;  %v1364_v27 = vld [vmem:[%s12486_s21 + $0x1f28] sm:$0xff] }
 0x267   : > { %7254 = vmatprep.subr.bf16.mxu1 %v11180_v41  ;;  %v11268_v34 = vcombine.high %v1360_v25, %v1364_v27  ;;  %v1224_v36 = vld [vmem:[%s12486_s21 + $0x1ac8] sm:$0xff]  ;;  %v11267_v30 = vcombine.low %v1360_v25, %v1364_v27 }
 0x268   : > { %7214 = vmatpush1.bf16.msra.mxu0 %v11051_v39  ;;  %v1228_v37 = vld [vmem:[%s12486_s21 + $0x1ae8] sm:$0xff] }
 0x269   : > { %7215 = vmatprep.subr.bf16.mxu0 %v11044_v53  ;;  %v1352_v38 = vld [vmem:[%s12486_s21 + $0x1ec8] sm:$0xff]  ;;  %v11132_v47 = vcombine.high %v1224_v36, %v1228_v37  ;;  %v11131_v42 = vcombine.low %v1224_v36, %v1228_v37 }
 0x26a   : > { %7255 = vmatpush1.bf16.msra.mxu1 %v11179_v51  ;;  %v1356_v41 = vld [vmem:[%s12486_s21 + $0x1ee8] sm:$0xff] }
 0x26b   : > { %7256 = vmatprep.subr.bf16.mxu1 %v11172_v46  ;;  %v11260_v49 = vcombine.high %v1352_v38, %v1356_v41  ;;  %v1216_v39 = vld [vmem:[%s12486_s21 + $0x1a88] sm:$0xff]  ;;  %v11259_v55 = vcombine.low %v1352_v38, %v1356_v41 }
 0x26c   : > { %7216 = vmatpush1.bf16.msra.mxu0 %v11043_v59  ;;  %v1220_v51 = vld [vmem:[%s12486_s21 + $0x1aa8] sm:$0xff] }
 0x26d   : > { %7217 = vmatprep.subr.bf16.mxu0 %v11164_v56  ;;  %v1344_v53 = vld [vmem:[%s12486_s21 + $0x1e88] sm:$0xff]  ;;  %v11124_v58 = vcombine.high %v1216_v39, %v1220_v51  ;;  %v11123_v1 = vcombine.low %v1216_v39, %v1220_v51  ;;  %v541_v39 = vld [vmem:[%s12486_s21 + $0x570] sm:$0xff] }
 0x26e   : > { %7257 = vmatpush1.bf16.msra.mxu1 %v11171_v62  ;;  %v1348_v46 = vld [vmem:[%s12486_s21 + $0x1ea8] sm:$0xff] }
 0x26f   : > { %7258 = vmatprep.subr.bf16.mxu1 %v11292_v63  ;;  %v11252_v52 = vcombine.high %v1344_v53, %v1348_v46  ;;  %v1208_v59 = vld [vmem:[%s12486_s21 + $0x1a48] sm:$0xff]  ;;  %v11251_v2 = vcombine.low %v1344_v53, %v1348_v46 }
 0x270   : > { %7218 = vmatpush2.bf16.msra.mxu0 %v11163_v8  ;;  %v1212_v62 = vld [vmem:[%s12486_s21 + $0x1a68] sm:$0xff] }
 0x271   : > { %7219 = vmatprep.subr.bf16.mxu0 %v11156_v26  ;;  %v1336_v56 = vld [vmem:[%s12486_s21 + $0x1e48] sm:$0xff]  ;;  %v11116_v5 = vcombine.high %v1208_v59, %v1212_v62  ;;  %v11115_v13 = vcombine.low %v1208_v59, %v1212_v62  ;;  %v401_v62 = vld [vmem:[%s12486_s21 + $0x110] sm:$0xff] }
 0x272   : > { %7259 = vmatpush2.bf16.msra.mxu1 %v11291_v9  ;;  %v1340_v63 = vld [vmem:[%s12486_s21 + $0x1e68] sm:$0xff] }
 0x273   : > { %7260 = vmatprep.subr.bf16.mxu1 %v11284_v60  ;;  %v11244_v6 = vcombine.high %v1336_v56, %v1340_v63  ;;  %v1200_v8 = vld [vmem:[%s12486_s21 + $0x1a08] sm:$0xff]  ;;  %v11243_v15 = vcombine.low %v1336_v56, %v1340_v63  ;;  %v405_v56 = vld [vmem:[%s12486_s21 + $0x130] sm:$0xff] }
 0x274   : > { %7220 = vmatpush2.bf16.msra.mxu0 %v11155_v11  ;;  %v1204_v9 = vld [vmem:[%s12486_s21 + $0x1a28] sm:$0xff]  ;;  %v425_v11 = vld [vmem:[%s12486_s21 + $0x1d0] sm:$0xff] }
 0x275   : > { %7221 = vmatprep.subr.bf16.mxu0 %v11148_v19  ;;  %v1328_v26 = vld [vmem:[%s12486_s21 + $0x1e08] sm:$0xff]  ;;  %v11108_v16 = vcombine.high %v1200_v8, %v1204_v9  ;;  %v553_v19 = vld [vmem:[%s12486_s21 + $0x5d0] sm:$0xff]  ;;  %v11107_v21 = vcombine.low %v1200_v8, %v1204_v9 }
 0x276   : > { %7261 = vmatpush2.bf16.msra.mxu1 %v11283_v18  ;;  %v1332_v60 = vld [vmem:[%s12486_s21 + $0x1e28] sm:$0xff]  ;;  %v429_v18 = vld [vmem:[%s12486_s21 + $0x1f0] sm:$0xff] }
 0x277   : > { %7262 = vmatprep.subr.bf16.mxu1 %v11276_v20  ;;  %v11236_v54 = vcombine.high %v1328_v26, %v1332_v60  ;;  %v557_v20 = vld [vmem:[%s12486_s21 + $0x5f0] sm:$0xff]  ;;  %v11235_v24 = vcombine.low %v1328_v26, %v1332_v60  ;;  %v10334_v25 = vcombine.high %v425_v11, %v429_v18  ;;  %v10333_v36 = vcombine.low %v425_v11, %v429_v18 }
 0x278   : > { %7222 = vmatpush2.bf16.msra.mxu0 %v11147_v28  ;;  %v10462_v27 = vcombine.high %v553_v19, %v557_v20  ;;  %v417_v28 = vld [vmem:[%s12486_s21 + $0x190] sm:$0xff]  ;;  %v10461_v37 = vcombine.low %v553_v19, %v557_v20  ;;  %v10310_v60 = vcombine.high %v401_v62, %v405_v56  ;;  %v10309_v19 = vcombine.low %v401_v62, %v405_v56 }
 0x279   : > { %7223 = vmatprep.subr.bf16.mxu0 %v11140_v32  ;;  %v545_v32 = vld [vmem:[%s12486_s21 + $0x590] sm:$0xff] }
 0x27a   : > { %7263 = vmatpush2.bf16.msra.mxu1 %v11275_v29  ;;  %v421_v29 = vld [vmem:[%s12486_s21 + $0x1b0] sm:$0xff] }
 0x27b   : > { %7264 = vmatprep.subr.bf16.mxu1 %v11268_v34  ;;  %v549_v34 = vld [vmem:[%s12486_s21 + $0x5b0] sm:$0xff]  ;;  %v10326_v38 = vcombine.high %v417_v28, %v421_v29  ;;  %v10325_v53 = vcombine.low %v417_v28, %v421_v29 }
 0x27c   : > { %7224 = vmatpush2.bf16.msra.mxu0 %v11139_v43  ;;  %v10454_v41 = vcombine.high %v545_v32, %v549_v34  ;;  %v409_v43 = vld [vmem:[%s12486_s21 + $0x150] sm:$0xff] }
 0x27d   : > { %7225 = vmatprep.subr.bf16.mxu0 %v11132_v47  ;;  %v521_v11 = vld [vmem:[%s12486_s21 + $0x4d0] sm:$0xff] }
 0x27e   : > { %7265 = vmatpush2.bf16.msra.mxu1 %v11267_v30  ;;  %v413_v30 = vld [vmem:[%s12486_s21 + $0x170] sm:$0xff] }
 0x27f   : > { %7266 = vmatprep.subr.bf16.mxu1 %v11260_v49  ;;  %v537_v49 = vld [vmem:[%s12486_s21 + $0x550] sm:$0xff]  ;;  %v10317_v8 = vcombine.low %v409_v43, %v413_v30 }
 0x280   : > { %7226 = vmatpush2.bf16.msra.mxu0 %v11131_v42  ;;  %v10446_v59 = vcombine.high %v537_v49, %v541_v39  ;;  %v10445_v26 = vcombine.low %v537_v49, %v541_v39  ;;  %v525_v18 = vld [vmem:[%s12486_s21 + $0x4f0] sm:$0xff] }
 0x281   : > { %7227 = vmatprep.subr.bf16.mxu0 %v11124_v58  ;;  %v10318_v58 = vcombine.high %v409_v43, %v413_v30  ;;  %v513_v28 = vld [vmem:[%s12486_s21 + $0x490] sm:$0xff] }
 0x282   : > { %7267 = vmatpush2.bf16.msra.mxu1 %v11259_v55  ;;  %v10453_v55 = vcombine.low %v545_v32, %v549_v34  ;;  %v517_v29 = vld [vmem:[%s12486_s21 + $0x4b0] sm:$0xff]  ;;  %v10429_v34 = vcombine.low %v521_v11, %v525_v18 }
 0x283   : > { %7268 = vmatprep.subr.bf16.mxu1 %v11252_v52  ;;  %v505_v43 = vld [vmem:[%s12486_s21 + $0x450] sm:$0xff]  ;;  %v10421_v49 = vcombine.low %v513_v28, %v517_v29 }
 0x284   : > { %7228 = vmatpush2.bf16.msra.mxu0 %v11123_v1  ;;  %v509_v30 = vld [vmem:[%s12486_s21 + $0x470] sm:$0xff] }
 0x285   : > { %7229 = vmatprep.subr.bf16.mxu0 %v11116_v5  ;;  %v533_v5 = vld [vmem:[%s12486_s21 + $0x530] sm:$0xff] }
 0x286   : > { %7269 = vmatpush2.bf16.msra.mxu1 %v11251_v2  ;;  %v529_v2 = vld [vmem:[%s12486_s21 + $0x510] sm:$0xff] }
 0x287   : > { %7270 = vmatprep.subr.bf16.mxu1 %v11244_v6  ;;  %v10437_v20 = vcombine.low %v529_v2, %v533_v5 }
 0x288   : > { %7230 = vmatpush2.bf16.msra.mxu0 %v11115_v13 }
 0x289   : > { %7231 = vmatprep.subr.bf16.mxu0 %v11108_v16  ;;  %v393_v16 = vld [vmem:[%s12486_s21 + $0xd0] sm:$0xff] }
 0x28a   : > { %7271 = vmatpush2.bf16.msra.mxu1 %v11243_v15  ;;  %v10438_v15 = vcombine.high %v529_v2, %v533_v5  ;;  %v493_v2 = vld [vmem:[%s12486_s21 + $0x3f0] sm:$0xff] }
 0x28b   : > { %7272 = vmatprep.subr.bf16.mxu1 %v11236_v54  ;;  %v397_v54 = vld [vmem:[%s12486_s21 + $0xf0] sm:$0xff] }
 0x28c   : > { %7232 = vmatpush2.bf16.msra.mxu0 %v11107_v21  ;;  %v10302_v21 = vcombine.high %v393_v16, %v397_v54  ;;  %v10301_v32 = vcombine.low %v393_v16, %v397_v54  ;;  %v617_v5 = vld [vmem:[%s12486_s21 + $0x7d0] sm:$0xff] }
 0x28d   : > { %7283 = vmatprep.subr.bf16.mxu0 %v10334_v25  ;;  %v385_v25 = vld [vmem:[%s12486_s21 + $0x90] sm:$0xff] }
 0x28e   : > { %7273 = vmatpush2.bf16.msra.mxu1 %v11235_v24  ;;  %v10430_v24 = vcombine.high %v521_v11, %v525_v18  ;;  %v609_v16 = vld [vmem:[%s12486_s21 + $0x790] sm:$0xff] }
 0x28f   : > { %7324 = vmatprep.subr.bf16.mxu1 %v10462_v27  ;;  %v6989_v47 = vpop.f32.mrf.mxu0  ;;  %7234 = vmatmul.mubr.bf16.vlgmr.msra.gmra.mxu0 %v12877_v7  ;;  %v389_v27 = vld [vmem:[%s12486_s21 + $0xb0] sm:$0xff] }
 0x290   : > { %7284 = vmatpush1.bf16.msra.mxu0 %v10333_v36  ;;  %7315 = vmatprep.mubr.bf16.mxu0 %v12560_v10  ;;  %v10294_v36 = vcombine.high %v385_v25, %v389_v27  ;;  %v613_v54 = vld [vmem:[%s12486_s21 + $0x7b0] sm:$0xff] }
 0x291   : > { %v7030_v51 = vpop.f32.mrf.mxu1  ;;  %7275 = vmatmul.mubr.bf16.vlgmr.msra.gmra.mxu1 %v12885_v17  ;;  %v6991_v42 = vpop.f32.mrf.mxu0  ;;  %7285 = vmatprep.subr.bf16.mxu0 %v10326_v38  ;;  %v377_v38 = vld [vmem:[%s12486_s21 + $0x50] sm:$0xff] }
 0x292   : > { %v13189_v46 = vadd.f32 %v7030_v51, %v6989_v47  ;;  %7325 = vmatpush1.bf16.msra.mxu1 %v10461_v37  ;;  %7356 = vmatprep.mubr.bf16.mxu1 %v12567_v14  ;;  %v10422_v37 = vcombine.high %v513_v28, %v517_v29  ;;  %v10293_v47 = vcombine.low %v385_v25, %v389_v27  ;;  %v601_v25 = vld [vmem:[%s12486_s21 + $0x750] sm:$0xff] }
 0x293   : > { %v7032_v52 = vpop.f32.mrf.mxu1  ;;  %7326 = vmatprep.subr.bf16.mxu1 %v10454_v41  ;;  %v6993_v1 = vpop.f32.mrf.mxu0  ;;  %v381_v41 = vld [vmem:[%s12486_s21 + $0x70] sm:$0xff]  ;;  %v10414_v51 = vcombine.high %v505_v43, %v509_v30  ;;  %v10517_v29 = vcombine.low %v609_v16, %v613_v54 }
 0x294   : > { %v13194_v63 = vadd.f32 %v7032_v52, %v6991_v42  ;;  %7286 = vmatpush1.bf16.msra.mxu0 %v10325_v53  ;;  %v10286_v39 = vcombine.high %v377_v38, %v381_v41  ;;  %v369_v53 = vld [vmem:[%s12486_s21 + $0x10] sm:$0xff]  ;;  %v10285_v52 = vcombine.low %v377_v38, %v381_v41 }
 0x295   : > { %v7034_v6 = vpop.f32.mrf.mxu1  ;;  %v6994_v9 = vpop.f32.mrf.mxu0  ;;  %7287 = vmatprep.subr.bf16.mxu0 %v10318_v58  ;;  %v373_v42 = vld [vmem:[%s12486_s21 + $0x30] sm:$0xff] }
 0x296   : > { %7327 = vmatpush1.bf16.msra.mxu1 %v10453_v55  ;;  %v497_v55 = vld [vmem:[%s12486_s21 + $0x410] sm:$0xff]  ;;  %v10278_v62 = vcombine.high %v369_v53, %v373_v42 }
 0x297   : > { %v7035_v13 = vpop.f32.mrf.mxu1  ;;  %7328 = vmatprep.subr.bf16.mxu1 %v10446_v59  ;;  %v501_v58 = vld [vmem:[%s12486_s21 + $0x430] sm:$0xff]  ;;  %v10413_v59 = vcombine.low %v505_v43, %v509_v30 }
 0x298   : > { %7288 = vmatpush1.bf16.msra.mxu0 %v10317_v8  ;;  %v10406_v56 = vcombine.high %v497_v55, %v501_v58  ;;  %v489_v1 = vld [vmem:[%s12486_s21 + $0x3d0] sm:$0xff]  ;;  %v10277_v8 = vcombine.low %v369_v53, %v373_v42  ;;  %v10405_v9 = vcombine.low %v497_v55, %v501_v58 }
 0x299   : > { %7289 = vmatprep.subr.bf16.mxu0 %v10310_v60  ;;  %v621_v6 = vld [vmem:[%s12486_s21 + $0x7f0] sm:$0xff]  ;;  %v10397_v11 = vcombine.low %v489_v1, %v493_v2 }
 0x29a   : > { %7329 = vmatpush1.bf16.msra.mxu1 %v10445_v26  ;;  %v10398_v26 = vcombine.high %v489_v1, %v493_v2  ;;  %v10526_v60 = vcombine.high %v617_v5, %v621_v6  ;;  %v481_v13 = vld [vmem:[%s12486_s21 + $0x390] sm:$0xff]  ;;  %v10525_v18 = vcombine.low %v617_v5, %v621_v6 }
 0x29b   : > { %7330 = vmatprep.subr.bf16.mxu1 %v10438_v15  ;;  %v485_v15 = vld [vmem:[%s12486_s21 + $0x3b0] sm:$0xff] }
 0x29c   : > { %7290 = vmatpush1.bf16.msra.mxu0 %v10309_v19  ;;  %v10390_v19 = vcombine.high %v481_v13, %v485_v15  ;;  %v605_v27 = vld [vmem:[%s12486_s21 + $0x770] sm:$0xff]  ;;  %v10389_v28 = vcombine.low %v481_v13, %v485_v15 }
 0x29d   : > { %7291 = vmatprep.subr.bf16.mxu0 %v10302_v21  ;;  %v473_v21 = vld [vmem:[%s12486_s21 + $0x350] sm:$0xff]  ;;  %v10509_v30 = vcombine.low %v601_v25, %v605_v27 }
 0x29e   : > { %7331 = vmatpush1.bf16.msra.mxu1 %v10437_v20  ;;  %v10518_v20 = vcombine.high %v609_v16, %v613_v54  ;;  %v593_v38 = vld [vmem:[%s12486_s21 + $0x710] sm:$0xff] }
 0x29f   : > { %7332 = vmatprep.subr.bf16.mxu1 %v10430_v24  ;;  %v477_v24 = vld [vmem:[%s12486_s21 + $0x370] sm:$0xff] }
 0x2a0   : > { %7292 = vmatpush1.bf16.msra.mxu0 %v10301_v32  ;;  %v10382_v32 = vcombine.high %v473_v21, %v477_v24  ;;  %v597_v41 = vld [vmem:[%s12486_s21 + $0x730] sm:$0xff]  ;;  %v10381_v43 = vcombine.low %v473_v21, %v477_v24 }
 0x2a1   : > { %7293 = vmatprep.subr.bf16.mxu0 %v10294_v36  ;;  %v465_v36 = vld [vmem:[%s12486_s21 + $0x310] sm:$0xff]  ;;  %v10501_v58 = vcombine.low %v593_v38, %v597_v41 }
 0x2a2   : > { %7333 = vmatpush1.bf16.msra.mxu1 %v10429_v34  ;;  %v10510_v34 = vcombine.high %v601_v25, %v605_v27  ;;  %v585_v53 = vld [vmem:[%s12486_s21 + $0x6d0] sm:$0xff] }
 0x2a3   : > { %7334 = vmatprep.subr.bf16.mxu1 %v10422_v37  ;;  %v469_v37 = vld [vmem:[%s12486_s21 + $0x330] sm:$0xff] }
 0x2a4   : > { %7294 = vmatpush1.bf16.msra.mxu0 %v10293_v47  ;;  %v10374_v47 = vcombine.high %v465_v36, %v469_v37  ;;  %v589_v42 = vld [vmem:[%s12486_s21 + $0x6f0] sm:$0xff]  ;;  %v10373_v55 = vcombine.low %v465_v36, %v469_v37 }
 0x2a5   : > { %7295 = vmatprep.subr.bf16.mxu0 %v10286_v39  ;;  %v457_v39 = vld [vmem:[%s12486_s21 + $0x2d0] sm:$0xff]  ;;  %v10493_v6 = vcombine.low %v585_v53, %v589_v42 }
 0x2a6   : > { %7335 = vmatpush1.bf16.msra.mxu1 %v10421_v49  ;;  %v10502_v49 = vcombine.high %v593_v38, %v597_v41  ;;  %v577_v1 = vld [vmem:[%s12486_s21 + $0x690] sm:$0xff] }
 0x2a7   : > { %7336 = vmatprep.subr.bf16.mxu1 %v10414_v51  ;;  %v461_v51 = vld [vmem:[%s12486_s21 + $0x2f0] sm:$0xff] }
 0x2a8   : > { %7296 = vmatpush1.bf16.msra.mxu0 %v10285_v52  ;;  %v10366_v52 = vcombine.high %v457_v39, %v461_v51  ;;  %v581_v2 = vld [vmem:[%s12486_s21 + $0x6b0] sm:$0xff]  ;;  %v10365_v5 = vcombine.low %v457_v39, %v461_v51 }
 0x2a9   : > { %7297 = vmatprep.subr.bf16.mxu0 %v10278_v62  ;;  %v449_v62 = vld [vmem:[%s12486_s21 + $0x290] sm:$0xff]  ;;  %v10485_v54 = vcombine.low %v577_v1, %v581_v2 }
 0x2aa   : > { %7337 = vmatpush1.bf16.msra.mxu1 %v10413_v59  ;;  %v10494_v59 = vcombine.high %v585_v53, %v589_v42  ;;  %v569_v13 = vld [vmem:[%s12486_s21 + $0x650] sm:$0xff] }
 0x2ab   : > { %7338 = vmatprep.subr.bf16.mxu1 %v10406_v56  ;;  %v453_v56 = vld [vmem:[%s12486_s21 + $0x2b0] sm:$0xff] }
 0x2ac   : > { %7298 = vmatpush1.bf16.msra.mxu0 %v10277_v8  ;;  %v10358_v8 = vcombine.high %v449_v62, %v453_v56  ;;  %v573_v15 = vld [vmem:[%s12486_s21 + $0x670] sm:$0xff]  ;;  %v10357_v16 = vcombine.low %v449_v62, %v453_v56 }
 0x2ad   : > { %7299 = vmatprep.subr.bf16.mxu0 %v10398_v26  ;;  %v441_v26 = vld [vmem:[%s12486_s21 + $0x250] sm:$0xff]  ;;  %v10477_v27 = vcombine.low %v569_v13, %v573_v15 }
 0x2ae   : > { %7339 = vmatpush1.bf16.msra.mxu1 %v10405_v9  ;;  %v10486_v9 = vcombine.high %v577_v1, %v581_v2  ;;  %v561_v21 = vld [vmem:[%s12486_s21 + $0x610] sm:$0xff] }
 0x2af   : > { %7340 = vmatprep.subr.bf16.mxu1 %v10526_v60  ;;  %v445_v60 = vld [vmem:[%s12486_s21 + $0x270] sm:$0xff] }
 0x2b0   : > { %7300 = vmatpush2.bf16.msra.mxu0 %v10397_v11  ;;  %v10350_v11 = vcombine.high %v441_v26, %v445_v60  ;;  %v565_v24 = vld [vmem:[%s12486_s21 + $0x630] sm:$0xff]  ;;  %v10349_v25 = vcombine.low %v441_v26, %v445_v60 }
 0x2b1   : > { %7301 = vmatprep.subr.bf16.mxu0 %v10390_v19  ;;  %v433_v19 = vld [vmem:[%s12486_s21 + $0x210] sm:$0xff]  ;;  %v10469_v41 = vcombine.low %v561_v21, %v565_v24 }
 0x2b2   : > { %7341 = vmatpush2.bf16.msra.mxu1 %v10525_v18  ;;  %v10478_v18 = vcombine.high %v569_v13, %v573_v15  ;;  %v809_v36 = vld [vmem:[%s12486_s21 + $0xdd0] sm:$0xff] }
 0x2b3   : > { %7342 = vmatprep.subr.bf16.mxu1 %v10518_v20  ;;  %v437_v20 = vld [vmem:[%s12486_s21 + $0x230] sm:$0xff] }
 0x2b4   : > { %7302 = vmatpush2.bf16.msra.mxu0 %v10389_v28  ;;  %v10342_v28 = vcombine.high %v433_v19, %v437_v20  ;;  %v813_v37 = vld [vmem:[%s12486_s21 + $0xdf0] sm:$0xff]  ;;  %v10341_v38 = vcombine.low %v433_v19, %v437_v20 }
 0x2b5   : > { %7303 = vmatprep.subr.bf16.mxu0 %v10382_v32  ;;  %v681_v32 = vld [vmem:[%s12486_s21 + $0x9d0] sm:$0xff]  ;;  %v10717_v42 = vcombine.low %v809_v36, %v813_v37 }
 0x2b6   : > { %7343 = vmatpush2.bf16.msra.mxu1 %v10517_v29  ;;  %v10470_v29 = vcombine.high %v561_v21, %v565_v24  ;;  %v801_v39 = vld [vmem:[%s12486_s21 + $0xd90] sm:$0xff] }
 0x2b7   : > { %7344 = vmatprep.subr.bf16.mxu1 %v10510_v34  ;;  %v685_v34 = vld [vmem:[%s12486_s21 + $0x9f0] sm:$0xff] }
 0x2b8   : > { %7304 = vmatpush2.bf16.msra.mxu0 %v10381_v43  ;;  %v10590_v43 = vcombine.high %v681_v32, %v685_v34  ;;  %v805_v51 = vld [vmem:[%s12486_s21 + $0xdb0] sm:$0xff]  ;;  %v10589_v53 = vcombine.low %v681_v32, %v685_v34 }
 0x2b9   : > { %7305 = vmatprep.subr.bf16.mxu0 %v10374_v47  ;;  %v673_v47 = vld [vmem:[%s12486_s21 + $0x990] sm:$0xff] }
 0x2ba   : > { %7345 = vmatpush2.bf16.msra.mxu1 %v10509_v30  ;;  %v10718_v30 = vcombine.high %v809_v36, %v813_v37  ;;  %v793_v56 = vld [vmem:[%s12486_s21 + $0xd50] sm:$0xff] }
 0x2bb   : > { %7346 = vmatprep.subr.bf16.mxu1 %v10502_v49  ;;  %v677_v49 = vld [vmem:[%s12486_s21 + $0x9b0] sm:$0xff] }
 0x2bc   : > { %7306 = vmatpush2.bf16.msra.mxu0 %v10373_v55  ;;  %v10582_v55 = vcombine.high %v673_v47, %v677_v49  ;;  %v797_v1 = vld [vmem:[%s12486_s21 + $0xd70] sm:$0xff] }
 0x2bd   : > { %7307 = vmatprep.subr.bf16.mxu0 %v10366_v52  ;;  %v665_v52 = vld [vmem:[%s12486_s21 + $0x950] sm:$0xff] }
 0x2be   : > { %7347 = vmatpush2.bf16.msra.mxu1 %v10501_v58  ;;  %v10710_v58 = vcombine.high %v801_v39, %v805_v51  ;;  %v789_v19 = vld [vmem:[%s12486_s21 + $0xd30] sm:$0xff] }
 0x2bf   : > { %7348 = vmatprep.subr.bf16.mxu1 %v10494_v59  ;;  %v669_v59 = vld [vmem:[%s12486_s21 + $0x970] sm:$0xff] }
 0x2c0   : > { %7308 = vmatpush2.bf16.msra.mxu0 %v10365_v5  ;;  %v10574_v26 = vcombine.high %v665_v52, %v669_v59  ;;  %v649_v32 = vld [vmem:[%s12486_s21 + $0x8d0] sm:$0xff] }
 0x2c1   : > { %7309 = vmatprep.subr.bf16.mxu0 %v10358_v8  ;;  %v653_v34 = vld [vmem:[%s12486_s21 + $0x8f0] sm:$0xff] }
 0x2c2   : > { %7349 = vmatpush2.bf16.msra.mxu1 %v10493_v6  ;;  %v10581_v6 = vcombine.low %v673_v47, %v677_v49  ;;  %v777_v36 = vld [vmem:[%s12486_s21 + $0xcd0] sm:$0xff] }
 0x2c3   : > { %7350 = vmatprep.subr.bf16.mxu1 %v10486_v9  ;;  %v10709_v9 = vcombine.low %v801_v39, %v805_v51  ;;  %v781_v37 = vld [vmem:[%s12486_s21 + $0xcf0] sm:$0xff] }
 0x2c4   : > { %7310 = vmatpush2.bf16.msra.mxu0 %v10357_v16  ;;  %v657_v16 = vld [vmem:[%s12486_s21 + $0x910] sm:$0xff] }
 0x2c5   : > { %7311 = vmatprep.subr.bf16.mxu0 %v10350_v11  ;;  %v641_v47 = vld [vmem:[%s12486_s21 + $0x890] sm:$0xff] }
 0x2c6   : > { %7351 = vmatpush2.bf16.msra.mxu1 %v10485_v54  ;;  %v661_v54 = vld [vmem:[%s12486_s21 + $0x930] sm:$0xff] }
 0x2c7   : > { %7352 = vmatprep.subr.bf16.mxu1 %v10478_v18  ;;  %v785_v18 = vld [vmem:[%s12486_s21 + $0xd10] sm:$0xff] }
 0x2c8   : > { %7312 = vmatpush2.bf16.msra.mxu0 %v10349_v25  ;;  %v10701_v25 = vcombine.low %v793_v56, %v797_v1  ;;  %v645_v49 = vld [vmem:[%s12486_s21 + $0x8b0] sm:$0xff] }
 0x2c9   : > { %7313 = vmatprep.subr.bf16.mxu0 %v10342_v28  ;;  %v769_v39 = vld [vmem:[%s12486_s21 + $0xc90] sm:$0xff] }
 0x2ca   : > { %7353 = vmatpush2.bf16.msra.mxu1 %v10477_v27  ;;  %v10566_v27 = vcombine.high %v657_v16, %v661_v54  ;;  %v773_v51 = vld [vmem:[%s12486_s21 + $0xcb0] sm:$0xff] }
 0x2cb   : > { %7354 = vmatprep.subr.bf16.mxu1 %v10470_v29  ;;  %v10694_v29 = vcombine.high %v785_v18, %v789_v19 }
 0x2cc   : > { %7314 = vmatpush2.bf16.msra.mxu0 %v10341_v38  ;;  %v10565_v38 = vcombine.low %v657_v16, %v661_v54 }
 0x2cd   : > { %7365 = vmatprep.subr.bf16.mxu0 %v10590_v43  ;;  %v10558_v43 = vcombine.high %v649_v32, %v653_v34 }
 0x2ce   : > { %7355 = vmatpush2.bf16.msra.mxu1 %v10469_v41  ;;  %v10693_v41 = vcombine.low %v785_v18, %v789_v19  ;;  %v749_v18 = vld [vmem:[%s12486_s21 + $0xbf0] sm:$0xff] }
 0x2cf   : > { %7406 = vmatprep.subr.bf16.mxu1 %v10718_v30  ;;  %v7071_v62 = vpop.f32.mrf.mxu0  ;;  %7316 = vmatmul.mubr.bf16.vlgmr.msra.gmra.mxu0 %v12611_v23  ;;  %v10686_v30 = vcombine.high %v777_v36, %v781_v37  ;;  %v873_v19 = vld [vmem:[%s12486_s21 + $0xfd0] sm:$0xff] }
 0x2d0   : > { %v7072_v2 = vadd.f32 %v7071_v62, %v13189_v46  ;;  %7366 = vmatpush1.bf16.msra.mxu0 %v10589_v53  ;;  %v10702_v46 = vcombine.high %v793_v56, %v797_v1  ;;  %7397 = vmatprep.mubr.bf16.mxu0 %v12618_v31  ;;  %v10557_v53 = vcombine.low %v649_v32, %v653_v34  ;;  %v761_v62 = vld [vmem:[%s12486_s21 + $0xc50] sm:$0xff] }
 0x2d1   : > { %v7112_v5 = vpop.f32.mrf.mxu1  ;;  %7357 = vmatmul.mubr.bf16.vlgmr.msra.gmra.mxu1 %v12622_v0  ;;  %v7073_v8 = vpop.f32.mrf.mxu0  ;;  %7367 = vmatprep.subr.bf16.mxu0 %v10582_v55  ;;  %v10550_v55 = vcombine.high %v641_v47, %v645_v49  ;;  %v765_v56 = vld [vmem:[%s12486_s21 + $0xc70] sm:$0xff]  ;;  %v10549_v1 = vcombine.low %v641_v47, %v645_v49 }
 0x2d2   : > { %7407 = vmatpush1.bf16.msra.mxu1 %v10717_v42  ;;  %v13262_v60 = vadd.f32 %v7112_v5, %v7072_v2  ;;  %v7074_v13 = vadd.f32 %v7073_v8, %v13194_v63  ;;  %7438 = vmatprep.mubr.bf16.mxu1 %v12631_v40  ;;  %v10573_v63 = vcombine.low %v665_v52, %v669_v59  ;;  %v633_v52 = vld [vmem:[%s12486_s21 + $0x850] sm:$0xff] }
 0x2d3   : > { %v7114_v15 = vpop.f32.mrf.mxu1  ;;  %7408 = vmatprep.subr.bf16.mxu1 %v10710_v58  ;;  %v7075_v11 = vpop.f32.mrf.mxu0  ;;  %v10685_v42 = vcombine.low %v777_v36, %v781_v37  ;;  %v10678_v58 = vcombine.high %v769_v39, %v773_v51  ;;  %v637_v59 = vld [vmem:[%s12486_s21 + $0x870] sm:$0xff]  ;;  %v10677_v2 = vcombine.low %v769_v39, %v773_v51 }
 0x2d4   : > { %v13271_v20 = vadd.f32 %v7114_v15, %v7074_v13  ;;  %7368 = vmatpush1.bf16.msra.mxu0 %v10581_v6  ;;  %v10542_v5 = vcombine.high %v633_v52, %v637_v59  ;;  %v10670_v6 = vcombine.high %v761_v62, %v765_v56  ;;  %v625_v8 = vld [vmem:[%s12486_s21 + $0x810] sm:$0xff]  ;;  %v10541_v15 = vcombine.low %v633_v52, %v637_v59 }
 0x2d5   : > { %v7116_v21 = vpop.f32.mrf.mxu1  ;;  %v7076_v24 = vpop.f32.mrf.mxu0  ;;  %7369 = vmatprep.subr.bf16.mxu0 %v10574_v26  ;;  %v753_v26 = vld [vmem:[%s12486_s21 + $0xc10] sm:$0xff] }
 0x2d6   : > { %7409 = vmatpush1.bf16.msra.mxu1 %v10709_v9  ;;  %v629_v9 = vld [vmem:[%s12486_s21 + $0x830] sm:$0xff] }
 0x2d7   : > { %v7117_v28 = vpop.f32.mrf.mxu1  ;;  %7410 = vmatprep.subr.bf16.mxu1 %v10702_v46  ;;  %v757_v13 = vld [vmem:[%s12486_s21 + $0xc30] sm:$0xff]  ;;  %v10669_v46 = vcombine.low %v761_v62, %v765_v56  ;;  %v10534_v16 = vcombine.high %v625_v8, %v629_v9 }
 0x2d8   : > { %7370 = vmatpush1.bf16.msra.mxu0 %v10573_v63  ;;  %v10662_v54 = vcombine.high %v753_v26, %v757_v13  ;;  %v745_v11 = vld [vmem:[%s12486_s21 + $0xbd0] sm:$0xff]  ;;  %v10533_v63 = vcombine.low %v625_v8, %v629_v9  ;;  %v10661_v24 = vcombine.low %v753_v26, %v757_v13 }
 0x2d9   : > { %7371 = vmatprep.subr.bf16.mxu0 %v10566_v27  ;;  %v877_v21 = vld [vmem:[%s12486_s21 + $0xff0] sm:$0xff]  ;;  %v10653_v36 = vcombine.low %v745_v11, %v749_v18 }
 0x2da   : > { %7411 = vmatpush1.bf16.msra.mxu1 %v10701_v25  ;;  %v10654_v25 = vcombine.high %v745_v11, %v749_v18  ;;  %v10782_v27 = vcombine.high %v873_v19, %v877_v21  ;;  %v737_v28 = vld [vmem:[%s12486_s21 + $0xb90] sm:$0xff]  ;;  %v10781_v37 = vcombine.low %v873_v19, %v877_v21 }
 0x2db   : > { %7412 = vmatprep.subr.bf16.mxu1 %v10694_v29  ;;  %v741_v29 = vld [vmem:[%s12486_s21 + $0xbb0] sm:$0xff] }
 0x2dc   : > { %7372 = vmatpush1.bf16.msra.mxu0 %v10565_v38  ;;  %v865_v32 = vld [vmem:[%s12486_s21 + $0xf90] sm:$0xff]  ;;  %v10646_v38 = vcombine.high %v737_v28, %v741_v29  ;;  %v10645_v39 = vcombine.low %v737_v28, %v741_v29 }
 0x2dd   : > { %7373 = vmatprep.subr.bf16.mxu0 %v10558_v43  ;;  %v869_v34 = vld [vmem:[%s12486_s21 + $0xfb0] sm:$0xff] }
 0x2de   : > { %7413 = vmatpush1.bf16.msra.mxu1 %v10693_v41  ;;  %v10774_v41 = vcombine.high %v865_v32, %v869_v34  ;;  %v729_v43 = vld [vmem:[%s12486_s21 + $0xb50] sm:$0xff]  ;;  %v10773_v51 = vcombine.low %v865_v32, %v869_v34 }
 0x2df   : > { %7414 = vmatprep.subr.bf16.mxu1 %v10686_v30  ;;  %v733_v30 = vld [vmem:[%s12486_s21 + $0xb70] sm:$0xff] }
 0x2e0   : > { %7374 = vmatpush1.bf16.msra.mxu0 %v10557_v53  ;;  %v857_v47 = vld [vmem:[%s12486_s21 + $0xf50] sm:$0xff]  ;;  %v10638_v53 = vcombine.high %v729_v43, %v733_v30  ;;  %v10637_v62 = vcombine.low %v729_v43, %v733_v30 }
 0x2e1   : > { %7375 = vmatprep.subr.bf16.mxu0 %v10550_v55  ;;  %v861_v49 = vld [vmem:[%s12486_s21 + $0xf70] sm:$0xff] }
 0x2e2   : > { %7415 = vmatpush1.bf16.msra.mxu1 %v10685_v42  ;;  %v10766_v42 = vcombine.high %v857_v47, %v861_v49  ;;  %v721_v55 = vld [vmem:[%s12486_s21 + $0xb10] sm:$0xff]  ;;  %v10765_v56 = vcombine.low %v857_v47, %v861_v49 }
 0x2e3   : > { %7416 = vmatprep.subr.bf16.mxu1 %v10678_v58  ;;  %v725_v58 = vld [vmem:[%s12486_s21 + $0xb30] sm:$0xff] }
 0x2e4   : > { %7376 = vmatpush1.bf16.msra.mxu0 %v10549_v1  ;;  %v849_v52 = vld [vmem:[%s12486_s21 + $0xf10] sm:$0xff]  ;;  %v10630_v1 = vcombine.high %v721_v55, %v725_v58  ;;  %v10629_v26 = vcombine.low %v721_v55, %v725_v58 }
 0x2e5   : > { %7377 = vmatprep.subr.bf16.mxu0 %v10542_v5  ;;  %v853_v59 = vld [vmem:[%s12486_s21 + $0xf30] sm:$0xff] }
 0x2e6   : > { %7417 = vmatpush1.bf16.msra.mxu1 %v10677_v2  ;;  %v10758_v2 = vcombine.high %v849_v52, %v853_v59  ;;  %v713_v5 = vld [vmem:[%s12486_s21 + $0xad0] sm:$0xff]  ;;  %v10757_v13 = vcombine.low %v849_v52, %v853_v59 }
 0x2e7   : > { %7418 = vmatprep.subr.bf16.mxu1 %v10670_v6  ;;  %v717_v6 = vld [vmem:[%s12486_s21 + $0xaf0] sm:$0xff] }
 0x2e8   : > { %7378 = vmatpush1.bf16.msra.mxu0 %v10541_v15  ;;  %v841_v8 = vld [vmem:[%s12486_s21 + $0xed0] sm:$0xff]  ;;  %v10622_v15 = vcombine.high %v713_v5, %v717_v6  ;;  %v10621_v19 = vcombine.low %v713_v5, %v717_v6 }
 0x2e9   : > { %7379 = vmatprep.subr.bf16.mxu0 %v10534_v16  ;;  %v845_v9 = vld [vmem:[%s12486_s21 + $0xef0] sm:$0xff] }
 0x2ea   : > { %7419 = vmatpush1.bf16.msra.mxu1 %v10669_v46  ;;  %v10750_v46 = vcombine.high %v841_v8, %v845_v9  ;;  %v705_v16 = vld [vmem:[%s12486_s21 + $0xa90] sm:$0xff]  ;;  %v10749_v21 = vcombine.low %v841_v8, %v845_v9 }
 0x2eb   : > { %7420 = vmatprep.subr.bf16.mxu1 %v10662_v54  ;;  %v709_v54 = vld [vmem:[%s12486_s21 + $0xab0] sm:$0xff] }
 0x2ec   : > { %7380 = vmatpush1.bf16.msra.mxu0 %v10533_v63  ;;  %v833_v11 = vld [vmem:[%s12486_s21 + $0xe90] sm:$0xff]  ;;  %v10614_v63 = vcombine.high %v705_v16, %v709_v54  ;;  %v10613_v32 = vcombine.low %v705_v16, %v709_v54 }
 0x2ed   : > { %7381 = vmatprep.subr.bf16.mxu0 %v10654_v25  ;;  %v837_v18 = vld [vmem:[%s12486_s21 + $0xeb0] sm:$0xff] }
 0x2ee   : > { %7421 = vmatpush1.bf16.msra.mxu1 %v10661_v24  ;;  %v10742_v24 = vcombine.high %v833_v11, %v837_v18  ;;  %v697_v25 = vld [vmem:[%s12486_s21 + $0xa50] sm:$0xff]  ;;  %v10741_v34 = vcombine.low %v833_v11, %v837_v18 }
 0x2ef   : > { %7422 = vmatprep.subr.bf16.mxu1 %v10782_v27  ;;  %v701_v27 = vld [vmem:[%s12486_s21 + $0xa70] sm:$0xff] }
 0x2f0   : > { %7382 = vmatpush2.bf16.msra.mxu0 %v10653_v36  ;;  %v825_v28 = vld [vmem:[%s12486_s21 + $0xe50] sm:$0xff]  ;;  %v10606_v36 = vcombine.high %v697_v25, %v701_v27  ;;  %v10605_v47 = vcombine.low %v697_v25, %v701_v27 }
 0x2f1   : > { %7383 = vmatprep.subr.bf16.mxu0 %v10646_v38  ;;  %v829_v29 = vld [vmem:[%s12486_s21 + $0xe70] sm:$0xff] }
 0x2f2   : > { %7423 = vmatpush2.bf16.msra.mxu1 %v10781_v37  ;;  %v10734_v37 = vcombine.high %v825_v28, %v829_v29  ;;  %v689_v38 = vld [vmem:[%s12486_s21 + $0xa10] sm:$0xff]  ;;  %v10733_v49 = vcombine.low %v825_v28, %v829_v29 }
 0x2f3   : > { %7424 = vmatprep.subr.bf16.mxu1 %v10774_v41  ;;  %v693_v41 = vld [vmem:[%s12486_s21 + $0xa30] sm:$0xff] }
 0x2f4   : > { %7384 = vmatpush2.bf16.msra.mxu0 %v10645_v39  ;;  %v817_v43 = vld [vmem:[%s12486_s21 + $0xe10] sm:$0xff]  ;;  %v10598_v39 = vcombine.high %v689_v38, %v693_v41  ;;  %v10597_v52 = vcombine.low %v689_v38, %v693_v41 }
 0x2f5   : > { %7385 = vmatprep.subr.bf16.mxu0 %v10638_v53  ;;  %v821_v30 = vld [vmem:[%s12486_s21 + $0xe30] sm:$0xff] }
 0x2f6   : > { %7425 = vmatpush2.bf16.msra.mxu1 %v10773_v51  ;;  %v10726_v51 = vcombine.high %v817_v43, %v821_v30  ;;  %v937_v53 = vld [vmem:[%s12486_s21 + $0x11d0] sm:$0xff]  ;;  %v10725_v59 = vcombine.low %v817_v43, %v821_v30 }
 0x2f7   : > { %7426 = vmatprep.subr.bf16.mxu1 %v10766_v42  ;;  %v941_v42 = vld [vmem:[%s12486_s21 + $0x11f0] sm:$0xff] }
 0x2f8   : > { %7386 = vmatpush2.bf16.msra.mxu0 %v10637_v62  ;;  %v1065_v55 = vld [vmem:[%s12486_s21 + $0x15d0] sm:$0xff]  ;;  %v10846_v62 = vcombine.high %v937_v53, %v941_v42  ;;  %v10845_v8 = vcombine.low %v937_v53, %v941_v42 }
 0x2f9   : > { %7387 = vmatprep.subr.bf16.mxu0 %v10630_v1  ;;  %v1069_v58 = vld [vmem:[%s12486_s21 + $0x15f0] sm:$0xff] }
 0x2fa   : > { %7427 = vmatpush2.bf16.msra.mxu1 %v10765_v56  ;;  %v10974_v56 = vcombine.high %v1065_v55, %v1069_v58  ;;  %v929_v1 = vld [vmem:[%s12486_s21 + $0x1190] sm:$0xff]  ;;  %v10973_v9 = vcombine.low %v1065_v55, %v1069_v58 }
 0x2fb   : > { %7428 = vmatprep.subr.bf16.mxu1 %v10758_v2  ;;  %v933_v2 = vld [vmem:[%s12486_s21 + $0x11b0] sm:$0xff] }
 0x2fc   : > { %7388 = vmatpush2.bf16.msra.mxu0 %v10629_v26  ;;  %v1057_v5 = vld [vmem:[%s12486_s21 + $0x1590] sm:$0xff]  ;;  %v10838_v26 = vcombine.high %v929_v1, %v933_v2 }
 0x2fd   : > { %7389 = vmatprep.subr.bf16.mxu0 %v10622_v15  ;;  %v1061_v6 = vld [vmem:[%s12486_s21 + $0x15b0] sm:$0xff] }
 0x2fe   : > { %7429 = vmatpush2.bf16.msra.mxu1 %v10757_v13  ;;  %v10966_v13 = vcombine.high %v1057_v5, %v1061_v6  ;;  %v921_v15 = vld [vmem:[%s12486_s21 + $0x1150] sm:$0xff] }
 0x2ff   : > { %7430 = vmatprep.subr.bf16.mxu1 %v10750_v46  ;;  %v925_v46 = vld [vmem:[%s12486_s21 + $0x1170] sm:$0xff] }
 0x300   : > { %7390 = vmatpush2.bf16.msra.mxu0 %v10621_v19  ;;  %v1049_v54 = vld [vmem:[%s12486_s21 + $0x1550] sm:$0xff]  ;;  %v10837_v19 = vcombine.low %v929_v1, %v933_v2  ;;  %v10829_v38 = vcombine.low %v921_v15, %v925_v46 }
 0x301   : > { %7391 = vmatprep.subr.bf16.mxu0 %v10614_v63  ;;  %v1053_v11 = vld [vmem:[%s12486_s21 + $0x1570] sm:$0xff]  ;;  %v10965_v63 = vcombine.low %v1057_v5, %v1061_v6 }
 0x302   : > { %7431 = vmatpush2.bf16.msra.mxu1 %v10749_v21  ;;  %v10958_v27 = vcombine.high %v1049_v54, %v1053_v11  ;;  %v913_v28 = vld [vmem:[%s12486_s21 + $0x1110] sm:$0xff]  ;;  %v10957_v43 = vcombine.low %v1049_v54, %v1053_v11 }
 0x303   : > { %7432 = vmatprep.subr.bf16.mxu1 %v10742_v24  ;;  %v10830_v24 = vcombine.high %v921_v15, %v925_v46  ;;  %v917_v29 = vld [vmem:[%s12486_s21 + $0x1130] sm:$0xff] }
 0x304   : > { %7392 = vmatpush2.bf16.msra.mxu0 %v10613_v32  ;;  %v10822_v30 = vcombine.high %v913_v28, %v917_v29  ;;  %v1033_v53 = vld [vmem:[%s12486_s21 + $0x14d0] sm:$0xff]  ;;  %v10821_v55 = vcombine.low %v913_v28, %v917_v29 }
 0x305   : > { %7393 = vmatprep.subr.bf16.mxu0 %v10606_v36  ;;  %v1045_v36 = vld [vmem:[%s12486_s21 + $0x1530] sm:$0xff] }
 0x306   : > { %7433 = vmatpush2.bf16.msra.mxu1 %v10741_v34  ;;  %v1041_v34 = vld [vmem:[%s12486_s21 + $0x1510] sm:$0xff] }
 0x307   : > { %7434 = vmatprep.subr.bf16.mxu1 %v10734_v37  ;;  %v1037_v42 = vld [vmem:[%s12486_s21 + $0x14f0] sm:$0xff]  ;;  %v10949_v58 = vcombine.low %v1041_v34, %v1045_v36 }
 0x308   : > { %7394 = vmatpush2.bf16.msra.mxu0 %v10605_v47  ;;  %v1025_v1 = vld [vmem:[%s12486_s21 + $0x1490] sm:$0xff]  ;;  %v10941_v6 = vcombine.low %v1033_v53, %v1037_v42 }
 0x309   : > { %7395 = vmatprep.subr.bf16.mxu0 %v10598_v39  ;;  %v905_v39 = vld [vmem:[%s12486_s21 + $0x10d0] sm:$0xff] }
 0x30a   : > { %7435 = vmatpush2.bf16.msra.mxu1 %v10733_v49  ;;  %v10950_v49 = vcombine.high %v1041_v34, %v1045_v36  ;;  %v1029_v2 = vld [vmem:[%s12486_s21 + $0x14b0] sm:$0xff] }
 0x30b   : > { %7436 = vmatprep.subr.bf16.mxu1 %v10726_v51  ;;  %v909_v51 = vld [vmem:[%s12486_s21 + $0x10f0] sm:$0xff]  ;;  %v10933_v11 = vcombine.low %v1025_v1, %v1029_v2 }
 0x30c   : > { %7396 = vmatpush2.bf16.msra.mxu0 %v10597_v52  ;;  %v10814_v52 = vcombine.high %v905_v39, %v909_v51  ;;  %v10813_v5 = vcombine.low %v905_v39, %v909_v51  ;;  %v1017_v15 = vld [vmem:[%s12486_s21 + $0x1450] sm:$0xff] }
 0x30d   : > { %7447 = vmatprep.subr.bf16.mxu0 %v10846_v62  ;;  %v897_v62 = vld [vmem:[%s12486_s21 + $0x1090] sm:$0xff] }
 0x30e   : > { %7437 = vmatpush2.bf16.msra.mxu1 %v10725_v59  ;;  %v10942_v59 = vcombine.high %v1033_v53, %v1037_v42  ;;  %v1021_v46 = vld [vmem:[%s12486_s21 + $0x1470] sm:$0xff] }
 0x30f   : > { %7488 = vmatprep.subr.bf16.mxu1 %v10974_v56  ;;  %v13331_v16 = vpop.f32.mrf.mxu0  ;;  %7398 = vmatmul.mubr.bf16.vlgmr.msra.gmra.mxu0 %v12704_v48  ;;  %v901_v56 = vld [vmem:[%s12486_s21 + $0x10b0] sm:$0xff]  ;;  %v10925_v34 = vcombine.low %v1017_v15, %v1021_v46 }
 0x310   : > { %7448 = vmatpush1.bf16.msra.mxu0 %v10845_v8  ;;  %7479 = vmatprep.mubr.bf16.mxu0 %v12711_v57  ;;  %v10806_v8 = vcombine.high %v897_v62, %v901_v56  ;;  %v10805_v54 = vcombine.low %v897_v62, %v901_v56  ;;  %v1009_v28 = vld [vmem:[%s12486_s21 + $0x1410] sm:$0xff] }
 0x311   : > { %v13336_v18 = vpop.f32.mrf.mxu1  ;;  %7439 = vmatmul.mubr.bf16.vlgmr.msra.gmra.mxu1 %v12715_v12  ;;  %v13339_v21 = vpop.f32.mrf.mxu0  ;;  %7449 = vmatprep.subr.bf16.mxu0 %v10838_v26  ;;  %v889_v26 = vld [vmem:[%s12486_s21 + $0x1050] sm:$0xff] }
 0x312   : > { %7489 = vmatpush1.bf16.msra.mxu1 %v10973_v9  ;;  %7520 = vmatprep.mubr.bf16.mxu1 %v12724_v4  ;;  %v10934_v9 = vcombine.high %v1025_v1, %v1029_v2  ;;  %v1013_v29 = vld [vmem:[%s12486_s21 + $0x1430] sm:$0xff] }
 0x313   : > { %v13341_v25 = vpop.f32.mrf.mxu1  ;;  %7490 = vmatprep.subr.bf16.mxu1 %v10966_v13  ;;  %v7157_v32 = vpop.f32.mrf.mxu0  ;;  %v893_v13 = vld [vmem:[%s12486_s21 + $0x1070] sm:$0xff] }
 0x314   : > { %7450 = vmatpush1.bf16.msra.mxu0 %v10837_v19  ;;  %v10798_v19 = vcombine.high %v889_v26, %v893_v13  ;;  %v10797_v32 = vcombine.low %v889_v26, %v893_v13  ;;  %v993_v53 = vld [vmem:[%s12486_s21 + $0x1390] sm:$0xff] }
 0x315   : > { %v7198_v37 = vpop.f32.mrf.mxu1  ;;  %v7158_v41 = vpop.f32.mrf.mxu0  ;;  %7451 = vmatprep.subr.bf16.mxu0 %v10830_v24  ;;  %v881_v24 = vld [vmem:[%s12486_s21 + $0x1010] sm:$0xff] }
 0x316   : > { %7491 = vmatpush1.bf16.msra.mxu1 %v10965_v63  ;;  %v10926_v63 = vcombine.high %v1017_v15, %v1021_v46  ;;  %v10918_v37 = vcombine.high %v1009_v28, %v1013_v29  ;;  %v1005_v41 = vld [vmem:[%s12486_s21 + $0x13f0] sm:$0xff] }
 0x317   : > { %v7199_v47 = vpop.f32.mrf.mxu1  ;;  %7492 = vmatprep.subr.bf16.mxu1 %v10958_v27  ;;  %v885_v27 = vld [vmem:[%s12486_s21 + $0x1030] sm:$0xff] }
 0x318   : > { %7452 = vmatpush1.bf16.msra.mxu0 %v10829_v38  ;;  %v10790_v36 = vcombine.high %v881_v24, %v885_v27  ;;  %v1001_v38 = vld [vmem:[%s12486_s21 + $0x13d0] sm:$0xff]  ;;  %v10789_v47 = vcombine.low %v881_v24, %v885_v27 }
 0x319   : > { %7453 = vmatprep.subr.bf16.mxu0 %v10822_v30  ;;  %v1133_v30 = vld [vmem:[%s12486_s21 + $0x17f0] sm:$0xff]  ;;  %v10910_v39 = vcombine.high %v1001_v38, %v1005_v41 }
 0x31a   : > { %7493 = vmatpush1.bf16.msra.mxu1 %v10957_v43  ;;  %v1129_v43 = vld [vmem:[%s12486_s21 + $0x17d0] sm:$0xff] }
 0x31b   : > { %7494 = vmatprep.subr.bf16.mxu1 %v10950_v49  ;;  %v10917_v49 = vcombine.low %v1009_v28, %v1013_v29  ;;  %v11038_v51 = vcombine.high %v1129_v43, %v1133_v30  ;;  %v997_v42 = vld [vmem:[%s12486_s21 + $0x13b0] sm:$0xff] }
 0x31c   : > { %7454 = vmatpush1.bf16.msra.mxu0 %v10821_v55  ;;  %v1121_v55 = vld [vmem:[%s12486_s21 + $0x1790] sm:$0xff]  ;;  %v10902_v62 = vcombine.high %v993_v53, %v997_v42 }
 0x31d   : > { %7455 = vmatprep.subr.bf16.mxu0 %v10814_v52  ;;  %v10909_v52 = vcombine.low %v1001_v38, %v1005_v41  ;;  %v985_v1 = vld [vmem:[%s12486_s21 + $0x1350] sm:$0xff] }
 0x31e   : > { %7495 = vmatpush1.bf16.msra.mxu1 %v10949_v58  ;;  %v1125_v58 = vld [vmem:[%s12486_s21 + $0x17b0] sm:$0xff] }
 0x31f   : > { %7496 = vmatprep.subr.bf16.mxu1 %v10942_v59  ;;  %v11037_v59 = vcombine.low %v1129_v43, %v1133_v30  ;;  %v11030_v56 = vcombine.high %v1121_v55, %v1125_v58  ;;  %v989_v2 = vld [vmem:[%s12486_s21 + $0x1370] sm:$0xff] }
 0x320   : > { %7456 = vmatpush1.bf16.msra.mxu0 %v10813_v5  ;;  %v1113_v5 = vld [vmem:[%s12486_s21 + $0x1750] sm:$0xff]  ;;  %v10894_v26 = vcombine.high %v985_v1, %v989_v2 }
 0x321   : > { %7457 = vmatprep.subr.bf16.mxu0 %v10806_v8  ;;  %v10901_v8 = vcombine.low %v993_v53, %v997_v42  ;;  %v977_v15 = vld [vmem:[%s12486_s21 + $0x1310] sm:$0xff] }
 0x322   : > { %7497 = vmatpush1.bf16.msra.mxu1 %v10941_v6  ;;  %v1117_v6 = vld [vmem:[%s12486_s21 + $0x1770] sm:$0xff] }
 0x323   : > { %7498 = vmatprep.subr.bf16.mxu1 %v10934_v9  ;;  %v11029_v9 = vcombine.low %v1121_v55, %v1125_v58  ;;  %v11022_v13 = vcombine.high %v1113_v5, %v1117_v6  ;;  %v981_v46 = vld [vmem:[%s12486_s21 + $0x1330] sm:$0xff] }
 0x324   : > { %7458 = vmatpush1.bf16.msra.mxu0 %v10805_v54  ;;  %v1105_v54 = vld [vmem:[%s12486_s21 + $0x1710] sm:$0xff]  ;;  %v10886_v24 = vcombine.high %v977_v15, %v981_v46 }
 0x325   : > { %7459 = vmatprep.subr.bf16.mxu0 %v10798_v19  ;;  %v10893_v19 = vcombine.low %v985_v1, %v989_v2  ;;  %v969_v28 = vld [vmem:[%s12486_s21 + $0x12d0] sm:$0xff] }
 0x326   : > { %7499 = vmatpush1.bf16.msra.mxu1 %v10933_v11  ;;  %v1109_v11 = vld [vmem:[%s12486_s21 + $0x1730] sm:$0xff] }
 0x327   : > { %7500 = vmatprep.subr.bf16.mxu1 %v10926_v63  ;;  %v11021_v63 = vcombine.low %v1113_v5, %v1117_v6  ;;  %v11014_v27 = vcombine.high %v1105_v54, %v1109_v11  ;;  %v973_v29 = vld [vmem:[%s12486_s21 + $0x12f0] sm:$0xff] }
 0x328   : > { %7460 = vmatpush1.bf16.msra.mxu0 %v10797_v32  ;;  %v1097_v32 = vld [vmem:[%s12486_s21 + $0x16d0] sm:$0xff]  ;;  %v10878_v38 = vcombine.high %v969_v28, %v973_v29 }
 0x329   : > { %7461 = vmatprep.subr.bf16.mxu0 %v10790_v36  ;;  %v10885_v36 = vcombine.low %v977_v15, %v981_v46  ;;  %v961_v43 = vld [vmem:[%s12486_s21 + $0x1290] sm:$0xff] }
 0x32a   : > { %7501 = vmatpush1.bf16.msra.mxu1 %v10925_v34  ;;  %v1101_v34 = vld [vmem:[%s12486_s21 + $0x16f0] sm:$0xff] }
 0x32b   : > { %7502 = vmatprep.subr.bf16.mxu1 %v10918_v37  ;;  %v11013_v37 = vcombine.low %v1105_v54, %v1109_v11  ;;  %v11006_v41 = vcombine.high %v1097_v32, %v1101_v34  ;;  %v965_v30 = vld [vmem:[%s12486_s21 + $0x12b0] sm:$0xff] }
 0x32c   : > { %7462 = vmatpush1.bf16.msra.mxu0 %v10789_v47  ;;  %v1089_v47 = vld [vmem:[%s12486_s21 + $0x1690] sm:$0xff]  ;;  %v10870_v53 = vcombine.high %v961_v43, %v965_v30 }
 0x32d   : > { %7463 = vmatprep.subr.bf16.mxu0 %v10910_v39  ;;  %v10877_v39 = vcombine.low %v969_v28, %v973_v29  ;;  %v953_v55 = vld [vmem:[%s12486_s21 + $0x1250] sm:$0xff]  ;;  %v7154_v29 = vadd.f32 %v13331_v16, %v13262_v60 }
 0x32e   : > { %7503 = vmatpush1.bf16.msra.mxu1 %v10917_v49  ;;  %v1093_v49 = vld [vmem:[%s12486_s21 + $0x16b0] sm:$0xff] }
 0x32f   : > { %7504 = vmatprep.subr.bf16.mxu1 %v11038_v51  ;;  %v11005_v51 = vcombine.low %v1097_v32, %v1101_v34  ;;  %v10998_v42 = vcombine.high %v1089_v47, %v1093_v49  ;;  %v957_v58 = vld [vmem:[%s12486_s21 + $0x1270] sm:$0xff] }
 0x330   : > { %7464 = vmatpush2.bf16.msra.mxu0 %v10909_v52  ;;  %v1081_v52 = vld [vmem:[%s12486_s21 + $0x1650] sm:$0xff]  ;;  %v10862_v1 = vcombine.high %v953_v55, %v957_v58 }
 0x331   : > { %7465 = vmatprep.subr.bf16.mxu0 %v10902_v62  ;;  %v10869_v62 = vcombine.low %v961_v43, %v965_v30  ;;  %v945_v5 = vld [vmem:[%s12486_s21 + $0x1210] sm:$0xff]  ;;  %v7156_v30 = vadd.f32 %v13339_v21, %v13271_v20 }
 0x332   : > { %7505 = vmatpush2.bf16.msra.mxu1 %v11037_v59  ;;  %v1085_v59 = vld [vmem:[%s12486_s21 + $0x1670] sm:$0xff] }
 0x333   : > { %7506 = vmatprep.subr.bf16.mxu1 %v11030_v56  ;;  %v10997_v56 = vcombine.low %v1089_v47, %v1093_v49  ;;  %v10990_v2 = vcombine.high %v1081_v52, %v1085_v59  ;;  %v949_v6 = vld [vmem:[%s12486_s21 + $0x1230] sm:$0xff]  ;;  %v7195_v49 = vadd.f32 %v13336_v18, %v7154_v29  ;;  %v7197_v20 = vadd.f32 %v13341_v25, %v7156_v30 }
 0x334   : > { %7466 = vmatpush2.bf16.msra.mxu0 %v10901_v8  ;;  %v1073_v8 = vld [vmem:[%s12486_s21 + $0x1610] sm:$0xff]  ;;  %v10854_v15 = vcombine.high %v945_v5, %v949_v6 }
 0x335   : > { %7467 = vmatprep.subr.bf16.mxu0 %v10894_v26  ;;  %v10861_v26 = vcombine.low %v953_v55, %v957_v58  ;;  %v1193_v54 = vld [vmem:[%s12486_s21 + $0x19d0] sm:$0xff] }
 0x336   : > { %7507 = vmatpush2.bf16.msra.mxu1 %v11029_v9  ;;  %v1077_v9 = vld [vmem:[%s12486_s21 + $0x1630] sm:$0xff] }
 0x337   : > { %7508 = vmatprep.subr.bf16.mxu1 %v11022_v13  ;;  %v10989_v13 = vcombine.low %v1081_v52, %v1085_v59  ;;  %v10982_v46 = vcombine.high %v1073_v8, %v1077_v9  ;;  %v1197_v11 = vld [vmem:[%s12486_s21 + $0x19f0] sm:$0xff] }
 0x338   : > { %7468 = vmatpush2.bf16.msra.mxu0 %v10893_v19  ;;  %v1321_v19 = vld [vmem:[%s12486_s21 + $0x1dd0] sm:$0xff]  ;;  %v11102_v28 = vcombine.high %v1193_v54, %v1197_v11  ;;  %v11101_v47 = vcombine.low %v1193_v54, %v1197_v11 }
 0x339   : > { %7469 = vmatprep.subr.bf16.mxu0 %v10886_v24  ;;  %v10853_v24 = vcombine.low %v945_v5, %v949_v6  ;;  %v1185_v34 = vld [vmem:[%s12486_s21 + $0x1990] sm:$0xff] }
 0x33a   : > { %7509 = vmatpush2.bf16.msra.mxu1 %v11021_v63  ;;  %v1325_v63 = vld [vmem:[%s12486_s21 + $0x1df0] sm:$0xff] }
 0x33b   : > { %7510 = vmatprep.subr.bf16.mxu1 %v11014_v27  ;;  %v10981_v27 = vcombine.low %v1073_v8, %v1077_v9  ;;  %v11230_v32 = vcombine.high %v1321_v19, %v1325_v63  ;;  %v11229_v60 = vcombine.low %v1321_v19, %v1325_v63  ;;  %v1305_v55 = vld [vmem:[%s12486_s21 + $0x1d50] sm:$0xff] }
 0x33c   : > { %7470 = vmatpush2.bf16.msra.mxu0 %v10885_v36  ;;  %v1189_v36 = vld [vmem:[%s12486_s21 + $0x19b0] sm:$0xff] }
 0x33d   : > { %7471 = vmatprep.subr.bf16.mxu0 %v10878_v38  ;;  %v1317_v38 = vld [vmem:[%s12486_s21 + $0x1db0] sm:$0xff]  ;;  %v11094_v16 = vcombine.high %v1185_v34, %v1189_v36  ;;  %v11093_v18 = vcombine.low %v1185_v34, %v1189_v36 }
 0x33e   : > { %7511 = vmatpush2.bf16.msra.mxu1 %v11013_v37  ;;  %v1313_v37 = vld [vmem:[%s12486_s21 + $0x1d90] sm:$0xff] }
 0x33f   : > { %7512 = vmatprep.subr.bf16.mxu1 %v11006_v41  ;;  %v12300_v41 = vmov 1983009808   ;;  %v1309_v58 = vld [vmem:[%s12486_s21 + $0x1d70] sm:$0xff] }
 0x340   : > { %7472 = vmatpush2.bf16.msra.mxu0 %v10877_v39  ;;  %v7950_v43 = vunpack.c.l.s4 %v12300_v41  ;;  %v11222_v39 = vcombine.high %v1313_v37, %v1317_v38  ;;  %v11214_v6 = vcombine.high %v1305_v55, %v1309_v58  ;;  %v1169_v8 = vld [vmem:[%s12486_s21 + $0x1910] sm:$0xff] }
 0x341   : > { %7473 = vmatprep.subr.bf16.mxu0 %v10870_v53  ;;  %v1181_v53 = vld [vmem:[%s12486_s21 + $0x1970] sm:$0xff] }
 0x342   : > { %7513 = vmatpush2.bf16.msra.mxu1 %v11005_v51  ;;  %v1177_v51 = vld [vmem:[%s12486_s21 + $0x1950] sm:$0xff]  ;;  %v7951_v52 = vunpack.c.0.s8 %v7950_v43 }
 0x343   : > { %7514 = vmatprep.subr.bf16.mxu1 %v10998_v42  ;;  %v1173_v25 = vld [vmem:[%s12486_s21 + $0x1930] sm:$0xff]  ;;  %v11085_v19 = vcombine.low %v1177_v51, %v1181_v53 }
 0x344   : > { %7474 = vmatpush2.bf16.msra.mxu0 %v10869_v62  ;;  %v1161_v34 = vld [vmem:[%s12486_s21 + $0x18d0] sm:$0xff]  ;;  %v11077_v30 = vcombine.low %v1169_v8, %v1173_v25 }
 0x345   : > { %7475 = vmatprep.subr.bf16.mxu0 %v10862_v1  ;;  %v11086_v1 = vcombine.high %v1177_v51, %v1181_v53  ;;  %v1165_v36 = vld [vmem:[%s12486_s21 + $0x18f0] sm:$0xff] }
 0x346   : > { %7515 = vmatpush2.bf16.msra.mxu1 %v10997_v56  ;;  %v11221_v56 = vcombine.low %v1313_v37, %v1317_v38  ;;  %v1289_v37 = vld [vmem:[%s12486_s21 + $0x1cd0] sm:$0xff] }
 0x347   : > { %7516 = vmatprep.subr.bf16.mxu1 %v10990_v2  ;;  %v1293_v38 = vld [vmem:[%s12486_s21 + $0x1cf0] sm:$0xff] }
 0x348   : > { %7476 = vmatpush2.bf16.msra.mxu0 %v10861_v26  ;;  %v1297_v26 = vld [vmem:[%s12486_s21 + $0x1d10] sm:$0xff] }
 0x349   : > { %7477 = vmatprep.subr.bf16.mxu0 %v10854_v15  ;;  %v13424_v15 = vsub.s32 %v7951_v52, %v12529_v45  ;;  %v1153_v51 = vld [vmem:[%s12486_s21 + $0x1890] sm:$0xff]  ;;  %v11190_v52 = vcombine.high %v1281_v50, %v1285_v61 }
 0x34a   : > { %7517 = vmatpush2.bf16.msra.mxu1 %v10989_v13  ;;  %v1301_v13 = vld [vmem:[%s12486_s21 + $0x1d30] sm:$0xff] }
 0x34b   : > { %7518 = vmatprep.subr.bf16.mxu1 %v10982_v46  ;;  %v7955_v41 = vrot.slane %v7947_v3, %v13424_v15  ;;  %v1157_v53 = vld [vmem:[%s12486_s21 + $0x18b0] sm:$0xff] }
 0x34c   : > { %7478 = vmatpush2.bf16.msra.mxu0 %v10853_v24  ;;  %v11213_v24 = vcombine.low %v1305_v55, %v1309_v58  ;;  %v11197_v55 = vcombine.low %v1289_v37, %v1293_v38  ;;  %v11062_v58 = vcombine.high %v1153_v51, %v1157_v53 }
 0x34d   : > { %7529 = vmatprep.subr.bf16.mxu0 %v11102_v28 }
 0x34e   : > { %7519 = vmatpush2.bf16.msra.mxu1 %v10981_v27  ;;  %v11078_v27 = vcombine.high %v1169_v8, %v1173_v25  ;;  %v1265_v8 = vld [vmem:[%s12486_s21 + $0x1c10] sm:$0xff] }
 0x34f   : > { %7570 = vmatprep.subr.bf16.mxu1 %v11230_v32  ;;  %v7235_v42 = vpop.f32.mrf.mxu0  ;;  %7480 = vmatmul.mubr.bf16.vlgmr.msra.gmra.mxu0 %v12794_v22  ;;  %v11206_v32 = vcombine.high %v1297_v26, %v1301_v13  ;;  %v1269_v25 = vld [vmem:[%s12486_s21 + $0x1c30] sm:$0xff] }
 0x350   : > { %v7236_v21 = vadd.f32 %v7235_v42, %v7195_v49  ;;  %7530 = vmatpush1.bf16.msra.mxu0 %v11101_v47  ;;  %7561 = vmatprep.mubr.bf16.mxu0 %v12801_v33  ;;  %v365_v47 = vld [vmem:[#allocation2] sm:$0xff]  ;;  %v11069_v42 = vcombine.low %v1161_v34, %v1165_v36 }
 0x351   : > { %v7276_v59 = vpop.f32.mrf.mxu1  ;;  %7521 = vmatmul.mubr.bf16.vlgmr.msra.gmra.mxu1 %v12805_v35  ;;  %v7237_v62 = vpop.f32.mrf.mxu0  ;;  %7531 = vmatprep.subr.bf16.mxu0 %v11094_v16  ;;  %v11070_v16 = vcombine.high %v1161_v34, %v1165_v36  ;;  %v1253_v34 = vld [vmem:[%s12486_s21 + $0x1bb0] sm:$0xff] }
 0x352   : > { %7571 = vmatpush1.bf16.msra.mxu1 %v11229_v60  ;;  %v7238_v2 = vadd.f32 %v7237_v62, %v7197_v20  ;;  %7602 = vmatprep.mubr.bf16.mxu1 %v12814_v44  ;;  %v7277_v46 = vadd.f32 %v7276_v59, %v7236_v21  ;;  %v11205_v60 = vcombine.low %v1297_v26, %v1301_v13  ;;  %v1145_v20 = vld [vmem:[%s12486_s21 + $0x1850] sm:$0xff] }
 0x353   : > { %v7278_v5 = vpop.f32.mrf.mxu1  ;;  %7572 = vmatprep.subr.bf16.mxu1 %v11222_v39  ;;  %v7239_v9 = vpop.f32.mrf.mxu0  ;;  %v11198_v39 = vcombine.high %v1289_v37, %v1293_v38  ;;  %v1149_v21 = vld [vmem:[%s12486_s21 + $0x1870] sm:$0xff]  ;;  %v11061_v62 = vcombine.low %v1153_v51, %v1157_v53 }
 0x354   : > { %v7279_v54 = vadd.f32 %v7278_v5, %v7238_v2  ;;  %7532 = vmatpush1.bf16.msra.mxu0 %v11093_v18  ;;  %v1273_v59 = vld [vmem:[%s12486_s21 + $0x1c50] sm:$0xff]  ;;  %v11053_v9 = vcombine.low %v1145_v20, %v1149_v21 }
 0x355   : > { %v7280_v11 = vpop.f32.mrf.mxu1  ;;  %v7240_v63 = vpop.f32.mrf.mxu0  ;;  %7533 = vmatprep.subr.bf16.mxu0 %v11086_v1  ;;  %v1277_v18 = vld [vmem:[%s12486_s21 + $0x1c70] sm:$0xff]  ;;  %v11054_v1 = vcombine.high %v1145_v20, %v1149_v21 }
 0x356   : > { %7573 = vmatpush1.bf16.msra.mxu1 %v11221_v56  ;;  %v7948_v28 = vcombine.low %v7277_v46, %v7279_v54  ;;  %v11189_v56 = vcombine.low %v1281_v50, %v1285_v61  ;;  %v11182_v2 = vcombine.high %v1273_v59, %v1277_v18  ;;  %v1137_v5 = vld [vmem:[%s12486_s21 + $0x1810] sm:$0xff]  ;;  %v11181_v26 = vcombine.low %v1273_v59, %v1277_v18 }
 0x357   : > { %v7281_v29 = vpop.f32.mrf.mxu1  ;;  %7574 = vmatprep.subr.bf16.mxu1 %v11214_v6  ;;  %v1141_v6 = vld [vmem:[%s12486_s21 + $0x1830] sm:$0xff]  ;;  %v11174_v46 = vcombine.high %v1265_v8, %v1269_v25 }
 0x358   : > { %v7962_v43 = vrot.slane %v7948_v28, %v13424_v15  ;;  %7534 = vmatpush1.bf16.msra.mxu0 %v11085_v19  ;;  %v11046_v13 = vcombine.high %v1137_v5, %v1141_v6  ;;  %v1257_v54 = vld [vmem:[%s12486_s21 + $0x1bd0] sm:$0xff] }
 0x359   : > { %7535 = vmatprep.subr.bf16.mxu0 %v11078_v27  ;;  %v1261_v11 = vld [vmem:[%s12486_s21 + $0x1bf0] sm:$0xff]  ;;  %v11173_v27 = vcombine.low %v1265_v8, %v1269_v25 }
 0x35a   : > { %7575 = vmatpush1.bf16.msra.mxu1 %v11213_v24  ;;  %v7963_v49 = vcombine.low %v7955_v41, %v7962_v43  ;;  %v1385_v19 = vld [vmem:[%s12486_s21 + $0x1fd0] sm:$0xff]  ;;  %v11045_v24 = vcombine.low %v1137_v5, %v1141_v6  ;;  %v11166_v28 = vcombine.high %v1257_v54, %v1261_v11  ;;  %v11165_v38 = vcombine.low %v1257_v54, %v1261_v11 }
 0x35b   : > { %7576 = vmatprep.subr.bf16.mxu1 %v11206_v32  ;;  %v1389_v63 = vld [vmem:[%s12486_s21 + $0x1ff0] sm:$0xff] }
 0x35c   : > { %v7983_v3 = vadd.f32 %v7963_v49, %v365_v47  ;;  %7536 = vmatpush1.bf16.msra.mxu0 %v11077_v30  ;;  %v11294_v29 = vcombine.high %v1385_v19, %v1389_v63  ;;  %v1249_v32 = vld [vmem:[%s12486_s21 + $0x1b90] sm:$0xff]  ;;  %v11293_v41 = vcombine.low %v1385_v19, %v1389_v63 }
 0x35d   : > { %7537 = vmatprep.subr.bf16.mxu0 %v11070_v16  ;;  %v1377_v36 = vld [vmem:[%s12486_s21 + $0x1f90] sm:$0xff]  ;;  %v11158_v43 = vcombine.high %v1249_v32, %v1253_v34 }
 0x35e   : > { %7577 = vmatpush1.bf16.msra.mxu1 %v11205_v60  ;;  %7985 = vst [vmem:[#allocation2] sm:$0xff] %v7983_v3  ;;  %v1381_v37 = vld [vmem:[%s12486_s21 + $0x1fb0] sm:$0xff] }
 0x35f   : > { %7578 = vmatprep.subr.bf16.mxu1 %v11198_v39  ;;  %v11286_v30 = vcombine.high %v1377_v36, %v1381_v37  ;;  %v1241_v47 = vld [vmem:[%s12486_s21 + $0x1b50] sm:$0xff]  ;;  %v11157_v39 = vcombine.low %v1249_v32, %v1253_v34  ;;  %v11285_v51 = vcombine.low %v1377_v36, %v1381_v37 }
 0x360   : > { %7538 = vmatpush1.bf16.msra.mxu0 %v11069_v42  ;;  %v1245_v60 = vld [vmem:[%s12486_s21 + $0x1b70] sm:$0xff] }
 0x361   : > { %7539 = vmatprep.subr.bf16.mxu0 %v11062_v58  ;;  %v1369_v16 = vld [vmem:[%s12486_s21 + $0x1f50] sm:$0xff]  ;;  %v11150_v53 = vcombine.high %v1241_v47, %v1245_v60  ;;  %v11149_v58 = vcombine.low %v1241_v47, %v1245_v60 }
 0x362   : > { %7579 = vmatpush1.bf16.msra.mxu1 %v11197_v55  ;;  %v1373_v49 = vld [vmem:[%s12486_s21 + $0x1f70] sm:$0xff] }
 0x363   : > { %7580 = vmatprep.subr.bf16.mxu1 %v11190_v52  ;;  %v11278_v50 = vcombine.high %v1369_v16, %v1373_v49  ;;  %v1233_v61 = vld [vmem:[%s12486_s21 + $0x1b10] sm:$0xff]  ;;  %v11277_v52 = vcombine.low %v1369_v16, %v1373_v49  ;;  %v426_v16 = vld [vmem:[%s12486_s21 + $0x1d8] sm:$0xff] }
 0x364   : > { %7540 = vmatpush1.bf16.msra.mxu0 %v11061_v62  ;;  %v1237_v3 = vld [vmem:[%s12486_s21 + $0x1b30] sm:$0xff]  ;;  %v430_v49 = vld [vmem:[%s12486_s21 + $0x1f8] sm:$0xff] }
 0x365   : > { %7541 = vmatprep.subr.bf16.mxu0 %v11054_v1  ;;  %v1361_v42 = vld [vmem:[%s12486_s21 + $0x1f10] sm:$0xff]  ;;  %v11142_v20 = vcombine.high %v1233_v61, %v1237_v3  ;;  %v11141_v1 = vcombine.low %v1233_v61, %v1237_v3  ;;  %v10336_v61 = vcombine.high %v426_v16, %v430_v49 }
 0x366   : > { %7581 = vmatpush1.bf16.msra.mxu1 %v11189_v56  ;;  %v1365_v55 = vld [vmem:[%s12486_s21 + $0x1f30] sm:$0xff] }
 0x367   : > { %7582 = vmatprep.subr.bf16.mxu1 %v11182_v2  ;;  %v11270_v21 = vcombine.high %v1361_v42, %v1365_v55  ;;  %v1225_v59 = vld [vmem:[%s12486_s21 + $0x1ad0] sm:$0xff]  ;;  %v11269_v2 = vcombine.low %v1361_v42, %v1365_v55  ;;  %v418_v42 = vld [vmem:[%s12486_s21 + $0x198] sm:$0xff] }
 0x368   : > { %7542 = vmatpush1.bf16.msra.mxu0 %v11053_v9  ;;  %v1229_v18 = vld [vmem:[%s12486_s21 + $0x1af0] sm:$0xff]  ;;  %v422_v55 = vld [vmem:[%s12486_s21 + $0x1b8] sm:$0xff] }
 0x369   : > { %7543 = vmatprep.subr.bf16.mxu0 %v11046_v13  ;;  %v1353_v62 = vld [vmem:[%s12486_s21 + $0x1ed0] sm:$0xff]  ;;  %v11134_v5 = vcombine.high %v1225_v59, %v1229_v18  ;;  %v11133_v13 = vcombine.low %v1225_v59, %v1229_v18  ;;  %v10328_v59 = vcombine.high %v418_v42, %v422_v55 }
 0x36a   : > { %7583 = vmatpush1.bf16.msra.mxu1 %v11181_v26  ;;  %v1357_v56 = vld [vmem:[%s12486_s21 + $0x1ef0] sm:$0xff] }
 0x36b   : > { %7584 = vmatprep.subr.bf16.mxu1 %v11174_v46  ;;  %v11262_v6 = vcombine.high %v1353_v62, %v1357_v56  ;;  %v1217_v8 = vld [vmem:[%s12486_s21 + $0x1a90] sm:$0xff]  ;;  %v11261_v46 = vcombine.low %v1353_v62, %v1357_v56  ;;  %v410_v62 = vld [vmem:[%s12486_s21 + $0x158] sm:$0xff] }
 0x36c   : > { %7544 = vmatpush1.bf16.msra.mxu0 %v11045_v24  ;;  %v1221_v25 = vld [vmem:[%s12486_s21 + $0x1ab0] sm:$0xff]  ;;  %v414_v56 = vld [vmem:[%s12486_s21 + $0x178] sm:$0xff] }
 0x36d   : > { %7545 = vmatprep.subr.bf16.mxu0 %v11166_v28  ;;  %v1345_v9 = vld [vmem:[%s12486_s21 + $0x1e90] sm:$0xff]  ;;  %v11126_v54 = vcombine.high %v1217_v8, %v1221_v25  ;;  %v11125_v28 = vcombine.low %v1217_v8, %v1221_v25  ;;  %v10327_v8 = vcombine.low %v418_v42, %v422_v55 }
 0x36e   : > { %7585 = vmatpush1.bf16.msra.mxu1 %v11173_v27  ;;  %v1349_v26 = vld [vmem:[%s12486_s21 + $0x1eb0] sm:$0xff] }
 0x36f   : > { %7586 = vmatprep.subr.bf16.mxu1 %v11294_v29  ;;  %v11254_v11 = vcombine.high %v1345_v9, %v1349_v26  ;;  %v1209_v19 = vld [vmem:[%s12486_s21 + $0x1a50] sm:$0xff]  ;;  %v11253_v29 = vcombine.low %v1345_v9, %v1349_v26 }
 0x370   : > { %7546 = vmatpush2.bf16.msra.mxu0 %v11165_v38  ;;  %v1213_v63 = vld [vmem:[%s12486_s21 + $0x1a70] sm:$0xff] }
 0x371   : > { %7547 = vmatprep.subr.bf16.mxu0 %v11158_v43  ;;  %v1337_v24 = vld [vmem:[%s12486_s21 + $0x1e50] sm:$0xff]  ;;  %v11118_v32 = vcombine.high %v1209_v19, %v1213_v63  ;;  %v11117_v43 = vcombine.low %v1209_v19, %v1213_v63  ;;  %v406_v19 = vld [vmem:[%s12486_s21 + $0x138] sm:$0xff] }
 0x372   : > { %7587 = vmatpush2.bf16.msra.mxu1 %v11293_v41  ;;  %v1341_v27 = vld [vmem:[%s12486_s21 + $0x1e70] sm:$0xff] }
 0x373   : > { %7588 = vmatprep.subr.bf16.mxu1 %v11286_v30  ;;  %v11246_v34 = vcombine.high %v1337_v24, %v1341_v27  ;;  %v1201_v36 = vld [vmem:[%s12486_s21 + $0x1a10] sm:$0xff]  ;;  %v11245_v30 = vcombine.low %v1337_v24, %v1341_v27  ;;  %v530_v27 = vld [vmem:[%s12486_s21 + $0x518] sm:$0xff] }
 0x374   : > { %7548 = vmatpush2.bf16.msra.mxu0 %v11157_v39  ;;  %v1205_v37 = vld [vmem:[%s12486_s21 + $0x1a30] sm:$0xff]  ;;  %v554_v39 = vld [vmem:[%s12486_s21 + $0x5d8] sm:$0xff] }
 0x375   : > { %7549 = vmatprep.subr.bf16.mxu0 %v11150_v53  ;;  %v1329_v38 = vld [vmem:[%s12486_s21 + $0x1e10] sm:$0xff]  ;;  %v11110_v47 = vcombine.high %v1201_v36, %v1205_v37  ;;  %v11109_v53 = vcombine.low %v1201_v36, %v1205_v37 }
 0x376   : > { %7589 = vmatpush2.bf16.msra.mxu1 %v11285_v51  ;;  %v1333_v41 = vld [vmem:[%s12486_s21 + $0x1e30] sm:$0xff]  ;;  %v558_v51 = vld [vmem:[%s12486_s21 + $0x5f8] sm:$0xff] }
 0x377   : > { %7590 = vmatprep.subr.bf16.mxu1 %v11278_v50  ;;  %v11238_v60 = vcombine.high %v1329_v38, %v1333_v41  ;;  %v11237_v50 = vcombine.low %v1329_v38, %v1333_v41  ;;  %v10464_v3 = vcombine.high %v554_v39, %v558_v51  ;;  %v394_v41 = vld [vmem:[%s12486_s21 + $0xd8] sm:$0xff] }
 0x378   : > { %7550 = vmatpush2.bf16.msra.mxu0 %v11149_v58  ;;  %v546_v58 = vld [vmem:[%s12486_s21 + $0x598] sm:$0xff] }
 0x379   : > { %7551 = vmatprep.subr.bf16.mxu0 %v11142_v20  ;;  %v10335_v20 = vcombine.low %v426_v16, %v430_v49 }
 0x37a   : > { %7591 = vmatpush2.bf16.msra.mxu1 %v11277_v52  ;;  %v550_v52 = vld [vmem:[%s12486_s21 + $0x5b8] sm:$0xff] }
 0x37b   : > { %7592 = vmatprep.subr.bf16.mxu1 %v11270_v21  ;;  %v10463_v21 = vcombine.low %v554_v39, %v558_v51  ;;  %v10456_v18 = vcombine.high %v546_v58, %v550_v52  ;;  %v10455_v26 = vcombine.low %v546_v58, %v550_v52  ;;  %v386_v39 = vld [vmem:[%s12486_s21 + $0x98] sm:$0xff] }
 0x37c   : > { %7552 = vmatpush2.bf16.msra.mxu0 %v11141_v1  ;;  %v390_v51 = vld [vmem:[%s12486_s21 + $0xb8] sm:$0xff] }
 0x37d   : > { %7553 = vmatprep.subr.bf16.mxu0 %v11134_v5  ;;  %v542_v5 = vld [vmem:[%s12486_s21 + $0x578] sm:$0xff]  ;;  %v10296_v42 = vcombine.high %v386_v39, %v390_v51 }
 0x37e   : > { %7593 = vmatpush2.bf16.msra.mxu1 %v11269_v2  ;;  %v538_v2 = vld [vmem:[%s12486_s21 + $0x558] sm:$0xff] }
 0x37f   : > { %7594 = vmatprep.subr.bf16.mxu1 %v11262_v6  ;;  %v10447_v36 = vcombine.low %v538_v2, %v542_v5  ;;  %v378_v58 = vld [vmem:[%s12486_s21 + $0x58] sm:$0xff] }
 0x380   : > { %7554 = vmatpush2.bf16.msra.mxu0 %v11133_v13  ;;  %v10320_v13 = vcombine.high %v410_v62, %v414_v56  ;;  %v382_v52 = vld [vmem:[%s12486_s21 + $0x78] sm:$0xff] }
 0x381   : > { %7555 = vmatprep.subr.bf16.mxu0 %v11126_v54  ;;  %v10448_v54 = vcombine.high %v538_v2, %v542_v5  ;;  %v374_v2 = vld [vmem:[%s12486_s21 + $0x38] sm:$0xff] }
 0x382   : > { %7595 = vmatpush2.bf16.msra.mxu1 %v11261_v46  ;;  %v498_v5 = vld [vmem:[%s12486_s21 + $0x418] sm:$0xff] }
 0x383   : > { %7596 = vmatprep.subr.bf16.mxu1 %v11254_v11  ;;  %v402_v11 = vld [vmem:[%s12486_s21 + $0x118] sm:$0xff] }
 0x384   : > { %7556 = vmatpush2.bf16.msra.mxu0 %v11125_v28  ;;  %v534_v28 = vld [vmem:[%s12486_s21 + $0x538] sm:$0xff]  ;;  %v10312_v37 = vcombine.high %v402_v11, %v406_v19 }
 0x385   : > { %7557 = vmatprep.subr.bf16.mxu0 %v11118_v32  ;;  %v10319_v32 = vcombine.low %v410_v62, %v414_v56  ;;  %v10440_v38 = vcombine.high %v530_v27, %v534_v28  ;;  %v10288_v62 = vcombine.high %v378_v58, %v382_v52 }
 0x386   : > { %7597 = vmatpush2.bf16.msra.mxu1 %v11253_v29 }
 0x387   : > { %7598 = vmatprep.subr.bf16.mxu1 %v11246_v34 }
 0x388   : > { %7558 = vmatpush2.bf16.msra.mxu0 %v11117_v43  ;;  %v398_v43 = vld [vmem:[%s12486_s21 + $0xf8] sm:$0xff] }
 0x389   : > { %7559 = vmatprep.subr.bf16.mxu0 %v11110_v47  ;;  %v526_v47 = vld [vmem:[%s12486_s21 + $0x4f8] sm:$0xff]  ;;  %v10304_v16 = vcombine.high %v394_v41, %v398_v43 }
 0x38a   : > { %7599 = vmatpush2.bf16.msra.mxu1 %v11245_v30  ;;  %v522_v30 = vld [vmem:[%s12486_s21 + $0x4d8] sm:$0xff] }
 0x38b   : > { %7600 = vmatprep.subr.bf16.mxu1 %v11238_v60  ;;  %v10439_v60 = vcombine.low %v530_v27, %v534_v28  ;;  %v10432_v49 = vcombine.high %v522_v30, %v526_v47 }
 0x38c   : > { %7560 = vmatpush2.bf16.msra.mxu0 %v11109_v53  ;;  %v514_v53 = vld [vmem:[%s12486_s21 + $0x498] sm:$0xff] }
 0x38d   : > { %7611 = vmatprep.subr.bf16.mxu0 %v10336_v61  ;;  %v10303_v61 = vcombine.low %v394_v41, %v398_v43 }
 0x38e   : > { %7601 = vmatpush2.bf16.msra.mxu1 %v11237_v50  ;;  %v518_v50 = vld [vmem:[%s12486_s21 + $0x4b8] sm:$0xff] }
 0x38f   : > { %7652 = vmatprep.subr.bf16.mxu1 %v10464_v3  ;;  %v7317_v1 = vpop.f32.mrf.mxu0  ;;  %7562 = vmatmul.mubr.bf16.vlgmr.msra.gmra.mxu0 %v12877_v7  ;;  %v10431_v3 = vcombine.low %v522_v30, %v526_v47  ;;  %v10424_v55 = vcombine.high %v514_v53, %v518_v50  ;;  %v474_v30 = vld [vmem:[%s12486_s21 + $0x358] sm:$0xff] }
 0x390   : > { %7612 = vmatpush1.bf16.msra.mxu0 %v10335_v20  ;;  %7643 = vmatprep.mubr.bf16.mxu0 %v12560_v10  ;;  %v506_v20 = vld [vmem:[%s12486_s21 + $0x458] sm:$0xff] }
 0x391   : > { %v7358_v6 = vpop.f32.mrf.mxu1  ;;  %7603 = vmatmul.mubr.bf16.vlgmr.msra.gmra.mxu1 %v12885_v17  ;;  %v7319_v9 = vpop.f32.mrf.mxu0  ;;  %7613 = vmatprep.subr.bf16.mxu0 %v10328_v59  ;;  %v10295_v59 = vcombine.low %v386_v39, %v390_v51  ;;  %v478_v47 = vld [vmem:[%s12486_s21 + $0x378] sm:$0xff] }
 0x392   : > { %v13493_v25 = vadd.f32 %v7358_v6, %v7317_v1  ;;  %7653 = vmatpush1.bf16.msra.mxu1 %v10463_v21  ;;  %7684 = vmatprep.mubr.bf16.mxu1 %v12567_v14  ;;  %v10311_v14 = vcombine.low %v402_v11, %v406_v19  ;;  %v510_v21 = vld [vmem:[%s12486_s21 + $0x478] sm:$0xff]  ;;  %v10384_v39 = vcombine.high %v474_v30, %v478_v47 }
 0x393   : > { %v7360_v46 = vpop.f32.mrf.mxu1  ;;  %7654 = vmatprep.subr.bf16.mxu1 %v10456_v18  ;;  %v7321_v24 = vpop.f32.mrf.mxu0  ;;  %v10423_v18 = vcombine.low %v514_v53, %v518_v50  ;;  %v10416_v56 = vcombine.high %v506_v20, %v510_v21  ;;  %v370_v1 = vld [vmem:[%s12486_s21 + $0x18] sm:$0xff] }
 0x394   : > { %v13498_v63 = vadd.f32 %v7360_v46, %v7319_v9  ;;  %7614 = vmatpush1.bf16.msra.mxu0 %v10327_v8  ;;  %v502_v6 = vld [vmem:[%s12486_s21 + $0x438] sm:$0xff]  ;;  %v10287_v8 = vcombine.low %v378_v58, %v382_v52  ;;  %v10415_v9 = vcombine.low %v506_v20, %v510_v21  ;;  %v10279_v24 = vcombine.low %v370_v1, %v374_v2 }
 0x395   : > { %v7362_v29 = vpop.f32.mrf.mxu1  ;;  %v7322_v34 = vpop.f32.mrf.mxu0  ;;  %7615 = vmatprep.subr.bf16.mxu0 %v10320_v13  ;;  %v10408_v13 = vcombine.high %v498_v5, %v502_v6  ;;  %v490_v46 = vld [vmem:[%s12486_s21 + $0x3d8] sm:$0xff]  ;;  %v10407_v27 = vcombine.low %v498_v5, %v502_v6 }
 0x396   : > { %7655 = vmatpush1.bf16.msra.mxu1 %v10455_v26  ;;  %v10280_v26 = vcombine.high %v370_v1, %v374_v2  ;;  %v618_v11 = vld [vmem:[%s12486_s21 + $0x7d8] sm:$0xff] }
 0x397   : > { %v7363_v10 = vpop.f32.mrf.mxu1  ;;  %7656 = vmatprep.subr.bf16.mxu1 %v10448_v54  ;;  %v494_v54 = vld [vmem:[%s12486_s21 + $0x3f8] sm:$0xff] }
 0x398   : > { %7616 = vmatpush1.bf16.msra.mxu0 %v10319_v32  ;;  %v622_v19 = vld [vmem:[%s12486_s21 + $0x7f8] sm:$0xff]  ;;  %v10400_v28 = vcombine.high %v490_v46, %v494_v54  ;;  %v10399_v10 = vcombine.low %v490_v46, %v494_v54 }
 0x399   : > { %7617 = vmatprep.subr.bf16.mxu0 %v10312_v37  ;;  %v10528_v29 = vcombine.high %v618_v11, %v622_v19  ;;  %v482_v32 = vld [vmem:[%s12486_s21 + $0x398] sm:$0xff] }
 0x39a   : > { %7657 = vmatpush1.bf16.msra.mxu1 %v10447_v36  ;;  %v486_v34 = vld [vmem:[%s12486_s21 + $0x3b8] sm:$0xff] }
 0x39b   : > { %7658 = vmatprep.subr.bf16.mxu1 %v10440_v38  ;;  %v610_v36 = vld [vmem:[%s12486_s21 + $0x798] sm:$0xff]  ;;  %v10527_v38 = vcombine.low %v618_v11, %v622_v19  ;;  %v10392_v41 = vcombine.high %v482_v32, %v486_v34 }
 0x39c   : > { %7618 = vmatpush1.bf16.msra.mxu0 %v10311_v14  ;;  %v614_v37 = vld [vmem:[%s12486_s21 + $0x7b8] sm:$0xff] }
 0x39d   : > { %7619 = vmatprep.subr.bf16.mxu0 %v10304_v16  ;;  %v10520_v43 = vcombine.high %v610_v36, %v614_v37  ;;  %v602_v14 = vld [vmem:[%s12486_s21 + $0x758] sm:$0xff]  ;;  %v10391_v16 = vcombine.low %v482_v32, %v486_v34 }
 0x39e   : > { %7659 = vmatpush1.bf16.msra.mxu1 %v10439_v60  ;;  %v606_v60 = vld [vmem:[%s12486_s21 + $0x778] sm:$0xff] }
 0x39f   : > { %7660 = vmatprep.subr.bf16.mxu1 %v10432_v49  ;;  %v10519_v49 = vcombine.low %v610_v36, %v614_v37  ;;  %v10512_v51 = vcombine.high %v602_v14, %v606_v60  ;;  %v466_v53 = vld [vmem:[%s12486_s21 + $0x318] sm:$0xff] }
 0x3a0   : > { %7620 = vmatpush1.bf16.msra.mxu0 %v10303_v61  ;;  %v470_v50 = vld [vmem:[%s12486_s21 + $0x338] sm:$0xff] }
 0x3a1   : > { %7621 = vmatprep.subr.bf16.mxu0 %v10296_v42  ;;  %v594_v61 = vld [vmem:[%s12486_s21 + $0x718] sm:$0xff]  ;;  %v10383_v42 = vcombine.low %v474_v30, %v478_v47  ;;  %v10376_v58 = vcombine.high %v466_v53, %v470_v50 }
 0x3a2   : > { %7661 = vmatpush1.bf16.msra.mxu1 %v10431_v3  ;;  %v598_v3 = vld [vmem:[%s12486_s21 + $0x738] sm:$0xff] }
 0x3a3   : > { %7662 = vmatprep.subr.bf16.mxu1 %v10424_v55  ;;  %v10511_v55 = vcombine.low %v602_v14, %v606_v60  ;;  %v10504_v52 = vcombine.high %v594_v61, %v598_v3  ;;  %v458_v20 = vld [vmem:[%s12486_s21 + $0x2d8] sm:$0xff] }
 0x3a4   : > { %7622 = vmatpush1.bf16.msra.mxu0 %v10295_v59  ;;  %v462_v21 = vld [vmem:[%s12486_s21 + $0x2f8] sm:$0xff] }
 0x3a5   : > { %7623 = vmatprep.subr.bf16.mxu0 %v10288_v62  ;;  %v586_v59 = vld [vmem:[%s12486_s21 + $0x6d8] sm:$0xff]  ;;  %v10375_v62 = vcombine.low %v466_v53, %v470_v50  ;;  %v10368_v1 = vcombine.high %v458_v20, %v462_v21 }
 0x3a6   : > { %7663 = vmatpush1.bf16.msra.mxu1 %v10423_v18  ;;  %v590_v18 = vld [vmem:[%s12486_s21 + $0x6f8] sm:$0xff] }
 0x3a7   : > { %7664 = vmatprep.subr.bf16.mxu1 %v10416_v56  ;;  %v10503_v56 = vcombine.low %v594_v61, %v598_v3  ;;  %v10496_v2 = vcombine.high %v586_v59, %v590_v18  ;;  %v450_v5 = vld [vmem:[%s12486_s21 + $0x298] sm:$0xff] }
 0x3a8   : > { %7624 = vmatpush1.bf16.msra.mxu0 %v10287_v8  ;;  %v454_v6 = vld [vmem:[%s12486_s21 + $0x2b8] sm:$0xff] }
 0x3a9   : > { %7625 = vmatprep.subr.bf16.mxu0 %v10280_v26  ;;  %v578_v8 = vld [vmem:[%s12486_s21 + $0x698] sm:$0xff]  ;;  %v10367_v26 = vcombine.low %v458_v20, %v462_v21  ;;  %v10360_v46 = vcombine.high %v450_v5, %v454_v6 }
 0x3aa   : > { %7665 = vmatpush1.bf16.msra.mxu1 %v10415_v9  ;;  %v582_v9 = vld [vmem:[%s12486_s21 + $0x6b8] sm:$0xff] }
 0x3ab   : > { %7666 = vmatprep.subr.bf16.mxu1 %v10408_v13  ;;  %v10495_v13 = vcombine.low %v586_v59, %v590_v18  ;;  %v10488_v54 = vcombine.high %v578_v8, %v582_v9  ;;  %v442_v11 = vld [vmem:[%s12486_s21 + $0x258] sm:$0xff] }
 0x3ac   : > { %7626 = vmatpush1.bf16.msra.mxu0 %v10279_v24  ;;  %v446_v19 = vld [vmem:[%s12486_s21 + $0x278] sm:$0xff] }
 0x3ad   : > { %7627 = vmatprep.subr.bf16.mxu0 %v10400_v28  ;;  %v570_v24 = vld [vmem:[%s12486_s21 + $0x658] sm:$0xff]  ;;  %v10359_v28 = vcombine.low %v450_v5, %v454_v6  ;;  %v10352_v32 = vcombine.high %v442_v11, %v446_v19 }
 0x3ae   : > { %7667 = vmatpush1.bf16.msra.mxu1 %v10407_v27  ;;  %v574_v27 = vld [vmem:[%s12486_s21 + $0x678] sm:$0xff] }
 0x3af   : > { %7668 = vmatprep.subr.bf16.mxu1 %v10528_v29  ;;  %v10487_v29 = vcombine.low %v578_v8, %v582_v9  ;;  %v10480_v34 = vcombine.high %v570_v24, %v574_v27  ;;  %v434_v36 = vld [vmem:[%s12486_s21 + $0x218] sm:$0xff] }
 0x3b0   : > { %7628 = vmatpush2.bf16.msra.mxu0 %v10399_v10  ;;  %v438_v37 = vld [vmem:[%s12486_s21 + $0x238] sm:$0xff] }
 0x3b1   : > { %7629 = vmatprep.subr.bf16.mxu0 %v10392_v41  ;;  %v562_v10 = vld [vmem:[%s12486_s21 + $0x618] sm:$0xff]  ;;  %v10351_v41 = vcombine.low %v442_v11, %v446_v19  ;;  %v10344_v30 = vcombine.high %v434_v36, %v438_v37 }
 0x3b2   : > { %7669 = vmatpush2.bf16.msra.mxu1 %v10527_v38  ;;  %v566_v38 = vld [vmem:[%s12486_s21 + $0x638] sm:$0xff] }
 0x3b3   : > { %7670 = vmatprep.subr.bf16.mxu1 %v10520_v43  ;;  %v10479_v43 = vcombine.low %v570_v24, %v574_v27  ;;  %v10472_v47 = vcombine.high %v562_v10, %v566_v38  ;;  %v682_v14 = vld [vmem:[%s12486_s21 + $0x9d8] sm:$0xff] }
 0x3b4   : > { %7630 = vmatpush2.bf16.msra.mxu0 %v10391_v16  ;;  %v686_v60 = vld [vmem:[%s12486_s21 + $0x9f8] sm:$0xff] }
 0x3b5   : > { %7631 = vmatprep.subr.bf16.mxu0 %v10384_v39  ;;  %v810_v16 = vld [vmem:[%s12486_s21 + $0xdd8] sm:$0xff]  ;;  %v10343_v39 = vcombine.low %v434_v36, %v438_v37  ;;  %v10592_v53 = vcombine.high %v682_v14, %v686_v60 }
 0x3b6   : > { %7671 = vmatpush2.bf16.msra.mxu1 %v10519_v49  ;;  %v814_v49 = vld [vmem:[%s12486_s21 + $0xdf8] sm:$0xff] }
 0x3b7   : > { %7672 = vmatprep.subr.bf16.mxu1 %v10512_v51  ;;  %v10471_v51 = vcombine.low %v562_v10, %v566_v38  ;;  %v10720_v50 = vcombine.high %v810_v16, %v814_v49  ;;  %v674_v61 = vld [vmem:[%s12486_s21 + $0x998] sm:$0xff] }
 0x3b8   : > { %7632 = vmatpush2.bf16.msra.mxu0 %v10383_v42  ;;  %v678_v3 = vld [vmem:[%s12486_s21 + $0x9b8] sm:$0xff] }
 0x3b9   : > { %7633 = vmatprep.subr.bf16.mxu0 %v10376_v58  ;;  %v802_v42 = vld [vmem:[%s12486_s21 + $0xd98] sm:$0xff]  ;;  %v10591_v58 = vcombine.low %v682_v14, %v686_v60  ;;  %v10584_v20 = vcombine.high %v674_v61, %v678_v3  ;;  %v10583_v6 = vcombine.low %v674_v61, %v678_v3 }
 0x3ba   : > { %7673 = vmatpush2.bf16.msra.mxu1 %v10511_v55  ;;  %v806_v55 = vld [vmem:[%s12486_s21 + $0xdb8] sm:$0xff] }
 0x3bb   : > { %7674 = vmatprep.subr.bf16.mxu1 %v10504_v52  ;;  %v10719_v52 = vcombine.low %v810_v16, %v814_v49  ;;  %v10712_v21 = vcombine.high %v802_v42, %v806_v55  ;;  %v666_v59 = vld [vmem:[%s12486_s21 + $0x958] sm:$0xff]  ;;  %v10711_v9 = vcombine.low %v802_v42, %v806_v55 }
 0x3bc   : > { %7634 = vmatpush2.bf16.msra.mxu0 %v10375_v62  ;;  %v670_v18 = vld [vmem:[%s12486_s21 + $0x978] sm:$0xff] }
 0x3bd   : > { %7635 = vmatprep.subr.bf16.mxu0 %v10368_v1  ;;  %v798_v1 = vld [vmem:[%s12486_s21 + $0xd78] sm:$0xff] }
 0x3be   : > { %7675 = vmatpush2.bf16.msra.mxu1 %v10503_v56  ;;  %v794_v56 = vld [vmem:[%s12486_s21 + $0xd58] sm:$0xff] }
 0x3bf   : > { %7676 = vmatprep.subr.bf16.mxu1 %v10496_v2  ;;  %v662_v11 = vld [vmem:[%s12486_s21 + $0x938] sm:$0xff] }
 0x3c0   : > { %7636 = vmatpush2.bf16.msra.mxu0 %v10367_v26  ;;  %v10576_v26 = vcombine.high %v666_v59, %v670_v18  ;;  %v786_v19 = vld [vmem:[%s12486_s21 + $0xd18] sm:$0xff] }
 0x3c1   : > { %7637 = vmatprep.subr.bf16.mxu0 %v10360_v46  ;;  %v790_v24 = vld [vmem:[%s12486_s21 + $0xd38] sm:$0xff] }
 0x3c2   : > { %7677 = vmatpush2.bf16.msra.mxu1 %v10495_v13  ;;  %v10696_v36 = vcombine.high %v786_v19, %v790_v24  ;;  %v650_v37 = vld [vmem:[%s12486_s21 + $0x8d8] sm:$0xff] }
 0x3c3   : > { %7678 = vmatprep.subr.bf16.mxu1 %v10488_v54  ;;  %v658_v54 = vld [vmem:[%s12486_s21 + $0x918] sm:$0xff] }
 0x3c4   : > { %7638 = vmatpush2.bf16.msra.mxu0 %v10359_v28  ;;  %v778_v10 = vld [vmem:[%s12486_s21 + $0xcd8] sm:$0xff] }
 0x3c5   : > { %7639 = vmatprep.subr.bf16.mxu0 %v10352_v32  ;;  %v10703_v32 = vcombine.low %v794_v56, %v798_v1  ;;  %v782_v38 = vld [vmem:[%s12486_s21 + $0xcf8] sm:$0xff] }
 0x3c6   : > { %7679 = vmatpush2.bf16.msra.mxu1 %v10487_v29  ;;  %v642_v14 = vld [vmem:[%s12486_s21 + $0x898] sm:$0xff] }
 0x3c7   : > { %7680 = vmatprep.subr.bf16.mxu1 %v10480_v34  ;;  %v10568_v34 = vcombine.high %v658_v54, %v662_v11  ;;  %v646_v60 = vld [vmem:[%s12486_s21 + $0x8b8] sm:$0xff] }
 0x3c8   : > { %7640 = vmatpush2.bf16.msra.mxu0 %v10351_v41  ;;  %v10567_v41 = vcombine.low %v658_v54, %v662_v11  ;;  %v770_v16 = vld [vmem:[%s12486_s21 + $0xc98] sm:$0xff] }
 0x3c9   : > { %7641 = vmatprep.subr.bf16.mxu0 %v10344_v30  ;;  %v774_v49 = vld [vmem:[%s12486_s21 + $0xcb8] sm:$0xff] }
 0x3ca   : > { %7681 = vmatpush2.bf16.msra.mxu1 %v10479_v43  ;;  %v10695_v43 = vcombine.low %v786_v19, %v790_v24  ;;  %v634_v61 = vld [vmem:[%s12486_s21 + $0x858] sm:$0xff] }
 0x3cb   : > { %7682 = vmatprep.subr.bf16.mxu1 %v10472_v47  ;;  %v10688_v47 = vcombine.high %v778_v10, %v782_v38  ;;  %v638_v3 = vld [vmem:[%s12486_s21 + $0x878] sm:$0xff] }
 0x3cc   : > { %7642 = vmatpush2.bf16.msra.mxu0 %v10343_v39  ;;  %v762_v42 = vld [vmem:[%s12486_s21 + $0xc58] sm:$0xff] }
 0x3cd   : > { %7693 = vmatprep.subr.bf16.mxu0 %v10592_v53  ;;  %v10552_v53 = vcombine.high %v642_v14, %v646_v60  ;;  %v766_v55 = vld [vmem:[%s12486_s21 + $0xc78] sm:$0xff] }
 0x3ce   : > { %7683 = vmatpush2.bf16.msra.mxu1 %v10471_v51  ;;  %v10687_v51 = vcombine.low %v778_v10, %v782_v38  ;;  %v742_v19 = vld [vmem:[%s12486_s21 + $0xbb8] sm:$0xff] }
 0x3cf   : > { %7734 = vmatprep.subr.bf16.mxu1 %v10720_v50  ;;  %v7399_v62 = vpop.f32.mrf.mxu0  ;;  %7644 = vmatmul.mubr.bf16.vlgmr.msra.gmra.mxu0 %v12611_v23  ;;  %v10680_v50 = vcombine.high %v770_v16, %v774_v49  ;;  %v866_v24 = vld [vmem:[%s12486_s21 + $0xf98] sm:$0xff] }
 0x3d0   : > { %v7400_v2 = vadd.f32 %v7399_v62, %v13493_v25  ;;  %7694 = vmatpush1.bf16.msra.mxu0 %v10591_v58  ;;  %v10704_v25 = vcombine.high %v794_v56, %v798_v1  ;;  %7725 = vmatprep.mubr.bf16.mxu0 %v12618_v31  ;;  %v10551_v58 = vcombine.low %v642_v14, %v646_v60  ;;  %v754_v62 = vld [vmem:[%s12486_s21 + $0xc18] sm:$0xff] }
 0x3d1   : > { %v7440_v5 = vpop.f32.mrf.mxu1  ;;  %7685 = vmatmul.mubr.bf16.vlgmr.msra.gmra.mxu1 %v12622_v0  ;;  %v7401_v8 = vpop.f32.mrf.mxu0  ;;  %7695 = vmatprep.subr.bf16.mxu0 %v10584_v20  ;;  %v10544_v20 = vcombine.high %v634_v61, %v638_v3  ;;  %v758_v56 = vld [vmem:[%s12486_s21 + $0xc38] sm:$0xff]  ;;  %v10543_v1 = vcombine.low %v634_v61, %v638_v3 }
 0x3d2   : > { %7735 = vmatpush1.bf16.msra.mxu1 %v10719_v52  ;;  %v13566_v13 = vadd.f32 %v7440_v5, %v7400_v2  ;;  %v7402_v23 = vadd.f32 %v7401_v8, %v13498_v63  ;;  %7766 = vmatprep.mubr.bf16.mxu1 %v12631_v40  ;;  %v10575_v63 = vcombine.low %v666_v59, %v670_v18  ;;  %v654_v40 = vld [vmem:[%s12486_s21 + $0x8f8] sm:$0xff] }
 0x3d3   : > { %v7442_v46 = vpop.f32.mrf.mxu1  ;;  %7736 = vmatprep.subr.bf16.mxu1 %v10712_v21  ;;  %v7403_v0 = vpop.f32.mrf.mxu0  ;;  %v10560_v30 = vcombine.high %v650_v37, %v654_v40  ;;  %v10559_v39 = vcombine.low %v650_v37, %v654_v40  ;;  %v10679_v52 = vcombine.low %v770_v16, %v774_v49  ;;  %v10672_v21 = vcombine.high %v762_v42, %v766_v55  ;;  %v626_v59 = vld [vmem:[%s12486_s21 + $0x818] sm:$0xff] }
 0x3d4   : > { %v13575_v27 = vadd.f32 %v7442_v46, %v7402_v23  ;;  %7696 = vmatpush1.bf16.msra.mxu0 %v10583_v6  ;;  %v630_v18 = vld [vmem:[%s12486_s21 + $0x838] sm:$0xff]  ;;  %v10671_v2 = vcombine.low %v762_v42, %v766_v55  ;;  %v10664_v6 = vcombine.high %v754_v62, %v758_v56 }
 0x3d5   : > { %v7444_v28 = vpop.f32.mrf.mxu1  ;;  %v7404_v29 = vpop.f32.mrf.mxu0  ;;  %7697 = vmatprep.subr.bf16.mxu0 %v10576_v26  ;;  %v10536_v5 = vcombine.high %v626_v59, %v630_v18  ;;  %v746_v8 = vld [vmem:[%s12486_s21 + $0xbd8] sm:$0xff]  ;;  %v10535_v46 = vcombine.low %v626_v59, %v630_v18 }
 0x3d6   : > { %7737 = vmatpush1.bf16.msra.mxu1 %v10711_v9  ;;  %v750_v9 = vld [vmem:[%s12486_s21 + $0xbf8] sm:$0xff] }
 0x3d7   : > { %v7445_v31 = vpop.f32.mrf.mxu1  ;;  %7738 = vmatprep.subr.bf16.mxu1 %v10704_v25  ;;  %v874_v26 = vld [vmem:[%s12486_s21 + $0xfd8] sm:$0xff]  ;;  %v10663_v25 = vcombine.low %v754_v62, %v758_v56  ;;  %v10656_v54 = vcombine.high %v746_v8, %v750_v9 }
 0x3d8   : > { %7698 = vmatpush1.bf16.msra.mxu0 %v10575_v63  ;;  %v878_v23 = vld [vmem:[%s12486_s21 + $0xff8] sm:$0xff]  ;;  %v10655_v63 = vcombine.low %v746_v8, %v750_v9 }
 0x3d9   : > { %7699 = vmatprep.subr.bf16.mxu0 %v10568_v34  ;;  %v10784_v11 = vcombine.high %v874_v26, %v878_v23  ;;  %v738_v0 = vld [vmem:[%s12486_s21 + $0xb98] sm:$0xff]  ;;  %v10783_v29 = vcombine.low %v874_v26, %v878_v23 }
 0x3da   : > { %7739 = vmatpush1.bf16.msra.mxu1 %v10703_v32  ;;  %v870_v28 = vld [vmem:[%s12486_s21 + $0xfb8] sm:$0xff]  ;;  %v10648_v32 = vcombine.high %v738_v0, %v742_v19  ;;  %v10647_v10 = vcombine.low %v738_v0, %v742_v19 }
 0x3db   : > { %7740 = vmatprep.subr.bf16.mxu1 %v10696_v36  ;;  %v10776_v34 = vcombine.high %v866_v24, %v870_v28  ;;  %v730_v31 = vld [vmem:[%s12486_s21 + $0xb58] sm:$0xff]  ;;  %v10775_v38 = vcombine.low %v866_v24, %v870_v28 }
 0x3dc   : > { %7700 = vmatpush1.bf16.msra.mxu0 %v10567_v41  ;;  %v734_v36 = vld [vmem:[%s12486_s21 + $0xb78] sm:$0xff] }
 0x3dd   : > { %7701 = vmatprep.subr.bf16.mxu0 %v10560_v30  ;;  %v858_v37 = vld [vmem:[%s12486_s21 + $0xf58] sm:$0xff]  ;;  %v10640_v41 = vcombine.high %v730_v31, %v734_v36  ;;  %v10639_v16 = vcombine.low %v730_v31, %v734_v36 }
 0x3de   : > { %7741 = vmatpush1.bf16.msra.mxu1 %v10695_v43  ;;  %v862_v40 = vld [vmem:[%s12486_s21 + $0xf78] sm:$0xff] }
 0x3df   : > { %7742 = vmatprep.subr.bf16.mxu1 %v10688_v47  ;;  %v10768_v43 = vcombine.high %v858_v37, %v862_v40  ;;  %v722_v30 = vld [vmem:[%s12486_s21 + $0xb18] sm:$0xff]  ;;  %v10767_v49 = vcombine.low %v858_v37, %v862_v40 }
 0x3e0   : > { %7702 = vmatpush1.bf16.msra.mxu0 %v10559_v39  ;;  %v726_v47 = vld [vmem:[%s12486_s21 + $0xb38] sm:$0xff] }
 0x3e1   : > { %7703 = vmatprep.subr.bf16.mxu0 %v10552_v53  ;;  %v850_v14 = vld [vmem:[%s12486_s21 + $0xf18] sm:$0xff]  ;;  %v10632_v39 = vcombine.high %v722_v30, %v726_v47  ;;  %v10631_v42 = vcombine.low %v722_v30, %v726_v47 }
 0x3e2   : > { %7743 = vmatpush1.bf16.msra.mxu1 %v10687_v51  ;;  %v854_v60 = vld [vmem:[%s12486_s21 + $0xf38] sm:$0xff] }
 0x3e3   : > { %7744 = vmatprep.subr.bf16.mxu1 %v10680_v50  ;;  %v10760_v51 = vcombine.high %v850_v14, %v854_v60  ;;  %v714_v53 = vld [vmem:[%s12486_s21 + $0xad8] sm:$0xff]  ;;  %v10759_v55 = vcombine.low %v850_v14, %v854_v60 }
 0x3e4   : > { %7704 = vmatpush1.bf16.msra.mxu0 %v10551_v58  ;;  %v718_v50 = vld [vmem:[%s12486_s21 + $0xaf8] sm:$0xff] }
 0x3e5   : > { %7705 = vmatprep.subr.bf16.mxu0 %v10544_v20  ;;  %v842_v61 = vld [vmem:[%s12486_s21 + $0xed8] sm:$0xff]  ;;  %v10624_v58 = vcombine.high %v714_v53, %v718_v50  ;;  %v10623_v62 = vcombine.low %v714_v53, %v718_v50 }
 0x3e6   : > { %7745 = vmatpush1.bf16.msra.mxu1 %v10679_v52  ;;  %v846_v3 = vld [vmem:[%s12486_s21 + $0xef8] sm:$0xff] }
 0x3e7   : > { %7746 = vmatprep.subr.bf16.mxu1 %v10672_v21  ;;  %v10752_v52 = vcombine.high %v842_v61, %v846_v3  ;;  %v706_v20 = vld [vmem:[%s12486_s21 + $0xa98] sm:$0xff]  ;;  %v10751_v56 = vcombine.low %v842_v61, %v846_v3 }
 0x3e8   : > { %7706 = vmatpush1.bf16.msra.mxu0 %v10543_v1  ;;  %v710_v21 = vld [vmem:[%s12486_s21 + $0xab8] sm:$0xff] }
 0x3e9   : > { %7707 = vmatprep.subr.bf16.mxu0 %v10536_v5  ;;  %v834_v59 = vld [vmem:[%s12486_s21 + $0xe98] sm:$0xff]  ;;  %v10616_v1 = vcombine.high %v706_v20, %v710_v21  ;;  %v10615_v26 = vcombine.low %v706_v20, %v710_v21 }
 0x3ea   : > { %7747 = vmatpush1.bf16.msra.mxu1 %v10671_v2  ;;  %v838_v18 = vld [vmem:[%s12486_s21 + $0xeb8] sm:$0xff] }
 0x3eb   : > { %7748 = vmatprep.subr.bf16.mxu1 %v10664_v6  ;;  %v10744_v2 = vcombine.high %v834_v59, %v838_v18  ;;  %v698_v5 = vld [vmem:[%s12486_s21 + $0xa58] sm:$0xff]  ;;  %v10743_v23 = vcombine.low %v834_v59, %v838_v18 }
 0x3ec   : > { %7708 = vmatpush1.bf16.msra.mxu0 %v10535_v46  ;;  %v702_v6 = vld [vmem:[%s12486_s21 + $0xa78] sm:$0xff] }
 0x3ed   : > { %7709 = vmatprep.subr.bf16.mxu0 %v10656_v54  ;;  %v826_v8 = vld [vmem:[%s12486_s21 + $0xe58] sm:$0xff]  ;;  %v10608_v46 = vcombine.high %v698_v5, %v702_v6  ;;  %v10607_v24 = vcombine.low %v698_v5, %v702_v6 }
 0x3ee   : > { %7749 = vmatpush1.bf16.msra.mxu1 %v10663_v25  ;;  %v830_v9 = vld [vmem:[%s12486_s21 + $0xe78] sm:$0xff] }
 0x3ef   : > { %7750 = vmatprep.subr.bf16.mxu1 %v10784_v11  ;;  %v10736_v25 = vcombine.high %v826_v8, %v830_v9  ;;  %v690_v54 = vld [vmem:[%s12486_s21 + $0xa18] sm:$0xff]  ;;  %v10735_v28 = vcombine.low %v826_v8, %v830_v9 }
 0x3f0   : > { %7710 = vmatpush2.bf16.msra.mxu0 %v10655_v63  ;;  %v694_v11 = vld [vmem:[%s12486_s21 + $0xa38] sm:$0xff] }
 0x3f1   : > { %7711 = vmatprep.subr.bf16.mxu0 %v10648_v32  ;;  %v818_v0 = vld [vmem:[%s12486_s21 + $0xe18] sm:$0xff]  ;;  %v10600_v63 = vcombine.high %v690_v54, %v694_v11  ;;  %v10599_v37 = vcombine.low %v690_v54, %v694_v11 }
 0x3f2   : > { %7751 = vmatpush2.bf16.msra.mxu1 %v10783_v29  ;;  %v822_v19 = vld [vmem:[%s12486_s21 + $0xe38] sm:$0xff] }
 0x3f3   : > { %7752 = vmatprep.subr.bf16.mxu1 %v10776_v34  ;;  %v10728_v29 = vcombine.high %v818_v0, %v822_v19  ;;  %v938_v32 = vld [vmem:[%s12486_s21 + $0x11d8] sm:$0xff]  ;;  %v10727_v40 = vcombine.low %v818_v0, %v822_v19 }
 0x3f4   : > { %7712 = vmatpush2.bf16.msra.mxu0 %v10647_v10  ;;  %v942_v34 = vld [vmem:[%s12486_s21 + $0x11f8] sm:$0xff] }
 0x3f5   : > { %7713 = vmatprep.subr.bf16.mxu0 %v10640_v41  ;;  %v1066_v31 = vld [vmem:[%s12486_s21 + $0x15d8] sm:$0xff]  ;;  %v10848_v10 = vcombine.high %v938_v32, %v942_v34  ;;  %v10847_v14 = vcombine.low %v938_v32, %v942_v34 }
 0x3f6   : > { %7753 = vmatpush2.bf16.msra.mxu1 %v10775_v38  ;;  %v1070_v36 = vld [vmem:[%s12486_s21 + $0x15f8] sm:$0xff] }
 0x3f7   : > { %7754 = vmatprep.subr.bf16.mxu1 %v10768_v43  ;;  %v10976_v38 = vcombine.high %v1066_v31, %v1070_v36  ;;  %v930_v41 = vld [vmem:[%s12486_s21 + $0x1198] sm:$0xff]  ;;  %v10975_v60 = vcombine.low %v1066_v31, %v1070_v36 }
 0x3f8   : > { %7714 = vmatpush2.bf16.msra.mxu0 %v10639_v16  ;;  %v934_v43 = vld [vmem:[%s12486_s21 + $0x11b8] sm:$0xff] }
 0x3f9   : > { %7715 = vmatprep.subr.bf16.mxu0 %v10632_v39  ;;  %v1058_v30 = vld [vmem:[%s12486_s21 + $0x1598] sm:$0xff]  ;;  %v10840_v16 = vcombine.high %v930_v41, %v934_v43 }
 0x3fa   : > { %7755 = vmatpush2.bf16.msra.mxu1 %v10767_v49  ;;  %v1062_v47 = vld [vmem:[%s12486_s21 + $0x15b8] sm:$0xff] }
 0x3fb   : > { %7756 = vmatprep.subr.bf16.mxu1 %v10760_v51  ;;  %v10968_v49 = vcombine.high %v1058_v30, %v1062_v47  ;;  %v922_v39 = vld [vmem:[%s12486_s21 + $0x1158] sm:$0xff] }
 0x3fc   : > { %7716 = vmatpush2.bf16.msra.mxu0 %v10631_v42  ;;  %v926_v51 = vld [vmem:[%s12486_s21 + $0x1178] sm:$0xff] }
 0x3fd   : > { %7717 = vmatprep.subr.bf16.mxu0 %v10624_v58  ;;  %v1050_v50 = vld [vmem:[%s12486_s21 + $0x1558] sm:$0xff]  ;;  %v10832_v20 = vcombine.high %v922_v39, %v926_v51 }
 0x3fe   : > { %7757 = vmatpush2.bf16.msra.mxu1 %v10759_v55  ;;  %v1054_v61 = vld [vmem:[%s12486_s21 + $0x1578] sm:$0xff]  ;;  %v10839_v55 = vcombine.low %v930_v41, %v934_v43 }
 0x3ff   : > { %7758 = vmatprep.subr.bf16.mxu1 %v10752_v52  ;;  %v10967_v52 = vcombine.low %v1058_v30, %v1062_v47  ;;  %v914_v18 = vld [vmem:[%s12486_s21 + $0x1118] sm:$0xff]  ;;  %v10959_v8 = vcombine.low %v1050_v50, %v1054_v61 }
 0x400   : > { %7718 = vmatpush2.bf16.msra.mxu0 %v10623_v62  ;;  %v918_v62 = vld [vmem:[%s12486_s21 + $0x1138] sm:$0xff] }
 0x401   : > { %7719 = vmatprep.subr.bf16.mxu0 %v10616_v1  ;;  %v1046_v1 = vld [vmem:[%s12486_s21 + $0x1538] sm:$0xff]  ;;  %v10824_v9 = vcombine.high %v914_v18, %v918_v62  ;;  %v10823_v54 = vcombine.low %v914_v18, %v918_v62 }
 0x402   : > { %7759 = vmatpush2.bf16.msra.mxu1 %v10751_v56  ;;  %v1042_v56 = vld [vmem:[%s12486_s21 + $0x1518] sm:$0xff] }
 0x403   : > { %7760 = vmatprep.subr.bf16.mxu1 %v10744_v2  ;;  %v10951_v11 = vcombine.low %v1042_v56, %v1046_v1  ;;  %v1122_v18 = vld [vmem:[%s12486_s21 + $0x1798] sm:$0xff] }
 0x404   : > { %7720 = vmatpush2.bf16.msra.mxu0 %v10615_v26  ;;  %v10952_v26 = vcombine.high %v1042_v56, %v1046_v1  ;;  %v1126_v62 = vld [vmem:[%s12486_s21 + $0x17b8] sm:$0xff] }
 0x405   : > { %7721 = vmatprep.subr.bf16.mxu0 %v10608_v46  ;;  %v1034_v46 = vld [vmem:[%s12486_s21 + $0x14d8] sm:$0xff] }
 0x406   : > { %7761 = vmatpush2.bf16.msra.mxu1 %v10743_v23  ;;  %v906_v23 = vld [vmem:[%s12486_s21 + $0x10d8] sm:$0xff] }
 0x407   : > { %7762 = vmatprep.subr.bf16.mxu1 %v10736_v25  ;;  %v1038_v25 = vld [vmem:[%s12486_s21 + $0x14f8] sm:$0xff] }
 0x408   : > { %7722 = vmatpush2.bf16.msra.mxu0 %v10607_v24  ;;  %v10944_v19 = vcombine.high %v1034_v46, %v1038_v25  ;;  %v898_v24 = vld [vmem:[%s12486_s21 + $0x1098] sm:$0xff]  ;;  %v10943_v34 = vcombine.low %v1034_v46, %v1038_v25 }
 0x409   : > { %7723 = vmatprep.subr.bf16.mxu0 %v10600_v63  ;;  %v1026_v63 = vld [vmem:[%s12486_s21 + $0x1498] sm:$0xff] }
 0x40a   : > { %7763 = vmatpush2.bf16.msra.mxu1 %v10735_v28  ;;  %v902_v28 = vld [vmem:[%s12486_s21 + $0x10b8] sm:$0xff] }
 0x40b   : > { %7764 = vmatprep.subr.bf16.mxu1 %v10728_v29  ;;  %v1030_v29 = vld [vmem:[%s12486_s21 + $0x14b8] sm:$0xff]  ;;  %v10808_v31 = vcombine.high %v898_v24, %v902_v28  ;;  %v10807_v41 = vcombine.low %v898_v24, %v902_v28 }
 0x40c   : > { %7724 = vmatpush2.bf16.msra.mxu0 %v10599_v37  ;;  %v10936_v36 = vcombine.high %v1026_v63, %v1030_v29  ;;  %v890_v37 = vld [vmem:[%s12486_s21 + $0x1058] sm:$0xff]  ;;  %v10935_v43 = vcombine.low %v1026_v63, %v1030_v29 }
 0x40d   : > { %7775 = vmatprep.subr.bf16.mxu0 %v10848_v10  ;;  %v1018_v10 = vld [vmem:[%s12486_s21 + $0x1458] sm:$0xff] }
 0x40e   : > { %7765 = vmatpush2.bf16.msra.mxu1 %v10727_v40  ;;  %v894_v40 = vld [vmem:[%s12486_s21 + $0x1078] sm:$0xff] }
 0x40f   : > { %7816 = vmatprep.subr.bf16.mxu1 %v10976_v38  ;;  %v7481_v53 = vpop.f32.mrf.mxu0  ;;  %7726 = vmatmul.mubr.bf16.vlgmr.msra.gmra.mxu0 %v12704_v48  ;;  %v1022_v38 = vld [vmem:[%s12486_s21 + $0x1478] sm:$0xff]  ;;  %v10800_v30 = vcombine.high %v890_v37, %v894_v40 }
 0x410   : > { %v7482_v3 = vadd.f32 %v7481_v53, %v13566_v13  ;;  %7776 = vmatpush1.bf16.msra.mxu0 %v10847_v14  ;;  %v10960_v13 = vcombine.high %v1050_v50, %v1054_v61  ;;  %7807 = vmatprep.mubr.bf16.mxu0 %v12711_v57  ;;  %v10928_v47 = vcombine.high %v1018_v10, %v1022_v38  ;;  %v882_v14 = vld [vmem:[%s12486_s21 + $0x1018] sm:$0xff] }
 0x411   : > { %v7522_v42 = vpop.f32.mrf.mxu1  ;;  %7767 = vmatmul.mubr.bf16.vlgmr.msra.gmra.mxu1 %v12715_v12  ;;  %v7483_v58 = vpop.f32.mrf.mxu0  ;;  %7777 = vmatprep.subr.bf16.mxu0 %v10840_v16  ;;  %v1010_v16 = vld [vmem:[%s12486_s21 + $0x1418] sm:$0xff] }
 0x412   : > { %7817 = vmatpush1.bf16.msra.mxu1 %v10975_v60  ;;  %v13640_v21 = vadd.f32 %v7522_v42, %v7482_v3  ;;  %v7484_v48 = vadd.f32 %v7483_v58, %v13575_v27  ;;  %7848 = vmatprep.mubr.bf16.mxu1 %v12724_v4  ;;  %v10831_v27 = vcombine.low %v922_v39, %v926_v51  ;;  %v910_v4 = vld [vmem:[%s12486_s21 + $0x10f8] sm:$0xff] }
 0x413   : > { %v7524_v59 = vpop.f32.mrf.mxu1  ;;  %7818 = vmatprep.subr.bf16.mxu1 %v10968_v49  ;;  %v7485_v12 = vpop.f32.mrf.mxu0  ;;  %v10816_v0 = vcombine.high %v906_v23, %v910_v4  ;;  %v10815_v32 = vcombine.low %v906_v23, %v910_v4  ;;  %v886_v60 = vld [vmem:[%s12486_s21 + $0x1038] sm:$0xff]  ;;  %v10799_v39 = vcombine.low %v890_v37, %v894_v40  ;;  %v10927_v51 = vcombine.low %v1018_v10, %v1022_v38 }
 0x414   : > { %v13649_v2 = vadd.f32 %v7524_v59, %v7484_v48  ;;  %7778 = vmatpush1.bf16.msra.mxu0 %v10839_v55  ;;  %v1014_v49 = vld [vmem:[%s12486_s21 + $0x1438] sm:$0xff]  ;;  %v10792_v53 = vcombine.high %v882_v14, %v886_v60  ;;  %v10791_v58 = vcombine.low %v882_v14, %v886_v60 }
 0x415   : > { %v7526_v5 = vpop.f32.mrf.mxu1  ;;  %v7486_v6 = vpop.f32.mrf.mxu0  ;;  %7779 = vmatprep.subr.bf16.mxu0 %v10832_v20  ;;  %v10920_v50 = vcombine.high %v1010_v16, %v1014_v49  ;;  %v1002_v61 = vld [vmem:[%s12486_s21 + $0x13d8] sm:$0xff] }
 0x416   : > { %7819 = vmatpush1.bf16.msra.mxu1 %v10967_v52  ;;  %v1006_v3 = vld [vmem:[%s12486_s21 + $0x13f8] sm:$0xff]  ;;  %v10919_v52 = vcombine.low %v1010_v16, %v1014_v49  ;;  %v11032_v5 = vcombine.high %v1122_v18, %v1126_v62 }
 0x417   : > { %v7527_v57 = vpop.f32.mrf.mxu1  ;;  %7820 = vmatprep.subr.bf16.mxu1 %v10960_v13  ;;  %v1130_v42 = vld [vmem:[%s12486_s21 + $0x17d8] sm:$0xff]  ;;  %v10912_v20 = vcombine.high %v1002_v61, %v1006_v3  ;;  %v10911_v12 = vcombine.low %v1002_v61, %v1006_v3 }
 0x418   : > { %7780 = vmatpush1.bf16.msra.mxu0 %v10831_v27  ;;  %v1134_v55 = vld [vmem:[%s12486_s21 + $0x17f8] sm:$0xff] }
 0x419   : > { %7781 = vmatprep.subr.bf16.mxu0 %v10824_v9  ;;  %v11040_v48 = vcombine.high %v1130_v42, %v1134_v55  ;;  %v994_v59 = vld [vmem:[%s12486_s21 + $0x1398] sm:$0xff]  ;;  %v11039_v56 = vcombine.low %v1130_v42, %v1134_v55 }
 0x41a   : > { %7821 = vmatpush1.bf16.msra.mxu1 %v10959_v8  ;;  %v998_v13 = vld [vmem:[%s12486_s21 + $0x13b8] sm:$0xff] }
 0x41b   : > { %7822 = vmatprep.subr.bf16.mxu1 %v10952_v26  ;;  %v10904_v1 = vcombine.high %v994_v59, %v998_v13  ;;  %v986_v27 = vld [vmem:[%s12486_s21 + $0x1358] sm:$0xff]  ;;  %v10903_v57 = vcombine.low %v994_v59, %v998_v13  ;;  %v11031_v26 = vcombine.low %v1122_v18, %v1126_v62 }
 0x41c   : > { %7782 = vmatpush1.bf16.msra.mxu0 %v10823_v54  ;;  %v990_v6 = vld [vmem:[%s12486_s21 + $0x1378] sm:$0xff] }
 0x41d   : > { %7783 = vmatprep.subr.bf16.mxu0 %v10816_v0  ;;  %v1114_v8 = vld [vmem:[%s12486_s21 + $0x1758] sm:$0xff]  ;;  %v10896_v23 = vcombine.high %v986_v27, %v990_v6  ;;  %v10895_v0 = vcombine.low %v986_v27, %v990_v6 }
 0x41e   : > { %7823 = vmatpush1.bf16.msra.mxu1 %v10951_v11  ;;  %v1118_v9 = vld [vmem:[%s12486_s21 + $0x1778] sm:$0xff] }
 0x41f   : > { %7824 = vmatprep.subr.bf16.mxu1 %v10944_v19  ;;  %v11024_v4 = vcombine.high %v1114_v8, %v1118_v9  ;;  %v978_v46 = vld [vmem:[%s12486_s21 + $0x1318] sm:$0xff]  ;;  %v11023_v19 = vcombine.low %v1114_v8, %v1118_v9 }
 0x420   : > { %7784 = vmatpush1.bf16.msra.mxu0 %v10815_v32  ;;  %v982_v25 = vld [vmem:[%s12486_s21 + $0x1338] sm:$0xff] }
 0x421   : > { %7785 = vmatprep.subr.bf16.mxu0 %v10808_v31  ;;  %v1106_v54 = vld [vmem:[%s12486_s21 + $0x1718] sm:$0xff]  ;;  %v10888_v24 = vcombine.high %v978_v46, %v982_v25  ;;  %v10887_v31 = vcombine.low %v978_v46, %v982_v25 }
 0x422   : > { %7825 = vmatpush1.bf16.msra.mxu1 %v10943_v34  ;;  %v1110_v11 = vld [vmem:[%s12486_s21 + $0x1738] sm:$0xff] }
 0x423   : > { %7826 = vmatprep.subr.bf16.mxu1 %v10936_v36  ;;  %v11016_v28 = vcombine.high %v1106_v54, %v1110_v11  ;;  %v970_v63 = vld [vmem:[%s12486_s21 + $0x12d8] sm:$0xff]  ;;  %v11015_v36 = vcombine.low %v1106_v54, %v1110_v11 }
 0x424   : > { %7786 = vmatpush1.bf16.msra.mxu0 %v10807_v41  ;;  %v974_v29 = vld [vmem:[%s12486_s21 + $0x12f8] sm:$0xff] }
 0x425   : > { %7787 = vmatprep.subr.bf16.mxu0 %v10800_v30  ;;  %v1098_v32 = vld [vmem:[%s12486_s21 + $0x16d8] sm:$0xff]  ;;  %v10880_v37 = vcombine.high %v970_v63, %v974_v29  ;;  %v10879_v30 = vcombine.low %v970_v63, %v974_v29 }
 0x426   : > { %7827 = vmatpush1.bf16.msra.mxu1 %v10935_v43  ;;  %v1102_v34 = vld [vmem:[%s12486_s21 + $0x16f8] sm:$0xff] }
 0x427   : > { %7828 = vmatprep.subr.bf16.mxu1 %v10928_v47  ;;  %v11008_v40 = vcombine.high %v1098_v32, %v1102_v34  ;;  %v962_v10 = vld [vmem:[%s12486_s21 + $0x1298] sm:$0xff]  ;;  %v11007_v47 = vcombine.low %v1098_v32, %v1102_v34 }
 0x428   : > { %7788 = vmatpush1.bf16.msra.mxu0 %v10799_v39  ;;  %v966_v38 = vld [vmem:[%s12486_s21 + $0x12b8] sm:$0xff] }
 0x429   : > { %7789 = vmatprep.subr.bf16.mxu0 %v10792_v53  ;;  %v1090_v41 = vld [vmem:[%s12486_s21 + $0x1698] sm:$0xff]  ;;  %v10872_v14 = vcombine.high %v962_v10, %v966_v38  ;;  %v10871_v53 = vcombine.low %v962_v10, %v966_v38 }
 0x42a   : > { %7829 = vmatpush1.bf16.msra.mxu1 %v10927_v51  ;;  %v1094_v43 = vld [vmem:[%s12486_s21 + $0x16b8] sm:$0xff] }
 0x42b   : > { %7830 = vmatprep.subr.bf16.mxu1 %v10920_v50  ;;  %v11000_v60 = vcombine.high %v1090_v41, %v1094_v43  ;;  %v954_v16 = vld [vmem:[%s12486_s21 + $0x1258] sm:$0xff]  ;;  %v10999_v50 = vcombine.low %v1090_v41, %v1094_v43 }
 0x42c   : > { %7790 = vmatpush1.bf16.msra.mxu0 %v10791_v58  ;;  %v958_v49 = vld [vmem:[%s12486_s21 + $0x1278] sm:$0xff] }
 0x42d   : > { %7791 = vmatprep.subr.bf16.mxu0 %v10912_v20  ;;  %v1082_v39 = vld [vmem:[%s12486_s21 + $0x1658] sm:$0xff]  ;;  %v10864_v61 = vcombine.high %v954_v16, %v958_v49  ;;  %v10863_v20 = vcombine.low %v954_v16, %v958_v49 }
 0x42e   : > { %7831 = vmatpush1.bf16.msra.mxu1 %v10919_v52  ;;  %v1086_v51 = vld [vmem:[%s12486_s21 + $0x1678] sm:$0xff] }
 0x42f   : > { %7832 = vmatprep.subr.bf16.mxu1 %v11040_v48  ;;  %v10992_v3 = vcombine.high %v1082_v39, %v1086_v51  ;;  %v946_v42 = vld [vmem:[%s12486_s21 + $0x1218] sm:$0xff]  ;;  %v10991_v48 = vcombine.low %v1082_v39, %v1086_v51 }
 0x430   : > { %7792 = vmatpush2.bf16.msra.mxu0 %v10911_v12  ;;  %v950_v55 = vld [vmem:[%s12486_s21 + $0x1238] sm:$0xff] }
 0x431   : > { %7793 = vmatprep.subr.bf16.mxu0 %v10904_v1  ;;  %v1074_v58 = vld [vmem:[%s12486_s21 + $0x1618] sm:$0xff]  ;;  %v10856_v59 = vcombine.high %v946_v42, %v950_v55  ;;  %v10855_v1 = vcombine.low %v946_v42, %v950_v55 }
 0x432   : > { %7833 = vmatpush2.bf16.msra.mxu1 %v11039_v56  ;;  %v1078_v52 = vld [vmem:[%s12486_s21 + $0x1638] sm:$0xff] }
 0x433   : > { %7834 = vmatprep.subr.bf16.mxu1 %v11032_v5  ;;  %v10984_v13 = vcombine.high %v1074_v58, %v1078_v52  ;;  %v1194_v18 = vld [vmem:[%s12486_s21 + $0x19d8] sm:$0xff]  ;;  %v10983_v5 = vcombine.low %v1074_v58, %v1078_v52 }
 0x434   : > { %7794 = vmatpush2.bf16.msra.mxu0 %v10903_v57  ;;  %v1198_v62 = vld [vmem:[%s12486_s21 + $0x19f8] sm:$0xff] }
 0x435   : > { %7795 = vmatprep.subr.bf16.mxu0 %v10896_v23  ;;  %v1322_v12 = vld [vmem:[%s12486_s21 + $0x1dd8] sm:$0xff]  ;;  %v11104_v27 = vcombine.high %v1194_v18, %v1198_v62  ;;  %v11103_v23 = vcombine.low %v1194_v18, %v1198_v62 }
 0x436   : > { %7835 = vmatpush2.bf16.msra.mxu1 %v11031_v26  ;;  %v1326_v56 = vld [vmem:[%s12486_s21 + $0x1df8] sm:$0xff] }
 0x437   : > { %7836 = vmatprep.subr.bf16.mxu1 %v11024_v4  ;;  %v11232_v6 = vcombine.high %v1322_v12, %v1326_v56  ;;  %v1186_v8 = vld [vmem:[%s12486_s21 + $0x1998] sm:$0xff]  ;;  %v11231_v4 = vcombine.low %v1322_v12, %v1326_v56 }
 0x438   : > { %7796 = vmatpush2.bf16.msra.mxu0 %v10895_v0  ;;  %v1190_v9 = vld [vmem:[%s12486_s21 + $0x19b8] sm:$0xff] }
 0x439   : > { %7797 = vmatprep.subr.bf16.mxu0 %v10888_v24  ;;  %v1314_v57 = vld [vmem:[%s12486_s21 + $0x1d98] sm:$0xff]  ;;  %v11096_v46 = vcombine.high %v1186_v8, %v1190_v9  ;;  %v11095_v29 = vcombine.low %v1186_v8, %v1190_v9 }
 0x43a   : > { %7837 = vmatpush2.bf16.msra.mxu1 %v11023_v19  ;;  %v1318_v26 = vld [vmem:[%s12486_s21 + $0x1db8] sm:$0xff] }
 0x43b   : > { %7838 = vmatprep.subr.bf16.mxu1 %v11016_v28  ;;  %v11224_v25 = vcombine.high %v1314_v57, %v1318_v26  ;;  %v1178_v54 = vld [vmem:[%s12486_s21 + $0x1958] sm:$0xff]  ;;  %v11223_v34 = vcombine.low %v1314_v57, %v1318_v26 }
 0x43c   : > { %7798 = vmatpush2.bf16.msra.mxu0 %v10887_v31  ;;  %v1182_v11 = vld [vmem:[%s12486_s21 + $0x1978] sm:$0xff] }
 0x43d   : > { %7799 = vmatprep.subr.bf16.mxu0 %v10880_v37  ;;  %v1306_v19 = vld [vmem:[%s12486_s21 + $0x1d58] sm:$0xff]  ;;  %v11088_v31 = vcombine.high %v1178_v54, %v1182_v11 }
 0x43e   : > { %7839 = vmatpush2.bf16.msra.mxu1 %v11015_v36  ;;  %v1310_v24 = vld [vmem:[%s12486_s21 + $0x1d78] sm:$0xff] }
 0x43f   : > { %7840 = vmatprep.subr.bf16.mxu1 %v11008_v40  ;;  %v1170_v40 = vld [vmem:[%s12486_s21 + $0x1918] sm:$0xff] }
 0x440   : > { %7800 = vmatpush2.bf16.msra.mxu0 %v10879_v30  ;;  %v1174_v10 = vld [vmem:[%s12486_s21 + $0x1938] sm:$0xff] }
 0x441   : > { %7801 = vmatprep.subr.bf16.mxu0 %v10872_v14  ;;  %v1298_v38 = vld [vmem:[%s12486_s21 + $0x1d18] sm:$0xff]  ;;  %v11215_v14 = vcombine.low %v1306_v19, %v1310_v24 }
 0x442   : > { %7841 = vmatpush2.bf16.msra.mxu1 %v11007_v47  ;;  %v1302_v41 = vld [vmem:[%s12486_s21 + $0x1d38] sm:$0xff] }
 0x443   : > { %7842 = vmatprep.subr.bf16.mxu1 %v11000_v60  ;;  %v11080_v60 = vcombine.high %v1170_v40, %v1174_v10  ;;  %v1162_v49 = vld [vmem:[%s12486_s21 + $0x18d8] sm:$0xff] }
 0x444   : > { %7802 = vmatpush2.bf16.msra.mxu0 %v10871_v53  ;;  %v1166_v39 = vld [vmem:[%s12486_s21 + $0x18f8] sm:$0xff] }
 0x445   : > { %7803 = vmatprep.subr.bf16.mxu0 %v10864_v61  ;;  %v1290_v51 = vld [vmem:[%s12486_s21 + $0x1cd8] sm:$0xff]  ;;  %v11207_v61 = vcombine.low %v1298_v38, %v1302_v41 }
 0x446   : > { %7843 = vmatpush2.bf16.msra.mxu1 %v10999_v50  ;;  %v1294_v53 = vld [vmem:[%s12486_s21 + $0x1cf8] sm:$0xff]  ;;  %v11079_v50 = vcombine.low %v1170_v40, %v1174_v10 }
 0x447   : > { %7844 = vmatprep.subr.bf16.mxu1 %v10992_v3  ;;  %v11072_v3 = vcombine.high %v1162_v49, %v1166_v39  ;;  %v11200_v42 = vcombine.high %v1290_v51, %v1294_v53  ;;  %v1154_v55 = vld [vmem:[%s12486_s21 + $0x1898] sm:$0xff] }
 0x448   : > { %7804 = vmatpush2.bf16.msra.mxu0 %v10863_v20  ;;  %v1158_v58 = vld [vmem:[%s12486_s21 + $0x18b8] sm:$0xff] }
 0x449   : > { %7805 = vmatprep.subr.bf16.mxu0 %v10856_v59  ;;  %v1282_v52 = vld [vmem:[%s12486_s21 + $0x1c98] sm:$0xff]  ;;  %v11199_v59 = vcombine.low %v1290_v51, %v1294_v53 }
 0x44a   : > { %7845 = vmatpush2.bf16.msra.mxu1 %v10991_v48  ;;  %v1286_v20 = vld [vmem:[%s12486_s21 + $0x1cb8] sm:$0xff]  ;;  %v11071_v48 = vcombine.low %v1162_v49, %v1166_v39 }
 0x44b   : > { %7846 = vmatprep.subr.bf16.mxu1 %v10984_v13  ;;  %v11064_v13 = vcombine.high %v1154_v55, %v1158_v58  ;;  %v11192_v18 = vcombine.high %v1282_v52, %v1286_v20  ;;  %v1146_v62 = vld [vmem:[%s12486_s21 + $0x1858] sm:$0xff] }
 0x44c   : > { %7806 = vmatpush2.bf16.msra.mxu0 %v10855_v1  ;;  %v1150_v12 = vld [vmem:[%s12486_s21 + $0x1878] sm:$0xff] }
 0x44d   : > { %7857 = vmatprep.subr.bf16.mxu0 %v11104_v27  ;;  %v1274_v56 = vld [vmem:[%s12486_s21 + $0x1c58] sm:$0xff]  ;;  %v11191_v27 = vcombine.low %v1282_v52, %v1286_v20 }
 0x44e   : > { %7847 = vmatpush2.bf16.msra.mxu1 %v10983_v5  ;;  %v1278_v1 = vld [vmem:[%s12486_s21 + $0x1c78] sm:$0xff]  ;;  %v11063_v5 = vcombine.low %v1154_v55, %v1158_v58 }
 0x44f   : > { %7898 = vmatprep.subr.bf16.mxu1 %v11232_v6  ;;  %v7563_v0 = vpop.f32.mrf.mxu0  ;;  %7808 = vmatmul.mubr.bf16.vlgmr.msra.gmra.mxu0 %v12794_v22  ;;  %v11056_v6 = vcombine.high %v1146_v62, %v1150_v12  ;;  %v11184_v8 = vcombine.high %v1274_v56, %v1278_v1  ;;  %v1138_v9 = vld [vmem:[%s12486_s21 + $0x1818] sm:$0xff] }
 0x450   : > { %v7564_v28 = vadd.f32 %v7563_v0, %v13640_v21  ;;  %7858 = vmatpush1.bf16.msra.mxu0 %v11103_v23  ;;  %v11216_v21 = vcombine.high %v1306_v19, %v1310_v24  ;;  %7889 = vmatprep.mubr.bf16.mxu0 %v12801_v33  ;;  %v1142_v57 = vld [vmem:[%s12486_s21 + $0x1838] sm:$0xff] }
 0x451   : > { %v7604_v63 = vpop.f32.mrf.mxu1  ;;  %7849 = vmatmul.mubr.bf16.vlgmr.msra.gmra.mxu1 %v12805_v35  ;;  %v7565_v32 = vpop.f32.mrf.mxu0  ;;  %7859 = vmatprep.subr.bf16.mxu0 %v11096_v46  ;;  %v1266_v26 = vld [vmem:[%s12486_s21 + $0x1c18] sm:$0xff]  ;;  %v11183_v46 = vcombine.low %v1274_v56, %v1278_v1 }
 0x452   : > { %7899 = vmatpush1.bf16.msra.mxu1 %v11231_v4  ;;  %v13714_v36 = vadd.f32 %v7604_v63, %v7564_v28  ;;  %v7566_v22 = vadd.f32 %v7565_v32, %v13649_v2  ;;  %7930 = vmatprep.mubr.bf16.mxu1 %v12814_v44  ;;  %v11087_v2 = vcombine.low %v1178_v54, %v1182_v11  ;;  %v1270_v23 = vld [vmem:[%s12486_s21 + $0x1c38] sm:$0xff] }
 0x453   : > { %v7606_v37 = vpop.f32.mrf.mxu1  ;;  %7900 = vmatprep.subr.bf16.mxu1 %v11224_v25  ;;  %v7567_v35 = vpop.f32.mrf.mxu0  ;;  %v11208_v44 = vcombine.high %v1298_v38, %v1302_v41  ;;  %v11055_v4 = vcombine.low %v1146_v62, %v1150_v12  ;;  %v11048_v25 = vcombine.high %v1138_v9, %v1142_v57  ;;  %v11176_v54 = vcombine.high %v1266_v26, %v1270_v23  ;;  %v1258_v11 = vld [vmem:[%s12486_s21 + $0x1bd8] sm:$0xff] }
 0x454   : > { %v13723_v43 = vadd.f32 %v7606_v37, %v7566_v22  ;;  %7860 = vmatpush1.bf16.msra.mxu0 %v11095_v29  ;;  %v1262_v0 = vld [vmem:[%s12486_s21 + $0x1bf8] sm:$0xff]  ;;  %v11047_v28 = vcombine.low %v1138_v9, %v1142_v57  ;;  %v11175_v63 = vcombine.low %v1266_v26, %v1270_v23 }
 0x455   : > { %v7608_v30 = vpop.f32.mrf.mxu1  ;;  %v7568_v47 = vpop.f32.mrf.mxu0  ;;  %7861 = vmatprep.subr.bf16.mxu0 %v11088_v31  ;;  %v1386_v19 = vld [vmem:[%s12486_s21 + $0x1fd8] sm:$0xff]  ;;  %v11168_v29 = vcombine.high %v1258_v11, %v1262_v0 }
 0x456   : > { %7901 = vmatpush1.bf16.msra.mxu1 %v11223_v34  ;;  %v7964_v33 = vcombine.low %v13714_v36, %v13723_v43  ;;  %v1390_v24 = vld [vmem:[%s12486_s21 + $0x1ff8] sm:$0xff] }
 0x457   : > { %v7609_v16 = vpop.f32.mrf.mxu1  ;;  %7902 = vmatprep.subr.bf16.mxu1 %v11216_v21  ;;  %v11296_v32 = vcombine.high %v1386_v19, %v1390_v24  ;;  %v1250_v34 = vld [vmem:[%s12486_s21 + $0x1b98] sm:$0xff]  ;;  %v11167_v21 = vcombine.low %v1258_v11, %v1262_v0  ;;  %v11295_v40 = vcombine.low %v1386_v19, %v1390_v24 }
 0x458   : > { %7862 = vmatpush1.bf16.msra.mxu0 %v11087_v2  ;;  %v1254_v31 = vld [vmem:[%s12486_s21 + $0x1bb8] sm:$0xff] }
 0x459   : > { %7863 = vmatprep.subr.bf16.mxu0 %v11080_v60  ;;  %v1378_v22 = vld [vmem:[%s12486_s21 + $0x1f98] sm:$0xff]  ;;  %v11160_v10 = vcombine.high %v1250_v34, %v1254_v31  ;;  %v11159_v47 = vcombine.low %v1250_v34, %v1254_v31 }
 0x45a   : > { %7903 = vmatpush1.bf16.msra.mxu1 %v11215_v14  ;;  %v1382_v37 = vld [vmem:[%s12486_s21 + $0x1fb8] sm:$0xff] }
 0x45b   : > { %7904 = vmatprep.subr.bf16.mxu1 %v11208_v44  ;;  %v11288_v35 = vcombine.high %v1378_v22, %v1382_v37  ;;  %v1242_v38 = vld [vmem:[%s12486_s21 + $0x1b58] sm:$0xff]  ;;  %v11287_v14 = vcombine.low %v1378_v22, %v1382_v37 }
 0x45c   : > { %7864 = vmatpush1.bf16.msra.mxu0 %v11079_v50  ;;  %v1246_v41 = vld [vmem:[%s12486_s21 + $0x1b78] sm:$0xff] }
 0x45d   : > { %7865 = vmatprep.subr.bf16.mxu0 %v11072_v3  ;;  %v1370_v30 = vld [vmem:[%s12486_s21 + $0x1f58] sm:$0xff]  ;;  %v11152_v60 = vcombine.high %v1242_v38, %v1246_v41  ;;  %v11151_v53 = vcombine.low %v1242_v38, %v1246_v41 }
 0x45e   : > { %7905 = vmatpush1.bf16.msra.mxu1 %v11207_v61  ;;  %v1374_v2 = vld [vmem:[%s12486_s21 + $0x1f78] sm:$0xff] }
 0x45f   : > { %7906 = vmatprep.subr.bf16.mxu1 %v11200_v42  ;;  %v11280_v16 = vcombine.high %v1370_v30, %v1374_v2  ;;  %v1234_v44 = vld [vmem:[%s12486_s21 + $0x1b18] sm:$0xff]  ;;  %v11279_v50 = vcombine.low %v1370_v30, %v1374_v2 }
 0x460   : > { %7866 = vmatpush1.bf16.msra.mxu0 %v11071_v48  ;;  %v1238_v49 = vld [vmem:[%s12486_s21 + $0x1b38] sm:$0xff] }
 0x461   : > { %7867 = vmatprep.subr.bf16.mxu0 %v11064_v13  ;;  %v1362_v39 = vld [vmem:[%s12486_s21 + $0x1f18] sm:$0xff]  ;;  %v11144_v61 = vcombine.high %v1234_v44, %v1238_v49  ;;  %v11143_v20 = vcombine.low %v1234_v44, %v1238_v49 }
 0x462   : > { %7907 = vmatpush1.bf16.msra.mxu1 %v11199_v59  ;;  %v1366_v51 = vld [vmem:[%s12486_s21 + $0x1f38] sm:$0xff] }
 0x463   : > { %7908 = vmatprep.subr.bf16.mxu1 %v11192_v18  ;;  %v11272_v3 = vcombine.high %v1362_v39, %v1366_v51  ;;  %v1226_v42 = vld [vmem:[%s12486_s21 + $0x1ad8] sm:$0xff]  ;;  %v11271_v48 = vcombine.low %v1362_v39, %v1366_v51 }
 0x464   : > { %7868 = vmatpush1.bf16.msra.mxu0 %v11063_v5  ;;  %v1230_v55 = vld [vmem:[%s12486_s21 + $0x1af8] sm:$0xff] }
 0x465   : > { %7869 = vmatprep.subr.bf16.mxu0 %v11056_v6  ;;  %v1354_v58 = vld [vmem:[%s12486_s21 + $0x1ed8] sm:$0xff]  ;;  %v11136_v59 = vcombine.high %v1226_v42, %v1230_v55  ;;  %v11135_v1 = vcombine.low %v1226_v42, %v1230_v55 }
 0x466   : > { %7909 = vmatpush1.bf16.msra.mxu1 %v11191_v27  ;;  %v1358_v52 = vld [vmem:[%s12486_s21 + $0x1ef8] sm:$0xff] }
 0x467   : > { %7910 = vmatprep.subr.bf16.mxu1 %v11184_v8  ;;  %v11264_v13 = vcombine.high %v1354_v58, %v1358_v52  ;;  %v1218_v18 = vld [vmem:[%s12486_s21 + $0x1a98] sm:$0xff]  ;;  %v11263_v5 = vcombine.low %v1354_v58, %v1358_v52 }
 0x468   : > { %7870 = vmatpush1.bf16.msra.mxu0 %v11055_v4  ;;  %v1222_v62 = vld [vmem:[%s12486_s21 + $0x1ab8] sm:$0xff] }
 0x469   : > { %7871 = vmatprep.subr.bf16.mxu0 %v11048_v25  ;;  %v1346_v12 = vld [vmem:[%s12486_s21 + $0x1e98] sm:$0xff]  ;;  %v11128_v27 = vcombine.high %v1218_v18, %v1222_v62  ;;  %v11127_v23 = vcombine.low %v1218_v18, %v1222_v62 }
 0x46a   : > { %7911 = vmatpush1.bf16.msra.mxu1 %v11183_v46  ;;  %v1350_v56 = vld [vmem:[%s12486_s21 + $0x1eb8] sm:$0xff] }
 0x46b   : > { %7912 = vmatprep.subr.bf16.mxu1 %v11176_v54  ;;  %v11256_v6 = vcombine.high %v1346_v12, %v1350_v56  ;;  %v1210_v8 = vld [vmem:[%s12486_s21 + $0x1a58] sm:$0xff]  ;;  %v11255_v4 = vcombine.low %v1346_v12, %v1350_v56 }
 0x46c   : > { %7872 = vmatpush1.bf16.msra.mxu0 %v11047_v28  ;;  %v1214_v9 = vld [vmem:[%s12486_s21 + $0x1a78] sm:$0xff] }
 0x46d   : > { %7873 = vmatprep.subr.bf16.mxu0 %v11168_v29  ;;  %v1338_v57 = vld [vmem:[%s12486_s21 + $0x1e58] sm:$0xff]  ;;  %v11120_v46 = vcombine.high %v1210_v8, %v1214_v9  ;;  %v11119_v24 = vcombine.low %v1210_v8, %v1214_v9 }
 0x46e   : > { %7913 = vmatpush1.bf16.msra.mxu1 %v11175_v63  ;;  %v1342_v26 = vld [vmem:[%s12486_s21 + $0x1e78] sm:$0xff] }
 0x46f   : > { %7914 = vmatprep.subr.bf16.mxu1 %v11296_v32  ;;  %v11248_v25 = vcombine.high %v1338_v57, %v1342_v26  ;;  %v1202_v54 = vld [vmem:[%s12486_s21 + $0x1a18] sm:$0xff]  ;;  %v11247_v28 = vcombine.low %v1338_v57, %v1342_v26 }
 0x470   : > { %7874 = vmatpush2.bf16.msra.mxu0 %v11167_v21  ;;  %v1206_v11 = vld [vmem:[%s12486_s21 + $0x1a38] sm:$0xff] }
 0x471   : > { %7875 = vmatprep.subr.bf16.mxu0 %v11160_v10  ;;  %v1330_v0 = vld [vmem:[%s12486_s21 + $0x1e18] sm:$0xff]  ;;  %v11112_v63 = vcombine.high %v1202_v54, %v1206_v11  ;;  %v11111_v32 = vcombine.low %v1202_v54, %v1206_v11 }
 0x472   : > { %7915 = vmatpush2.bf16.msra.mxu1 %v11295_v40  ;;  %v1334_v19 = vld [vmem:[%s12486_s21 + $0x1e38] sm:$0xff] }
 0x473   : > { %7916 = vmatprep.subr.bf16.mxu1 %v11288_v35  ;;  %v11240_v29 = vcombine.high %v1330_v0, %v1334_v19  ;;  %v11239_v34 = vcombine.low %v1330_v0, %v1334_v19  ;;  %v366_v54 = vld [vmem:[#allocation2 + $0x8] sm:$0xff] }
 0x474   : > { %7876 = vmatpush2.bf16.msra.mxu0 %v11159_v47 }
 0x475   : > { %7877 = vmatprep.subr.bf16.mxu0 %v11152_v60 }
 0x476   : > { %7917 = vmatpush2.bf16.msra.mxu1 %v11287_v14 }
 0x477   : > { %7918 = vmatprep.subr.bf16.mxu1 %v11280_v16 }
 0x478   : > { %7878 = vmatpush2.bf16.msra.mxu0 %v11151_v53 }
 0x479   : > { %7879 = vmatprep.subr.bf16.mxu0 %v11144_v61 }
 0x47a   : > { %7919 = vmatpush2.bf16.msra.mxu1 %v11279_v50 }
 0x47b   : > { %7920 = vmatprep.subr.bf16.mxu1 %v11272_v3 }
 0x47c   : > { %7880 = vmatpush2.bf16.msra.mxu0 %v11143_v20 }
 0x47d   : > { %7881 = vmatprep.subr.bf16.mxu0 %v11136_v59 }
 0x47e   : > { %7921 = vmatpush2.bf16.msra.mxu1 %v11271_v48 }
 0x47f   : > { %7922 = vmatprep.subr.bf16.mxu1 %v11264_v13 }
 0x480   : > { %7882 = vmatpush2.bf16.msra.mxu0 %v11135_v1 }
 0x481   : > { %7883 = vmatprep.subr.bf16.mxu0 %v11128_v27 }
 0x482   : > { %7923 = vmatpush2.bf16.msra.mxu1 %v11263_v5 }
 0x483   : > { %7924 = vmatprep.subr.bf16.mxu1 %v11256_v6 }
 0x484   : > { %7884 = vmatpush2.bf16.msra.mxu0 %v11127_v23 }
 0x485   : > { %7885 = vmatprep.subr.bf16.mxu0 %v11120_v46  ;;  %v7972_v46 = vrot.slane %v7964_v33, %v13424_v15 }
 0x486   : > { %7925 = vmatpush2.bf16.msra.mxu1 %v11255_v4 }
 0x487   : > { %7926 = vmatprep.subr.bf16.mxu1 %v11248_v25 }
 0x488   : > { %7886 = vmatpush2.bf16.msra.mxu0 %v11119_v24 }
 0x489   : > { %7887 = vmatprep.subr.bf16.mxu0 %v11112_v63 }
 0x48a   : > { %7927 = vmatpush2.bf16.msra.mxu1 %v11247_v28 }
 0x48b   : > { %7928 = vmatprep.subr.bf16.mxu1 %v11240_v29 }
 0x48c   : > { %7888 = vmatpush2.bf16.msra.mxu0 %v11111_v32 }
 0x48e   : > { %7929 = vmatpush2.bf16.msra.mxu1 %v11239_v34 }
 0x48f   : > { %v7645_v31 = vpop.f32.mrf.mxu0  ;;  %7890 = vmatmul.mubr.bf16.vlgmr.msra.gmra.mxu0 %v12877_v7 }
 0x491   : > { %v7686_v22 = vpop.f32.mrf.mxu1  ;;  %7931 = vmatmul.mubr.bf16.vlgmr.msra.gmra.mxu1 %v12885_v17  ;;  %v7647_v21 = vpop.f32.mrf.mxu0 }
 0x492   : > { %v7687_v37 = vadd.f32 %v7686_v22, %v7645_v31 }
 0x493   : > { %v7688_v40 = vpop.f32.mrf.mxu1  ;;  %v7649_v35 = vpop.f32.mrf.mxu0 }
 0x494   : > { %v7689_v10 = vadd.f32 %v7688_v40, %v7647_v21 }
 0x495   : > { %v7690_v38 = vpop.f32.mrf.mxu1  ;;  %v7650_v41 = vpop.f32.mrf.mxu0 }
 0x497   : > { %v7691_v30 = vpop.f32.mrf.mxu1 }
 0x4cf   : > { %v7727_v2 = vpop.f32.mrf.mxu0 }
 0x4d0   : > { %v7728_v47 = vadd.f32 %v7727_v2, %v7687_v37 }
 0x4d1   : > { %v7768_v14 = vpop.f32.mrf.mxu1  ;;  %v7729_v60 = vpop.f32.mrf.mxu0 }
 0x4d2   : > { %v7769_v16 = vadd.f32 %v7768_v14, %v7728_v47  ;;  %v7730_v44 = vadd.f32 %v7729_v60, %v7689_v10 }
 0x4d3   : > { %v7770_v49 = vpop.f32.mrf.mxu1  ;;  %v7731_v39 = vpop.f32.mrf.mxu0 }
 0x4d4   : > { %v7771_v7 = vadd.f32 %v7770_v49, %v7730_v44 }
 0x4d5   : > { %v7772_v51 = vpop.f32.mrf.mxu1  ;;  %v7732_v53 = vpop.f32.mrf.mxu0 }
 0x4d7   : > { %v7773_v17 = vpop.f32.mrf.mxu1 }
 0x50f   : > { %v7809_v50 = vpop.f32.mrf.mxu0 }
 0x510   : > { %v7810_v48 = vadd.f32 %v7809_v50, %v7769_v16 }
 0x511   : > { %v7850_v61 = vpop.f32.mrf.mxu1  ;;  %v7811_v3 = vpop.f32.mrf.mxu0 }
 0x512   : > { %v7812_v59 = vadd.f32 %v7811_v3, %v7771_v7  ;;  %v7851_v13 = vadd.f32 %v7850_v61, %v7810_v48 }
 0x513   : > { %v7852_v42 = vpop.f32.mrf.mxu1  ;;  %v7813_v55 = vpop.f32.mrf.mxu0 }
 0x514   : > { %v7853_v62 = vadd.f32 %v7852_v42, %v7812_v59 }
 0x515   : > { %v7854_v58 = vpop.f32.mrf.mxu1  ;;  %v7814_v52 = vpop.f32.mrf.mxu0 }
 0x517   : > { %v7855_v20 = vpop.f32.mrf.mxu1 }
 0x54f   : > { %v7891_v18 = vpop.f32.mrf.mxu0 }
 0x550   : > { %v7892_v12 = vadd.f32 %v7891_v18, %v7851_v13 }
 0x551   : > { %v7932_v56 = vpop.f32.mrf.mxu1  ;;  %v7893_v1 = vpop.f32.mrf.mxu0 }
 0x552   : > { %v7894_v5 = vadd.f32 %v7893_v1, %v7853_v62  ;;  %v7933_v8 = vadd.f32 %v7932_v56, %v7892_v12 }
 0x553   : > { %v7934_v27 = vpop.f32.mrf.mxu1  ;;  %v7895_v6 = vpop.f32.mrf.mxu0 }
 0x554   : > { %v7935_v9 = vadd.f32 %v7934_v27, %v7894_v5 }
 0x555   : > { %v7936_v57 = vpop.f32.mrf.mxu1  ;;  %v7896_v26 = vpop.f32.mrf.mxu0 }
 0x556   : > { %v7965_v23 = vcombine.low %v7933_v8, %v7935_v9 }
 0x557   : > { %v7937_v4 = vpop.f32.mrf.mxu1 }
 0x558   : > { %v7979_v25 = vrot.slane %v7965_v23, %v13424_v15 }
 0x55a   : > { %v7980_v11 = vcombine.low %v7972_v46, %v7979_v25  ;;  %7990 = sbr.rel (%p11297_p12) target bundleno = 1985 (0x7c1), region = 80 }
 0x55c   : > { %v7984_v0 = vadd.f32 %v7980_v11, %v366_v54 }
 0x55e   : > { %7986 = vst [vmem:[#allocation2 + $0x8] sm:$0xff] %v7984_v0 }
 0x55f   : > { %v11666_v19 = vld [vmem:[#allocation10 + $0xe4] ss:$16 sps:$4 sm:$0xff]   ;;  %v11670_v28 = vld [vmem:[#allocation10 + $0xe0] ss:$16 sps:$4 sm:$0xff]   ;;  %v13784_v56 = vsub.s32 0, %v12529_v45  ;;  %v13787_v1 = vsub.s32 2, %v12529_v45 }
 0x560   : > { %v11668_v24 = vld [vmem:[#allocation10 + $0x2e4] ss:$16 sps:$4 sm:$0xff]   ;;  %9745 = vmatprep.subr.bf16.mxu0 %v11666_v19  ;;  %v11671_v63 = vld [vmem:[#allocation10 + $0x2e0] ss:$16 sps:$4 sm:$0xff]   ;;  %v13790_v5 = vsub.s32 4, %v12529_v45  ;;  %v13793_v27 = vsub.s32 6, %v12529_v45 }
 0x561   : > { %9786 = vmatprep.subr.bf16.mxu1 %v11668_v24  ;;  %v11672_v29 = vld [vmem:[#allocation10 + $0xc4] ss:$16 sps:$4 sm:$0xff]   ;;  %9746 = vmatpush1.bf16.msra.mxu0 %v11670_v28  ;;  %v11676_v43 = vld [vmem:[#allocation10 + $0xc0] ss:$16 sps:$4 sm:$0xff]   ;;  %v7993_v6 = vld [vmem:[#allocation9] sm:$0xff]  ;;  %vm10128_vm0 = vcmask 1041408  }
 0x562   : > { %9787 = vmatpush1.bf16.msra.mxu1 %v11671_v63  ;;  %v11674_v36 = vld [vmem:[#allocation10 + $0x2c4] ss:$16 sps:$4 sm:$0xff]   ;;  %9747 = vmatprep.subr.bf16.mxu0 %v11672_v29  ;;  %v11677_v33 = vld [vmem:[#allocation10 + $0x2c0] ss:$16 sps:$4 sm:$0xff]   ;;  %v7994_v57 = vunpack.c.l.bf16 %v7993_v6  ;;  %vm10142_vm1 = vcmask 0  }
 0x563   : > { %9788 = vmatprep.subr.bf16.mxu1 %v11674_v36  ;;  %v11678_v32 = vld [vmem:[#allocation10 + $0xa4] ss:$16 sps:$4 sm:$0xff]   ;;  %v11682_v31 = vld [vmem:[#allocation10 + $0xa0] ss:$16 sps:$4 sm:$0xff]  }
 0x564   : > { %v11680_v34 = vld [vmem:[#allocation10 + $0x2a4] ss:$16 sps:$4 sm:$0xff]   ;;  %v11683_v22 = vld [vmem:[#allocation10 + $0x2a0] ss:$16 sps:$4 sm:$0xff]   ;;  %v8001_v4 = vrot.slane %v7994_v57, %v13784_v56  ;;  %v8005_v46 = vrot.slane %v7994_v57, %v13787_v1  ;;  %v8009_v25 = vrot.slane %v7994_v57, %v13790_v5  ;;  %v8013_v54 = vrot.slane %v7994_v57, %v13793_v27 }
 0x565   : > { %9748 = vmatpush1.bf16.msra.mxu0 %v11676_v43  ;;  %v11684_v37 = vld [vmem:[#allocation10 + $0x84] ss:$16 sps:$4 sm:$0xff]   ;;  %v11688_v40 = vld [vmem:[#allocation10 + $0x80] ss:$16 sps:$4 sm:$0xff]  }
 0x566   : > { %9789 = vmatpush1.bf16.msra.mxu1 %v11677_v33  ;;  %9749 = vmatprep.subr.bf16.mxu0 %v11678_v32  ;;  %v11686_v21 = vld [vmem:[#allocation10 + $0x284] ss:$16 sps:$4 sm:$0xff]   ;;  %v11689_v10 = vld [vmem:[#allocation10 + $0x280] ss:$16 sps:$4 sm:$0xff]   ;;  %v8041_v0 = vrot.slane %v8001_v4, %v13784_v56  ;;  %v8045_v19 = vrot.slane %v8005_v46, %v13784_v56  ;;  %v8049_v24 = vrot.slane %v8009_v25, %v13784_v56 }
 0x567   : > { %9790 = vmatprep.subr.bf16.mxu1 %v11680_v34  ;;  %v11690_v35 = vld [vmem:[#allocation10 + $0x64] ss:$16 sps:$4 sm:$0xff]   ;;  %v11694_v41 = vld [vmem:[#allocation10 + $0x60] ss:$16 sps:$4 sm:$0xff]   ;;  %v8053_v29 = vrot.slane %v8013_v54, %v13784_v56 }
 0x568   : > { %v11692_v38 = vld [vmem:[#allocation10 + $0x264] ss:$16 sps:$4 sm:$0xff]   ;;  %v11695_v30 = vld [vmem:[#allocation10 + $0x260] ss:$16 sps:$4 sm:$0xff]   ;;  %v8078_v36 = vcombine.low %v8041_v0, %v8045_v19 }
 0x569   : > { %9750 = vmatpush1.bf16.msra.mxu0 %v11682_v31  ;;  %v11696_v2 = vld [vmem:[#allocation10 + $0x44] ss:$16 sps:$4 sm:$0xff]   ;;  %v11700_v14 = vld [vmem:[#allocation10 + $0x40] ss:$16 sps:$4 sm:$0xff]   ;;  %v8079_v43 = vcombine.low %v8049_v24, %v8053_v29 }
 0x56a   : > { %9791 = vmatpush1.bf16.msra.mxu1 %v11683_v22  ;;  %9751 = vmatprep.subr.bf16.mxu0 %v11684_v37  ;;  %v11698_v47 = vld [vmem:[#allocation10 + $0x244] ss:$16 sps:$4 sm:$0xff]   ;;  %v11701_v60 = vld [vmem:[#allocation10 + $0x240] ss:$16 sps:$4 sm:$0xff]   ;;  %v8086_v34 = vrot.slane %v8078_v36, %v13424_v15 }
 0x56b   : > { %9792 = vmatprep.subr.bf16.mxu1 %v11686_v21  ;;  %v11702_v16 = vld [vmem:[#allocation10 + $0x24] ss:$16 sps:$4 sm:$0xff]   ;;  %v11706_v49 = vld [vmem:[#allocation10 + $0x20] ss:$16 sps:$4 sm:$0xff]   ;;  %v8093_v37 = vrot.slane %v8079_v43, %v13424_v15  ;;  %v7991_v21 = vld [vmem:[#allocation2] sm:$0xff] }
 0x56c   : > { %v11704_v44 = vld [vmem:[#allocation10 + $0x224] ss:$16 sps:$4 sm:$0xff]   ;;  %v11707_v39 = vld [vmem:[#allocation10 + $0x220] ss:$16 sps:$4 sm:$0xff]  }
 0x56d   : > { %9752 = vmatpush1.bf16.msra.mxu0 %v11688_v40  ;;  %v11708_v7 = vld [vmem:[#allocation10 + $0x4] ss:$16 sps:$4 sm:$0xff]   ;;  %v11712_v53 = vld [vmem:[#allocation10] ss:$16 sps:$4 sm:$0xff]   ;;  %v8094_v40 = vcombine.low %v8086_v34, %v8093_v37 }
 0x56e   : > { %9793 = vmatpush1.bf16.msra.mxu1 %v11689_v10  ;;  %9753 = vmatprep.subr.bf16.mxu0 %v11690_v35  ;;  %v11710_v51 = vld [vmem:[#allocation10 + $0x204] ss:$16 sps:$4 sm:$0xff]   ;;  %v11713_v17 = vld [vmem:[#allocation10 + $0x200] ss:$16 sps:$4 sm:$0xff]  }
 0x56f   : > { %9794 = vmatprep.subr.bf16.mxu1 %v11692_v38  ;;  %v11714_v50 = vld [vmem:[#allocation10 + $0x1e4] ss:$16 sps:$4 sm:$0xff]   ;;  %v11718_v3 = vld [vmem:[#allocation10 + $0x1e0] ss:$16 sps:$4 sm:$0xff]  }
 0x570   : > { %v11716_v61 = vld [vmem:[#allocation10 + $0x3e4] ss:$16 sps:$4 sm:$0xff]   ;;  %v11719_v42 = vld [vmem:[#allocation10 + $0x3e0] ss:$16 sps:$4 sm:$0xff]  }
 0x571   : > { %9754 = vmatpush1.bf16.msra.mxu0 %v11694_v41  ;;  %v11720_v55 = vld [vmem:[#allocation10 + $0x1c4] ss:$16 sps:$4 sm:$0xff]   ;;  %v11724_v52 = vld [vmem:[#allocation10 + $0x1c0] ss:$16 sps:$4 sm:$0xff]  }
 0x572   : > { %9795 = vmatpush1.bf16.msra.mxu1 %v11695_v30  ;;  %9755 = vmatprep.subr.bf16.mxu0 %v11696_v2  ;;  %v11722_v58 = vld [vmem:[#allocation10 + $0x3c4] ss:$16 sps:$4 sm:$0xff]   ;;  %v11725_v20 = vld [vmem:[#allocation10 + $0x3c0] ss:$16 sps:$4 sm:$0xff]   ;;  %v8114_v30 = vadd.f32 %v8094_v40, %v7991_v21 }
 0x573   : > { %9796 = vmatprep.subr.bf16.mxu1 %v11698_v47  ;;  %v11726_v48 = vld [vmem:[#allocation10 + $0x1a4] ss:$16 sps:$4 sm:$0xff]   ;;  %v11730_v13 = vld [vmem:[#allocation10 + $0x1a0] ss:$16 sps:$4 sm:$0xff]  }
 0x574   : > { %v11728_v59 = vld [vmem:[#allocation10 + $0x3a4] ss:$16 sps:$4 sm:$0xff]   ;;  %v11731_v18 = vld [vmem:[#allocation10 + $0x3a0] ss:$16 sps:$4 sm:$0xff]   ;;  %v8116_v2 = vmax.f32 %v8114_v30, 0.0 }
 0x575   : > { %9756 = vmatpush1.bf16.msra.mxu0 %v11700_v14  ;;  %v11732_v62 = vld [vmem:[#allocation10 + $0x184] ss:$16 sps:$4 sm:$0xff]   ;;  %v11736_v8 = vld [vmem:[#allocation10 + $0x180] ss:$16 sps:$4 sm:$0xff]  }
 0x576   : > { %9797 = vmatpush1.bf16.msra.mxu1 %v11701_v60  ;;  %9757 = vmatprep.subr.bf16.mxu0 %v11702_v16  ;;  %v11734_v12 = vld [vmem:[#allocation10 + $0x384] ss:$16 sps:$4 sm:$0xff]   ;;  %v11737_v9 = vld [vmem:[#allocation10 + $0x380] ss:$16 sps:$4 sm:$0xff]   ;;  %v8127_v60 = vrot.slane %v8116_v2, %v13424_v15  ;;  %v8120_v16 = vcombine.high %v8116_v2, %v8116_v2 }
 0x577   : > { %9798 = vmatprep.subr.bf16.mxu1 %v11704_v44  ;;  %v11738_v26 = vld [vmem:[#allocation10 + $0x164] ss:$16 sps:$4 sm:$0xff]   ;;  %v11742_v45 = vld [vmem:[#allocation10 + $0x160] ss:$16 sps:$4 sm:$0xff]  }
 0x578   : > { %v11740_v23 = vld [vmem:[#allocation10 + $0x364] ss:$16 sps:$4 sm:$0xff]   ;;  %v11743_v11 = vld [vmem:[#allocation10 + $0x360] ss:$16 sps:$4 sm:$0xff]  }
 0x579   : > { %9758 = vmatpush1.bf16.msra.mxu0 %v11706_v49  ;;  %v11744_v28 = vld [vmem:[#allocation10 + $0x144] ss:$16 sps:$4 sm:$0xff]   ;;  %v11748_v33 = vld [vmem:[#allocation10 + $0x140] ss:$16 sps:$4 sm:$0xff]  }
 0x57a   : > { %9799 = vmatpush1.bf16.msra.mxu1 %v11707_v39  ;;  %9759 = vmatprep.subr.bf16.mxu0 %v11708_v7  ;;  %v11746_v63 = vld [vmem:[#allocation10 + $0x344] ss:$16 sps:$4 sm:$0xff]   ;;  %v11749_v32 = vld [vmem:[#allocation10 + $0x340] ss:$16 sps:$4 sm:$0xff]   ;;  %v7995_v39 = vunpack.c.h.bf16 %v7993_v6  ;;  %v8135_v7 = vcombine.high %v8127_v60, %v8127_v60 }
 0x57b   : > { %9800 = vmatprep.subr.bf16.mxu1 %v11710_v51  ;;  %v11750_v31 = vld [vmem:[#allocation10 + $0x124] ss:$16 sps:$4 sm:$0xff]   ;;  %v11754_v10 = vld [vmem:[#allocation10 + $0x120] ss:$16 sps:$4 sm:$0xff]   ;;  %v8134_v51 = vrot.slane %v8120_v16, %v13424_v15 }
 0x57c   : > { %v11752_v22 = vld [vmem:[#allocation10 + $0x324] ss:$16 sps:$4 sm:$0xff]   ;;  %v11755_v35 = vld [vmem:[#allocation10 + $0x320] ss:$16 sps:$4 sm:$0xff]  }
 0x57d   : > { %9760 = vmatpush1.bf16.msra.mxu0 %v11712_v53  ;;  %v11756_v38 = vld [vmem:[#allocation10 + $0x104] ss:$16 sps:$4 sm:$0xff]   ;;  %v11760_v47 = vld [vmem:[#allocation10 + $0x100] ss:$16 sps:$4 sm:$0xff]   ;;  %v13807_v53 = vpack.c.bf16 %v8127_v60, %v8127_v60 }
 0x57e   : > { %9801 = vmatpush1.bf16.msra.mxu1 %v11713_v17  ;;  %9761 = vmatprep.subr.bf16.mxu0 %v11714_v50  ;;  %v11758_v41 = vld [vmem:[#allocation10 + $0x304] ss:$16 sps:$4 sm:$0xff]   ;;  %v11761_v14 = vld [vmem:[#allocation10 + $0x300] ss:$16 sps:$4 sm:$0xff]   ;;  %v13809_v17 = vpack.c.bf16 %v8135_v7, %v8135_v7  ;;  %v8136_v50 = vcombine.high %v8134_v51, %v8134_v51 }
 0x57f   : > { %9802 = vmatprep.subr.bf16.mxu1 %v11716_v61  ;;  %v11764_v44 = vld [vmem:[#allocation10 + $0x4e4] ss:$16 sps:$4 sm:$0xff]   ;;  %v11762_v61 = vld [vmem:[#allocation10 + $0x4e0] ss:$16 sps:$4 sm:$0xff]  }
 0x580   : > { %v11767_v49 = vld [vmem:[#allocation10 + $0x6e4] ss:$16 sps:$4 sm:$0xff]   ;;  %9777 = vmatprep.mubr.bf16.mxu0 %v13809_v17  ;;  %v11777_v46 = vld [vmem:[#allocation10 + $0x6a0] ss:$16 sps:$4 sm:$0xff]  }
 0x581   : > { %9762 = vmatpush2.bf16.msra.mxu0 %v11718_v3  ;;  %v13811_v3 = vpack.c.bf16 %v8134_v51, %v8134_v51  ;;  %v11782_v4 = vld [vmem:[#allocation10 + $0x484] ss:$16 sps:$4 sm:$0xff]   ;;  %v11783_v19 = vld [vmem:[#allocation10 + $0x680] ss:$16 sps:$4 sm:$0xff]  }
 0x582   : > { %9803 = vmatpush2.bf16.msra.mxu1 %v11719_v42  ;;  %9763 = vmatprep.subr.bf16.mxu0 %v11720_v55  ;;  %v11770_v42 = vld [vmem:[#allocation10 + $0x4c4] ss:$16 sps:$4 sm:$0xff]   ;;  %v8017_v55 = vrot.slane %v7995_v39, %v13784_v56  ;;  %v11786_v29 = vld [vmem:[#allocation10 + $0x460] ss:$16 sps:$4 sm:$0xff]  }
 0x583   : > { %9804 = vmatprep.subr.bf16.mxu1 %v11722_v58  ;;  %v13815_v58 = vpack.c.bf16 %v8136_v50, %v8136_v50  ;;  %v11788_v0 = vld [vmem:[#allocation10 + $0x464] ss:$16 sps:$4 sm:$0xff]   ;;  %v11789_v43 = vld [vmem:[#allocation10 + $0x660] ss:$16 sps:$4 sm:$0xff]  }
 0x584   : > { %v8057_v6 = vrot.slane %v8017_v55, %v13784_v56  ;;  %v11794_v36 = vld [vmem:[#allocation10 + $0x444] ss:$16 sps:$4 sm:$0xff]   ;;  %v11792_v34 = vld [vmem:[#allocation10 + $0x440] ss:$16 sps:$4 sm:$0xff]  }
 0x585   : > { %9764 = vmatpush2.bf16.msra.mxu0 %v11724_v52  ;;  %v11765_v52 = vld [vmem:[#allocation10 + $0x6e0] ss:$16 sps:$4 sm:$0xff]   ;;  %9818 = vmatprep.mubr.bf16.mxu1 %v13815_v58  ;;  %v11803_v40 = vld [vmem:[#allocation10 + $0x624] ss:$16 sps:$4 sm:$0xff]  }
 0x586   : > { %9805 = vmatpush2.bf16.msra.mxu1 %v11725_v20  ;;  %9765 = vmatprep.subr.bf16.mxu0 %v11726_v48  ;;  %v8021_v20 = vrot.slane %v7995_v39, %v13787_v1  ;;  %v8025_v48 = vrot.slane %v7995_v39, %v13790_v5  ;;  %v11795_v37 = vld [vmem:[#allocation10 + $0x640] ss:$16 sps:$4 sm:$0xff]   ;;  %v11815_v51 = vld [vmem:[#allocation10 + $0x7e4] ss:$16 sps:$4 sm:$0xff]  }
 0x587   : > { %9806 = vmatprep.subr.bf16.mxu1 %v11728_v59  ;;  %v8029_v59 = vrot.slane %v7995_v39, %v13793_v27  ;;  %v11810_v50 = vld [vmem:[#allocation10 + $0x5e0] ss:$16 sps:$4 sm:$0xff]   ;;  %v11821_v55 = vld [vmem:[#allocation10 + $0x7c4] ss:$16 sps:$4 sm:$0xff]  }
 0x589   : > { %9766 = vmatpush2.bf16.msra.mxu0 %v11730_v13  ;;  %v11773_v13 = vld [vmem:[#allocation10 + $0x6c4] ss:$16 sps:$4 sm:$0xff]   ;;  %v8069_v57 = vrot.slane %v8029_v59, %v13784_v56 }
 0x58a   : > { %9807 = vmatpush2.bf16.msra.mxu1 %v11731_v18  ;;  %9767 = vmatprep.subr.bf16.mxu0 %v11732_v62  ;;  %v11768_v18 = vld [vmem:[#allocation10 + $0x4c0] ss:$16 sps:$4 sm:$0xff]   ;;  %v11776_v62 = vld [vmem:[#allocation10 + $0x4a4] ss:$16 sps:$4 sm:$0xff]  }
 0x58b   : > { %9808 = vmatprep.subr.bf16.mxu1 %v11734_v12  ;;  %v11771_v12 = vld [vmem:[#allocation10 + $0x6c0] ss:$16 sps:$4 sm:$0xff]   ;;  %v11827_v59 = vld [vmem:[#allocation10 + $0x7a4] ss:$16 sps:$4 sm:$0xff]  }
 0x58d   : > { %9768 = vmatpush2.bf16.msra.mxu0 %v11736_v8  ;;  %v8061_v8 = vrot.slane %v8021_v20, %v13784_v56  ;;  %v11824_v20 = vld [vmem:[#allocation10 + $0x5a4] ss:$16 sps:$4 sm:$0xff]  }
 0x58e   : > { %9809 = vmatpush2.bf16.msra.mxu1 %v11737_v9  ;;  %9769 = vmatprep.subr.bf16.mxu0 %v11738_v26  ;;  %v8065_v9 = vrot.slane %v8025_v48, %v13784_v56  ;;  %v11779_v26 = vld [vmem:[#allocation10 + $0x6a4] ss:$16 sps:$4 sm:$0xff]   ;;  %v11819_v48 = vld [vmem:[#allocation10 + $0x7c0] ss:$16 sps:$4 sm:$0xff]  }
 0x58f   : > { %9810 = vmatprep.subr.bf16.mxu1 %v11740_v23  ;;  %v11774_v23 = vld [vmem:[#allocation10 + $0x4a0] ss:$16 sps:$4 sm:$0xff]   ;;  %v8095_v25 = vcombine.low %v8057_v6, %v8061_v8  ;;  %v11836_v8 = vld [vmem:[#allocation10 + $0x564] ss:$16 sps:$4 sm:$0xff]  }
 0x590   : > { %v8096_v54 = vcombine.low %v8065_v9, %v8069_v57  ;;  %v11828_v6 = vld [vmem:[#allocation10 + $0x580] ss:$16 sps:$4 sm:$0xff]   ;;  %v11839_v57 = vld [vmem:[#allocation10 + $0x764] ss:$16 sps:$4 sm:$0xff]  }
 0x591   : > { %9770 = vmatpush2.bf16.msra.mxu0 %v11742_v45  ;;  %v11785_v45 = vld [vmem:[#allocation10 + $0x684] ss:$16 sps:$4 sm:$0xff]   ;;  %v8103_v24 = vrot.slane %v8095_v25, %v13424_v15  ;;  %v11831_v9 = vld [vmem:[#allocation10 + $0x780] ss:$16 sps:$4 sm:$0xff]  }
 0x592   : > { %9811 = vmatpush2.bf16.msra.mxu1 %v11743_v11  ;;  %9771 = vmatprep.subr.bf16.mxu0 %v11744_v28  ;;  %v11780_v11 = vld [vmem:[#allocation10 + $0x480] ss:$16 sps:$4 sm:$0xff]   ;;  %v8110_v28 = vrot.slane %v8096_v54, %v13424_v15  ;;  %v11848_v54 = vld [vmem:[#allocation10 + $0x524] ss:$16 sps:$4 sm:$0xff]  }
 0x593   : > { %9812 = vmatprep.subr.bf16.mxu1 %v11746_v63  ;;  %v11791_v63 = vld [vmem:[#allocation10 + $0x664] ss:$16 sps:$4 sm:$0xff]   ;;  %v11840_v25 = vld [vmem:[#allocation10 + $0x540] ss:$16 sps:$4 sm:$0xff]  }
 0x595   : > { %9772 = vmatpush2.bf16.msra.mxu0 %v11748_v33  ;;  %v8111_v33 = vcombine.low %v8103_v24, %v8110_v28  ;;  %v11849_v24 = vld [vmem:[#allocation10 + $0x720] ss:$16 sps:$4 sm:$0xff]   ;;  %v11857_v28 = vld [vmem:[#allocation10 + $0x704] ss:$16 sps:$4 sm:$0xff]  }
 0x596   : > { %9813 = vmatpush2.bf16.msra.mxu1 %v11749_v32  ;;  %9773 = vmatprep.subr.bf16.mxu0 %v11750_v31  ;;  %v11797_v32 = vld [vmem:[#allocation10 + $0x644] ss:$16 sps:$4 sm:$0xff]  }
 0x597   : > { %9814 = vmatprep.subr.bf16.mxu1 %v11752_v22  ;;  %v11800_v31 = vld [vmem:[#allocation10 + $0x424] ss:$16 sps:$4 sm:$0xff]  }
 0x598   : > { %v7992_v22 = vld [vmem:[#allocation2 + $0x8] sm:$0xff] }
 0x599   : > { %9774 = vmatpush2.bf16.msra.mxu0 %v11754_v10  ;;  %v8115_v21 = vadd.f32 %v8111_v33, %v7992_v22  ;;  %v11798_v10 = vld [vmem:[#allocation10 + $0x420] ss:$16 sps:$4 sm:$0xff]   ;;  %v11863_v33 = vld [vmem:[#allocation10 + $0x2ec] ss:$16 sps:$4 sm:$0xff]   ;;  %v11861_v22 = vld [vmem:[#allocation10 + $0x2e8] ss:$16 sps:$4 sm:$0xff]  }
 0x59a   : > { %9815 = vmatpush2.bf16.msra.mxu1 %v11755_v35  ;;  %9775 = vmatprep.subr.bf16.mxu0 %v11756_v38  ;;  %v11806_v38 = vld [vmem:[#allocation10 + $0x404] ss:$16 sps:$4 sm:$0xff]  }
 0x59b   : > { %9816 = vmatprep.subr.bf16.mxu1 %v11758_v41  ;;  %v8117_v35 = vmax.f32 %v8115_v21, 0.0  ;;  %v11801_v41 = vld [vmem:[#allocation10 + $0x620] ss:$16 sps:$4 sm:$0xff]   ;;  %v11864_v21 = vld [vmem:[#allocation10 + $0xc8] ss:$16 sps:$4 sm:$0xff]  }
 0x59d   : > { %9776 = vmatpush2.bf16.msra.mxu0 %v11760_v47  ;;  %v13830_v30 = vrot.slane %v8117_v35, %v13424_v15  ;;  %v8137_v2 = vcombine.high %v8117_v35, %v8117_v35  ;;  %v11809_v47 = vld [vmem:[#allocation10 + $0x604] ss:$16 sps:$4 sm:$0xff]   ;;  %v11875_v35 = vld [vmem:[#allocation10 + $0x2ac] ss:$16 sps:$4 sm:$0xff]  }
 0x59e   : > { %9817 = vmatpush2.bf16.msra.mxu1 %v11761_v14  ;;  %9827 = vmatprep.subr.bf16.mxu0 %v11764_v44  ;;  %v11804_v14 = vld [vmem:[#allocation10 + $0x400] ss:$16 sps:$4 sm:$0xff]   ;;  %v11812_v44 = vld [vmem:[#allocation10 + $0x5e4] ss:$16 sps:$4 sm:$0xff]  }
 0x59f   : > { %9868 = vmatprep.subr.bf16.mxu1 %v11767_v49  ;;  %v8152_v60 = vcombine.high %v13830_v30, %v13830_v30  ;;  %v13835_v16 = vrot.slane %v8137_v2, %v13424_v15  ;;  %v11807_v49 = vld [vmem:[#allocation10 + $0x600] ss:$16 sps:$4 sm:$0xff]   ;;  %v11818_v15 = vld [vmem:[#allocation10 + $0x5c4] ss:$16 sps:$4 sm:$0xff]   ;;  %v11881_v2 = vld [vmem:[#allocation10 + $0x28c] ss:$16 sps:$4 sm:$0xff]  }
 0x5a0   : > { %9778 = vmatmul.mubr.bf16.vlgmr.msra.gmra.mxu0 %v13807_v53 }
 0x5a1   : > { %9828 = vmatpush1.bf16.msra.mxu0 %v11762_v61  ;;  %9819 = vmatmul.mubr.bf16.vlgmr.msra.gmra.mxu1 %v13811_v3  ;;  %v13837_v39 = vpack.c.bf16 %v8152_v60, %v8152_v60  ;;  %v8153_v7 = vcombine.high %v13835_v16, %v13835_v16  ;;  %v11887_v60 = vld [vmem:[#allocation10 + $0x26c] ss:$16 sps:$4 sm:$0xff]  }
 0x5a2   : > { %9829 = vmatprep.subr.bf16.mxu0 %v11770_v42  ;;  %9869 = vmatpush1.bf16.msra.mxu1 %v11765_v52  ;;  %v11813_v42 = vld [vmem:[#allocation10 + $0x7e0] ss:$16 sps:$4 sm:$0xff]  }
 0x5a3   : > { %9870 = vmatprep.subr.bf16.mxu1 %v11773_v13  ;;  %9859 = vmatprep.mubr.bf16.mxu0 %v13837_v39  ;;  %v13842_v61 = vpack.c.bf16 %v8153_v7, %v8153_v7  ;;  %v11816_v52 = vld [vmem:[#allocation10 + $0x5c0] ss:$16 sps:$4 sm:$0xff]   ;;  %v11888_v7 = vld [vmem:[#allocation10 + $0x48] ss:$16 sps:$4 sm:$0xff]  }
 0x5a4   : > { %v11822_v13 = vld [vmem:[#allocation10 + $0x5a0] ss:$16 sps:$4 sm:$0xff]  }
 0x5a5   : > { %9830 = vmatpush1.bf16.msra.mxu0 %v11768_v18  ;;  %9900 = vmatprep.mubr.bf16.mxu1 %v13842_v61  ;;  %v11830_v18 = vld [vmem:[#allocation10 + $0x584] ss:$16 sps:$4 sm:$0xff]  }
 0x5a6   : > { %9831 = vmatprep.subr.bf16.mxu0 %v11776_v62  ;;  %9871 = vmatpush1.bf16.msra.mxu1 %v11771_v12  ;;  %v11825_v62 = vld [vmem:[#allocation10 + $0x7a0] ss:$16 sps:$4 sm:$0xff]   ;;  %v11833_v12 = vld [vmem:[#allocation10 + $0x784] ss:$16 sps:$4 sm:$0xff]  }
 0x5a7   : > { %9872 = vmatprep.subr.bf16.mxu1 %v11779_v26  ;;  %v11834_v26 = vld [vmem:[#allocation10 + $0x560] ss:$16 sps:$4 sm:$0xff]  }
 0x5a9   : > { %9832 = vmatpush1.bf16.msra.mxu0 %v11774_v23  ;;  %v11842_v23 = vld [vmem:[#allocation10 + $0x544] ss:$16 sps:$4 sm:$0xff]  }
 0x5aa   : > { %9833 = vmatprep.subr.bf16.mxu0 %v11782_v4  ;;  %9873 = vmatpush1.bf16.msra.mxu1 %v11777_v46  ;;  %v11837_v4 = vld [vmem:[#allocation10 + $0x760] ss:$16 sps:$4 sm:$0xff]   ;;  %v11845_v46 = vld [vmem:[#allocation10 + $0x744] ss:$16 sps:$4 sm:$0xff]  }
 0x5ab   : > { %9874 = vmatprep.subr.bf16.mxu1 %v11785_v45  ;;  %v11843_v45 = vld [vmem:[#allocation10 + $0x740] ss:$16 sps:$4 sm:$0xff]  }
 0x5ad   : > { %9834 = vmatpush1.bf16.msra.mxu0 %v11780_v11  ;;  %v11851_v11 = vld [vmem:[#allocation10 + $0x724] ss:$16 sps:$4 sm:$0xff]  }
 0x5ae   : > { %9835 = vmatprep.subr.bf16.mxu0 %v11788_v0  ;;  %9875 = vmatpush1.bf16.msra.mxu1 %v11783_v19  ;;  %v11846_v0 = vld [vmem:[#allocation10 + $0x520] ss:$16 sps:$4 sm:$0xff]   ;;  %v11854_v19 = vld [vmem:[#allocation10 + $0x504] ss:$16 sps:$4 sm:$0xff]  }
 0x5af   : > { %9876 = vmatprep.subr.bf16.mxu1 %v11791_v63  ;;  %v11852_v63 = vld [vmem:[#allocation10 + $0x500] ss:$16 sps:$4 sm:$0xff]  }
 0x5b1   : > { %9836 = vmatpush1.bf16.msra.mxu0 %v11786_v29  ;;  %v11860_v29 = vld [vmem:[#allocation10 + $0xec] ss:$16 sps:$4 sm:$0xff]  }
 0x5b2   : > { %9837 = vmatprep.subr.bf16.mxu0 %v11794_v36  ;;  %9877 = vmatpush1.bf16.msra.mxu1 %v11789_v43  ;;  %v11855_v36 = vld [vmem:[#allocation10 + $0x700] ss:$16 sps:$4 sm:$0xff]   ;;  %v13847_v43 = vpack.c.bf16 %v13830_v30, %v13830_v30  ;;  %v11873_v30 = vld [vmem:[#allocation10 + $0x2a8] ss:$16 sps:$4 sm:$0xff]  }
 0x5b3   : > { %9878 = vmatprep.subr.bf16.mxu1 %v11797_v32  ;;  %v11858_v32 = vld [vmem:[#allocation10 + $0xe8] ss:$16 sps:$4 sm:$0xff]  }
 0x5b5   : > { %9838 = vmatpush1.bf16.msra.mxu0 %v11792_v34  ;;  %v13851_v34 = vpack.c.bf16 %v13835_v16, %v13835_v16  ;;  %v11890_v16 = vld [vmem:[#allocation10 + $0x4c] ss:$16 sps:$4 sm:$0xff]  }
 0x5b6   : > { %9839 = vmatprep.subr.bf16.mxu0 %v11800_v31  ;;  %9879 = vmatpush1.bf16.msra.mxu1 %v11795_v37  ;;  %v11866_v31 = vld [vmem:[#allocation10 + $0xcc] ss:$16 sps:$4 sm:$0xff]  }
 0x5b7   : > { %9880 = vmatprep.subr.bf16.mxu1 %v11803_v40  ;;  %v11869_v37 = vld [vmem:[#allocation10 + $0x2cc] ss:$16 sps:$4 sm:$0xff]  }
 0x5b8   : > { %v11872_v40 = vld [vmem:[#allocation10 + $0xac] ss:$16 sps:$4 sm:$0xff]  }
 0x5b9   : > { %9840 = vmatpush1.bf16.msra.mxu0 %v11798_v10  ;;  %v11867_v10 = vld [vmem:[#allocation10 + $0x2c8] ss:$16 sps:$4 sm:$0xff]  }
 0x5ba   : > { %9841 = vmatprep.subr.bf16.mxu0 %v11806_v38  ;;  %9881 = vmatpush1.bf16.msra.mxu1 %v11801_v41  ;;  %v11870_v38 = vld [vmem:[#allocation10 + $0xa8] ss:$16 sps:$4 sm:$0xff]   ;;  %v11878_v41 = vld [vmem:[#allocation10 + $0x8c] ss:$16 sps:$4 sm:$0xff]  }
 0x5bb   : > { %9882 = vmatprep.subr.bf16.mxu1 %v11809_v47  ;;  %v11884_v47 = vld [vmem:[#allocation10 + $0x6c] ss:$16 sps:$4 sm:$0xff]  }
 0x5bd   : > { %9842 = vmatpush1.bf16.msra.mxu0 %v11804_v14  ;;  %v11879_v14 = vld [vmem:[#allocation10 + $0x288] ss:$16 sps:$4 sm:$0xff]  }
 0x5be   : > { %9843 = vmatprep.subr.bf16.mxu0 %v11812_v44  ;;  %9883 = vmatpush1.bf16.msra.mxu1 %v11807_v49  ;;  %v11885_v44 = vld [vmem:[#allocation10 + $0x268] ss:$16 sps:$4 sm:$0xff]   ;;  %v11893_v49 = vld [vmem:[#allocation10 + $0x24c] ss:$16 sps:$4 sm:$0xff]  }
 0x5bf   : > { %9884 = vmatprep.subr.bf16.mxu1 %v11815_v51  ;;  %v11896_v51 = vld [vmem:[#allocation10 + $0x2c] ss:$16 sps:$4 sm:$0xff]  }
 0x5c1   : > { %9844 = vmatpush2.bf16.msra.mxu0 %v11810_v50  ;;  %v11891_v50 = vld [vmem:[#allocation10 + $0x248] ss:$16 sps:$4 sm:$0xff]  }
 0x5c2   : > { %9845 = vmatprep.subr.bf16.mxu0 %v11818_v15  ;;  %9885 = vmatpush2.bf16.msra.mxu1 %v11813_v42  ;;  %v11899_v15 = vld [vmem:[#allocation10 + $0x22c] ss:$16 sps:$4 sm:$0xff]   ;;  %v11894_v42 = vld [vmem:[#allocation10 + $0x28] ss:$16 sps:$4 sm:$0xff]  }
 0x5c3   : > { %9886 = vmatprep.subr.bf16.mxu1 %v11821_v55  ;;  %v11902_v55 = vld [vmem:[#allocation10 + $0xc] ss:$16 sps:$4 sm:$0xff]  }
 0x5c5   : > { %9846 = vmatpush2.bf16.msra.mxu0 %v11816_v52  ;;  %v11897_v52 = vld [vmem:[#allocation10 + $0x228] ss:$16 sps:$4 sm:$0xff]  }
 0x5c6   : > { %9847 = vmatprep.subr.bf16.mxu0 %v11824_v20  ;;  %9887 = vmatpush2.bf16.msra.mxu1 %v11819_v48  ;;  %v11905_v20 = vld [vmem:[#allocation10 + $0x20c] ss:$16 sps:$4 sm:$0xff]   ;;  %v11900_v48 = vld [vmem:[#allocation10 + $0x8] ss:$16 sps:$4 sm:$0xff]  }
 0x5c7   : > { %9888 = vmatprep.subr.bf16.mxu1 %v11827_v59  ;;  %v11908_v59 = vld [vmem:[#allocation10 + $0x1ec] ss:$16 sps:$4 sm:$0xff]  }
 0x5c9   : > { %9848 = vmatpush2.bf16.msra.mxu0 %v11822_v13  ;;  %v11903_v13 = vld [vmem:[#allocation10 + $0x208] ss:$16 sps:$4 sm:$0xff]  }
 0x5ca   : > { %9849 = vmatprep.subr.bf16.mxu0 %v11830_v18  ;;  %9889 = vmatpush2.bf16.msra.mxu1 %v11825_v62  ;;  %v11911_v18 = vld [vmem:[#allocation10 + $0x3ec] ss:$16 sps:$4 sm:$0xff]   ;;  %v11906_v62 = vld [vmem:[#allocation10 + $0x1e8] ss:$16 sps:$4 sm:$0xff]  }
 0x5cb   : > { %9890 = vmatprep.subr.bf16.mxu1 %v11833_v12  ;;  %v11914_v12 = vld [vmem:[#allocation10 + $0x1cc] ss:$16 sps:$4 sm:$0xff]  }
 0x5cd   : > { %9850 = vmatpush2.bf16.msra.mxu0 %v11828_v6  ;;  %v11909_v6 = vld [vmem:[#allocation10 + $0x3e8] ss:$16 sps:$4 sm:$0xff]  }
 0x5ce   : > { %9851 = vmatprep.subr.bf16.mxu0 %v11836_v8  ;;  %9891 = vmatpush2.bf16.msra.mxu1 %v11831_v9  ;;  %v11917_v8 = vld [vmem:[#allocation10 + $0x3cc] ss:$16 sps:$4 sm:$0xff]   ;;  %v11912_v9 = vld [vmem:[#allocation10 + $0x1c8] ss:$16 sps:$4 sm:$0xff]  }
 0x5cf   : > { %9892 = vmatprep.subr.bf16.mxu1 %v11839_v57  ;;  %v11920_v57 = vld [vmem:[#allocation10 + $0x1ac] ss:$16 sps:$4 sm:$0xff]  }
 0x5d1   : > { %9852 = vmatpush2.bf16.msra.mxu0 %v11834_v26  ;;  %v11915_v26 = vld [vmem:[#allocation10 + $0x3c8] ss:$16 sps:$4 sm:$0xff]  }
 0x5d2   : > { %9853 = vmatprep.subr.bf16.mxu0 %v11842_v23  ;;  %9893 = vmatpush2.bf16.msra.mxu1 %v11837_v4  ;;  %v11923_v23 = vld [vmem:[#allocation10 + $0x3ac] ss:$16 sps:$4 sm:$0xff]   ;;  %v11918_v4 = vld [vmem:[#allocation10 + $0x1a8] ss:$16 sps:$4 sm:$0xff]  }
 0x5d3   : > { %9894 = vmatprep.subr.bf16.mxu1 %v11845_v46  ;;  %v11926_v46 = vld [vmem:[#allocation10 + $0x18c] ss:$16 sps:$4 sm:$0xff]  }
 0x5d5   : > { %9854 = vmatpush2.bf16.msra.mxu0 %v11840_v25  ;;  %v11921_v25 = vld [vmem:[#allocation10 + $0x3a8] ss:$16 sps:$4 sm:$0xff]  }
 0x5d6   : > { %9855 = vmatprep.subr.bf16.mxu0 %v11848_v54  ;;  %9895 = vmatpush2.bf16.msra.mxu1 %v11843_v45  ;;  %v11929_v54 = vld [vmem:[#allocation10 + $0x38c] ss:$16 sps:$4 sm:$0xff]   ;;  %v11924_v45 = vld [vmem:[#allocation10 + $0x188] ss:$16 sps:$4 sm:$0xff]  }
 0x5d7   : > { %9896 = vmatprep.subr.bf16.mxu1 %v11851_v11  ;;  %v11932_v11 = vld [vmem:[#allocation10 + $0x16c] ss:$16 sps:$4 sm:$0xff]  }
 0x5d9   : > { %9856 = vmatpush2.bf16.msra.mxu0 %v11846_v0  ;;  %v11927_v0 = vld [vmem:[#allocation10 + $0x388] ss:$16 sps:$4 sm:$0xff]  }
 0x5da   : > { %9857 = vmatprep.subr.bf16.mxu0 %v11854_v19  ;;  %9897 = vmatpush2.bf16.msra.mxu1 %v11849_v24  ;;  %v11935_v19 = vld [vmem:[#allocation10 + $0x36c] ss:$16 sps:$4 sm:$0xff]   ;;  %v11930_v24 = vld [vmem:[#allocation10 + $0x168] ss:$16 sps:$4 sm:$0xff]  }
 0x5db   : > { %9898 = vmatprep.subr.bf16.mxu1 %v11857_v28  ;;  %v11938_v28 = vld [vmem:[#allocation10 + $0x14c] ss:$16 sps:$4 sm:$0xff]  }
 0x5dd   : > { %9858 = vmatpush2.bf16.msra.mxu0 %v11852_v63  ;;  %v11933_v63 = vld [vmem:[#allocation10 + $0x368] ss:$16 sps:$4 sm:$0xff]  }
 0x5de   : > { %9909 = vmatprep.subr.bf16.mxu0 %v11860_v29  ;;  %9899 = vmatpush2.bf16.msra.mxu1 %v11855_v36  ;;  %v11941_v29 = vld [vmem:[#allocation10 + $0x34c] ss:$16 sps:$4 sm:$0xff]   ;;  %v11936_v36 = vld [vmem:[#allocation10 + $0x148] ss:$16 sps:$4 sm:$0xff]  }
 0x5df   : > { %9950 = vmatprep.subr.bf16.mxu1 %v11863_v33  ;;  %v11944_v33 = vld [vmem:[#allocation10 + $0x12c] ss:$16 sps:$4 sm:$0xff]  }
 0x5e0   : > { %9860 = vmatmul.mubr.bf16.vlgmr.msra.gmra.mxu0 %v13847_v43 }
 0x5e1   : > { %9910 = vmatpush1.bf16.msra.mxu0 %v11858_v32  ;;  %9941 = vmatprep.mubr.bf16.mxu0 %v13809_v17  ;;  %v11876_v17 = vld [vmem:[#allocation10 + $0x88] ss:$16 sps:$4 sm:$0xff]  }
 0x5e2   : > { %9901 = vmatmul.mubr.bf16.vlgmr.msra.gmra.mxu1 %v13851_v34  ;;  %9911 = vmatprep.subr.bf16.mxu0 %v11866_v31  ;;  %v11939_v32 = vld [vmem:[#allocation10 + $0x348] ss:$16 sps:$4 sm:$0xff]   ;;  %v11947_v31 = vld [vmem:[#allocation10 + $0x32c] ss:$16 sps:$4 sm:$0xff]  }
 0x5e3   : > { %9951 = vmatpush1.bf16.msra.mxu1 %v11861_v22  ;;  %9982 = vmatprep.mubr.bf16.mxu1 %v13815_v58  ;;  %v11882_v58 = vld [vmem:[#allocation10 + $0x68] ss:$16 sps:$4 sm:$0xff]  }
 0x5e4   : > { %9952 = vmatprep.subr.bf16.mxu1 %v11869_v37  ;;  %v11942_v22 = vld [vmem:[#allocation10 + $0x128] ss:$16 sps:$4 sm:$0xff]   ;;  %v11950_v37 = vld [vmem:[#allocation10 + $0x10c] ss:$16 sps:$4 sm:$0xff]  }
 0x5e5   : > { %9912 = vmatpush1.bf16.msra.mxu0 %v11864_v21  ;;  %v11945_v21 = vld [vmem:[#allocation10 + $0x328] ss:$16 sps:$4 sm:$0xff]  }
 0x5e6   : > { %9913 = vmatprep.subr.bf16.mxu0 %v11872_v40  ;;  %v11953_v40 = vld [vmem:[#allocation10 + $0x30c] ss:$16 sps:$4 sm:$0xff]  }
 0x5e7   : > { %9953 = vmatpush1.bf16.msra.mxu1 %v11867_v10  ;;  %v11948_v10 = vld [vmem:[#allocation10 + $0x108] ss:$16 sps:$4 sm:$0xff]  }
 0x5e8   : > { %9954 = vmatprep.subr.bf16.mxu1 %v11875_v35  ;;  %v11956_v35 = vld [vmem:[#allocation10 + $0x4ec] ss:$16 sps:$4 sm:$0xff]  }
 0x5e9   : > { %9914 = vmatpush1.bf16.msra.mxu0 %v11870_v38  ;;  %v11951_v38 = vld [vmem:[#allocation10 + $0x308] ss:$16 sps:$4 sm:$0xff]  }
 0x5ea   : > { %9915 = vmatprep.subr.bf16.mxu0 %v11878_v41  ;;  %v11959_v41 = vld [vmem:[#allocation10 + $0x6ec] ss:$16 sps:$4 sm:$0xff]  }
 0x5eb   : > { %9955 = vmatpush1.bf16.msra.mxu1 %v11873_v30  ;;  %v11954_v30 = vld [vmem:[#allocation10 + $0x4e8] ss:$16 sps:$4 sm:$0xff]  }
 0x5ec   : > { %9956 = vmatprep.subr.bf16.mxu1 %v11881_v2  ;;  %v11962_v2 = vld [vmem:[#allocation10 + $0x4cc] ss:$16 sps:$4 sm:$0xff]  }
 0x5ed   : > { %9916 = vmatpush1.bf16.msra.mxu0 %v11876_v17  ;;  %v11957_v17 = vld [vmem:[#allocation10 + $0x6e8] ss:$16 sps:$4 sm:$0xff]  }
 0x5ee   : > { %9917 = vmatprep.subr.bf16.mxu0 %v11884_v47  ;;  %v11965_v47 = vld [vmem:[#allocation10 + $0x6cc] ss:$16 sps:$4 sm:$0xff]  }
 0x5ef   : > { %9957 = vmatpush1.bf16.msra.mxu1 %v11879_v14  ;;  %v11960_v14 = vld [vmem:[#allocation10 + $0x4c8] ss:$16 sps:$4 sm:$0xff]  }
 0x5f0   : > { %9958 = vmatprep.subr.bf16.mxu1 %v11887_v60  ;;  %v11968_v60 = vld [vmem:[#allocation10 + $0x4ac] ss:$16 sps:$4 sm:$0xff]  }
 0x5f1   : > { %9918 = vmatpush1.bf16.msra.mxu0 %v11882_v58  ;;  %v11963_v58 = vld [vmem:[#allocation10 + $0x6c8] ss:$16 sps:$4 sm:$0xff]  }
 0x5f2   : > { %9919 = vmatprep.subr.bf16.mxu0 %v11890_v16  ;;  %v11971_v16 = vld [vmem:[#allocation10 + $0x6ac] ss:$16 sps:$4 sm:$0xff]  }
 0x5f3   : > { %9959 = vmatpush1.bf16.msra.mxu1 %v11885_v44  ;;  %v11966_v44 = vld [vmem:[#allocation10 + $0x4a8] ss:$16 sps:$4 sm:$0xff]  }
 0x5f4   : > { %9960 = vmatprep.subr.bf16.mxu1 %v11893_v49  ;;  %v11969_v49 = vld [vmem:[#allocation10 + $0x6a8] ss:$16 sps:$4 sm:$0xff]  }
 0x5f5   : > { %9920 = vmatpush1.bf16.msra.mxu0 %v11888_v7  ;;  %v11977_v7 = vld [vmem:[#allocation10 + $0x68c] ss:$16 sps:$4 sm:$0xff]  }
 0x5f6   : > { %9921 = vmatprep.subr.bf16.mxu0 %v11896_v51  ;;  %v11975_v51 = vld [vmem:[#allocation10 + $0x688] ss:$16 sps:$4 sm:$0xff]  }
 0x5f7   : > { %9961 = vmatpush1.bf16.msra.mxu1 %v11891_v50  ;;  %v11983_v50 = vld [vmem:[#allocation10 + $0x66c] ss:$16 sps:$4 sm:$0xff]  }
 0x5f8   : > { %9962 = vmatprep.subr.bf16.mxu1 %v11899_v15  ;;  %v11986_v15 = vld [vmem:[#allocation10 + $0x44c] ss:$16 sps:$4 sm:$0xff]  }
 0x5f9   : > { %9922 = vmatpush1.bf16.msra.mxu0 %v11894_v42  ;;  %v11981_v42 = vld [vmem:[#allocation10 + $0x668] ss:$16 sps:$4 sm:$0xff]  }
 0x5fa   : > { %9923 = vmatprep.subr.bf16.mxu0 %v11902_v55  ;;  %v11989_v55 = vld [vmem:[#allocation10 + $0x64c] ss:$16 sps:$4 sm:$0xff]  }
 0x5fb   : > { %9963 = vmatpush1.bf16.msra.mxu1 %v11897_v52  ;;  %v11984_v52 = vld [vmem:[#allocation10 + $0x448] ss:$16 sps:$4 sm:$0xff]  }
 0x5fc   : > { %9964 = vmatprep.subr.bf16.mxu1 %v11905_v20  ;;  %v11992_v20 = vld [vmem:[#allocation10 + $0x42c] ss:$16 sps:$4 sm:$0xff]  }
 0x5fd   : > { %9924 = vmatpush1.bf16.msra.mxu0 %v11900_v48  ;;  %v11987_v48 = vld [vmem:[#allocation10 + $0x648] ss:$16 sps:$4 sm:$0xff]  }
 0x5fe   : > { %9925 = vmatprep.subr.bf16.mxu0 %v11908_v59  ;;  %v11995_v59 = vld [vmem:[#allocation10 + $0x62c] ss:$16 sps:$4 sm:$0xff]  }
 0x5ff   : > { %9965 = vmatpush1.bf16.msra.mxu1 %v11903_v13  ;;  %v11990_v13 = vld [vmem:[#allocation10 + $0x428] ss:$16 sps:$4 sm:$0xff]  }
 0x600   : > { %9966 = vmatprep.subr.bf16.mxu1 %v11911_v18  ;;  %v11998_v18 = vld [vmem:[#allocation10 + $0x40c] ss:$16 sps:$4 sm:$0xff]  }
 0x601   : > { %9926 = vmatpush2.bf16.msra.mxu0 %v11906_v62  ;;  %v11993_v62 = vld [vmem:[#allocation10 + $0x628] ss:$16 sps:$4 sm:$0xff]  }
 0x602   : > { %9927 = vmatprep.subr.bf16.mxu0 %v11914_v12  ;;  %v12001_v12 = vld [vmem:[#allocation10 + $0x60c] ss:$16 sps:$4 sm:$0xff]  }
 0x603   : > { %9967 = vmatpush2.bf16.msra.mxu1 %v11909_v6  ;;  %v11996_v6 = vld [vmem:[#allocation10 + $0x408] ss:$16 sps:$4 sm:$0xff]  }
 0x604   : > { %9968 = vmatprep.subr.bf16.mxu1 %v11917_v8  ;;  %v12004_v8 = vld [vmem:[#allocation10 + $0x5ec] ss:$16 sps:$4 sm:$0xff]  }
 0x605   : > { %9928 = vmatpush2.bf16.msra.mxu0 %v11912_v9  ;;  %v11999_v9 = vld [vmem:[#allocation10 + $0x608] ss:$16 sps:$4 sm:$0xff]  }
 0x606   : > { %9929 = vmatprep.subr.bf16.mxu0 %v11920_v57  ;;  %v12007_v57 = vld [vmem:[#allocation10 + $0x7ec] ss:$16 sps:$4 sm:$0xff]  }
 0x607   : > { %9969 = vmatpush2.bf16.msra.mxu1 %v11915_v26  ;;  %v12002_v26 = vld [vmem:[#allocation10 + $0x5e8] ss:$16 sps:$4 sm:$0xff]  }
 0x608   : > { %9970 = vmatprep.subr.bf16.mxu1 %v11923_v23  ;;  %v12010_v23 = vld [vmem:[#allocation10 + $0x5cc] ss:$16 sps:$4 sm:$0xff]  }
 0x609   : > { %9930 = vmatpush2.bf16.msra.mxu0 %v11918_v4  ;;  %v12005_v4 = vld [vmem:[#allocation10 + $0x7e8] ss:$16 sps:$4 sm:$0xff]  }
 0x60a   : > { %9931 = vmatprep.subr.bf16.mxu0 %v11926_v46  ;;  %v12013_v46 = vld [vmem:[#allocation10 + $0x7cc] ss:$16 sps:$4 sm:$0xff]  }
 0x60b   : > { %9971 = vmatpush2.bf16.msra.mxu1 %v11921_v25  ;;  %v12008_v25 = vld [vmem:[#allocation10 + $0x5c8] ss:$16 sps:$4 sm:$0xff]  }
 0x60c   : > { %9972 = vmatprep.subr.bf16.mxu1 %v11929_v54  ;;  %v12016_v54 = vld [vmem:[#allocation10 + $0x5ac] ss:$16 sps:$4 sm:$0xff]  }
 0x60d   : > { %9932 = vmatpush2.bf16.msra.mxu0 %v11924_v45  ;;  %v12011_v45 = vld [vmem:[#allocation10 + $0x7c8] ss:$16 sps:$4 sm:$0xff]  }
 0x60e   : > { %9933 = vmatprep.subr.bf16.mxu0 %v11932_v11  ;;  %v12019_v11 = vld [vmem:[#allocation10 + $0x7ac] ss:$16 sps:$4 sm:$0xff]  }
 0x60f   : > { %9973 = vmatpush2.bf16.msra.mxu1 %v11927_v0  ;;  %v12014_v0 = vld [vmem:[#allocation10 + $0x5a8] ss:$16 sps:$4 sm:$0xff]  }
 0x610   : > { %9974 = vmatprep.subr.bf16.mxu1 %v11935_v19  ;;  %v12022_v19 = vld [vmem:[#allocation10 + $0x58c] ss:$16 sps:$4 sm:$0xff]  }
 0x611   : > { %9934 = vmatpush2.bf16.msra.mxu0 %v11930_v24  ;;  %v12017_v24 = vld [vmem:[#allocation10 + $0x7a8] ss:$16 sps:$4 sm:$0xff]  }
 0x612   : > { %9935 = vmatprep.subr.bf16.mxu0 %v11938_v28  ;;  %v12025_v28 = vld [vmem:[#allocation10 + $0x78c] ss:$16 sps:$4 sm:$0xff]  }
 0x613   : > { %9975 = vmatpush2.bf16.msra.mxu1 %v11933_v63  ;;  %v12020_v63 = vld [vmem:[#allocation10 + $0x588] ss:$16 sps:$4 sm:$0xff]  }
 0x614   : > { %9976 = vmatprep.subr.bf16.mxu1 %v11941_v29  ;;  %v12028_v29 = vld [vmem:[#allocation10 + $0x56c] ss:$16 sps:$4 sm:$0xff]  }
 0x615   : > { %9936 = vmatpush2.bf16.msra.mxu0 %v11936_v36  ;;  %v12023_v36 = vld [vmem:[#allocation10 + $0x788] ss:$16 sps:$4 sm:$0xff]  }
 0x616   : > { %9937 = vmatprep.subr.bf16.mxu0 %v11944_v33  ;;  %v12031_v33 = vld [vmem:[#allocation10 + $0x76c] ss:$16 sps:$4 sm:$0xff]  }
 0x617   : > { %9977 = vmatpush2.bf16.msra.mxu1 %v11939_v32  ;;  %v12026_v32 = vld [vmem:[#allocation10 + $0x568] ss:$16 sps:$4 sm:$0xff]  }
 0x618   : > { %9978 = vmatprep.subr.bf16.mxu1 %v11947_v31  ;;  %v12034_v31 = vld [vmem:[#allocation10 + $0x54c] ss:$16 sps:$4 sm:$0xff]  }
 0x619   : > { %9938 = vmatpush2.bf16.msra.mxu0 %v11942_v22  ;;  %v12029_v22 = vld [vmem:[#allocation10 + $0x768] ss:$16 sps:$4 sm:$0xff]  }
 0x61a   : > { %9939 = vmatprep.subr.bf16.mxu0 %v11950_v37  ;;  %v12037_v37 = vld [vmem:[#allocation10 + $0x74c] ss:$16 sps:$4 sm:$0xff]  }
 0x61b   : > { %9979 = vmatpush2.bf16.msra.mxu1 %v11945_v21  ;;  %v12032_v21 = vld [vmem:[#allocation10 + $0x548] ss:$16 sps:$4 sm:$0xff]  }
 0x61c   : > { %9980 = vmatprep.subr.bf16.mxu1 %v11953_v40  ;;  %v12040_v40 = vld [vmem:[#allocation10 + $0x52c] ss:$16 sps:$4 sm:$0xff]  }
 0x61d   : > { %9940 = vmatpush2.bf16.msra.mxu0 %v11948_v10  ;;  %v8426_v10 = vld [vmem:[#allocation12] sm:$0xf] }
 0x61e   : > { %9991 = vmatprep.subr.bf16.mxu0 %v11956_v35  ;;  %v12035_v35 = vld [vmem:[#allocation10 + $0x748] ss:$16 sps:$4 sm:$0xff]  }
 0x61f   : > { %9981 = vmatpush2.bf16.msra.mxu1 %v11951_v38  ;;  %v12043_v38 = vld [vmem:[#allocation10 + $0x72c] ss:$16 sps:$4 sm:$0xff]  }
 0x620   : > { %9942 = vmatmul.mubr.bf16.vlgmr.msra.gmra.mxu0 %v13807_v53  ;;  %10032 = vmatprep.subr.bf16.mxu1 %v11959_v41  ;;  %v11974_v53 = vld [vmem:[#allocation10 + $0x48c] ss:$16 sps:$4 sm:$0xff]   ;;  %v12038_v41 = vld [vmem:[#allocation10 + $0x528] ss:$16 sps:$4 sm:$0xff]  }
 0x621   : > { %9992 = vmatpush1.bf16.msra.mxu0 %v11954_v30  ;;  %10023 = vmatprep.mubr.bf16.mxu0 %v13837_v39  ;;  %v11972_v39 = vld [vmem:[#allocation10 + $0x488] ss:$16 sps:$4 sm:$0xff]   ;;  %v13861_v30 = vunpack.c.l.bf16 %v8426_v10 }
 0x622   : > { %9983 = vmatmul.mubr.bf16.vlgmr.msra.gmra.mxu1 %v13811_v3  ;;  %9993 = vmatprep.subr.bf16.mxu0 %v11962_v2  ;;  %v11980_v3 = vld [vmem:[#allocation10 + $0x46c] ss:$16 sps:$4 sm:$0xff]  }
 0x623   : > { %10033 = vmatpush1.bf16.msra.mxu1 %v11957_v17  ;;  %10064 = vmatprep.mubr.bf16.mxu1 %v13842_v61  ;;  %v11978_v61 = vld [vmem:[#allocation10 + $0x468] ss:$16 sps:$4 sm:$0xff]   ;;  %v12046_v2 = vld [vmem:[#allocation10 + $0x50c] ss:$16 sps:$4 sm:$0xff]  }
 0x624   : > { %10034 = vmatprep.subr.bf16.mxu1 %v11965_v47  ;;  %v12041_v17 = vld [vmem:[#allocation10 + $0x728] ss:$16 sps:$4 sm:$0xff]   ;;  %v12049_v47 = vld [vmem:[#allocation10 + $0x70c] ss:$16 sps:$4 sm:$0xff]  }
 0x625   : > { %9994 = vmatpush1.bf16.msra.mxu0 %v11960_v14  ;;  %v12044_v14 = vld [vmem:[#allocation10 + $0x508] ss:$16 sps:$4 sm:$0xff]  }
 0x626   : > { %9995 = vmatprep.subr.bf16.mxu0 %v11968_v60  ;;  %v8432_v60 = vrot.slane %v13861_v30, %v13784_v56 }
 0x627   : > { %10035 = vmatpush1.bf16.msra.mxu1 %v11963_v58  ;;  %v12047_v58 = vld [vmem:[#allocation10 + $0x708] ss:$16 sps:$4 sm:$0xff]  }
 0x628   : > { %10036 = vmatprep.subr.bf16.mxu1 %v11971_v16  ;;  %v8436_v16 = vrot.slane %v13861_v30, %v13787_v1 }
 0x629   : > { %9996 = vmatpush1.bf16.msra.mxu0 %v11966_v44  ;;  %v8452_v44 = vrot.slane %v8432_v60, %v13784_v56 }
 0x62a   : > { %9997 = vmatprep.subr.bf16.mxu0 %v11974_v53  ;;  %v8456_v53 = vrot.slane %v8436_v16, %v13784_v56 }
 0x62b   : > { %10037 = vmatpush1.bf16.msra.mxu1 %v11969_v49 }
 0x62c   : > { %10038 = vmatprep.subr.bf16.mxu1 %v11977_v7 }
 0x62d   : > { %9998 = vmatpush1.bf16.msra.mxu0 %v11972_v39 }
 0x62e   : > { %9999 = vmatprep.subr.bf16.mxu0 %v11980_v3 }
 0x62f   : > { %10039 = vmatpush1.bf16.msra.mxu1 %v11975_v51 }
 0x630   : > { %10040 = vmatprep.subr.bf16.mxu1 %v11983_v50 }
 0x631   : > { %10000 = vmatpush1.bf16.msra.mxu0 %v11978_v61 }
 0x632   : > { %10001 = vmatprep.subr.bf16.mxu0 %v11986_v15 }
 0x633   : > { %10041 = vmatpush1.bf16.msra.mxu1 %v11981_v42 }
 0x634   : > { %10042 = vmatprep.subr.bf16.mxu1 %v11989_v55 }
 0x635   : > { %10002 = vmatpush1.bf16.msra.mxu0 %v11984_v52 }
 0x636   : > { %10003 = vmatprep.subr.bf16.mxu0 %v11992_v20 }
 0x637   : > { %10043 = vmatpush1.bf16.msra.mxu1 %v11987_v48  ;;  %v10081_v48 = vld [vmem:[#allocation13] sm:$0xf] }
 0x638   : > { %10044 = vmatprep.subr.bf16.mxu1 %v11995_v59  ;;  %v13871_v59 = vunpack.c.l.bf16 %v10081_v48 }
 0x639   : > { %10004 = vmatpush1.bf16.msra.mxu0 %v11990_v13 }
 0x63a   : > { %10005 = vmatprep.subr.bf16.mxu0 %v11998_v18 }
 0x63b   : > { %10045 = vmatpush1.bf16.msra.mxu1 %v11993_v62 }
 0x63c   : > { %10046 = vmatprep.subr.bf16.mxu1 %v12001_v12 }
 0x63d   : > { %10006 = vmatpush1.bf16.msra.mxu0 %v11996_v6 }
 0x63e   : > { %10007 = vmatprep.subr.bf16.mxu0 %v12004_v8 }
 0x63f   : > { %10047 = vmatpush1.bf16.msra.mxu1 %v11999_v9 }
 0x640   : > { %10048 = vmatprep.subr.bf16.mxu1 %v12007_v57 }
 0x641   : > { %10008 = vmatpush2.bf16.msra.mxu0 %v12002_v26 }
 0x642   : > { %10009 = vmatprep.subr.bf16.mxu0 %v12010_v23  ;;  %v10095_v23 = vrot.slane %v13871_v59, %v13787_v1 }
 0x643   : > { %10049 = vmatpush2.bf16.msra.mxu1 %v12005_v4 }
 0x644   : > { %10050 = vmatprep.subr.bf16.mxu1 %v12013_v46 }
 0x645   : > { %10010 = vmatpush2.bf16.msra.mxu0 %v12008_v25 }
 0x646   : > { %10011 = vmatprep.subr.bf16.mxu0 %v12016_v54 }
 0x647   : > { %10051 = vmatpush2.bf16.msra.mxu1 %v12011_v45 }
 0x648   : > { %10052 = vmatprep.subr.bf16.mxu1 %v12019_v11 }
 0x649   : > { %10012 = vmatpush2.bf16.msra.mxu0 %v12014_v0 }
 0x64a   : > { %10013 = vmatprep.subr.bf16.mxu0 %v12022_v19 }
 0x64b   : > { %10053 = vmatpush2.bf16.msra.mxu1 %v12017_v24  ;;  %v10115_v24 = vrot.slane %v10095_v23, %v13784_v56 }
 0x64c   : > { %10054 = vmatprep.subr.bf16.mxu1 %v12025_v28 }
 0x64d   : > { %10014 = vmatpush2.bf16.msra.mxu0 %v12020_v63 }
 0x64e   : > { %10015 = vmatprep.subr.bf16.mxu0 %v12028_v29 }
 0x64f   : > { %10055 = vmatpush2.bf16.msra.mxu1 %v12023_v36 }
 0x650   : > { %10056 = vmatprep.subr.bf16.mxu1 %v12031_v33 }
 0x651   : > { %10016 = vmatpush2.bf16.msra.mxu0 %v12026_v32 }
 0x652   : > { %10017 = vmatprep.subr.bf16.mxu0 %v12034_v31 }
 0x653   : > { %10057 = vmatpush2.bf16.msra.mxu1 %v12029_v22 }
 0x654   : > { %10058 = vmatprep.subr.bf16.mxu1 %v12037_v37 }
 0x655   : > { %10018 = vmatpush2.bf16.msra.mxu0 %v12032_v21 }
 0x656   : > { %10019 = vmatprep.subr.bf16.mxu0 %v12040_v40 }
 0x657   : > { %10059 = vmatpush2.bf16.msra.mxu1 %v12035_v35 }
 0x658   : > { %10060 = vmatprep.subr.bf16.mxu1 %v12043_v38  ;;  %v8440_v38 = vrot.slane %v13861_v30, %v13790_v5 }
 0x659   : > { %10020 = vmatpush2.bf16.msra.mxu0 %v12038_v41  ;;  %v8444_v41 = vrot.slane %v13861_v30, %v13793_v27 }
 0x65a   : > { %10021 = vmatprep.subr.bf16.mxu0 %v12046_v2  ;;  %v8460_v2 = vrot.slane %v8440_v38, %v13784_v56 }
 0x65b   : > { %10061 = vmatpush2.bf16.msra.mxu1 %v12041_v17  ;;  %v8464_v17 = vrot.slane %v8444_v41, %v13784_v56 }
 0x65c   : > { %10062 = vmatprep.subr.bf16.mxu1 %v12049_v47 }
 0x65d   : > { %10022 = vmatpush2.bf16.msra.mxu0 %v12044_v14 }
 0x65f   : > { %10063 = vmatpush2.bf16.msra.mxu1 %v12047_v58 }
 0x660   : > { %v9779_v49 = vpop.f32.mrf.mxu0  ;;  %10024 = vmatmul.mubr.bf16.vlgmr.msra.gmra.mxu0 %v13847_v43 }
 0x661   : > { %v9780_v7 = vadd.f32 %v9779_v49, %v8452_v44  ;;  %v9820_v39 = vpop.f32.mrf.mxu1 }
 0x662   : > { %10065 = vmatmul.mubr.bf16.vlgmr.msra.gmra.mxu1 %v13851_v34  ;;  %v9781_v3 = vpop.f32.mrf.mxu0  ;;  %v10091_v34 = vrot.slane %v13871_v59, %v13784_v56 }
 0x663   : > { %v9821_v51 = vadd.f32 %v9820_v39, %v9780_v7  ;;  %v9782_v50 = vadd.f32 %v9781_v3, %v8456_v53  ;;  %v9822_v61 = vpop.f32.mrf.mxu1  ;;  %v10099_v39 = vrot.slane %v13871_v59, %v13790_v5 }
 0x664   : > { %v9783_v15 = vpop.f32.mrf.mxu0  ;;  %v10111_v54 = vrot.slane %v10091_v34, %v13784_v56 }
 0x665   : > { %v9823_v42 = vadd.f32 %v9822_v61, %v9782_v50  ;;  %v9824_v55 = vpop.f32.mrf.mxu1  ;;  %v10103_v15 = vrot.slane %v13871_v59, %v13793_v27  ;;  %v10139_v59 = vstv %s10138_s17 }
 0x666   : > { %v9784_v52 = vpop.f32.mrf.mxu0 }
 0x667   : > { %v9825_v20 = vpop.f32.mrf.mxu1 }
 0x668   : > { %v10119_v20 = vrot.slane %v10099_v39, %v13784_v56 }
 0x6a0   : > { %v9861_v13 = vpop.f32.mrf.mxu0 }
 0x6a1   : > { %v9862_v18 = vadd.f32 %v9861_v13, %v9821_v51 }
 0x6a2   : > { %v9902_v62 = vpop.f32.mrf.mxu1  ;;  %v9863_v43 = vpop.f32.mrf.mxu0 }
 0x6a3   : > { %v9903_v12 = vadd.f32 %v9902_v62, %v9862_v18  ;;  %v9864_v6 = vadd.f32 %v9863_v43, %v9823_v42  ;;  %v10123_v43 = vrot.slane %v10103_v15, %v13784_v56 }
 0x6a4   : > { %v9904_v8 = vpop.f32.mrf.mxu1  ;;  %v9865_v9 = vpop.f32.mrf.mxu0 }
 0x6a5   : > { %v10073_v57 = vmax.f32 %v9903_v12, 0.0  ;;  %v9905_v26 = vadd.f32 %v9904_v8, %v9864_v6 }
 0x6a6   : > { %v9906_v4 = vpop.f32.mrf.mxu1  ;;  %v9866_v46 = vpop.f32.mrf.mxu0 }
 0x6a7   : > { %v10077_v25 = vpack.c.bf16 %v10073_v57, %v10073_v57  ;;  %v10074_v45 = vmax.f32 %v9905_v26, 0.0 }
 0x6a8   : > { %v9907_v11 = vpop.f32.mrf.mxu1 }
 0x6a9   : > { %v10083_v0 = vunpack.c.l.bf16 %v10077_v25  ;;  %v10078_v19 = vpack.c.bf16 %v10074_v45, %v10074_v45 }
 0x6ab   : > { %v10124_v28 = vmul.f32 %v10111_v54, %v10083_v0  ;;  %v10084_v63 = vunpack.c.l.bf16 %v10078_v19 }
 0x6ad   : > { %v10125_v29 = vmul.f32 %v10115_v24, %v10084_v63  ;;  %v10129_v36 = vsel %vm10128_vm0, %v10124_v28, 0.0 }
 0x6af   : > { %v10130_v33 = vsel %vm10128_vm0, %v10125_v29, 0.0 }
 0x6b0   : > { %v10131_v1 = vadd.f32 %v10130_v33, %v10129_v36 }
 0x6e0   : > { %v9943_v32 = vpop.f32.mrf.mxu0 }
 0x6e1   : > { %v9944_v47 = vadd.f32 %v9943_v32, %v8460_v2 }
 0x6e2   : > { %v9984_v31 = vpop.f32.mrf.mxu1  ;;  %v9945_v22 = vpop.f32.mrf.mxu0 }
 0x6e3   : > { %v9946_v14 = vadd.f32 %v9945_v22, %v8464_v17  ;;  %v9985_v60 = vadd.f32 %v9984_v31, %v9944_v47 }
 0x6e4   : > { %v9986_v37 = vpop.f32.mrf.mxu1  ;;  %v9947_v21 = vpop.f32.mrf.mxu0 }
 0x6e5   : > { %v9987_v16 = vadd.f32 %v9986_v37, %v9946_v14 }
 0x6e6   : > { %v9988_v40 = vpop.f32.mrf.mxu1  ;;  %v9948_v10 = vpop.f32.mrf.mxu0 }
 0x6e8   : > { %v9989_v35 = vpop.f32.mrf.mxu1 }
 0x720   : > { %v10025_v58 = vpop.f32.mrf.mxu0 }
 0x721   : > { %v10026_v44 = vadd.f32 %v10025_v58, %v9985_v60 }
 0x722   : > { %v10066_v53 = vpop.f32.mrf.mxu1  ;;  %v10027_v49 = vpop.f32.mrf.mxu0 }
 0x723   : > { %v10067_v7 = vadd.f32 %v10066_v53, %v10026_v44  ;;  %v10028_v3 = vadd.f32 %v10027_v49, %v9987_v16 }
 0x724   : > { %v10068_v51 = vpop.f32.mrf.mxu1  ;;  %v10029_v50 = vpop.f32.mrf.mxu0 }
 0x725   : > { %v10075_v30 = vmax.f32 %v10067_v7, 0.0  ;;  %v10069_v61 = vadd.f32 %v10068_v51, %v10028_v3 }
 0x726   : > { %v10070_v42 = vpop.f32.mrf.mxu1  ;;  %v10030_v55 = vpop.f32.mrf.mxu0 }
 0x727   : > { %v10079_v52 = vpack.c.bf16 %v10075_v30, %v10075_v30  ;;  %v10076_v48 = vmax.f32 %v10069_v61, 0.0 }
 0x728   : > { %v10071_v13 = vpop.f32.mrf.mxu1 }
 0x729   : > { %v10085_v18 = vunpack.c.l.bf16 %v10079_v52  ;;  %v10080_v62 = vpack.c.bf16 %v10076_v48, %v10076_v48 }
 0x72b   : > { %v10126_v5 = vmul.f32 %v10119_v20, %v10085_v18  ;;  %v10086_v12 = vunpack.c.l.bf16 %v10080_v62 }
 0x72d   : > { %v10127_v34 = vmul.f32 %v10123_v43, %v10086_v12  ;;  %v10132_v6 = vsel %vm10128_vm0, %v10126_v5, 0.0 }
 0x72e   : > { %v10133_v8 = vadd.f32 %v10132_v6, %v10131_v1 }
 0x72f   : > { %v10134_v9 = vsel %vm10128_vm0, %v10127_v34, 0.0 }
 0x730   : > { %v10135_v27 = vadd.f32 %v10134_v9, %v10133_v8 }
 0x732   : > { %10136 = vadd.xlane.f32.xlu0 %v10135_v27 }
 0x7bb   : > { %v10137_v57 = vpop.xlane.xlu0 %10136 }
 0x7bc   : > { %v10140_v26 = vadd.f32 %v10139_v59, %v10137_v57 }
 0x7be   : > { %v10141_v23 = vpack.c.bf16 %v10140_v26, %v10140_v26 }
 0x7c0   : > { %10143 = vst.msk [vmem:[#allocation15] sm:$0x1] %vm10142_vm1, %v10141_v23 }
 0x7c1 PF: > { %p11617_p13 = scmp.eq.s32.totalorder %s12364_s6, 1  ;;  %s12301_s18 = smov [#allocation15]  }
 0x7c2   : > { %s10151_s19 = sshll.u32 %s12301_s18, 4  ;;  %s10152_s19 = int_to_ptr.vmem [resolvable:$true] %s10151_s19 }
 0x7c3   : > { %s12208_s22 = scalar_lea.vmem %s10152_s19, 16  ;;  %s12214_s13 = scalar_lea.vmem %s10152_s19, 32 }
 0x7c4   : > { %p12209_p0 = scmp.ne.s32.totalorder %s10152_s19, %s12208_s22  ;;  %p12215_p5 = scmp.lt.s32.totalorder %s10152_s19, %s10152_s19 }
 0x7c5   : > { %p12216_p1 = scmp.lt.s32.totalorder %s12214_s13, %s12208_s22 }
 0x7c6   : > { %p12210_p4 = pnand %p12209_p0, %p11617_p13 }
 0x7c7   : > { %p12217_p8 = por %p12216_p1, %p12215_p5 }
 0x7c8   : > { %p12211_p2 = pneg %p12210_p4 }
 0x7ca   : > { %p12218_p6 = pnand %p12217_p8, %p12211_p2 }
 0x7cc   : > { %12221 = shalt.err (!%p12218_p6)
}
 0x7cd   : > { %11583 = dma.vmem_to_hbm [thread:$0]  (%p11617_p13), %s10152_s19, 16, %s13927_s7, [#allocation6]  }
 0x7ce   : > { %12269 = dma.done.wait (%p11617_p13), [#allocation6], 16  }
 0x7cf   : > { %12271 = vsyncadd (%p11617_p13), [#allocation6], 4294967280 }
 0x7d0 PF: > { %p22_p3 = scmp.ge.s32.totalorder %s12431_s16, 4   ;;  %s13947_s26 = smov %s12278_s27 }
 0x7d1   : > { %s13948_s27 = smov %s12282_s28  ;;  %s13949_s28 = smov %s12441_s23 }
 0x7d2   : > { %s13950_s29 = smov %s12431_s16  ;;  %24 = sbr.rel (!%p22_p3) target bundleno = 9 (0x9), region = 115 }
 0x7d7   :  { %10164 = vsyncpa [#allocation5], 1 }
 0x7d8   :  { %10166 = vsyncpa [#allocation5 + $0x1], 1 }
 0x7d9   :  { %10167 = vsyncpa [#allocation8], 1 }
 0x7da   :  { %10169 = vsyncpa [#allocation8 + $0x1], 1 }
 0x7db   :  { %10170 = vsyncpa [#allocation11], 1 }
 0x7dc   :  { %10171 = vsyncpa [#allocation14], 1 }
 0x7dd   :  { %10172 = vsyncpa [#allocation6], 1 }
 0x7de   :  { %10174 = vsyncpa [#allocation6 + $0x1], 1 }

</bundles_post_ra>
